<compile_context>
chip_gen: v5e
topology: v5e:2x2
jax: 0.10.0
libtpu: 0.0.40
codegen_flags: <defaults>
</compile_context>

<pallas_src>
import functools

import jax
import jax.numpy as jnp
from jax.experimental import pallas as pl
from jax.experimental.pallas import tpu as pltpu

ENC_NF = [16, 32, 32, 32]
DEC_NF = [32, 32, 32, 32, 32, 16, 16]
NEG_SLOPE = 0.2


# ---------------------------------------------------------------------------
# Kernel 1: direct 3x3 / stride-1 conv + bias + LeakyReLU, one frame per step.
#   x_ref: (Cin, Lext)   zero-padded frame flattened to Hp*Wp, with S slack
#                        zeros on each side so every tap offset is in-bounds.
#   w_ref: (9, Cout, Cin) tap-major weights (VMEM-resident across the grid).
#   b_ref: (Cout, 1)
#   o_ref: (Cout, L)     output in padded-flat layout; border columns are
#                        meaningless and dropped by the wrapper's interior slice.
# ---------------------------------------------------------------------------
def _conv3x3_s1_kernel(x_ref, w_ref, b_ref, o_ref, *, Wp, L, S):
    acc = jnp.zeros(o_ref.shape, jnp.float32)
    for t in range(9):
        dh, dw = divmod(t, 3)
        off = (dh - 1) * Wp + (dw - 1)            # static lane offset of this tap
        xs = x_ref[:, S + off:S + off + L]        # (Cin, L) shifted view
        acc = acc + jnp.dot(w_ref[t], xs, preferred_element_type=jnp.float32)
    acc = acc + b_ref[...]
    o_ref[...] = jnp.where(acc >= 0.0, acc, NEG_SLOPE * acc).astype(o_ref.dtype)


def conv3x3_s1(x, w, b):
    """3x3 conv, stride 1, pad 1, + LeakyReLU(0.2).
    x: (N, Cin, H, W), w: (Cout, Cin, 3, 3) [PyTorch layout], b: (Cout,)."""
    n, cin, h, wd = x.shape
    cout = w.shape[0]
    hp, wp = h + 2, wd + 2
    L = hp * wp
    S = wp + 1                                    # max |tap offset|
    lext = L + 2 * S

    xp = jnp.pad(x, ((0, 0), (0, 0), (1, 1), (1, 1)))              # (N,Cin,Hp,Wp)
    xf = jnp.pad(xp.reshape(n, cin, L), ((0, 0), (0, 0), (S, S)))  # (N,Cin,Lext)
    w9 = jnp.transpose(w, (2, 3, 0, 1)).reshape(9, cout, cin)      # tap-major
    b2 = b.reshape(cout, 1)

    kernel = functools.partial(_conv3x3_s1_kernel, Wp=wp, L=L, S=S)
    cost = pl.CostEstimate(
        flops=2 * n * cout * cin * 9 * L,
        transcendentals=0,
        bytes_accessed=4 * (n * cin * lext + n * cout * L + 9 * cout * cin + cout))

    out = pl.pallas_call(
        kernel,
        out_shape=jax.ShapeDtypeStruct((n, cout, L), jnp.float32),
        grid=(n,),
        in_specs=[
            pl.BlockSpec((None, cin, lext), lambda i: (i, 0, 0)),   # per-frame
            pl.BlockSpec((9, cout, cin), lambda i: (0, 0, 0)),      # resident
            pl.BlockSpec((cout, 1), lambda i: (0, 0)),              # resident
        ],
        out_specs=pl.BlockSpec((None, cout, L), lambda i: (i, 0, 0)),
        compiler_params=pltpu.CompilerParams(
            dimension_semantics=("parallel",)),
        cost_estimate=cost,
    )(xf, w9, b2)

    # drop the padded border -> (N, Cout, H, W)
    return out.reshape(n, cout, hp, wp)[:, :, 1:-1, 1:-1]


# ---------------------------------------------------------------------------
# Kernel 2: transposed GEMM + bias + LeakyReLU (used for stride-2 encoder).
#   a_ref: (K, tm) im2col^T patches, w_ref: (Cout, K), b_ref: (Cout, 1)
#   o_ref: (Cout, tm)  -- lane-dense output (M on lanes).
# ---------------------------------------------------------------------------
def _gemm_bias_lrelu_kernel(a_ref, w_ref, b_ref, o_ref):
    acc = jnp.dot(w_ref[...], a_ref[...], preferred_element_type=jnp.float32)
    acc = acc + b_ref[...]
    o_ref[...] = jnp.where(acc >= 0.0, acc, NEG_SLOPE * acc).astype(o_ref.dtype)


def conv3x3_s2(x, w, b):
    """3x3 conv, stride 2, pad 1, + LeakyReLU(0.2) via transposed im2col GEMM.
    Encoder-only; M = N*Ho*Wo is tiny here so it is not over-tiled."""
    n, cin, h, wd = x.shape
    cout = w.shape[0]
    ho = (h - 1) // 2 + 1
    wo = (wd - 1) // 2 + 1
    m = n * ho * wo
    k = 9 * cin

    xp = jnp.pad(x, ((0, 0), (0, 0), (1, 1), (1, 1)))
    taps = []
    for dh in range(3):
        for dw in range(3):
            t = xp[:, :, dh:dh + 2 * ho - 1:2, dw:dw + 2 * wo - 1:2]  # (N,Cin,Ho,Wo)
            taps.append(jnp.transpose(t, (1, 0, 2, 3)).reshape(cin, m))
    a_t = jnp.concatenate(taps, axis=0)                   # (9*Cin, M) tap-major
    wg = jnp.transpose(w, (0, 2, 3, 1)).reshape(cout, k)  # tap-major / ch-minor
    b2 = b.reshape(cout, 1)

    # Tile M only when large (keeps tiny levels as one block, per review).
    tm = 512 if (m > 1024 and m % 128 == 0) else m
    grid = (pl.cdiv(m, tm),)

    cost = pl.CostEstimate(
        flops=2 * m * k * cout, transcendentals=0,
        bytes_accessed=4 * (k * m + cout * m + cout * k + cout))

    out = pl.pallas_call(
        _gemm_bias_lrelu_kernel,
        out_shape=jax.ShapeDtypeStruct((cout, m), jnp.float32),
        grid=grid,
        in_specs=[
            pl.BlockSpec((k, tm), lambda i: (0, i)),
            pl.BlockSpec((cout, k), lambda i: (0, 0)),
            pl.BlockSpec((cout, 1), lambda i: (0, 0)),
        ],
        out_specs=pl.BlockSpec((cout, tm), lambda i: (0, i)),
        compiler_params=pltpu.CompilerParams(
            dimension_semantics=("parallel",)),
        cost_estimate=cost,
    )(a_t, wg, b2)

    return jnp.transpose(out.reshape(cout, n, ho, wo), (1, 0, 2, 3))


# ------------------------------- glue ops -----------------------------------
def upsample2x(x):
    # nn.Upsample(scale_factor=2, mode='nearest') on (N, C, H, W)
    return jnp.repeat(jnp.repeat(x, 2, axis=2), 2, axis=3)


# ------------------------------ parameters -----------------------------------
def init_params(key):
    def conv_param(k, cin, cout):
        kw, kb = jax.random.split(k)
        bound = 1.0 / (cin * 9) ** 0.5   # mimic torch default conv init bound
        w = jax.random.uniform(kw, (cout, cin, 3, 3), jnp.float32, -bound, bound)
        b = jax.random.uniform(kb, (cout,), jnp.float32, -bound, bound)
        return w, b

    params = {"down": [], "up": [], "extras": []}
    keys = jax.random.split(key, len(ENC_NF) + len(DEC_NF))
    ki = 0
    prev = 2
    for nf in ENC_NF:
        params["down"].append(conv_param(keys[ki], prev, nf)); ki += 1
        prev = nf
    enc_hist = list(reversed(ENC_NF))
    for i, nf in enumerate(DEC_NF[: len(ENC_NF)]):
        cin = prev + enc_hist[i] if i > 0 else prev
        params["up"].append(conv_param(keys[ki], cin, nf)); ki += 1
        prev = nf
    prev += 2
    for nf in DEC_NF[len(ENC_NF):]:
        params["extras"].append(conv_param(keys[ki], prev, nf)); ki += 1
        prev = nf
    return params


# -------------------------------- forward ------------------------------------
def uconvlstm_forward(x, params):
    """UConvLSTMnet.forward (use_lstm=False path). x: (B, T, 2, H, W) float32.
    Returns (B, T, 16, H, W). Frames are processed channels-first (NCHW)."""
    B, T = x.shape[:2]

    def fold(z):    # TimeDistributed(batch_first=True): (B,T,...) -> (B*T,...)
        return z.reshape((B * T,) + z.shape[2:])

    def unfold(z):
        return z.reshape((B, T) + z.shape[1:])

    h = fold(x)                       # (N, 2, H, W)
    x_enc = [h]
    for (w, b) in params["down"]:     # encoder: stride-2 conv blocks
        h = conv3x3_s2(h, w, b)
        x_enc.append(h)

    h = x_enc.pop()
    for (w, b) in params["up"]:       # decoder: conv -> upsample -> concat skip
        h = conv3x3_s1(h, w, b)
        h = upsample2x(h)
        h = jnp.concatenate([h, x_enc.pop()], axis=1)   # torch.cat([x, skip], dim=2)

    for (w, b) in params["extras"]:   # extras: stride-1 conv blocks
        h = conv3x3_s1(h, w, b)

    return unfold(h)                  # (B, T, 16, H, W)


# ---------------------- pure-JAX reference (correctness) ---------------------
def _ref_conv_block(x, w, b, stride):
    y = jax.lax.conv_general_dilated(
        x, w, window_strides=(stride, stride), padding=((1, 1), (1, 1)),
        dimension_numbers=('NCHW', 'OIHW', 'NCHW'))
    y = y + b.reshape(1, -1, 1, 1)
    return jnp.where(y >= 0.0, y, NEG_SLOPE * y)


def reference_forward(x, params):
    B, T = x.shape[:2]
    h = x.reshape((B * T,) + x.shape[2:])
    x_enc = [h]
    for (w, b) in params["down"]:
        h = _ref_conv_block(h, w, b, 2); x_enc.append(h)
    h = x_enc.pop()
    for (w, b) in params["up"]:
        h = _ref_conv_block(h, w, b, 1)
        h = jnp.repeat(jnp.repeat(h, 2, axis=2), 2, axis=3)
        h = jnp.concatenate([h, x_enc.pop()], axis=1)
    for (w, b) in params["extras"]:
        h = _ref_conv_block(h, w, b, 1)
    return h.reshape((B, T) + h.shape[1:])


if __name__ == "__main__":
    key = jax.random.PRNGKey(0)
    kx, kp = jax.random.split(key)
    B, T, C, H, W = 2, 3, 2, 16, 16   # inshape=(16,16) (ndims=2), prev_nf=2 input channels
    x = jax.random.normal(kx, (B, T, C, H, W), jnp.float32)
    params = init_params(kp)

    fwd = jax.jit(uconvlstm_forward)
    y = fwd(x, params)
    jax.block_until_ready(y)
    assert y.shape == (B, T, 16, H, W), y.shape
    assert bool(jnp.all(jnp.isfinite(y)))

    y_ref = jax.jit(reference_forward)(x, params)
    jax.block_until_ready(y_ref)
    max_err = float(jnp.max(jnp.abs(y - y_ref)))
    assert max_err < 3e-3, f"mismatch vs reference: {max_err}"

    print("KERNEL_OK")
</pallas_src>

<mosaic_0001>
module attributes {stable_mosaic.version = 11 : i64} {
  func.func @_gemm_bias_lrelu_kernel(%arg0: i32, %arg1: memref<18x384xf32, #tpu.memory_space<vmem>>, %arg2: memref<16x18xf32, #tpu.memory_space<vmem>>, %arg3: memref<16x1xf32, #tpu.memory_space<vmem>>, %arg4: memref<16x384xf32, #tpu.memory_space<vmem>>) attributes {dimension_semantics = [#tpu.dimension_semantics<parallel>], iteration_bounds = array<i64: 1>, scalar_prefetch = 0 : i64, scratch_operands = 0 : i64, tpu.core_type = #tpu.core_type<tc>, window_params = [{transform_indices = @transform_0, window_bounds = array<i64: 18, 384>}, {pipeline_mode = #tpu.pipeline_mode<synchronous>, transform_indices = @transform_1, window_bounds = array<i64: 16, 18>}, {pipeline_mode = #tpu.pipeline_mode<synchronous>, transform_indices = @transform_2, window_bounds = array<i64: 16, 1>}, {transform_indices = @transform_3, window_bounds = array<i64: 16, 384>}]} {
    %c0 = arith.constant 0 : index
    %c0_0 = arith.constant 0 : index
    %0 = vector.load %arg2[%c0, %c0_0] : memref<16x18xf32, #tpu.memory_space<vmem>>, vector<16x18xf32>
    %c0_1 = arith.constant 0 : index
    %c0_2 = arith.constant 0 : index
    %1 = vector.load %arg1[%c0_1, %c0_2] : memref<18x384xf32, #tpu.memory_space<vmem>>, vector<18x384xf32>
    %cst = arith.constant dense<0.000000e+00> : vector<16x384xf32>
    %2 = tpu.matmul %0, %1, %cst {dimension_numbers = #tpu.dot_dimension_numbers<[1], [0], [0], [1], [0, 0, 1, 1], [], []>} : vector<16x18xf32>, vector<18x384xf32>, vector<16x384xf32> -> vector<16x384xf32>
    %c0_3 = arith.constant 0 : index
    %c0_4 = arith.constant 0 : index
    %3 = vector.load %arg3[%c0_3, %c0_4] : memref<16x1xf32, #tpu.memory_space<vmem>>, vector<16x1xf32>
    %4 = vector.broadcast %3 : vector<16x1xf32> to vector<16x384xf32>
    %5 = arith.addf %2, %4 : vector<16x384xf32>
    %cst_5 = arith.constant 0.000000e+00 : f32
    %6 = vector.broadcast %cst_5 : f32 to vector<16x384xf32>
    %7 = arith.cmpf oge, %5, %6 : vector<16x384xf32>
    %cst_6 = arith.constant 2.000000e-01 : f32
    %8 = vector.broadcast %cst_6 : f32 to vector<16x384xf32>
    %9 = arith.mulf %8, %5 : vector<16x384xf32>
    %10 = arith.select %7, %5, %9 : vector<16x384xi1>, vector<16x384xf32>
    %c0_7 = arith.constant 0 : index
    %c0_8 = arith.constant 0 : index
    %11 = vector.load %arg4[%c0_7, %c0_8] : memref<16x384xf32, #tpu.memory_space<vmem>>, vector<16x384xf32>
    tpu.vector_store %arg4[%c0_7, %c0_8], %10 {strides = array<i32>} : memref<16x384xf32, #tpu.memory_space<vmem>>, vector<16x384xf32>,
    return
  }
  func.func @transform_0(%arg0: i32) -> (i32, i32) {
    %c0_i32 = arith.constant 0 : i32
    %c0_i32_0 = arith.constant 0 : i32
    return %c0_i32, %arg0 : i32, i32
  }
  func.func @transform_1(%arg0: i32) -> (i32, i32) {
    %c0_i32 = arith.constant 0 : i32
    %c0_i32_0 = arith.constant 0 : i32
    %c0_i32_1 = arith.constant 0 : i32
    return %c0_i32, %c0_i32_0 : i32, i32
  }
  func.func @transform_2(%arg0: i32) -> (i32, i32) {
    %c0_i32 = arith.constant 0 : i32
    %c0_i32_0 = arith.constant 0 : i32
    %c0_i32_1 = arith.constant 0 : i32
    return %c0_i32, %c0_i32_0 : i32, i32
  }
  func.func @transform_3(%arg0: i32) -> (i32, i32) {
    %c0_i32 = arith.constant 0 : i32
    %c0_i32_0 = arith.constant 0 : i32
    return %c0_i32, %arg0 : i32, i32
  }
}

module attributes {stable_mosaic.version = 11 : i64} {
  func.func @_gemm_bias_lrelu_kernel(%arg0: i32, %arg1: memref<144x96xf32, #tpu.memory_space<vmem>>, %arg2: memref<32x144xf32, #tpu.memory_space<vmem>>, %arg3: memref<32x1xf32, #tpu.memory_space<vmem>>, %arg4: memref<32x96xf32, #tpu.memory_space<vmem>>) attributes {dimension_semantics = [#tpu.dimension_semantics<parallel>], iteration_bounds = array<i64: 1>, scalar_prefetch = 0 : i64, scratch_operands = 0 : i64, tpu.core_type = #tpu.core_type<tc>, window_params = [{transform_indices = @transform_0, window_bounds = array<i64: 144, 96>}, {pipeline_mode = #tpu.pipeline_mode<synchronous>, transform_indices = @transform_1, window_bounds = array<i64: 32, 144>}, {pipeline_mode = #tpu.pipeline_mode<synchronous>, transform_indices = @transform_2, window_bounds = array<i64: 32, 1>}, {transform_indices = @transform_3, window_bounds = array<i64: 32, 96>}]} {
    %c0 = arith.constant 0 : index
    %c0_0 = arith.constant 0 : index
    %0 = vector.load %arg2[%c0, %c0_0] : memref<32x144xf32, #tpu.memory_space<vmem>>, vector<32x144xf32>
    %c0_1 = arith.constant 0 : index
    %c0_2 = arith.constant 0 : index
    %1 = vector.load %arg1[%c0_1, %c0_2] : memref<144x96xf32, #tpu.memory_space<vmem>>, vector<144x96xf32>
    %cst = arith.constant dense<0.000000e+00> : vector<32x96xf32>
    %2 = tpu.matmul %0, %1, %cst {dimension_numbers = #tpu.dot_dimension_numbers<[1], [0], [0], [1], [0, 0, 1, 1], [], []>} : vector<32x144xf32>, vector<144x96xf32>, vector<32x96xf32> -> vector<32x96xf32>
    %c0_3 = arith.constant 0 : index
    %c0_4 = arith.constant 0 : index
    %3 = vector.load %arg3[%c0_3, %c0_4] : memref<32x1xf32, #tpu.memory_space<vmem>>, vector<32x1xf32>
    %4 = vector.broadcast %3 : vector<32x1xf32> to vector<32x96xf32>
    %5 = arith.addf %2, %4 : vector<32x96xf32>
    %cst_5 = arith.constant 0.000000e+00 : f32
    %6 = vector.broadcast %cst_5 : f32 to vector<32x96xf32>
    %7 = arith.cmpf oge, %5, %6 : vector<32x96xf32>
    %cst_6 = arith.constant 2.000000e-01 : f32
    %8 = vector.broadcast %cst_6 : f32 to vector<32x96xf32>
    %9 = arith.mulf %8, %5 : vector<32x96xf32>
    %10 = arith.select %7, %5, %9 : vector<32x96xi1>, vector<32x96xf32>
    %c0_7 = arith.constant 0 : index
    %c0_8 = arith.constant 0 : index
    %11 = vector.load %arg4[%c0_7, %c0_8] : memref<32x96xf32, #tpu.memory_space<vmem>>, vector<32x96xf32>
    tpu.vector_store %arg4[%c0_7, %c0_8], %10 {strides = array<i32>} : memref<32x96xf32, #tpu.memory_space<vmem>>, vector<32x96xf32>,
    return
  }
  func.func @transform_0(%arg0: i32) -> (i32, i32) {
    %c0_i32 = arith.constant 0 : i32
    %c0_i32_0 = arith.constant 0 : i32
    return %c0_i32, %arg0 : i32, i32
  }
  func.func @transform_1(%arg0: i32) -> (i32, i32) {
    %c0_i32 = arith.constant 0 : i32
    %c0_i32_0 = arith.constant 0 : i32
    %c0_i32_1 = arith.constant 0 : i32
    return %c0_i32, %c0_i32_0 : i32, i32
  }
  func.func @transform_2(%arg0: i32) -> (i32, i32) {
    %c0_i32 = arith.constant 0 : i32
    %c0_i32_0 = arith.constant 0 : i32
    %c0_i32_1 = arith.constant 0 : i32
    return %c0_i32, %c0_i32_0 : i32, i32
  }
  func.func @transform_3(%arg0: i32) -> (i32, i32) {
    %c0_i32 = arith.constant 0 : i32
    %c0_i32_0 = arith.constant 0 : i32
    return %c0_i32, %arg0 : i32, i32
  }
}

module attributes {stable_mosaic.version = 11 : i64} {
  func.func @_gemm_bias_lrelu_kernel(%arg0: i32, %arg1: memref<288x24xf32, #tpu.memory_space<vmem>>, %arg2: memref<32x288xf32, #tpu.memory_space<vmem>>, %arg3: memref<32x1xf32, #tpu.memory_space<vmem>>, %arg4: memref<32x24xf32, #tpu.memory_space<vmem>>) attributes {dimension_semantics = [#tpu.dimension_semantics<parallel>], iteration_bounds = array<i64: 1>, scalar_prefetch = 0 : i64, scratch_operands = 0 : i64, tpu.core_type = #tpu.core_type<tc>, window_params = [{transform_indices = @transform_0, window_bounds = array<i64: 288, 24>}, {pipeline_mode = #tpu.pipeline_mode<synchronous>, transform_indices = @transform_1, window_bounds = array<i64: 32, 288>}, {pipeline_mode = #tpu.pipeline_mode<synchronous>, transform_indices = @transform_2, window_bounds = array<i64: 32, 1>}, {transform_indices = @transform_3, window_bounds = array<i64: 32, 24>}]} {
    %c0 = arith.constant 0 : index
    %c0_0 = arith.constant 0 : index
    %0 = vector.load %arg2[%c0, %c0_0] : memref<32x288xf32, #tpu.memory_space<vmem>>, vector<32x288xf32>
    %c0_1 = arith.constant 0 : index
    %c0_2 = arith.constant 0 : index
    %1 = vector.load %arg1[%c0_1, %c0_2] : memref<288x24xf32, #tpu.memory_space<vmem>>, vector<288x24xf32>
    %cst = arith.constant dense<0.000000e+00> : vector<32x24xf32>
    %2 = tpu.matmul %0, %1, %cst {dimension_numbers = #tpu.dot_dimension_numbers<[1], [0], [0], [1], [0, 0, 1, 1], [], []>} : vector<32x288xf32>, vector<288x24xf32>, vector<32x24xf32> -> vector<32x24xf32>
    %c0_3 = arith.constant 0 : index
    %c0_4 = arith.constant 0 : index
    %3 = vector.load %arg3[%c0_3, %c0_4] : memref<32x1xf32, #tpu.memory_space<vmem>>, vector<32x1xf32>
    %4 = vector.broadcast %3 : vector<32x1xf32> to vector<32x24xf32>
    %5 = arith.addf %2, %4 : vector<32x24xf32>
    %cst_5 = arith.constant 0.000000e+00 : f32
    %6 = vector.broadcast %cst_5 : f32 to vector<32x24xf32>
    %7 = arith.cmpf oge, %5, %6 : vector<32x24xf32>
    %cst_6 = arith.constant 2.000000e-01 : f32
    %8 = vector.broadcast %cst_6 : f32 to vector<32x24xf32>
    %9 = arith.mulf %8, %5 : vector<32x24xf32>
    %10 = arith.select %7, %5, %9 : vector<32x24xi1>, vector<32x24xf32>
    %c0_7 = arith.constant 0 : index
    %c0_8 = arith.constant 0 : index
    %11 = vector.load %arg4[%c0_7, %c0_8] : memref<32x24xf32, #tpu.memory_space<vmem>>, vector<32x24xf32>
    tpu.vector_store %arg4[%c0_7, %c0_8], %10 {strides = array<i32>} : memref<32x24xf32, #tpu.memory_space<vmem>>, vector<32x24xf32>,
    return
  }
  func.func @transform_0(%arg0: i32) -> (i32, i32) {
    %c0_i32 = arith.constant 0 : i32
    %c0_i32_0 = arith.constant 0 : i32
    return %c0_i32, %arg0 : i32, i32
  }
  func.func @transform_1(%arg0: i32) -> (i32, i32) {
    %c0_i32 = arith.constant 0 : i32
    %c0_i32_0 = arith.constant 0 : i32
    %c0_i32_1 = arith.constant 0 : i32
    return %c0_i32, %c0_i32_0 : i32, i32
  }
  func.func @transform_2(%arg0: i32) -> (i32, i32) {
    %c0_i32 = arith.constant 0 : i32
    %c0_i32_0 = arith.constant 0 : i32
    %c0_i32_1 = arith.constant 0 : i32
    return %c0_i32, %c0_i32_0 : i32, i32
  }
  func.func @transform_3(%arg0: i32) -> (i32, i32) {
    %c0_i32 = arith.constant 0 : i32
    %c0_i32_0 = arith.constant 0 : i32
    return %c0_i32, %arg0 : i32, i32
  }
}

module attributes {stable_mosaic.version = 11 : i64} {
  func.func @_gemm_bias_lrelu_kernel(%arg0: i32, %arg1: memref<288x6xf32, #tpu.memory_space<vmem>>, %arg2: memref<32x288xf32, #tpu.memory_space<vmem>>, %arg3: memref<32x1xf32, #tpu.memory_space<vmem>>, %arg4: memref<32x6xf32, #tpu.memory_space<vmem>>) attributes {dimension_semantics = [#tpu.dimension_semantics<parallel>], iteration_bounds = array<i64: 1>, scalar_prefetch = 0 : i64, scratch_operands = 0 : i64, tpu.core_type = #tpu.core_type<tc>, window_params = [{transform_indices = @transform_0, window_bounds = array<i64: 288, 6>}, {pipeline_mode = #tpu.pipeline_mode<synchronous>, transform_indices = @transform_1, window_bounds = array<i64: 32, 288>}, {pipeline_mode = #tpu.pipeline_mode<synchronous>, transform_indices = @transform_2, window_bounds = array<i64: 32, 1>}, {transform_indices = @transform_3, window_bounds = array<i64: 32, 6>}]} {
    %c0 = arith.constant 0 : index
    %c0_0 = arith.constant 0 : index
    %0 = vector.load %arg2[%c0, %c0_0] : memref<32x288xf32, #tpu.memory_space<vmem>>, vector<32x288xf32>
    %c0_1 = arith.constant 0 : index
    %c0_2 = arith.constant 0 : index
    %1 = vector.load %arg1[%c0_1, %c0_2] : memref<288x6xf32, #tpu.memory_space<vmem>>, vector<288x6xf32>
    %cst = arith.constant dense<0.000000e+00> : vector<32x6xf32>
    %2 = tpu.matmul %0, %1, %cst {dimension_numbers = #tpu.dot_dimension_numbers<[1], [0], [0], [1], [0, 0, 1, 1], [], []>} : vector<32x288xf32>, vector<288x6xf32>, vector<32x6xf32> -> vector<32x6xf32>
    %c0_3 = arith.constant 0 : index
    %c0_4 = arith.constant 0 : index
    %3 = vector.load %arg3[%c0_3, %c0_4] : memref<32x1xf32, #tpu.memory_space<vmem>>, vector<32x1xf32>
    %4 = vector.broadcast %3 : vector<32x1xf32> to vector<32x6xf32>
    %5 = arith.addf %2, %4 : vector<32x6xf32>
    %cst_5 = arith.constant 0.000000e+00 : f32
    %6 = vector.broadcast %cst_5 : f32 to vector<32x6xf32>
    %7 = arith.cmpf oge, %5, %6 : vector<32x6xf32>
    %cst_6 = arith.constant 2.000000e-01 : f32
    %8 = vector.broadcast %cst_6 : f32 to vector<32x6xf32>
    %9 = arith.mulf %8, %5 : vector<32x6xf32>
    %10 = arith.select %7, %5, %9 : vector<32x6xi1>, vector<32x6xf32>
    %c0_7 = arith.constant 0 : index
    %c0_8 = arith.constant 0 : index
    %11 = vector.load %arg4[%c0_7, %c0_8] : memref<32x6xf32, #tpu.memory_space<vmem>>, vector<32x6xf32>
    tpu.vector_store %arg4[%c0_7, %c0_8], %10 {strides = array<i32>} : memref<32x6xf32, #tpu.memory_space<vmem>>, vector<32x6xf32>,
    return
  }
  func.func @transform_0(%arg0: i32) -> (i32, i32) {
    %c0_i32 = arith.constant 0 : i32
    %c0_i32_0 = arith.constant 0 : i32
    return %c0_i32, %arg0 : i32, i32
  }
  func.func @transform_1(%arg0: i32) -> (i32, i32) {
    %c0_i32 = arith.constant 0 : i32
    %c0_i32_0 = arith.constant 0 : i32
    %c0_i32_1 = arith.constant 0 : i32
    return %c0_i32, %c0_i32_0 : i32, i32
  }
  func.func @transform_2(%arg0: i32) -> (i32, i32) {
    %c0_i32 = arith.constant 0 : i32
    %c0_i32_0 = arith.constant 0 : i32
    %c0_i32_1 = arith.constant 0 : i32
    return %c0_i32, %c0_i32_0 : i32, i32
  }
  func.func @transform_3(%arg0: i32) -> (i32, i32) {
    %c0_i32 = arith.constant 0 : i32
    %c0_i32_0 = arith.constant 0 : i32
    return %c0_i32, %arg0 : i32, i32
  }
}

module attributes {stable_mosaic.version = 11 : i64} {
  func.func @_conv3x3_s1_kernel(%arg0: i32, %arg1: memref<1x32x17xf32, #tpu.memory_space<vmem>>, %arg2: memref<9x32x32xf32, #tpu.memory_space<vmem>>, %arg3: memref<32x1xf32, #tpu.memory_space<vmem>>, %arg4: memref<1x32x9xf32, #tpu.memory_space<vmem>>) attributes {dimension_semantics = [#tpu.dimension_semantics<parallel>], iteration_bounds = array<i64: 6>, scalar_prefetch = 0 : i64, scratch_operands = 0 : i64, tpu.core_type = #tpu.core_type<tc>, window_params = [{transform_indices = @transform_0, window_bounds = array<i64: 1, 32, 17>}, {pipeline_mode = #tpu.pipeline_mode<synchronous>, transform_indices = @transform_1, window_bounds = array<i64: 9, 32, 32>}, {pipeline_mode = #tpu.pipeline_mode<synchronous>, transform_indices = @transform_2, window_bounds = array<i64: 32, 1>}, {transform_indices = @transform_3, window_bounds = array<i64: 1, 32, 9>}]} {
    %cst = arith.constant 0.000000e+00 : f32
    %0 = vector.broadcast %cst : f32 to vector<32x9xf32>
    %c0 = arith.constant 0 : index
    %c0_0 = arith.constant 0 : index
    %c0_1 = arith.constant 0 : index
    %1 = vector.load %arg1[%c0, %c0_0, %c0_1] : memref<1x32x17xf32, #tpu.memory_space<vmem>>, vector<1x32x9xf32>
    %2 = vector.shape_cast %1 : vector<1x32x9xf32> to vector<32x9xf32>
    %c0_2 = arith.constant 0 : index
    %c0_3 = arith.constant 0 : index
    %c0_4 = arith.constant 0 : index
    %3 = vector.load %arg2[%c0_2, %c0_3, %c0_4] : memref<9x32x32xf32, #tpu.memory_space<vmem>>, vector<1x32x32xf32>
    %4 = vector.shape_cast %3 : vector<1x32x32xf32> to vector<32x32xf32>
    %cst_5 = arith.constant dense<0.000000e+00> : vector<32x9xf32>
    %5 = tpu.matmul %4, %2, %cst_5 {dimension_numbers = #tpu.dot_dimension_numbers<[1], [0], [0], [1], [0, 0, 1, 1], [], []>} : vector<32x32xf32>, vector<32x9xf32>, vector<32x9xf32> -> vector<32x9xf32>
    %6 = arith.addf %0, %5 : vector<32x9xf32>
    %c0_6 = arith.constant 0 : index
    %c0_7 = arith.constant 0 : index
    %c1 = arith.constant 1 : index
    %7 = vector.load %arg1[%c0_6, %c0_7, %c1] : memref<1x32x17xf32, #tpu.memory_space<vmem>>, vector<1x32x9xf32>
    %8 = vector.shape_cast %7 : vector<1x32x9xf32> to vector<32x9xf32>
    %c1_8 = arith.constant 1 : index
    %c0_9 = arith.constant 0 : index
    %c0_10 = arith.constant 0 : index
    %9 = vector.load %arg2[%c1_8, %c0_9, %c0_10] : memref<9x32x32xf32, #tpu.memory_space<vmem>>, vector<1x32x32xf32>
    %10 = vector.shape_cast %9 : vector<1x32x32xf32> to vector<32x32xf32>
    %cst_11 = arith.constant dense<0.000000e+00> : vector<32x9xf32>
    %11 = tpu.matmul %10, %8, %cst_11 {dimension_numbers = #tpu.dot_dimension_numbers<[1], [0], [0], [1], [0, 0, 1, 1], [], []>} : vector<32x32xf32>, vector<32x9xf32>, vector<32x9xf32> -> vector<32x9xf32>
    %12 = arith.addf %6, %11 : vector<32x9xf32>
    %c0_12 = arith.constant 0 : index
    %c0_13 = arith.constant 0 : index
    %c2 = arith.constant 2 : index
    %13 = vector.load %arg1[%c0_12, %c0_13, %c2] : memref<1x32x17xf32, #tpu.memory_space<vmem>>, vector<1x32x9xf32>
    %14 = vector.shape_cast %13 : vector<1x32x9xf32> to vector<32x9xf32>
    %c2_14 = arith.constant 2 : index
    %c0_15 = arith.constant 0 : index
    %c0_16 = arith.constant 0 : index
    %15 = vector.load %arg2[%c2_14, %c0_15, %c0_16] : memref<9x32x32xf32, #tpu.memory_space<vmem>>, vector<1x32x32xf32>
    %16 = vector.shape_cast %15 : vector<1x32x32xf32> to vector<32x32xf32>
    %cst_17 = arith.constant dense<0.000000e+00> : vector<32x9xf32>
    %17 = tpu.matmul %16, %14, %cst_17 {dimension_numbers = #tpu.dot_dimension_numbers<[1], [0], [0], [1], [0, 0, 1, 1], [], []>} : vector<32x32xf32>, vector<32x9xf32>, vector<32x9xf32> -> vector<32x9xf32>
    %18 = arith.addf %12, %17 : vector<32x9xf32>
    %c0_18 = arith.constant 0 : index
    %c0_19 = arith.constant 0 : index
    %c3 = arith.constant 3 : index
    %19 = vector.load %arg1[%c0_18, %c0_19, %c3] : memref<1x32x17xf32, #tpu.memory_space<vmem>>, vector<1x32x9xf32>
    %20 = vector.shape_cast %19 : vector<1x32x9xf32> to vector<32x9xf32>
    %c3_20 = arith.constant 3 : index
    %c0_21 = arith.constant 0 : index
    %c0_22 = arith.constant 0 : index
    %21 = vector.load %arg2[%c3_20, %c0_21, %c0_22] : memref<9x32x32xf32, #tpu.memory_space<vmem>>, vector<1x32x32xf32>
    %22 = vector.shape_cast %21 : vector<1x32x32xf32> to vector<32x32xf32>
    %cst_23 = arith.constant dense<0.000000e+00> : vector<32x9xf32>
    %23 = tpu.matmul %22, %20, %cst_23 {dimension_numbers = #tpu.dot_dimension_numbers<[1], [0], [0], [1], [0, 0, 1, 1], [], []>} : vector<32x32xf32>, vector<32x9xf32>, vector<32x9xf32> -> vector<32x9xf32>
    %24 = arith.addf %18, %23 : vector<32x9xf32>
    %c0_24 = arith.constant 0 : index
    %c0_25 = arith.constant 0 : index
    %c4 = arith.constant 4 : index
    %25 = vector.load %arg1[%c0_24, %c0_25, %c4] : memref<1x32x17xf32, #tpu.memory_space<vmem>>, vector<1x32x9xf32>
    %26 = vector.shape_cast %25 : vector<1x32x9xf32> to vector<32x9xf32>
    %c4_26 = arith.constant 4 : index
    %c0_27 = arith.constant 0 : index
    %c0_28 = arith.constant 0 : index
    %27 = vector.load %arg2[%c4_26, %c0_27, %c0_28] : memref<9x32x32xf32, #tpu.memory_space<vmem>>, vector<1x32x32xf32>
    %28 = vector.shape_cast %27 : vector<1x32x32xf32> to vector<32x32xf32>
    %cst_29 = arith.constant dense<0.000000e+00> : vector<32x9xf32>
    %29 = tpu.matmul %28, %26, %cst_29 {dimension_numbers = #tpu.dot_dimension_numbers<[1], [0], [0], [1], [0, 0, 1, 1], [], []>} : vector<32x32xf32>, vector<32x9xf32>, vector<32x9xf32> -> vector<32x9xf32>
    %30 = arith.addf %24, %29 : vector<32x9xf32>
    %c0_30 = arith.constant 0 : index
    %c0_31 = arith.constant 0 : index
    %c5 = arith.constant 5 : index
    %31 = vector.load %arg1[%c0_30, %c0_31, %c5] : memref<1x32x17xf32, #tpu.memory_space<vmem>>, vector<1x32x9xf32>
    %32 = vector.shape_cast %31 : vector<1x32x9xf32> to vector<32x9xf32>
    %c5_32 = arith.constant 5 : index
    %c0_33 = arith.constant 0 : index
    %c0_34 = arith.constant 0 : index
    %33 = vector.load %arg2[%c5_32, %c0_33, %c0_34] : memref<9x32x32xf32, #tpu.memory_space<vmem>>, vector<1x32x32xf32>
    %34 = vector.shape_cast %33 : vector<1x32x32xf32> to vector<32x32xf32>
    %cst_35 = arith.constant dense<0.000000e+00> : vector<32x9xf32>
    %35 = tpu.matmul %34, %32, %cst_35 {dimension_numbers = #tpu.dot_dimension_numbers<[1], [0], [0], [1], [0, 0, 1, 1], [], []>} : vector<32x32xf32>, vector<32x9xf32>, vector<32x9xf32> -> vector<32x9xf32>
    %36 = arith.addf %30, %35 : vector<32x9xf32>
    %c0_36 = arith.constant 0 : index
    %c0_37 = arith.constant 0 : index
    %c6 = arith.constant 6 : index
    %37 = vector.load %arg1[%c0_36, %c0_37, %c6] : memref<1x32x17xf32, #tpu.memory_space<vmem>>, vector<1x32x9xf32>
    %38 = vector.shape_cast %37 : vector<1x32x9xf32> to vector<32x9xf32>
    %c6_38 = arith.constant 6 : index
    %c0_39 = arith.constant 0 : index
    %c0_40 = arith.constant 0 : index
    %39 = vector.load %arg2[%c6_38, %c0_39, %c0_40] : memref<9x32x32xf32, #tpu.memory_space<vmem>>, vector<1x32x32xf32>
    %40 = vector.shape_cast %39 : vector<1x32x32xf32> to vector<32x32xf32>
    %cst_41 = arith.constant dense<0.000000e+00> : vector<32x9xf32>
    %41 = tpu.matmul %40, %38, %cst_41 {dimension_numbers = #tpu.dot_dimension_numbers<[1], [0], [0], [1], [0, 0, 1, 1], [], []>} : vector<32x32xf32>, vector<32x9xf32>, vector<32x9xf32> -> vector<32x9xf32>
    %42 = arith.addf %36, %41 : vector<32x9xf32>
    %c0_42 = arith.constant 0 : index
    %c0_43 = arith.constant 0 : index
    %c7 = arith.constant 7 : index
    %43 = vector.load %arg1[%c0_42, %c0_43, %c7] : memref<1x32x17xf32, #tpu.memory_space<vmem>>, vector<1x32x9xf32>
    %44 = vector.shape_cast %43 : vector<1x32x9xf32> to vector<32x9xf32>
    %c7_44 = arith.constant 7 : index
    %c0_45 = arith.constant 0 : index
    %c0_46 = arith.constant 0 : index
    %45 = vector.load %arg2[%c7_44, %c0_45, %c0_46] : memref<9x32x32xf32, #tpu.memory_space<vmem>>, vector<1x32x32xf32>
    %46 = vector.shape_cast %45 : vector<1x32x32xf32> to vector<32x32xf32>
    %cst_47 = arith.constant dense<0.000000e+00> : vector<32x9xf32>
    %47 = tpu.matmul %46, %44, %cst_47 {dimension_numbers = #tpu.dot_dimension_numbers<[1], [0], [0], [1], [0, 0, 1, 1], [], []>} : vector<32x32xf32>, vector<32x9xf32>, vector<32x9xf32> -> vector<32x9xf32>
    %48 = arith.addf %42, %47 : vector<32x9xf32>
    %c0_48 = arith.constant 0 : index
    %c0_49 = arith.constant 0 : index
    %c8 = arith.constant 8 : index
    %49 = vector.load %arg1[%c0_48, %c0_49, %c8] : memref<1x32x17xf32, #tpu.memory_space<vmem>>, vector<1x32x9xf32>
    %50 = vector.shape_cast %49 : vector<1x32x9xf32> to vector<32x9xf32>
    %c8_50 = arith.constant 8 : index
    %c0_51 = arith.constant 0 : index
    %c0_52 = arith.constant 0 : index
    %51 = vector.load %arg2[%c8_50, %c0_51, %c0_52] : memref<9x32x32xf32, #tpu.memory_space<vmem>>, vector<1x32x32xf32>
    %52 = vector.shape_cast %51 : vector<1x32x32xf32> to vector<32x32xf32>
    %cst_53 = arith.constant dense<0.000000e+00> : vector<32x9xf32>
    %53 = tpu.matmul %52, %50, %cst_53 {dimension_numbers = #tpu.dot_dimension_numbers<[1], [0], [0], [1], [0, 0, 1, 1], [], []>} : vector<32x32xf32>, vector<32x9xf32>, vector<32x9xf32> -> vector<32x9xf32>
    %54 = arith.addf %48, %53 : vector<32x9xf32>
    %c0_54 = arith.constant 0 : index
    %c0_55 = arith.constant 0 : index
    %55 = vector.load %arg3[%c0_54, %c0_55] : memref<32x1xf32, #tpu.memory_space<vmem>>, vector<32x1xf32>
    %56 = vector.broadcast %55 : vector<32x1xf32> to vector<32x9xf32>
    %57 = arith.addf %54, %56 : vector<32x9xf32>
    %cst_56 = arith.constant 0.000000e+00 : f32
    %58 = vector.broadcast %cst_56 : f32 to vector<32x9xf32>
    %59 = arith.cmpf oge, %57, %58 : vector<32x9xf32>
    %cst_57 = arith.constant 2.000000e-01 : f32
    %60 = vector.broadcast %cst_57 : f32 to vector<32x9xf32>
    %61 = arith.mulf %60, %57 : vector<32x9xf32>
    %62 = arith.select %59, %57, %61 : vector<32x9xi1>, vector<32x9xf32>
    %c0_58 = arith.constant 0 : index
    %c0_59 = arith.constant 0 : index
    %c0_60 = arith.constant 0 : index
    %63 = vector.load %arg4[%c0_58, %c0_59, %c0_60] : memref<1x32x9xf32, #tpu.memory_space<vmem>>, vector<1x32x9xf32>
    %64 = vector.shape_cast %63 : vector<1x32x9xf32> to vector<32x9xf32>
    %65 = vector.shape_cast %62 : vector<32x9xf32> to vector<1x32x9xf32>
    tpu.vector_store %arg4[%c0_58, %c0_59, %c0_60], %65 {strides = array<i32>} : memref<1x32x9xf32, #tpu.memory_space<vmem>>, vector<1x32x9xf32>,
    return
  }
  func.func @transform_0(%arg0: i32) -> (i32, i32, i32) {
    %c0_i32 = arith.constant 0 : i32
    %c0_i32_0 = arith.constant 0 : i32
    %c0_i32_1 = arith.constant 0 : i32
    return %arg0, %c0_i32, %c0_i32_0 : i32, i32, i32
  }
  func.func @transform_1(%arg0: i32) -> (i32, i32, i32) {
    %c0_i32 = arith.constant 0 : i32
    %c0_i32_0 = arith.constant 0 : i32
    %c0_i32_1 = arith.constant 0 : i32
    %c0_i32_2 = arith.constant 0 : i32
    return %c0_i32, %c0_i32_0, %c0_i32_1 : i32, i32, i32
  }
  func.func @transform_2(%arg0: i32) -> (i32, i32) {
    %c0_i32 = arith.constant 0 : i32
    %c0_i32_0 = arith.constant 0 : i32
    %c0_i32_1 = arith.constant 0 : i32
    return %c0_i32, %c0_i32_0 : i32, i32
  }
  func.func @transform_3(%arg0: i32) -> (i32, i32, i32) {
    %c0_i32 = arith.constant 0 : i32
    %c0_i32_0 = arith.constant 0 : i32
    %c0_i32_1 = arith.constant 0 : i32
    return %arg0, %c0_i32, %c0_i32_0 : i32, i32, i32
  }
}

module attributes {stable_mosaic.version = 11 : i64} {
  func.func @_conv3x3_s1_kernel(%arg0: i32, %arg1: memref<1x64x26xf32, #tpu.memory_space<vmem>>, %arg2: memref<9x32x64xf32, #tpu.memory_space<vmem>>, %arg3: memref<32x1xf32, #tpu.memory_space<vmem>>, %arg4: memref<1x32x16xf32, #tpu.memory_space<vmem>>) attributes {dimension_semantics = [#tpu.dimension_semantics<parallel>], iteration_bounds = array<i64: 6>, scalar_prefetch = 0 : i64, scratch_operands = 0 : i64, tpu.core_type = #tpu.core_type<tc>, window_params = [{transform_indices = @transform_0, window_bounds = array<i64: 1, 64, 26>}, {pipeline_mode = #tpu.pipeline_mode<synchronous>, transform_indices = @transform_1, window_bounds = array<i64: 9, 32, 64>}, {pipeline_mode = #tpu.pipeline_mode<synchronous>, transform_indices = @transform_2, window_bounds = array<i64: 32, 1>}, {transform_indices = @transform_3, window_bounds = array<i64: 1, 32, 16>}]} {
    %cst = arith.constant 0.000000e+00 : f32
    %0 = vector.broadcast %cst : f32 to vector<32x16xf32>
    %c0 = arith.constant 0 : index
    %c0_0 = arith.constant 0 : index
    %c0_1 = arith.constant 0 : index
    %1 = vector.load %arg1[%c0, %c0_0, %c0_1] : memref<1x64x26xf32, #tpu.memory_space<vmem>>, vector<1x64x16xf32>
    %2 = vector.shape_cast %1 : vector<1x64x16xf32> to vector<64x16xf32>
    %c0_2 = arith.constant 0 : index
    %c0_3 = arith.constant 0 : index
    %c0_4 = arith.constant 0 : index
    %3 = vector.load %arg2[%c0_2, %c0_3, %c0_4] : memref<9x32x64xf32, #tpu.memory_space<vmem>>, vector<1x32x64xf32>
    %4 = vector.shape_cast %3 : vector<1x32x64xf32> to vector<32x64xf32>
    %cst_5 = arith.constant dense<0.000000e+00> : vector<32x16xf32>
    %5 = tpu.matmul %4, %2, %cst_5 {dimension_numbers = #tpu.dot_dimension_numbers<[1], [0], [0], [1], [0, 0, 1, 1], [], []>} : vector<32x64xf32>, vector<64x16xf32>, vector<32x16xf32> -> vector<32x16xf32>
    %6 = arith.addf %0, %5 : vector<32x16xf32>
    %c0_6 = arith.constant 0 : index
    %c0_7 = arith.constant 0 : index
    %c1 = arith.constant 1 : index
    %7 = vector.load %arg1[%c0_6, %c0_7, %c1] : memref<1x64x26xf32, #tpu.memory_space<vmem>>, vector<1x64x16xf32>
    %8 = vector.shape_cast %7 : vector<1x64x16xf32> to vector<64x16xf32>
    %c1_8 = arith.constant 1 : index
    %c0_9 = arith.constant 0 : index
    %c0_10 = arith.constant 0 : index
    %9 = vector.load %arg2[%c1_8, %c0_9, %c0_10] : memref<9x32x64xf32, #tpu.memory_space<vmem>>, vector<1x32x64xf32>
    %10 = vector.shape_cast %9 : vector<1x32x64xf32> to vector<32x64xf32>
    %cst_11 = arith.constant dense<0.000000e+00> : vector<32x16xf32>
    %11 = tpu.matmul %10, %8, %cst_11 {dimension_numbers = #tpu.dot_dimension_numbers<[1], [0], [0], [1], [0, 0, 1, 1], [], []>} : vector<32x64xf32>, vector<64x16xf32>, vector<32x16xf32> -> vector<32x16xf32>
    %12 = arith.addf %6, %11 : vector<32x16xf32>
    %c0_12 = arith.constant 0 : index
    %c0_13 = arith.constant 0 : index
    %c2 = arith.constant 2 : index
    %13 = vector.load %arg1[%c0_12, %c0_13, %c2] : memref<1x64x26xf32, #tpu.memory_space<vmem>>, vector<1x64x16xf32>
    %14 = vector.shape_cast %13 : vector<1x64x16xf32> to vector<64x16xf32>
    %c2_14 = arith.constant 2 : index
    %c0_15 = arith.constant 0 : index
    %c0_16 = arith.constant 0 : index
    %15 = vector.load %arg2[%c2_14, %c0_15, %c0_16] : memref<9x32x64xf32, #tpu.memory_space<vmem>>, vector<1x32x64xf32>
    %16 = vector.shape_cast %15 : vector<1x32x64xf32> to vector<32x64xf32>
    %cst_17 = arith.constant dense<0.000000e+00> : vector<32x16xf32>
    %17 = tpu.matmul %16, %14, %cst_17 {dimension_numbers = #tpu.dot_dimension_numbers<[1], [0], [0], [1], [0, 0, 1, 1], [], []>} : vector<32x64xf32>, vector<64x16xf32>, vector<32x16xf32> -> vector<32x16xf32>
    %18 = arith.addf %12, %17 : vector<32x16xf32>
    %c0_18 = arith.constant 0 : index
    %c0_19 = arith.constant 0 : index
    %c4 = arith.constant 4 : index
    %19 = vector.load %arg1[%c0_18, %c0_19, %c4] : memref<1x64x26xf32, #tpu.memory_space<vmem>>, vector<1x64x16xf32>
    %20 = vector.shape_cast %19 : vector<1x64x16xf32> to vector<64x16xf32>
    %c3 = arith.constant 3 : index
    %c0_20 = arith.constant 0 : index
    %c0_21 = arith.constant 0 : index
    %21 = vector.load %arg2[%c3, %c0_20, %c0_21] : memref<9x32x64xf32, #tpu.memory_space<vmem>>, vector<1x32x64xf32>
    %22 = vector.shape_cast %21 : vector<1x32x64xf32> to vector<32x64xf32>
    %cst_22 = arith.constant dense<0.000000e+00> : vector<32x16xf32>
    %23 = tpu.matmul %22, %20, %cst_22 {dimension_numbers = #tpu.dot_dimension_numbers<[1], [0], [0], [1], [0, 0, 1, 1], [], []>} : vector<32x64xf32>, vector<64x16xf32>, vector<32x16xf32> -> vector<32x16xf32>
    %24 = arith.addf %18, %23 : vector<32x16xf32>
    %c0_23 = arith.constant 0 : index
    %c0_24 = arith.constant 0 : index
    %c5 = arith.constant 5 : index
    %25 = vector.load %arg1[%c0_23, %c0_24, %c5] : memref<1x64x26xf32, #tpu.memory_space<vmem>>, vector<1x64x16xf32>
    %26 = vector.shape_cast %25 : vector<1x64x16xf32> to vector<64x16xf32>
    %c4_25 = arith.constant 4 : index
    %c0_26 = arith.constant 0 : index
    %c0_27 = arith.constant 0 : index
    %27 = vector.load %arg2[%c4_25, %c0_26, %c0_27] : memref<9x32x64xf32, #tpu.memory_space<vmem>>, vector<1x32x64xf32>
    %28 = vector.shape_cast %27 : vector<1x32x64xf32> to vector<32x64xf32>
    %cst_28 = arith.constant dense<0.000000e+00> : vector<32x16xf32>
    %29 = tpu.matmul %28, %26, %cst_28 {dimension_numbers = #tpu.dot_dimension_numbers<[1], [0], [0], [1], [0, 0, 1, 1], [], []>} : vector<32x64xf32>, vector<64x16xf32>, vector<32x16xf32> -> vector<32x16xf32>
    %30 = arith.addf %24, %29 : vector<32x16xf32>
    %c0_29 = arith.constant 0 : index
    %c0_30 = arith.constant 0 : index
    %c6 = arith.constant 6 : index
    %31 = vector.load %arg1[%c0_29, %c0_30, %c6] : memref<1x64x26xf32, #tpu.memory_space<vmem>>, vector<1x64x16xf32>
    %32 = vector.shape_cast %31 : vector<1x64x16xf32> to vector<64x16xf32>
    %c5_31 = arith.constant 5 : index
    %c0_32 = arith.constant 0 : index
    %c0_33 = arith.constant 0 : index
    %33 = vector.load %arg2[%c5_31, %c0_32, %c0_33] : memref<9x32x64xf32, #tpu.memory_space<vmem>>, vector<1x32x64xf32>
    %34 = vector.shape_cast %33 : vector<1x32x64xf32> to vector<32x64xf32>
    %cst_34 = arith.constant dense<0.000000e+00> : vector<32x16xf32>
    %35 = tpu.matmul %34, %32, %cst_34 {dimension_numbers = #tpu.dot_dimension_numbers<[1], [0], [0], [1], [0, 0, 1, 1], [], []>} : vector<32x64xf32>, vector<64x16xf32>, vector<32x16xf32> -> vector<32x16xf32>
    %36 = arith.addf %30, %35 : vector<32x16xf32>
    %c0_35 = arith.constant 0 : index
    %c0_36 = arith.constant 0 : index
    %c8 = arith.constant 8 : index
    %37 = vector.load %arg1[%c0_35, %c0_36, %c8] : memref<1x64x26xf32, #tpu.memory_space<vmem>>, vector<1x64x16xf32>
    %38 = vector.shape_cast %37 : vector<1x64x16xf32> to vector<64x16xf32>
    %c6_37 = arith.constant 6 : index
    %c0_38 = arith.constant 0 : index
    %c0_39 = arith.constant 0 : index
    %39 = vector.load %arg2[%c6_37, %c0_38, %c0_39] : memref<9x32x64xf32, #tpu.memory_space<vmem>>, vector<1x32x64xf32>
    %40 = vector.shape_cast %39 : vector<1x32x64xf32> to vector<32x64xf32>
    %cst_40 = arith.constant dense<0.000000e+00> : vector<32x16xf32>
    %41 = tpu.matmul %40, %38, %cst_40 {dimension_numbers = #tpu.dot_dimension_numbers<[1], [0], [0], [1], [0, 0, 1, 1], [], []>} : vector<32x64xf32>, vector<64x16xf32>, vector<32x16xf32> -> vector<32x16xf32>
    %42 = arith.addf %36, %41 : vector<32x16xf32>
    %c0_41 = arith.constant 0 : index
    %c0_42 = arith.constant 0 : index
    %c9 = arith.constant 9 : index
    %43 = vector.load %arg1[%c0_41, %c0_42, %c9] : memref<1x64x26xf32, #tpu.memory_space<vmem>>, vector<1x64x16xf32>
    %44 = vector.shape_cast %43 : vector<1x64x16xf32> to vector<64x16xf32>
    %c7 = arith.constant 7 : index
    %c0_43 = arith.constant 0 : index
    %c0_44 = arith.constant 0 : index
    %45 = vector.load %arg2[%c7, %c0_43, %c0_44] : memref<9x32x64xf32, #tpu.memory_space<vmem>>, vector<1x32x64xf32>
    %46 = vector.shape_cast %45 : vector<1x32x64xf32> to vector<32x64xf32>
    %cst_45 = arith.constant dense<0.000000e+00> : vector<32x16xf32>
    %47 = tpu.matmul %46, %44, %cst_45 {dimension_numbers = #tpu.dot_dimension_numbers<[1], [0], [0], [1], [0, 0, 1, 1], [], []>} : vector<32x64xf32>, vector<64x16xf32>, vector<32x16xf32> -> vector<32x16xf32>
    %48 = arith.addf %42, %47 : vector<32x16xf32>
    %c0_46 = arith.constant 0 : index
    %c0_47 = arith.constant 0 : index
    %c10 = arith.constant 10 : index
    %49 = vector.load %arg1[%c0_46, %c0_47, %c10] : memref<1x64x26xf32, #tpu.memory_space<vmem>>, vector<1x64x16xf32>
    %50 = vector.shape_cast %49 : vector<1x64x16xf32> to vector<64x16xf32>
    %c8_48 = arith.constant 8 : index
    %c0_49 = arith.constant 0 : index
    %c0_50 = arith.constant 0 : index
    %51 = vector.load %arg2[%c8_48, %c0_49, %c0_50] : memref<9x32x64xf32, #tpu.memory_space<vmem>>, vector<1x32x64xf32>
    %52 = vector.shape_cast %51 : vector<1x32x64xf32> to vector<32x64xf32>
    %cst_51 = arith.constant dense<0.000000e+00> : vector<32x16xf32>
    %53 = tpu.matmul %52, %50, %cst_51 {dimension_numbers = #tpu.dot_dimension_numbers<[1], [0], [0], [1], [0, 0, 1, 1], [], []>} : vector<32x64xf32>, vector<64x16xf32>, vector<32x16xf32> -> vector<32x16xf32>
    %54 = arith.addf %48, %53 : vector<32x16xf32>
    %c0_52 = arith.constant 0 : index
    %c0_53 = arith.constant 0 : index
    %55 = vector.load %arg3[%c0_52, %c0_53] : memref<32x1xf32, #tpu.memory_space<vmem>>, vector<32x1xf32>
    %56 = vector.broadcast %55 : vector<32x1xf32> to vector<32x16xf32>
    %57 = arith.addf %54, %56 : vector<32x16xf32>
    %cst_54 = arith.constant 0.000000e+00 : f32
    %58 = vector.broadcast %cst_54 : f32 to vector<32x16xf32>
    %59 = arith.cmpf oge, %57, %58 : vector<32x16xf32>
    %cst_55 = arith.constant 2.000000e-01 : f32
    %60 = vector.broadcast %cst_55 : f32 to vector<32x16xf32>
    %61 = arith.mulf %60, %57 : vector<32x16xf32>
    %62 = arith.select %59, %57, %61 : vector<32x16xi1>, vector<32x16xf32>
    %c0_56 = arith.constant 0 : index
    %c0_57 = arith.constant 0 : index
    %c0_58 = arith.constant 0 : index
    %63 = vector.load %arg4[%c0_56, %c0_57, %c0_58] : memref<1x32x16xf32, #tpu.memory_space<vmem>>, vector<1x32x16xf32>
    %64 = vector.shape_cast %63 : vector<1x32x16xf32> to vector<32x16xf32>
    %65 = vector.shape_cast %62 : vector<32x16xf32> to vector<1x32x16xf32>
    tpu.vector_store %arg4[%c0_56, %c0_57, %c0_58], %65 {strides = array<i32>} : memref<1x32x16xf32, #tpu.memory_space<vmem>>, vector<1x32x16xf32>,
    return
  }
  func.func @transform_0(%arg0: i32) -> (i32, i32, i32) {
    %c0_i32 = arith.constant 0 : i32
    %c0_i32_0 = arith.constant 0 : i32
    %c0_i32_1 = arith.constant 0 : i32
    return %arg0, %c0_i32, %c0_i32_0 : i32, i32, i32
  }
  func.func @transform_1(%arg0: i32) -> (i32, i32, i32) {
    %c0_i32 = arith.constant 0 : i32
    %c0_i32_0 = arith.constant 0 : i32
    %c0_i32_1 = arith.constant 0 : i32
    %c0_i32_2 = arith.constant 0 : i32
    return %c0_i32, %c0_i32_0, %c0_i32_1 : i32, i32, i32
  }
  func.func @transform_2(%arg0: i32) -> (i32, i32) {
    %c0_i32 = arith.constant 0 : i32
    %c0_i32_0 = arith.constant 0 : i32
    %c0_i32_1 = arith.constant 0 : i32
    return %c0_i32, %c0_i32_0 : i32, i32
  }
  func.func @transform_3(%arg0: i32) -> (i32, i32, i32) {
    %c0_i32 = arith.constant 0 : i32
    %c0_i32_0 = arith.constant 0 : i32
    %c0_i32_1 = arith.constant 0 : i32
    return %arg0, %c0_i32, %c0_i32_0 : i32, i32, i32
  }
}

module attributes {stable_mosaic.version = 11 : i64} {
  func.func @_conv3x3_s1_kernel(%arg0: i32, %arg1: memref<1x64x50xf32, #tpu.memory_space<vmem>>, %arg2: memref<9x32x64xf32, #tpu.memory_space<vmem>>, %arg3: memref<32x1xf32, #tpu.memory_space<vmem>>, %arg4: memref<1x32x36xf32, #tpu.memory_space<vmem>>) attributes {dimension_semantics = [#tpu.dimension_semantics<parallel>], iteration_bounds = array<i64: 6>, scalar_prefetch = 0 : i64, scratch_operands = 0 : i64, tpu.core_type = #tpu.core_type<tc>, window_params = [{transform_indices = @transform_0, window_bounds = array<i64: 1, 64, 50>}, {pipeline_mode = #tpu.pipeline_mode<synchronous>, transform_indices = @transform_1, window_bounds = array<i64: 9, 32, 64>}, {pipeline_mode = #tpu.pipeline_mode<synchronous>, transform_indices = @transform_2, window_bounds = array<i64: 32, 1>}, {transform_indices = @transform_3, window_bounds = array<i64: 1, 32, 36>}]} {
    %cst = arith.constant 0.000000e+00 : f32
    %0 = vector.broadcast %cst : f32 to vector<32x36xf32>
    %c0 = arith.constant 0 : index
    %c0_0 = arith.constant 0 : index
    %c0_1 = arith.constant 0 : index
    %1 = vector.load %arg1[%c0, %c0_0, %c0_1] : memref<1x64x50xf32, #tpu.memory_space<vmem>>, vector<1x64x36xf32>
    %2 = vector.shape_cast %1 : vector<1x64x36xf32> to vector<64x36xf32>
    %c0_2 = arith.constant 0 : index
    %c0_3 = arith.constant 0 : index
    %c0_4 = arith.constant 0 : index
    %3 = vector.load %arg2[%c0_2, %c0_3, %c0_4] : memref<9x32x64xf32, #tpu.memory_space<vmem>>, vector<1x32x64xf32>
    %4 = vector.shape_cast %3 : vector<1x32x64xf32> to vector<32x64xf32>
    %cst_5 = arith.constant dense<0.000000e+00> : vector<32x36xf32>
    %5 = tpu.matmul %4, %2, %cst_5 {dimension_numbers = #tpu.dot_dimension_numbers<[1], [0], [0], [1], [0, 0, 1, 1], [], []>} : vector<32x64xf32>, vector<64x36xf32>, vector<32x36xf32> -> vector<32x36xf32>
    %6 = arith.addf %0, %5 : vector<32x36xf32>
    %c0_6 = arith.constant 0 : index
    %c0_7 = arith.constant 0 : index
    %c1 = arith.constant 1 : index
    %7 = vector.load %arg1[%c0_6, %c0_7, %c1] : memref<1x64x50xf32, #tpu.memory_space<vmem>>, vector<1x64x36xf32>
    %8 = vector.shape_cast %7 : vector<1x64x36xf32> to vector<64x36xf32>
    %c1_8 = arith.constant 1 : index
    %c0_9 = arith.constant 0 : index
    %c0_10 = arith.constant 0 : index
    %9 = vector.load %arg2[%c1_8, %c0_9, %c0_10] : memref<9x32x64xf32, #tpu.memory_space<vmem>>, vector<1x32x64xf32>
    %10 = vector.shape_cast %9 : vector<1x32x64xf32> to vector<32x64xf32>
    %cst_11 = arith.constant dense<0.000000e+00> : vector<32x36xf32>
    %11 = tpu.matmul %10, %8, %cst_11 {dimension_numbers = #tpu.dot_dimension_numbers<[1], [0], [0], [1], [0, 0, 1, 1], [], []>} : vector<32x64xf32>, vector<64x36xf32>, vector<32x36xf32> -> vector<32x36xf32>
    %12 = arith.addf %6, %11 : vector<32x36xf32>
    %c0_12 = arith.constant 0 : index
    %c0_13 = arith.constant 0 : index
    %c2 = arith.constant 2 : index
    %13 = vector.load %arg1[%c0_12, %c0_13, %c2] : memref<1x64x50xf32, #tpu.memory_space<vmem>>, vector<1x64x36xf32>
    %14 = vector.shape_cast %13 : vector<1x64x36xf32> to vector<64x36xf32>
    %c2_14 = arith.constant 2 : index
    %c0_15 = arith.constant 0 : index
    %c0_16 = arith.constant 0 : index
    %15 = vector.load %arg2[%c2_14, %c0_15, %c0_16] : memref<9x32x64xf32, #tpu.memory_space<vmem>>, vector<1x32x64xf32>
    %16 = vector.shape_cast %15 : vector<1x32x64xf32> to vector<32x64xf32>
    %cst_17 = arith.constant dense<0.000000e+00> : vector<32x36xf32>
    %17 = tpu.matmul %16, %14, %cst_17 {dimension_numbers = #tpu.dot_dimension_numbers<[1], [0], [0], [1], [0, 0, 1, 1], [], []>} : vector<32x64xf32>, vector<64x36xf32>, vector<32x36xf32> -> vector<32x36xf32>
    %18 = arith.addf %12, %17 : vector<32x36xf32>
    %c0_18 = arith.constant 0 : index
    %c0_19 = arith.constant 0 : index
    %c6 = arith.constant 6 : index
    %19 = vector.load %arg1[%c0_18, %c0_19, %c6] : memref<1x64x50xf32, #tpu.memory_space<vmem>>, vector<1x64x36xf32>
    %20 = vector.shape_cast %19 : vector<1x64x36xf32> to vector<64x36xf32>
    %c3 = arith.constant 3 : index
    %c0_20 = arith.constant 0 : index
    %c0_21 = arith.constant 0 : index
    %21 = vector.load %arg2[%c3, %c0_20, %c0_21] : memref<9x32x64xf32, #tpu.memory_space<vmem>>, vector<1x32x64xf32>
    %22 = vector.shape_cast %21 : vector<1x32x64xf32> to vector<32x64xf32>
    %cst_22 = arith.constant dense<0.000000e+00> : vector<32x36xf32>
    %23 = tpu.matmul %22, %20, %cst_22 {dimension_numbers = #tpu.dot_dimension_numbers<[1], [0], [0], [1], [0, 0, 1, 1], [], []>} : vector<32x64xf32>, vector<64x36xf32>, vector<32x36xf32> -> vector<32x36xf32>
    %24 = arith.addf %18, %23 : vector<32x36xf32>
    %c0_23 = arith.constant 0 : index
    %c0_24 = arith.constant 0 : index
    %c7 = arith.constant 7 : index
    %25 = vector.load %arg1[%c0_23, %c0_24, %c7] : memref<1x64x50xf32, #tpu.memory_space<vmem>>, vector<1x64x36xf32>
    %26 = vector.shape_cast %25 : vector<1x64x36xf32> to vector<64x36xf32>
    %c4 = arith.constant 4 : index
    %c0_25 = arith.constant 0 : index
    %c0_26 = arith.constant 0 : index
    %27 = vector.load %arg2[%c4, %c0_25, %c0_26] : memref<9x32x64xf32, #tpu.memory_space<vmem>>, vector<1x32x64xf32>
    %28 = vector.shape_cast %27 : vector<1x32x64xf32> to vector<32x64xf32>
    %cst_27 = arith.constant dense<0.000000e+00> : vector<32x36xf32>
    %29 = tpu.matmul %28, %26, %cst_27 {dimension_numbers = #tpu.dot_dimension_numbers<[1], [0], [0], [1], [0, 0, 1, 1], [], []>} : vector<32x64xf32>, vector<64x36xf32>, vector<32x36xf32> -> vector<32x36xf32>
    %30 = arith.addf %24, %29 : vector<32x36xf32>
    %c0_28 = arith.constant 0 : index
    %c0_29 = arith.constant 0 : index
    %c8 = arith.constant 8 : index
    %31 = vector.load %arg1[%c0_28, %c0_29, %c8] : memref<1x64x50xf32, #tpu.memory_space<vmem>>, vector<1x64x36xf32>
    %32 = vector.shape_cast %31 : vector<1x64x36xf32> to vector<64x36xf32>
    %c5 = arith.constant 5 : index
    %c0_30 = arith.constant 0 : index
    %c0_31 = arith.constant 0 : index
    %33 = vector.load %arg2[%c5, %c0_30, %c0_31] : memref<9x32x64xf32, #tpu.memory_space<vmem>>, vector<1x32x64xf32>
    %34 = vector.shape_cast %33 : vector<1x32x64xf32> to vector<32x64xf32>
    %cst_32 = arith.constant dense<0.000000e+00> : vector<32x36xf32>
    %35 = tpu.matmul %34, %32, %cst_32 {dimension_numbers = #tpu.dot_dimension_numbers<[1], [0], [0], [1], [0, 0, 1, 1], [], []>} : vector<32x64xf32>, vector<64x36xf32>, vector<32x36xf32> -> vector<32x36xf32>
    %36 = arith.addf %30, %35 : vector<32x36xf32>
    %c0_33 = arith.constant 0 : index
    %c0_34 = arith.constant 0 : index
    %c12 = arith.constant 12 : index
    %37 = vector.load %arg1[%c0_33, %c0_34, %c12] : memref<1x64x50xf32, #tpu.memory_space<vmem>>, vector<1x64x36xf32>
    %38 = vector.shape_cast %37 : vector<1x64x36xf32> to vector<64x36xf32>
    %c6_35 = arith.constant 6 : index
    %c0_36 = arith.constant 0 : index
    %c0_37 = arith.constant 0 : index
    %39 = vector.load %arg2[%c6_35, %c0_36, %c0_37] : memref<9x32x64xf32, #tpu.memory_space<vmem>>, vector<1x32x64xf32>
    %40 = vector.shape_cast %39 : vector<1x32x64xf32> to vector<32x64xf32>
    %cst_38 = arith.constant dense<0.000000e+00> : vector<32x36xf32>
    %41 = tpu.matmul %40, %38, %cst_38 {dimension_numbers = #tpu.dot_dimension_numbers<[1], [0], [0], [1], [0, 0, 1, 1], [], []>} : vector<32x64xf32>, vector<64x36xf32>, vector<32x36xf32> -> vector<32x36xf32>
    %42 = arith.addf %36, %41 : vector<32x36xf32>
    %c0_39 = arith.constant 0 : index
    %c0_40 = arith.constant 0 : index
    %c13 = arith.constant 13 : index
    %43 = vector.load %arg1[%c0_39, %c0_40, %c13] : memref<1x64x50xf32, #tpu.memory_space<vmem>>, vector<1x64x36xf32>
    %44 = vector.shape_cast %43 : vector<1x64x36xf32> to vector<64x36xf32>
    %c7_41 = arith.constant 7 : index
    %c0_42 = arith.constant 0 : index
    %c0_43 = arith.constant 0 : index
    %45 = vector.load %arg2[%c7_41, %c0_42, %c0_43] : memref<9x32x64xf32, #tpu.memory_space<vmem>>, vector<1x32x64xf32>
    %46 = vector.shape_cast %45 : vector<1x32x64xf32> to vector<32x64xf32>
    %cst_44 = arith.constant dense<0.000000e+00> : vector<32x36xf32>
    %47 = tpu.matmul %46, %44, %cst_44 {dimension_numbers = #tpu.dot_dimension_numbers<[1], [0], [0], [1], [0, 0, 1, 1], [], []>} : vector<32x64xf32>, vector<64x36xf32>, vector<32x36xf32> -> vector<32x36xf32>
    %48 = arith.addf %42, %47 : vector<32x36xf32>
    %c0_45 = arith.constant 0 : index
    %c0_46 = arith.constant 0 : index
    %c14 = arith.constant 14 : index
    %49 = vector.load %arg1[%c0_45, %c0_46, %c14] : memref<1x64x50xf32, #tpu.memory_space<vmem>>, vector<1x64x36xf32>
    %50 = vector.shape_cast %49 : vector<1x64x36xf32> to vector<64x36xf32>
    %c8_47 = arith.constant 8 : index
    %c0_48 = arith.constant 0 : index
    %c0_49 = arith.constant 0 : index
    %51 = vector.load %arg2[%c8_47, %c0_48, %c0_49] : memref<9x32x64xf32, #tpu.memory_space<vmem>>, vector<1x32x64xf32>
    %52 = vector.shape_cast %51 : vector<1x32x64xf32> to vector<32x64xf32>
    %cst_50 = arith.constant dense<0.000000e+00> : vector<32x36xf32>
    %53 = tpu.matmul %52, %50, %cst_50 {dimension_numbers = #tpu.dot_dimension_numbers<[1], [0], [0], [1], [0, 0, 1, 1], [], []>} : vector<32x64xf32>, vector<64x36xf32>, vector<32x36xf32> -> vector<32x36xf32>
    %54 = arith.addf %48, %53 : vector<32x36xf32>
    %c0_51 = arith.constant 0 : index
    %c0_52 = arith.constant 0 : index
    %55 = vector.load %arg3[%c0_51, %c0_52] : memref<32x1xf32, #tpu.memory_space<vmem>>, vector<32x1xf32>
    %56 = vector.broadcast %55 : vector<32x1xf32> to vector<32x36xf32>
    %57 = arith.addf %54, %56 : vector<32x36xf32>
    %cst_53 = arith.constant 0.000000e+00 : f32
    %58 = vector.broadcast %cst_53 : f32 to vector<32x36xf32>
    %59 = arith.cmpf oge, %57, %58 : vector<32x36xf32>
    %cst_54 = arith.constant 2.000000e-01 : f32
    %60 = vector.broadcast %cst_54 : f32 to vector<32x36xf32>
    %61 = arith.mulf %60, %57 : vector<32x36xf32>
    %62 = arith.select %59, %57, %61 : vector<32x36xi1>, vector<32x36xf32>
    %c0_55 = arith.constant 0 : index
    %c0_56 = arith.constant 0 : index
    %c0_57 = arith.constant 0 : index
    %63 = vector.load %arg4[%c0_55, %c0_56, %c0_57] : memref<1x32x36xf32, #tpu.memory_space<vmem>>, vector<1x32x36xf32>
    %64 = vector.shape_cast %63 : vector<1x32x36xf32> to vector<32x36xf32>
    %65 = vector.shape_cast %62 : vector<32x36xf32> to vector<1x32x36xf32>
    tpu.vector_store %arg4[%c0_55, %c0_56, %c0_57], %65 {strides = array<i32>} : memref<1x32x36xf32, #tpu.memory_space<vmem>>, vector<1x32x36xf32>,
    return
  }
  func.func @transform_0(%arg0: i32) -> (i32, i32, i32) {
    %c0_i32 = arith.constant 0 : i32
    %c0_i32_0 = arith.constant 0 : i32
    %c0_i32_1 = arith.constant 0 : i32
    return %arg0, %c0_i32, %c0_i32_0 : i32, i32, i32
  }
  func.func @transform_1(%arg0: i32) -> (i32, i32, i32) {
    %c0_i32 = arith.constant 0 : i32
    %c0_i32_0 = arith.constant 0 : i32
    %c0_i32_1 = arith.constant 0 : i32
    %c0_i32_2 = arith.constant 0 : i32
    return %c0_i32, %c0_i32_0, %c0_i32_1 : i32, i32, i32
  }
  func.func @transform_2(%arg0: i32) -> (i32, i32) {
    %c0_i32 = arith.constant 0 : i32
    %c0_i32_0 = arith.constant 0 : i32
    %c0_i32_1 = arith.constant 0 : i32
    return %c0_i32, %c0_i32_0 : i32, i32
  }
  func.func @transform_3(%arg0: i32) -> (i32, i32, i32) {
    %c0_i32 = arith.constant 0 : i32
    %c0_i32_0 = arith.constant 0 : i32
    %c0_i32_1 = arith.constant 0 : i32
    return %arg0, %c0_i32, %c0_i32_0 : i32, i32, i32
  }
}

module attributes {stable_mosaic.version = 11 : i64} {
  func.func @_conv3x3_s1_kernel(%arg0: i32, %arg1: memref<1x48x122xf32, #tpu.memory_space<vmem>>, %arg2: memref<9x32x48xf32, #tpu.memory_space<vmem>>, %arg3: memref<32x1xf32, #tpu.memory_space<vmem>>, %arg4: memref<1x32x100xf32, #tpu.memory_space<vmem>>) attributes {dimension_semantics = [#tpu.dimension_semantics<parallel>], iteration_bounds = array<i64: 6>, scalar_prefetch = 0 : i64, scratch_operands = 0 : i64, tpu.core_type = #tpu.core_type<tc>, window_params = [{transform_indices = @transform_0, window_bounds = array<i64: 1, 48, 122>}, {pipeline_mode = #tpu.pipeline_mode<synchronous>, transform_indices = @transform_1, window_bounds = array<i64: 9, 32, 48>}, {pipeline_mode = #tpu.pipeline_mode<synchronous>, transform_indices = @transform_2, window_bounds = array<i64: 32, 1>}, {transform_indices = @transform_3, window_bounds = array<i64: 1, 32, 100>}]} {
    %cst = arith.constant 0.000000e+00 : f32
    %0 = vector.broadcast %cst : f32 to vector<32x100xf32>
    %c0 = arith.constant 0 : index
    %c0_0 = arith.constant 0 : index
    %c0_1 = arith.constant 0 : index
    %1 = vector.load %arg1[%c0, %c0_0, %c0_1] : memref<1x48x122xf32, #tpu.memory_space<vmem>>, vector<1x48x100xf32>
    %2 = vector.shape_cast %1 : vector<1x48x100xf32> to vector<48x100xf32>
    %c0_2 = arith.constant 0 : index
    %c0_3 = arith.constant 0 : index
    %c0_4 = arith.constant 0 : index
    %3 = vector.load %arg2[%c0_2, %c0_3, %c0_4] : memref<9x32x48xf32, #tpu.memory_space<vmem>>, vector<1x32x48xf32>
    %4 = vector.shape_cast %3 : vector<1x32x48xf32> to vector<32x48xf32>
    %cst_5 = arith.constant dense<0.000000e+00> : vector<32x100xf32>
    %5 = tpu.matmul %4, %2, %cst_5 {dimension_numbers = #tpu.dot_dimension_numbers<[1], [0], [0], [1], [0, 0, 1, 1], [], []>} : vector<32x48xf32>, vector<48x100xf32>, vector<32x100xf32> -> vector<32x100xf32>
    %6 = arith.addf %0, %5 : vector<32x100xf32>
    %c0_6 = arith.constant 0 : index
    %c0_7 = arith.constant 0 : index
    %c1 = arith.constant 1 : index
    %7 = vector.load %arg1[%c0_6, %c0_7, %c1] : memref<1x48x122xf32, #tpu.memory_space<vmem>>, vector<1x48x100xf32>
    %8 = vector.shape_cast %7 : vector<1x48x100xf32> to vector<48x100xf32>
    %c1_8 = arith.constant 1 : index
    %c0_9 = arith.constant 0 : index
    %c0_10 = arith.constant 0 : index
    %9 = vector.load %arg2[%c1_8, %c0_9, %c0_10] : memref<9x32x48xf32, #tpu.memory_space<vmem>>, vector<1x32x48xf32>
    %10 = vector.shape_cast %9 : vector<1x32x48xf32> to vector<32x48xf32>
    %cst_11 = arith.constant dense<0.000000e+00> : vector<32x100xf32>
    %11 = tpu.matmul %10, %8, %cst_11 {dimension_numbers = #tpu.dot_dimension_numbers<[1], [0], [0], [1], [0, 0, 1, 1], [], []>} : vector<32x48xf32>, vector<48x100xf32>, vector<32x100xf32> -> vector<32x100xf32>
    %12 = arith.addf %6, %11 : vector<32x100xf32>
    %c0_12 = arith.constant 0 : index
    %c0_13 = arith.constant 0 : index
    %c2 = arith.constant 2 : index
    %13 = vector.load %arg1[%c0_12, %c0_13, %c2] : memref<1x48x122xf32, #tpu.memory_space<vmem>>, vector<1x48x100xf32>
    %14 = vector.shape_cast %13 : vector<1x48x100xf32> to vector<48x100xf32>
    %c2_14 = arith.constant 2 : index
    %c0_15 = arith.constant 0 : index
    %c0_16 = arith.constant 0 : index
    %15 = vector.load %arg2[%c2_14, %c0_15, %c0_16] : memref<9x32x48xf32, #tpu.memory_space<vmem>>, vector<1x32x48xf32>
    %16 = vector.shape_cast %15 : vector<1x32x48xf32> to vector<32x48xf32>
    %cst_17 = arith.constant dense<0.000000e+00> : vector<32x100xf32>
    %17 = tpu.matmul %16, %14, %cst_17 {dimension_numbers = #tpu.dot_dimension_numbers<[1], [0], [0], [1], [0, 0, 1, 1], [], []>} : vector<32x48xf32>, vector<48x100xf32>, vector<32x100xf32> -> vector<32x100xf32>
    %18 = arith.addf %12, %17 : vector<32x100xf32>
    %c0_18 = arith.constant 0 : index
    %c0_19 = arith.constant 0 : index
    %c10 = arith.constant 10 : index
    %19 = vector.load %arg1[%c0_18, %c0_19, %c10] : memref<1x48x122xf32, #tpu.memory_space<vmem>>, vector<1x48x100xf32>
    %20 = vector.shape_cast %19 : vector<1x48x100xf32> to vector<48x100xf32>
    %c3 = arith.constant 3 : index
    %c0_20 = arith.constant 0 : index
    %c0_21 = arith.constant 0 : index
    %21 = vector.load %arg2[%c3, %c0_20, %c0_21] : memref<9x32x48xf32, #tpu.memory_space<vmem>>, vector<1x32x48xf32>
    %22 = vector.shape_cast %21 : vector<1x32x48xf32> to vector<32x48xf32>
    %cst_22 = arith.constant dense<0.000000e+00> : vector<32x100xf32>
    %23 = tpu.matmul %22, %20, %cst_22 {dimension_numbers = #tpu.dot_dimension_numbers<[1], [0], [0], [1], [0, 0, 1, 1], [], []>} : vector<32x48xf32>, vector<48x100xf32>, vector<32x100xf32> -> vector<32x100xf32>
    %24 = arith.addf %18, %23 : vector<32x100xf32>
    %c0_23 = arith.constant 0 : index
    %c0_24 = arith.constant 0 : index
    %c11 = arith.constant 11 : index
    %25 = vector.load %arg1[%c0_23, %c0_24, %c11] : memref<1x48x122xf32, #tpu.memory_space<vmem>>, vector<1x48x100xf32>
    %26 = vector.shape_cast %25 : vector<1x48x100xf32> to vector<48x100xf32>
    %c4 = arith.constant 4 : index
    %c0_25 = arith.constant 0 : index
    %c0_26 = arith.constant 0 : index
    %27 = vector.load %arg2[%c4, %c0_25, %c0_26] : memref<9x32x48xf32, #tpu.memory_space<vmem>>, vector<1x32x48xf32>
    %28 = vector.shape_cast %27 : vector<1x32x48xf32> to vector<32x48xf32>
    %cst_27 = arith.constant dense<0.000000e+00> : vector<32x100xf32>
    %29 = tpu.matmul %28, %26, %cst_27 {dimension_numbers = #tpu.dot_dimension_numbers<[1], [0], [0], [1], [0, 0, 1, 1], [], []>} : vector<32x48xf32>, vector<48x100xf32>, vector<32x100xf32> -> vector<32x100xf32>
    %30 = arith.addf %24, %29 : vector<32x100xf32>
    %c0_28 = arith.constant 0 : index
    %c0_29 = arith.constant 0 : index
    %c12 = arith.constant 12 : index
    %31 = vector.load %arg1[%c0_28, %c0_29, %c12] : memref<1x48x122xf32, #tpu.memory_space<vmem>>, vector<1x48x100xf32>
    %32 = vector.shape_cast %31 : vector<1x48x100xf32> to vector<48x100xf32>
    %c5 = arith.constant 5 : index
    %c0_30 = arith.constant 0 : index
    %c0_31 = arith.constant 0 : index
    %33 = vector.load %arg2[%c5, %c0_30, %c0_31] : memref<9x32x48xf32, #tpu.memory_space<vmem>>, vector<1x32x48xf32>
    %34 = vector.shape_cast %33 : vector<1x32x48xf32> to vector<32x48xf32>
    %cst_32 = arith.constant dense<0.000000e+00> : vector<32x100xf32>
    %35 = tpu.matmul %34, %32, %cst_32 {dimension_numbers = #tpu.dot_dimension_numbers<[1], [0], [0], [1], [0, 0, 1, 1], [], []>} : vector<32x48xf32>, vector<48x100xf32>, vector<32x100xf32> -> vector<32x100xf32>
    %36 = arith.addf %30, %35 : vector<32x100xf32>
    %c0_33 = arith.constant 0 : index
    %c0_34 = arith.constant 0 : index
    %c20 = arith.constant 20 : index
    %37 = vector.load %arg1[%c0_33, %c0_34, %c20] : memref<1x48x122xf32, #tpu.memory_space<vmem>>, vector<1x48x100xf32>
    %38 = vector.shape_cast %37 : vector<1x48x100xf32> to vector<48x100xf32>
    %c6 = arith.constant 6 : index
    %c0_35 = arith.constant 0 : index
    %c0_36 = arith.constant 0 : index
    %39 = vector.load %arg2[%c6, %c0_35, %c0_36] : memref<9x32x48xf32, #tpu.memory_space<vmem>>, vector<1x32x48xf32>
    %40 = vector.shape_cast %39 : vector<1x32x48xf32> to vector<32x48xf32>
    %cst_37 = arith.constant dense<0.000000e+00> : vector<32x100xf32>
    %41 = tpu.matmul %40, %38, %cst_37 {dimension_numbers = #tpu.dot_dimension_numbers<[1], [0], [0], [1], [0, 0, 1, 1], [], []>} : vector<32x48xf32>, vector<48x100xf32>, vector<32x100xf32> -> vector<32x100xf32>
    %42 = arith.addf %36, %41 : vector<32x100xf32>
    %c0_38 = arith.constant 0 : index
    %c0_39 = arith.constant 0 : index
    %c21 = arith.constant 21 : index
    %43 = vector.load %arg1[%c0_38, %c0_39, %c21] : memref<1x48x122xf32, #tpu.memory_space<vmem>>, vector<1x48x100xf32>
    %44 = vector.shape_cast %43 : vector<1x48x100xf32> to vector<48x100xf32>
    %c7 = arith.constant 7 : index
    %c0_40 = arith.constant 0 : index
    %c0_41 = arith.constant 0 : index
    %45 = vector.load %arg2[%c7, %c0_40, %c0_41] : memref<9x32x48xf32, #tpu.memory_space<vmem>>, vector<1x32x48xf32>
    %46 = vector.shape_cast %45 : vector<1x32x48xf32> to vector<32x48xf32>
    %cst_42 = arith.constant dense<0.000000e+00> : vector<32x100xf32>
    %47 = tpu.matmul %46, %44, %cst_42 {dimension_numbers = #tpu.dot_dimension_numbers<[1], [0], [0], [1], [0, 0, 1, 1], [], []>} : vector<32x48xf32>, vector<48x100xf32>, vector<32x100xf32> -> vector<32x100xf32>
    %48 = arith.addf %42, %47 : vector<32x100xf32>
    %c0_43 = arith.constant 0 : index
    %c0_44 = arith.constant 0 : index
    %c22 = arith.constant 22 : index
    %49 = vector.load %arg1[%c0_43, %c0_44, %c22] : memref<1x48x122xf32, #tpu.memory_space<vmem>>, vector<1x48x100xf32>
    %50 = vector.shape_cast %49 : vector<1x48x100xf32> to vector<48x100xf32>
    %c8 = arith.constant 8 : index
    %c0_45 = arith.constant 0 : index
    %c0_46 = arith.constant 0 : index
    %51 = vector.load %arg2[%c8, %c0_45, %c0_46] : memref<9x32x48xf32, #tpu.memory_space<vmem>>, vector<1x32x48xf32>
    %52 = vector.shape_cast %51 : vector<1x32x48xf32> to vector<32x48xf32>
    %cst_47 = arith.constant dense<0.000000e+00> : vector<32x100xf32>
    %53 = tpu.matmul %52, %50, %cst_47 {dimension_numbers = #tpu.dot_dimension_numbers<[1], [0], [0], [1], [0, 0, 1, 1], [], []>} : vector<32x48xf32>, vector<48x100xf32>, vector<32x100xf32> -> vector<32x100xf32>
    %54 = arith.addf %48, %53 : vector<32x100xf32>
    %c0_48 = arith.constant 0 : index
    %c0_49 = arith.constant 0 : index
    %55 = vector.load %arg3[%c0_48, %c0_49] : memref<32x1xf32, #tpu.memory_space<vmem>>, vector<32x1xf32>
    %56 = vector.broadcast %55 : vector<32x1xf32> to vector<32x100xf32>
    %57 = arith.addf %54, %56 : vector<32x100xf32>
    %cst_50 = arith.constant 0.000000e+00 : f32
    %58 = vector.broadcast %cst_50 : f32 to vector<32x100xf32>
    %59 = arith.cmpf oge, %57, %58 : vector<32x100xf32>
    %cst_51 = arith.constant 2.000000e-01 : f32
    %60 = vector.broadcast %cst_51 : f32 to vector<32x100xf32>
    %61 = arith.mulf %60, %57 : vector<32x100xf32>
    %62 = arith.select %59, %57, %61 : vector<32x100xi1>, vector<32x100xf32>
    %c0_52 = arith.constant 0 : index
    %c0_53 = arith.constant 0 : index
    %c0_54 = arith.constant 0 : index
    %63 = vector.load %arg4[%c0_52, %c0_53, %c0_54] : memref<1x32x100xf32, #tpu.memory_space<vmem>>, vector<1x32x100xf32>
    %64 = vector.shape_cast %63 : vector<1x32x100xf32> to vector<32x100xf32>
    %65 = vector.shape_cast %62 : vector<32x100xf32> to vector<1x32x100xf32>
    tpu.vector_store %arg4[%c0_52, %c0_53, %c0_54], %65 {strides = array<i32>} : memref<1x32x100xf32, #tpu.memory_space<vmem>>, vector<1x32x100xf32>,
    return
  }
  func.func @transform_0(%arg0: i32) -> (i32, i32, i32) {
    %c0_i32 = arith.constant 0 : i32
    %c0_i32_0 = arith.constant 0 : i32
    %c0_i32_1 = arith.constant 0 : i32
    return %arg0, %c0_i32, %c0_i32_0 : i32, i32, i32
  }
  func.func @transform_1(%arg0: i32) -> (i32, i32, i32) {
    %c0_i32 = arith.constant 0 : i32
    %c0_i32_0 = arith.constant 0 : i32
    %c0_i32_1 = arith.constant 0 : i32
    %c0_i32_2 = arith.constant 0 : i32
    return %c0_i32, %c0_i32_0, %c0_i32_1 : i32, i32, i32
  }
  func.func @transform_2(%arg0: i32) -> (i32, i32) {
    %c0_i32 = arith.constant 0 : i32
    %c0_i32_0 = arith.constant 0 : i32
    %c0_i32_1 = arith.constant 0 : i32
    return %c0_i32, %c0_i32_0 : i32, i32
  }
  func.func @transform_3(%arg0: i32) -> (i32, i32, i32) {
    %c0_i32 = arith.constant 0 : i32
    %c0_i32_0 = arith.constant 0 : i32
    %c0_i32_1 = arith.constant 0 : i32
    return %arg0, %c0_i32, %c0_i32_0 : i32, i32, i32
  }
}

module attributes {stable_mosaic.version = 11 : i64} {
  func.func @_conv3x3_s1_kernel(%arg0: i32, %arg1: memref<1x34x362xf32, #tpu.memory_space<vmem>>, %arg2: memref<9x32x34xf32, #tpu.memory_space<vmem>>, %arg3: memref<32x1xf32, #tpu.memory_space<vmem>>, %arg4: memref<1x32x324xf32, #tpu.memory_space<vmem>>) attributes {dimension_semantics = [#tpu.dimension_semantics<parallel>], iteration_bounds = array<i64: 6>, scalar_prefetch = 0 : i64, scratch_operands = 0 : i64, tpu.core_type = #tpu.core_type<tc>, window_params = [{transform_indices = @transform_0, window_bounds = array<i64: 1, 34, 362>}, {pipeline_mode = #tpu.pipeline_mode<synchronous>, transform_indices = @transform_1, window_bounds = array<i64: 9, 32, 34>}, {pipeline_mode = #tpu.pipeline_mode<synchronous>, transform_indices = @transform_2, window_bounds = array<i64: 32, 1>}, {transform_indices = @transform_3, window_bounds = array<i64: 1, 32, 324>}]} {
    %cst = arith.constant 0.000000e+00 : f32
    %0 = vector.broadcast %cst : f32 to vector<32x324xf32>
    %c0 = arith.constant 0 : index
    %c0_0 = arith.constant 0 : index
    %c0_1 = arith.constant 0 : index
    %1 = vector.load %arg1[%c0, %c0_0, %c0_1] : memref<1x34x362xf32, #tpu.memory_space<vmem>>, vector<1x34x324xf32>
    %2 = vector.shape_cast %1 : vector<1x34x324xf32> to vector<34x324xf32>
    %c0_2 = arith.constant 0 : index
    %c0_3 = arith.constant 0 : index
    %c0_4 = arith.constant 0 : index
    %3 = vector.load %arg2[%c0_2, %c0_3, %c0_4] : memref<9x32x34xf32, #tpu.memory_space<vmem>>, vector<1x32x34xf32>
    %4 = vector.shape_cast %3 : vector<1x32x34xf32> to vector<32x34xf32>
    %cst_5 = arith.constant dense<0.000000e+00> : vector<32x324xf32>
    %5 = tpu.matmul %4, %2, %cst_5 {dimension_numbers = #tpu.dot_dimension_numbers<[1], [0], [0], [1], [0, 0, 1, 1], [], []>} : vector<32x34xf32>, vector<34x324xf32>, vector<32x324xf32> -> vector<32x324xf32>
    %6 = arith.addf %0, %5 : vector<32x324xf32>
    %c0_6 = arith.constant 0 : index
    %c0_7 = arith.constant 0 : index
    %c1 = arith.constant 1 : index
    %7 = vector.load %arg1[%c0_6, %c0_7, %c1] : memref<1x34x362xf32, #tpu.memory_space<vmem>>, vector<1x34x324xf32>
    %8 = vector.shape_cast %7 : vector<1x34x324xf32> to vector<34x324xf32>
    %c1_8 = arith.constant 1 : index
    %c0_9 = arith.constant 0 : index
    %c0_10 = arith.constant 0 : index
    %9 = vector.load %arg2[%c1_8, %c0_9, %c0_10] : memref<9x32x34xf32, #tpu.memory_space<vmem>>, vector<1x32x34xf32>
    %10 = vector.shape_cast %9 : vector<1x32x34xf32> to vector<32x34xf32>
    %cst_11 = arith.constant dense<0.000000e+00> : vector<32x324xf32>
    %11 = tpu.matmul %10, %8, %cst_11 {dimension_numbers = #tpu.dot_dimension_numbers<[1], [0], [0], [1], [0, 0, 1, 1], [], []>} : vector<32x34xf32>, vector<34x324xf32>, vector<32x324xf32> -> vector<32x324xf32>
    %12 = arith.addf %6, %11 : vector<32x324xf32>
    %c0_12 = arith.constant 0 : index
    %c0_13 = arith.constant 0 : index
    %c2 = arith.constant 2 : index
    %13 = vector.load %arg1[%c0_12, %c0_13, %c2] : memref<1x34x362xf32, #tpu.memory_space<vmem>>, vector<1x34x324xf32>
    %14 = vector.shape_cast %13 : vector<1x34x324xf32> to vector<34x324xf32>
    %c2_14 = arith.constant 2 : index
    %c0_15 = arith.constant 0 : index
    %c0_16 = arith.constant 0 : index
    %15 = vector.load %arg2[%c2_14, %c0_15, %c0_16] : memref<9x32x34xf32, #tpu.memory_space<vmem>>, vector<1x32x34xf32>
    %16 = vector.shape_cast %15 : vector<1x32x34xf32> to vector<32x34xf32>
    %cst_17 = arith.constant dense<0.000000e+00> : vector<32x324xf32>
    %17 = tpu.matmul %16, %14, %cst_17 {dimension_numbers = #tpu.dot_dimension_numbers<[1], [0], [0], [1], [0, 0, 1, 1], [], []>} : vector<32x34xf32>, vector<34x324xf32>, vector<32x324xf32> -> vector<32x324xf32>
    %18 = arith.addf %12, %17 : vector<32x324xf32>
    %c0_18 = arith.constant 0 : index
    %c0_19 = arith.constant 0 : index
    %c18 = arith.constant 18 : index
    %19 = vector.load %arg1[%c0_18, %c0_19, %c18] : memref<1x34x362xf32, #tpu.memory_space<vmem>>, vector<1x34x324xf32>
    %20 = vector.shape_cast %19 : vector<1x34x324xf32> to vector<34x324xf32>
    %c3 = arith.constant 3 : index
    %c0_20 = arith.constant 0 : index
    %c0_21 = arith.constant 0 : index
    %21 = vector.load %arg2[%c3, %c0_20, %c0_21] : memref<9x32x34xf32, #tpu.memory_space<vmem>>, vector<1x32x34xf32>
    %22 = vector.shape_cast %21 : vector<1x32x34xf32> to vector<32x34xf32>
    %cst_22 = arith.constant dense<0.000000e+00> : vector<32x324xf32>
    %23 = tpu.matmul %22, %20, %cst_22 {dimension_numbers = #tpu.dot_dimension_numbers<[1], [0], [0], [1], [0, 0, 1, 1], [], []>} : vector<32x34xf32>, vector<34x324xf32>, vector<32x324xf32> -> vector<32x324xf32>
    %24 = arith.addf %18, %23 : vector<32x324xf32>
    %c0_23 = arith.constant 0 : index
    %c0_24 = arith.constant 0 : index
    %c19 = arith.constant 19 : index
    %25 = vector.load %arg1[%c0_23, %c0_24, %c19] : memref<1x34x362xf32, #tpu.memory_space<vmem>>, vector<1x34x324xf32>
    %26 = vector.shape_cast %25 : vector<1x34x324xf32> to vector<34x324xf32>
    %c4 = arith.constant 4 : index
    %c0_25 = arith.constant 0 : index
    %c0_26 = arith.constant 0 : index
    %27 = vector.load %arg2[%c4, %c0_25, %c0_26] : memref<9x32x34xf32, #tpu.memory_space<vmem>>, vector<1x32x34xf32>
    %28 = vector.shape_cast %27 : vector<1x32x34xf32> to vector<32x34xf32>
    %cst_27 = arith.constant dense<0.000000e+00> : vector<32x324xf32>
    %29 = tpu.matmul %28, %26, %cst_27 {dimension_numbers = #tpu.dot_dimension_numbers<[1], [0], [0], [1], [0, 0, 1, 1], [], []>} : vector<32x34xf32>, vector<34x324xf32>, vector<32x324xf32> -> vector<32x324xf32>
    %30 = arith.addf %24, %29 : vector<32x324xf32>
    %c0_28 = arith.constant 0 : index
    %c0_29 = arith.constant 0 : index
    %c20 = arith.constant 20 : index
    %31 = vector.load %arg1[%c0_28, %c0_29, %c20] : memref<1x34x362xf32, #tpu.memory_space<vmem>>, vector<1x34x324xf32>
    %32 = vector.shape_cast %31 : vector<1x34x324xf32> to vector<34x324xf32>
    %c5 = arith.constant 5 : index
    %c0_30 = arith.constant 0 : index
    %c0_31 = arith.constant 0 : index
    %33 = vector.load %arg2[%c5, %c0_30, %c0_31] : memref<9x32x34xf32, #tpu.memory_space<vmem>>, vector<1x32x34xf32>
    %34 = vector.shape_cast %33 : vector<1x32x34xf32> to vector<32x34xf32>
    %cst_32 = arith.constant dense<0.000000e+00> : vector<32x324xf32>
    %35 = tpu.matmul %34, %32, %cst_32 {dimension_numbers = #tpu.dot_dimension_numbers<[1], [0], [0], [1], [0, 0, 1, 1], [], []>} : vector<32x34xf32>, vector<34x324xf32>, vector<32x324xf32> -> vector<32x324xf32>
    %36 = arith.addf %30, %35 : vector<32x324xf32>
    %c0_33 = arith.constant 0 : index
    %c0_34 = arith.constant 0 : index
    %c36 = arith.constant 36 : index
    %37 = vector.load %arg1[%c0_33, %c0_34, %c36] : memref<1x34x362xf32, #tpu.memory_space<vmem>>, vector<1x34x324xf32>
    %38 = vector.shape_cast %37 : vector<1x34x324xf32> to vector<34x324xf32>
    %c6 = arith.constant 6 : index
    %c0_35 = arith.constant 0 : index
    %c0_36 = arith.constant 0 : index
    %39 = vector.load %arg2[%c6, %c0_35, %c0_36] : memref<9x32x34xf32, #tpu.memory_space<vmem>>, vector<1x32x34xf32>
    %40 = vector.shape_cast %39 : vector<1x32x34xf32> to vector<32x34xf32>
    %cst_37 = arith.constant dense<0.000000e+00> : vector<32x324xf32>
    %41 = tpu.matmul %40, %38, %cst_37 {dimension_numbers = #tpu.dot_dimension_numbers<[1], [0], [0], [1], [0, 0, 1, 1], [], []>} : vector<32x34xf32>, vector<34x324xf32>, vector<32x324xf32> -> vector<32x324xf32>
    %42 = arith.addf %36, %41 : vector<32x324xf32>
    %c0_38 = arith.constant 0 : index
    %c0_39 = arith.constant 0 : index
    %c37 = arith.constant 37 : index
    %43 = vector.load %arg1[%c0_38, %c0_39, %c37] : memref<1x34x362xf32, #tpu.memory_space<vmem>>, vector<1x34x324xf32>
    %44 = vector.shape_cast %43 : vector<1x34x324xf32> to vector<34x324xf32>
    %c7 = arith.constant 7 : index
    %c0_40 = arith.constant 0 : index
    %c0_41 = arith.constant 0 : index
    %45 = vector.load %arg2[%c7, %c0_40, %c0_41] : memref<9x32x34xf32, #tpu.memory_space<vmem>>, vector<1x32x34xf32>
    %46 = vector.shape_cast %45 : vector<1x32x34xf32> to vector<32x34xf32>
    %cst_42 = arith.constant dense<0.000000e+00> : vector<32x324xf32>
    %47 = tpu.matmul %46, %44, %cst_42 {dimension_numbers = #tpu.dot_dimension_numbers<[1], [0], [0], [1], [0, 0, 1, 1], [], []>} : vector<32x34xf32>, vector<34x324xf32>, vector<32x324xf32> -> vector<32x324xf32>
    %48 = arith.addf %42, %47 : vector<32x324xf32>
    %c0_43 = arith.constant 0 : index
    %c0_44 = arith.constant 0 : index
    %c38 = arith.constant 38 : index
    %49 = vector.load %arg1[%c0_43, %c0_44, %c38] : memref<1x34x362xf32, #tpu.memory_space<vmem>>, vector<1x34x324xf32>
    %50 = vector.shape_cast %49 : vector<1x34x324xf32> to vector<34x324xf32>
    %c8 = arith.constant 8 : index
    %c0_45 = arith.constant 0 : index
    %c0_46 = arith.constant 0 : index
    %51 = vector.load %arg2[%c8, %c0_45, %c0_46] : memref<9x32x34xf32, #tpu.memory_space<vmem>>, vector<1x32x34xf32>
    %52 = vector.shape_cast %51 : vector<1x32x34xf32> to vector<32x34xf32>
    %cst_47 = arith.constant dense<0.000000e+00> : vector<32x324xf32>
    %53 = tpu.matmul %52, %50, %cst_47 {dimension_numbers = #tpu.dot_dimension_numbers<[1], [0], [0], [1], [0, 0, 1, 1], [], []>} : vector<32x34xf32>, vector<34x324xf32>, vector<32x324xf32> -> vector<32x324xf32>
    %54 = arith.addf %48, %53 : vector<32x324xf32>
    %c0_48 = arith.constant 0 : index
    %c0_49 = arith.constant 0 : index
    %55 = vector.load %arg3[%c0_48, %c0_49] : memref<32x1xf32, #tpu.memory_space<vmem>>, vector<32x1xf32>
    %56 = vector.broadcast %55 : vector<32x1xf32> to vector<32x324xf32>
    %57 = arith.addf %54, %56 : vector<32x324xf32>
    %cst_50 = arith.constant 0.000000e+00 : f32
    %58 = vector.broadcast %cst_50 : f32 to vector<32x324xf32>
    %59 = arith.cmpf oge, %57, %58 : vector<32x324xf32>
    %cst_51 = arith.constant 2.000000e-01 : f32
    %60 = vector.broadcast %cst_51 : f32 to vector<32x324xf32>
    %61 = arith.mulf %60, %57 : vector<32x324xf32>
    %62 = arith.select %59, %57, %61 : vector<32x324xi1>, vector<32x324xf32>
    %c0_52 = arith.constant 0 : index
    %c0_53 = arith.constant 0 : index
    %c0_54 = arith.constant 0 : index
    %63 = vector.load %arg4[%c0_52, %c0_53, %c0_54] : memref<1x32x324xf32, #tpu.memory_space<vmem>>, vector<1x32x324xf32>
    %64 = vector.shape_cast %63 : vector<1x32x324xf32> to vector<32x324xf32>
    %65 = vector.shape_cast %62 : vector<32x324xf32> to vector<1x32x324xf32>
    tpu.vector_store %arg4[%c0_52, %c0_53, %c0_54], %65 {strides = array<i32>} : memref<1x32x324xf32, #tpu.memory_space<vmem>>, vector<1x32x324xf32>,
    return
  }
  func.func @transform_0(%arg0: i32) -> (i32, i32, i32) {
    %c0_i32 = arith.constant 0 : i32
    %c0_i32_0 = arith.constant 0 : i32
    %c0_i32_1 = arith.constant 0 : i32
    return %arg0, %c0_i32, %c0_i32_0 : i32, i32, i32
  }
  func.func @transform_1(%arg0: i32) -> (i32, i32, i32) {
    %c0_i32 = arith.constant 0 : i32
    %c0_i32_0 = arith.constant 0 : i32
    %c0_i32_1 = arith.constant 0 : i32
    %c0_i32_2 = arith.constant 0 : i32
    return %c0_i32, %c0_i32_0, %c0_i32_1 : i32, i32, i32
  }
  func.func @transform_2(%arg0: i32) -> (i32, i32) {
    %c0_i32 = arith.constant 0 : i32
    %c0_i32_0 = arith.constant 0 : i32
    %c0_i32_1 = arith.constant 0 : i32
    return %c0_i32, %c0_i32_0 : i32, i32
  }
  func.func @transform_3(%arg0: i32) -> (i32, i32, i32) {
    %c0_i32 = arith.constant 0 : i32
    %c0_i32_0 = arith.constant 0 : i32
    %c0_i32_1 = arith.constant 0 : i32
    return %arg0, %c0_i32, %c0_i32_0 : i32, i32, i32
  }
}

module attributes {stable_mosaic.version = 11 : i64} {
  func.func @_conv3x3_s1_kernel(%arg0: i32, %arg1: memref<1x32x362xf32, #tpu.memory_space<vmem>>, %arg2: memref<9x16x32xf32, #tpu.memory_space<vmem>>, %arg3: memref<16x1xf32, #tpu.memory_space<vmem>>, %arg4: memref<1x16x324xf32, #tpu.memory_space<vmem>>) attributes {dimension_semantics = [#tpu.dimension_semantics<parallel>], iteration_bounds = array<i64: 6>, scalar_prefetch = 0 : i64, scratch_operands = 0 : i64, tpu.core_type = #tpu.core_type<tc>, window_params = [{transform_indices = @transform_0, window_bounds = array<i64: 1, 32, 362>}, {pipeline_mode = #tpu.pipeline_mode<synchronous>, transform_indices = @transform_1, window_bounds = array<i64: 9, 16, 32>}, {pipeline_mode = #tpu.pipeline_mode<synchronous>, transform_indices = @transform_2, window_bounds = array<i64: 16, 1>}, {transform_indices = @transform_3, window_bounds = array<i64: 1, 16, 324>}]} {
    %cst = arith.constant 0.000000e+00 : f32
    %0 = vector.broadcast %cst : f32 to vector<16x324xf32>
    %c0 = arith.constant 0 : index
    %c0_0 = arith.constant 0 : index
    %c0_1 = arith.constant 0 : index
    %1 = vector.load %arg1[%c0, %c0_0, %c0_1] : memref<1x32x362xf32, #tpu.memory_space<vmem>>, vector<1x32x324xf32>
    %2 = vector.shape_cast %1 : vector<1x32x324xf32> to vector<32x324xf32>
    %c0_2 = arith.constant 0 : index
    %c0_3 = arith.constant 0 : index
    %c0_4 = arith.constant 0 : index
    %3 = vector.load %arg2[%c0_2, %c0_3, %c0_4] : memref<9x16x32xf32, #tpu.memory_space<vmem>>, vector<1x16x32xf32>
    %4 = vector.shape_cast %3 : vector<1x16x32xf32> to vector<16x32xf32>
    %cst_5 = arith.constant dense<0.000000e+00> : vector<16x324xf32>
    %5 = tpu.matmul %4, %2, %cst_5 {dimension_numbers = #tpu.dot_dimension_numbers<[1], [0], [0], [1], [0, 0, 1, 1], [], []>} : vector<16x32xf32>, vector<32x324xf32>, vector<16x324xf32> -> vector<16x324xf32>
    %6 = arith.addf %0, %5 : vector<16x324xf32>
    %c0_6 = arith.constant 0 : index
    %c0_7 = arith.constant 0 : index
    %c1 = arith.constant 1 : index
    %7 = vector.load %arg1[%c0_6, %c0_7, %c1] : memref<1x32x362xf32, #tpu.memory_space<vmem>>, vector<1x32x324xf32>
    %8 = vector.shape_cast %7 : vector<1x32x324xf32> to vector<32x324xf32>
    %c1_8 = arith.constant 1 : index
    %c0_9 = arith.constant 0 : index
    %c0_10 = arith.constant 0 : index
    %9 = vector.load %arg2[%c1_8, %c0_9, %c0_10] : memref<9x16x32xf32, #tpu.memory_space<vmem>>, vector<1x16x32xf32>
    %10 = vector.shape_cast %9 : vector<1x16x32xf32> to vector<16x32xf32>
    %cst_11 = arith.constant dense<0.000000e+00> : vector<16x324xf32>
    %11 = tpu.matmul %10, %8, %cst_11 {dimension_numbers = #tpu.dot_dimension_numbers<[1], [0], [0], [1], [0, 0, 1, 1], [], []>} : vector<16x32xf32>, vector<32x324xf32>, vector<16x324xf32> -> vector<16x324xf32>
    %12 = arith.addf %6, %11 : vector<16x324xf32>
    %c0_12 = arith.constant 0 : index
    %c0_13 = arith.constant 0 : index
    %c2 = arith.constant 2 : index
    %13 = vector.load %arg1[%c0_12, %c0_13, %c2] : memref<1x32x362xf32, #tpu.memory_space<vmem>>, vector<1x32x324xf32>
    %14 = vector.shape_cast %13 : vector<1x32x324xf32> to vector<32x324xf32>
    %c2_14 = arith.constant 2 : index
    %c0_15 = arith.constant 0 : index
    %c0_16 = arith.constant 0 : index
    %15 = vector.load %arg2[%c2_14, %c0_15, %c0_16] : memref<9x16x32xf32, #tpu.memory_space<vmem>>, vector<1x16x32xf32>
    %16 = vector.shape_cast %15 : vector<1x16x32xf32> to vector<16x32xf32>
    %cst_17 = arith.constant dense<0.000000e+00> : vector<16x324xf32>
    %17 = tpu.matmul %16, %14, %cst_17 {dimension_numbers = #tpu.dot_dimension_numbers<[1], [0], [0], [1], [0, 0, 1, 1], [], []>} : vector<16x32xf32>, vector<32x324xf32>, vector<16x324xf32> -> vector<16x324xf32>
    %18 = arith.addf %12, %17 : vector<16x324xf32>
    %c0_18 = arith.constant 0 : index
    %c0_19 = arith.constant 0 : index
    %c18 = arith.constant 18 : index
    %19 = vector.load %arg1[%c0_18, %c0_19, %c18] : memref<1x32x362xf32, #tpu.memory_space<vmem>>, vector<1x32x324xf32>
    %20 = vector.shape_cast %19 : vector<1x32x324xf32> to vector<32x324xf32>
    %c3 = arith.constant 3 : index
    %c0_20 = arith.constant 0 : index
    %c0_21 = arith.constant 0 : index
    %21 = vector.load %arg2[%c3, %c0_20, %c0_21] : memref<9x16x32xf32, #tpu.memory_space<vmem>>, vector<1x16x32xf32>
    %22 = vector.shape_cast %21 : vector<1x16x32xf32> to vector<16x32xf32>
    %cst_22 = arith.constant dense<0.000000e+00> : vector<16x324xf32>
    %23 = tpu.matmul %22, %20, %cst_22 {dimension_numbers = #tpu.dot_dimension_numbers<[1], [0], [0], [1], [0, 0, 1, 1], [], []>} : vector<16x32xf32>, vector<32x324xf32>, vector<16x324xf32> -> vector<16x324xf32>
    %24 = arith.addf %18, %23 : vector<16x324xf32>
    %c0_23 = arith.constant 0 : index
    %c0_24 = arith.constant 0 : index
    %c19 = arith.constant 19 : index
    %25 = vector.load %arg1[%c0_23, %c0_24, %c19] : memref<1x32x362xf32, #tpu.memory_space<vmem>>, vector<1x32x324xf32>
    %26 = vector.shape_cast %25 : vector<1x32x324xf32> to vector<32x324xf32>
    %c4 = arith.constant 4 : index
    %c0_25 = arith.constant 0 : index
    %c0_26 = arith.constant 0 : index
    %27 = vector.load %arg2[%c4, %c0_25, %c0_26] : memref<9x16x32xf32, #tpu.memory_space<vmem>>, vector<1x16x32xf32>
    %28 = vector.shape_cast %27 : vector<1x16x32xf32> to vector<16x32xf32>
    %cst_27 = arith.constant dense<0.000000e+00> : vector<16x324xf32>
    %29 = tpu.matmul %28, %26, %cst_27 {dimension_numbers = #tpu.dot_dimension_numbers<[1], [0], [0], [1], [0, 0, 1, 1], [], []>} : vector<16x32xf32>, vector<32x324xf32>, vector<16x324xf32> -> vector<16x324xf32>
    %30 = arith.addf %24, %29 : vector<16x324xf32>
    %c0_28 = arith.constant 0 : index
    %c0_29 = arith.constant 0 : index
    %c20 = arith.constant 20 : index
    %31 = vector.load %arg1[%c0_28, %c0_29, %c20] : memref<1x32x362xf32, #tpu.memory_space<vmem>>, vector<1x32x324xf32>
    %32 = vector.shape_cast %31 : vector<1x32x324xf32> to vector<32x324xf32>
    %c5 = arith.constant 5 : index
    %c0_30 = arith.constant 0 : index
    %c0_31 = arith.constant 0 : index
    %33 = vector.load %arg2[%c5, %c0_30, %c0_31] : memref<9x16x32xf32, #tpu.memory_space<vmem>>, vector<1x16x32xf32>
    %34 = vector.shape_cast %33 : vector<1x16x32xf32> to vector<16x32xf32>
    %cst_32 = arith.constant dense<0.000000e+00> : vector<16x324xf32>
    %35 = tpu.matmul %34, %32, %cst_32 {dimension_numbers = #tpu.dot_dimension_numbers<[1], [0], [0], [1], [0, 0, 1, 1], [], []>} : vector<16x32xf32>, vector<32x324xf32>, vector<16x324xf32> -> vector<16x324xf32>
    %36 = arith.addf %30, %35 : vector<16x324xf32>
    %c0_33 = arith.constant 0 : index
    %c0_34 = arith.constant 0 : index
    %c36 = arith.constant 36 : index
    %37 = vector.load %arg1[%c0_33, %c0_34, %c36] : memref<1x32x362xf32, #tpu.memory_space<vmem>>, vector<1x32x324xf32>
    %38 = vector.shape_cast %37 : vector<1x32x324xf32> to vector<32x324xf32>
    %c6 = arith.constant 6 : index
    %c0_35 = arith.constant 0 : index
    %c0_36 = arith.constant 0 : index
    %39 = vector.load %arg2[%c6, %c0_35, %c0_36] : memref<9x16x32xf32, #tpu.memory_space<vmem>>, vector<1x16x32xf32>
    %40 = vector.shape_cast %39 : vector<1x16x32xf32> to vector<16x32xf32>
    %cst_37 = arith.constant dense<0.000000e+00> : vector<16x324xf32>
    %41 = tpu.matmul %40, %38, %cst_37 {dimension_numbers = #tpu.dot_dimension_numbers<[1], [0], [0], [1], [0, 0, 1, 1], [], []>} : vector<16x32xf32>, vector<32x324xf32>, vector<16x324xf32> -> vector<16x324xf32>
    %42 = arith.addf %36, %41 : vector<16x324xf32>
    %c0_38 = arith.constant 0 : index
    %c0_39 = arith.constant 0 : index
    %c37 = arith.constant 37 : index
    %43 = vector.load %arg1[%c0_38, %c0_39, %c37] : memref<1x32x362xf32, #tpu.memory_space<vmem>>, vector<1x32x324xf32>
    %44 = vector.shape_cast %43 : vector<1x32x324xf32> to vector<32x324xf32>
    %c7 = arith.constant 7 : index
    %c0_40 = arith.constant 0 : index
    %c0_41 = arith.constant 0 : index
    %45 = vector.load %arg2[%c7, %c0_40, %c0_41] : memref<9x16x32xf32, #tpu.memory_space<vmem>>, vector<1x16x32xf32>
    %46 = vector.shape_cast %45 : vector<1x16x32xf32> to vector<16x32xf32>
    %cst_42 = arith.constant dense<0.000000e+00> : vector<16x324xf32>
    %47 = tpu.matmul %46, %44, %cst_42 {dimension_numbers = #tpu.dot_dimension_numbers<[1], [0], [0], [1], [0, 0, 1, 1], [], []>} : vector<16x32xf32>, vector<32x324xf32>, vector<16x324xf32> -> vector<16x324xf32>
    %48 = arith.addf %42, %47 : vector<16x324xf32>
    %c0_43 = arith.constant 0 : index
    %c0_44 = arith.constant 0 : index
    %c38 = arith.constant 38 : index
    %49 = vector.load %arg1[%c0_43, %c0_44, %c38] : memref<1x32x362xf32, #tpu.memory_space<vmem>>, vector<1x32x324xf32>
    %50 = vector.shape_cast %49 : vector<1x32x324xf32> to vector<32x324xf32>
    %c8 = arith.constant 8 : index
    %c0_45 = arith.constant 0 : index
    %c0_46 = arith.constant 0 : index
    %51 = vector.load %arg2[%c8, %c0_45, %c0_46] : memref<9x16x32xf32, #tpu.memory_space<vmem>>, vector<1x16x32xf32>
    %52 = vector.shape_cast %51 : vector<1x16x32xf32> to vector<16x32xf32>
    %cst_47 = arith.constant dense<0.000000e+00> : vector<16x324xf32>
    %53 = tpu.matmul %52, %50, %cst_47 {dimension_numbers = #tpu.dot_dimension_numbers<[1], [0], [0], [1], [0, 0, 1, 1], [], []>} : vector<16x32xf32>, vector<32x324xf32>, vector<16x324xf32> -> vector<16x324xf32>
    %54 = arith.addf %48, %53 : vector<16x324xf32>
    %c0_48 = arith.constant 0 : index
    %c0_49 = arith.constant 0 : index
    %55 = vector.load %arg3[%c0_48, %c0_49] : memref<16x1xf32, #tpu.memory_space<vmem>>, vector<16x1xf32>
    %56 = vector.broadcast %55 : vector<16x1xf32> to vector<16x324xf32>
    %57 = arith.addf %54, %56 : vector<16x324xf32>
    %cst_50 = arith.constant 0.000000e+00 : f32
    %58 = vector.broadcast %cst_50 : f32 to vector<16x324xf32>
    %59 = arith.cmpf oge, %57, %58 : vector<16x324xf32>
    %cst_51 = arith.constant 2.000000e-01 : f32
    %60 = vector.broadcast %cst_51 : f32 to vector<16x324xf32>
    %61 = arith.mulf %60, %57 : vector<16x324xf32>
    %62 = arith.select %59, %57, %61 : vector<16x324xi1>, vector<16x324xf32>
    %c0_52 = arith.constant 0 : index
    %c0_53 = arith.constant 0 : index
    %c0_54 = arith.constant 0 : index
    %63 = vector.load %arg4[%c0_52, %c0_53, %c0_54] : memref<1x16x324xf32, #tpu.memory_space<vmem>>, vector<1x16x324xf32>
    %64 = vector.shape_cast %63 : vector<1x16x324xf32> to vector<16x324xf32>
    %65 = vector.shape_cast %62 : vector<16x324xf32> to vector<1x16x324xf32>
    tpu.vector_store %arg4[%c0_52, %c0_53, %c0_54], %65 {strides = array<i32>} : memref<1x16x324xf32, #tpu.memory_space<vmem>>, vector<1x16x324xf32>,
    return
  }
  func.func @transform_0(%arg0: i32) -> (i32, i32, i32) {
    %c0_i32 = arith.constant 0 : i32
    %c0_i32_0 = arith.constant 0 : i32
    %c0_i32_1 = arith.constant 0 : i32
    return %arg0, %c0_i32, %c0_i32_0 : i32, i32, i32
  }
  func.func @transform_1(%arg0: i32) -> (i32, i32, i32) {
    %c0_i32 = arith.constant 0 : i32
    %c0_i32_0 = arith.constant 0 : i32
    %c0_i32_1 = arith.constant 0 : i32
    %c0_i32_2 = arith.constant 0 : i32
    return %c0_i32, %c0_i32_0, %c0_i32_1 : i32, i32, i32
  }
  func.func @transform_2(%arg0: i32) -> (i32, i32) {
    %c0_i32 = arith.constant 0 : i32
    %c0_i32_0 = arith.constant 0 : i32
    %c0_i32_1 = arith.constant 0 : i32
    return %c0_i32, %c0_i32_0 : i32, i32
  }
  func.func @transform_3(%arg0: i32) -> (i32, i32, i32) {
    %c0_i32 = arith.constant 0 : i32
    %c0_i32_0 = arith.constant 0 : i32
    %c0_i32_1 = arith.constant 0 : i32
    return %arg0, %c0_i32, %c0_i32_0 : i32, i32, i32
  }
}

module attributes {stable_mosaic.version = 11 : i64} {
  func.func @_conv3x3_s1_kernel(%arg0: i32, %arg1: memref<1x16x362xf32, #tpu.memory_space<vmem>>, %arg2: memref<9x16x16xf32, #tpu.memory_space<vmem>>, %arg3: memref<16x1xf32, #tpu.memory_space<vmem>>, %arg4: memref<1x16x324xf32, #tpu.memory_space<vmem>>) attributes {dimension_semantics = [#tpu.dimension_semantics<parallel>], iteration_bounds = array<i64: 6>, scalar_prefetch = 0 : i64, scratch_operands = 0 : i64, tpu.core_type = #tpu.core_type<tc>, window_params = [{transform_indices = @transform_0, window_bounds = array<i64: 1, 16, 362>}, {pipeline_mode = #tpu.pipeline_mode<synchronous>, transform_indices = @transform_1, window_bounds = array<i64: 9, 16, 16>}, {pipeline_mode = #tpu.pipeline_mode<synchronous>, transform_indices = @transform_2, window_bounds = array<i64: 16, 1>}, {transform_indices = @transform_3, window_bounds = array<i64: 1, 16, 324>}]} {
    %cst = arith.constant 0.000000e+00 : f32
    %0 = vector.broadcast %cst : f32 to vector<16x324xf32>
    %c0 = arith.constant 0 : index
    %c0_0 = arith.constant 0 : index
    %c0_1 = arith.constant 0 : index
    %1 = vector.load %arg1[%c0, %c0_0, %c0_1] : memref<1x16x362xf32, #tpu.memory_space<vmem>>, vector<1x16x324xf32>
    %2 = vector.shape_cast %1 : vector<1x16x324xf32> to vector<16x324xf32>
    %c0_2 = arith.constant 0 : index
    %c0_3 = arith.constant 0 : index
    %c0_4 = arith.constant 0 : index
    %3 = vector.load %arg2[%c0_2, %c0_3, %c0_4] : memref<9x16x16xf32, #tpu.memory_space<vmem>>, vector<1x16x16xf32>
    %4 = vector.shape_cast %3 : vector<1x16x16xf32> to vector<16x16xf32>
    %cst_5 = arith.constant dense<0.000000e+00> : vector<16x324xf32>
    %5 = tpu.matmul %4, %2, %cst_5 {dimension_numbers = #tpu.dot_dimension_numbers<[1], [0], [0], [1], [0, 0, 1, 1], [], []>} : vector<16x16xf32>, vector<16x324xf32>, vector<16x324xf32> -> vector<16x324xf32>
    %6 = arith.addf %0, %5 : vector<16x324xf32>
    %c0_6 = arith.constant 0 : index
    %c0_7 = arith.constant 0 : index
    %c1 = arith.constant 1 : index
    %7 = vector.load %arg1[%c0_6, %c0_7, %c1] : memref<1x16x362xf32, #tpu.memory_space<vmem>>, vector<1x16x324xf32>
    %8 = vector.shape_cast %7 : vector<1x16x324xf32> to vector<16x324xf32>
    %c1_8 = arith.constant 1 : index
    %c0_9 = arith.constant 0 : index
    %c0_10 = arith.constant 0 : index
    %9 = vector.load %arg2[%c1_8, %c0_9, %c0_10] : memref<9x16x16xf32, #tpu.memory_space<vmem>>, vector<1x16x16xf32>
    %10 = vector.shape_cast %9 : vector<1x16x16xf32> to vector<16x16xf32>
    %cst_11 = arith.constant dense<0.000000e+00> : vector<16x324xf32>
    %11 = tpu.matmul %10, %8, %cst_11 {dimension_numbers = #tpu.dot_dimension_numbers<[1], [0], [0], [1], [0, 0, 1, 1], [], []>} : vector<16x16xf32>, vector<16x324xf32>, vector<16x324xf32> -> vector<16x324xf32>
    %12 = arith.addf %6, %11 : vector<16x324xf32>
    %c0_12 = arith.constant 0 : index
    %c0_13 = arith.constant 0 : index
    %c2 = arith.constant 2 : index
    %13 = vector.load %arg1[%c0_12, %c0_13, %c2] : memref<1x16x362xf32, #tpu.memory_space<vmem>>, vector<1x16x324xf32>
    %14 = vector.shape_cast %13 : vector<1x16x324xf32> to vector<16x324xf32>
    %c2_14 = arith.constant 2 : index
    %c0_15 = arith.constant 0 : index
    %c0_16 = arith.constant 0 : index
    %15 = vector.load %arg2[%c2_14, %c0_15, %c0_16] : memref<9x16x16xf32, #tpu.memory_space<vmem>>, vector<1x16x16xf32>
    %16 = vector.shape_cast %15 : vector<1x16x16xf32> to vector<16x16xf32>
    %cst_17 = arith.constant dense<0.000000e+00> : vector<16x324xf32>
    %17 = tpu.matmul %16, %14, %cst_17 {dimension_numbers = #tpu.dot_dimension_numbers<[1], [0], [0], [1], [0, 0, 1, 1], [], []>} : vector<16x16xf32>, vector<16x324xf32>, vector<16x324xf32> -> vector<16x324xf32>
    %18 = arith.addf %12, %17 : vector<16x324xf32>
    %c0_18 = arith.constant 0 : index
    %c0_19 = arith.constant 0 : index
    %c18 = arith.constant 18 : index
    %19 = vector.load %arg1[%c0_18, %c0_19, %c18] : memref<1x16x362xf32, #tpu.memory_space<vmem>>, vector<1x16x324xf32>
    %20 = vector.shape_cast %19 : vector<1x16x324xf32> to vector<16x324xf32>
    %c3 = arith.constant 3 : index
    %c0_20 = arith.constant 0 : index
    %c0_21 = arith.constant 0 : index
    %21 = vector.load %arg2[%c3, %c0_20, %c0_21] : memref<9x16x16xf32, #tpu.memory_space<vmem>>, vector<1x16x16xf32>
    %22 = vector.shape_cast %21 : vector<1x16x16xf32> to vector<16x16xf32>
    %cst_22 = arith.constant dense<0.000000e+00> : vector<16x324xf32>
    %23 = tpu.matmul %22, %20, %cst_22 {dimension_numbers = #tpu.dot_dimension_numbers<[1], [0], [0], [1], [0, 0, 1, 1], [], []>} : vector<16x16xf32>, vector<16x324xf32>, vector<16x324xf32> -> vector<16x324xf32>
    %24 = arith.addf %18, %23 : vector<16x324xf32>
    %c0_23 = arith.constant 0 : index
    %c0_24 = arith.constant 0 : index
    %c19 = arith.constant 19 : index
    %25 = vector.load %arg1[%c0_23, %c0_24, %c19] : memref<1x16x362xf32, #tpu.memory_space<vmem>>, vector<1x16x324xf32>
    %26 = vector.shape_cast %25 : vector<1x16x324xf32> to vector<16x324xf32>
    %c4 = arith.constant 4 : index
    %c0_25 = arith.constant 0 : index
    %c0_26 = arith.constant 0 : index
    %27 = vector.load %arg2[%c4, %c0_25, %c0_26] : memref<9x16x16xf32, #tpu.memory_space<vmem>>, vector<1x16x16xf32>
    %28 = vector.shape_cast %27 : vector<1x16x16xf32> to vector<16x16xf32>
    %cst_27 = arith.constant dense<0.000000e+00> : vector<16x324xf32>
    %29 = tpu.matmul %28, %26, %cst_27 {dimension_numbers = #tpu.dot_dimension_numbers<[1], [0], [0], [1], [0, 0, 1, 1], [], []>} : vector<16x16xf32>, vector<16x324xf32>, vector<16x324xf32> -> vector<16x324xf32>
    %30 = arith.addf %24, %29 : vector<16x324xf32>
    %c0_28 = arith.constant 0 : index
    %c0_29 = arith.constant 0 : index
    %c20 = arith.constant 20 : index
    %31 = vector.load %arg1[%c0_28, %c0_29, %c20] : memref<1x16x362xf32, #tpu.memory_space<vmem>>, vector<1x16x324xf32>
    %32 = vector.shape_cast %31 : vector<1x16x324xf32> to vector<16x324xf32>
    %c5 = arith.constant 5 : index
    %c0_30 = arith.constant 0 : index
    %c0_31 = arith.constant 0 : index
    %33 = vector.load %arg2[%c5, %c0_30, %c0_31] : memref<9x16x16xf32, #tpu.memory_space<vmem>>, vector<1x16x16xf32>
    %34 = vector.shape_cast %33 : vector<1x16x16xf32> to vector<16x16xf32>
    %cst_32 = arith.constant dense<0.000000e+00> : vector<16x324xf32>
    %35 = tpu.matmul %34, %32, %cst_32 {dimension_numbers = #tpu.dot_dimension_numbers<[1], [0], [0], [1], [0, 0, 1, 1], [], []>} : vector<16x16xf32>, vector<16x324xf32>, vector<16x324xf32> -> vector<16x324xf32>
    %36 = arith.addf %30, %35 : vector<16x324xf32>
    %c0_33 = arith.constant 0 : index
    %c0_34 = arith.constant 0 : index
    %c36 = arith.constant 36 : index
    %37 = vector.load %arg1[%c0_33, %c0_34, %c36] : memref<1x16x362xf32, #tpu.memory_space<vmem>>, vector<1x16x324xf32>
    %38 = vector.shape_cast %37 : vector<1x16x324xf32> to vector<16x324xf32>
    %c6 = arith.constant 6 : index
    %c0_35 = arith.constant 0 : index
    %c0_36 = arith.constant 0 : index
    %39 = vector.load %arg2[%c6, %c0_35, %c0_36] : memref<9x16x16xf32, #tpu.memory_space<vmem>>, vector<1x16x16xf32>
    %40 = vector.shape_cast %39 : vector<1x16x16xf32> to vector<16x16xf32>
    %cst_37 = arith.constant dense<0.000000e+00> : vector<16x324xf32>
    %41 = tpu.matmul %40, %38, %cst_37 {dimension_numbers = #tpu.dot_dimension_numbers<[1], [0], [0], [1], [0, 0, 1, 1], [], []>} : vector<16x16xf32>, vector<16x324xf32>, vector<16x324xf32> -> vector<16x324xf32>
    %42 = arith.addf %36, %41 : vector<16x324xf32>
    %c0_38 = arith.constant 0 : index
    %c0_39 = arith.constant 0 : index
    %c37 = arith.constant 37 : index
    %43 = vector.load %arg1[%c0_38, %c0_39, %c37] : memref<1x16x362xf32, #tpu.memory_space<vmem>>, vector<1x16x324xf32>
    %44 = vector.shape_cast %43 : vector<1x16x324xf32> to vector<16x324xf32>
    %c7 = arith.constant 7 : index
    %c0_40 = arith.constant 0 : index
    %c0_41 = arith.constant 0 : index
    %45 = vector.load %arg2[%c7, %c0_40, %c0_41] : memref<9x16x16xf32, #tpu.memory_space<vmem>>, vector<1x16x16xf32>
    %46 = vector.shape_cast %45 : vector<1x16x16xf32> to vector<16x16xf32>
    %cst_42 = arith.constant dense<0.000000e+00> : vector<16x324xf32>
    %47 = tpu.matmul %46, %44, %cst_42 {dimension_numbers = #tpu.dot_dimension_numbers<[1], [0], [0], [1], [0, 0, 1, 1], [], []>} : vector<16x16xf32>, vector<16x324xf32>, vector<16x324xf32> -> vector<16x324xf32>
    %48 = arith.addf %42, %47 : vector<16x324xf32>
    %c0_43 = arith.constant 0 : index
    %c0_44 = arith.constant 0 : index
    %c38 = arith.constant 38 : index
    %49 = vector.load %arg1[%c0_43, %c0_44, %c38] : memref<1x16x362xf32, #tpu.memory_space<vmem>>, vector<1x16x324xf32>
    %50 = vector.shape_cast %49 : vector<1x16x324xf32> to vector<16x324xf32>
    %c8 = arith.constant 8 : index
    %c0_45 = arith.constant 0 : index
    %c0_46 = arith.constant 0 : index
    %51 = vector.load %arg2[%c8, %c0_45, %c0_46] : memref<9x16x16xf32, #tpu.memory_space<vmem>>, vector<1x16x16xf32>
    %52 = vector.shape_cast %51 : vector<1x16x16xf32> to vector<16x16xf32>
    %cst_47 = arith.constant dense<0.000000e+00> : vector<16x324xf32>
    %53 = tpu.matmul %52, %50, %cst_47 {dimension_numbers = #tpu.dot_dimension_numbers<[1], [0], [0], [1], [0, 0, 1, 1], [], []>} : vector<16x16xf32>, vector<16x324xf32>, vector<16x324xf32> -> vector<16x324xf32>
    %54 = arith.addf %48, %53 : vector<16x324xf32>
    %c0_48 = arith.constant 0 : index
    %c0_49 = arith.constant 0 : index
    %55 = vector.load %arg3[%c0_48, %c0_49] : memref<16x1xf32, #tpu.memory_space<vmem>>, vector<16x1xf32>
    %56 = vector.broadcast %55 : vector<16x1xf32> to vector<16x324xf32>
    %57 = arith.addf %54, %56 : vector<16x324xf32>
    %cst_50 = arith.constant 0.000000e+00 : f32
    %58 = vector.broadcast %cst_50 : f32 to vector<16x324xf32>
    %59 = arith.cmpf oge, %57, %58 : vector<16x324xf32>
    %cst_51 = arith.constant 2.000000e-01 : f32
    %60 = vector.broadcast %cst_51 : f32 to vector<16x324xf32>
    %61 = arith.mulf %60, %57 : vector<16x324xf32>
    %62 = arith.select %59, %57, %61 : vector<16x324xi1>, vector<16x324xf32>
    %c0_52 = arith.constant 0 : index
    %c0_53 = arith.constant 0 : index
    %c0_54 = arith.constant 0 : index
    %63 = vector.load %arg4[%c0_52, %c0_53, %c0_54] : memref<1x16x324xf32, #tpu.memory_space<vmem>>, vector<1x16x324xf32>
    %64 = vector.shape_cast %63 : vector<1x16x324xf32> to vector<16x324xf32>
    %65 = vector.shape_cast %62 : vector<16x324xf32> to vector<1x16x324xf32>
    tpu.vector_store %arg4[%c0_52, %c0_53, %c0_54], %65 {strides = array<i32>} : memref<1x16x324xf32, #tpu.memory_space<vmem>>, vector<1x16x324xf32>,
    return
  }
  func.func @transform_0(%arg0: i32) -> (i32, i32, i32) {
    %c0_i32 = arith.constant 0 : i32
    %c0_i32_0 = arith.constant 0 : i32
    %c0_i32_1 = arith.constant 0 : i32
    return %arg0, %c0_i32, %c0_i32_0 : i32, i32, i32
  }
  func.func @transform_1(%arg0: i32) -> (i32, i32, i32) {
    %c0_i32 = arith.constant 0 : i32
    %c0_i32_0 = arith.constant 0 : i32
    %c0_i32_1 = arith.constant 0 : i32
    %c0_i32_2 = arith.constant 0 : i32
    return %c0_i32, %c0_i32_0, %c0_i32_1 : i32, i32, i32
  }
  func.func @transform_2(%arg0: i32) -> (i32, i32) {
    %c0_i32 = arith.constant 0 : i32
    %c0_i32_0 = arith.constant 0 : i32
    %c0_i32_1 = arith.constant 0 : i32
    return %c0_i32, %c0_i32_0 : i32, i32
  }
  func.func @transform_3(%arg0: i32) -> (i32, i32, i32) {
    %c0_i32 = arith.constant 0 : i32
    %c0_i32_0 = arith.constant 0 : i32
    %c0_i32_1 = arith.constant 0 : i32
    return %arg0, %c0_i32, %c0_i32_0 : i32, i32, i32
  }
}

</mosaic_0001>

<bundles_post_ra>
// kernel: uconvlstm_forward.11
= control target key start
LH: loop header
LB: loop body
LE: loop exit
PB: predicated region body
PF: predicated region fallthrough
CT: control target
= control target key end

     0   :  { %vm44_vm0 = vcmask 1041408   ;;  %v165_v3 = vmov 0   ;;  %vm37_vm1 = vcmask 146432   ;;  %s249_s0 = inlined_call_operand.vmem [shape: f32[18,384], index: 0, kind: input, shape index: {}]   ;;  %s250_s1 = inlined_call_operand.vmem [shape: f32[16,18], index: 1, kind: input, shape index: {}]   ;;  %s251_s2 = inlined_call_operand.vmem [shape: f32[16,1], index: 2, kind: input, shape index: {}]   ;;  %s252_s3 = inlined_call_operand.vmem [shape: f32[16,384], index: 3, kind: output, shape index: {}]  }
   0x1   :  { %v22_v0 = vld [vmem:[%s249_s0 + $0x30] sm:$0x3]  ;;  %v23_v1 = vld [vmem:[%s249_s0 + $0x38] sm:$0x3]  ;;  %v24_v2 = vld [vmem:[%s249_s0 + $0x40] sm:$0x3]  ;;  %164 = vset.pattern.permute.xlu0 %v165_v3 }
   0x2   :  { %160 = vmatpush.msk.msra.mxu3 %vm44_vm0, %v22_v0  ;;  %154 = vmatpush.msk.msra.mxu1 %vm44_vm0, %v23_v1  ;;  %v19_v4 = vld [vmem:[%s249_s0 + $0x18] sm:$0xff]  ;;  %v20_v5 = vld [vmem:[%s249_s0 + $0x20] sm:$0xff]  ;;  %v21_v6 = vld [vmem:[%s249_s0 + $0x28] sm:$0xff] }
   0x3   :  { %157 = vmatpush.msk.msra.mxu2 %vm44_vm0, %v24_v2  ;;  %151 = vmatpush.msk.msra.mxu0 %vm44_vm0, %v22_v0  ;;  %v16_v7 = vld [vmem:[%s249_s0] sm:$0xff]  ;;  %v17_v8 = vld [vmem:[%s249_s0 + $0x8] sm:$0xff]  ;;  %v18_v9 = vld [vmem:[%s249_s0 + $0x10] sm:$0xff] }
   0x4   :  { %161 = vmatpush.msra.mxu3 %v19_v4  ;;  %91 = vmatpush.msra.mxu1 %v20_v5  ;;  %v15_v10 = vld [vmem:[%s250_s1 + $0x8] sm:$0xff]  ;;  %v14_v11 = vld [vmem:[%s250_s1] sm:$0xff] }
   0x5   :  { %114 = vmatpush.msra.mxu2 %v21_v6  ;;  %68 = vmatpush.msra.mxu0 %v19_v4  ;;  %v25_v12 = vld [vmem:[%s251_s2] sm:$0xff]  ;;  %v26_v13 = vld [vmem:[%s251_s2 + $0x8] sm:$0xff] }
   0x6   :  { %162 = vmatpush.msra.mxu3 %v16_v7  ;;  %92 = vmatpush.msra.mxu1 %v17_v8 }
   0x7   :  { %115 = vmatpush.msra.mxu2 %v18_v9  ;;  %153 = vmatmul.msk.f32.vlgmr.msra.gmra.mxu3 %vm37_vm1, %v15_v10 }
   0x8   :  { %155 = vmatmul.msk.f32.vlgmr.msra.gmra.mxu1 %vm37_vm1, %v14_v11  ;;  %158 = vmatmul.msk.f32.vlgmr.msra.gmra.mxu2 %vm37_vm1, %v14_v11 }
   0x9   :  { %69 = vmatpush.msra.mxu0 %v16_v7  ;;  %29 = vperm.xlu0 %164, %v25_v12  }
   0xa   :  { %152 = vmatmul.msk.f32.vlgmr.msra.gmra.mxu0 %vm37_vm1, %v14_v11 }
  0x10   :  { %156 = vmatmul.msk.f32.gmra.mxu1 %vm37_vm1, %v15_v10  ;;  %159 = vmatmul.msk.f32.gmra.mxu2 %vm37_vm1, %v15_v10 }
  0x11   :  { %34 = vperm.xlu0 %164, %v26_v13  }
  0x7b   :  { %v30_v14 = vpop.permute.xlu0 %29 }
  0x83   :  { %v35_v20 = vpop.permute.xlu0 %34 }
  0x85   :  { %v94_v15 = vpop.f32.mrf.mxu1 }
  0x86   :  { %v95_v16 = vadd.f32 %v94_v15, %v30_v14 }
  0x87   :  { %v71_v17 = vpop.f32.mrf.mxu0 }
  0x88   :  { %vm124_vm2 = vcmp.ge.f32.partialorder %v95_v16, 0.0  ;;  %v130_v18 = vmul.f32 0.2, %v95_v16  ;;  %v72_v19 = vadd.f32 %v71_v17, %v30_v14 }
  0x8a   :  { %v136_v21 = vsel %vm124_vm2, %v95_v16, %v130_v18  ;;  %vm123_vm3 = vcmp.ge.f32.partialorder %v72_v19, 0.0  ;;  %v129_v22 = vmul.f32 0.2, %v72_v19  ;;  %v74_v23 = vpop.f32.mrf.mxu3 }
  0x8b   :  { %142 = vst [vmem:[%s252_s3 + $0x8] sm:$0xff] %v136_v21  ;;  %v75_v24 = vadd.f32 %v74_v23, %v35_v20  ;;  %v117_v25 = vpop.f32.mrf.mxu2 }
  0x8c   :  { %v135_v26 = vsel %vm123_vm3, %v72_v19, %v129_v22  ;;  %v118_v27 = vadd.f32 %v117_v25, %v30_v14 }
  0x8d   :  { %141 = vst [vmem:[%s252_s3] sm:$0xff] %v135_v26  ;;  %vm126_vm4 = vcmp.ge.f32.partialorder %v75_v24, 0.0  ;;  %v132_v28 = vmul.f32 0.2, %v75_v24  ;;  %v97_v29 = vpop.f32.mrf.mxu1 }
  0x8e   :  { %vm125_vm5 = vcmp.ge.f32.partialorder %v118_v27, 0.0  ;;  %v131_v30 = vmul.f32 0.2, %v118_v27  ;;  %v98_v31 = vadd.f32 %v97_v29, %v35_v20 }
  0x8f   :  { %v138_v32 = vsel %vm126_vm4, %v75_v24, %v132_v28 }
  0x90   :  { %144 = vst [vmem:[%s252_s3 + $0x18] sm:$0xff] %v138_v32  ;;  %v137_v33 = vsel %vm125_vm5, %v118_v27, %v131_v30  ;;  %vm127_vm6 = vcmp.ge.f32.partialorder %v98_v31, 0.0  ;;  %v133_v34 = vmul.f32 0.2, %v98_v31 }
  0x91   :  { %143 = vst [vmem:[%s252_s3 + $0x10] sm:$0xff] %v137_v33 }
  0x92   :  { %v139_v35 = vsel %vm127_vm6, %v98_v31, %v133_v34 }
  0x93   :  { %145 = vst [vmem:[%s252_s3 + $0x20] sm:$0xff] %v139_v35  ;;  %v120_v36 = vpop.f32.mrf.mxu2 }
  0x94   :  { %v121_v37 = vadd.f32 %v120_v36, %v35_v20 }
  0x96   :  { %vm128_vm7 = vcmp.ge.f32.partialorder %v121_v37, 0.0  ;;  %v134_v38 = vmul.f32 0.2, %v121_v37 }
  0x98   :  { %v140_v39 = vsel %vm128_vm7, %v121_v37, %v134_v38 }
  0x99   :  { %146 = vst [vmem:[%s252_s3 + $0x28] sm:$0xff] %v140_v39 }

// kernel: uconvlstm_forward.12
= control target key start
LH: loop header
LB: loop body
LE: loop exit
PB: predicated region body
PF: predicated region fallthrough
CT: control target
= control target key end

     0   :  { %v195_v3 = vmov 0   ;;  %vm64_vm0 = vcmask 130048   ;;  %vm147_vm2 = vcmask 785408   ;;  %s326_s0 = inlined_call_operand.vmem [shape: f32[144,96], index: 0, kind: input, shape index: {}]   ;;  %s327_s1 = inlined_call_operand.vmem [shape: f32[32,144], index: 1, kind: input, shape index: {}]   ;;  %s328_s2 = inlined_call_operand.vmem [shape: f32[32,1], index: 2, kind: input, shape index: {}]   ;;  %s329_s3 = inlined_call_operand.vmem [shape: f32[32,96], index: 3, kind: output, shape index: {}]  }
   0x1   :  { %v37_v0 = vld [vmem:[%s326_s0 + $0x78] sm:$0xff]  ;;  %v36_v1 = vld [vmem:[%s326_s0 + $0x70] sm:$0xff]  ;;  %v35_v2 = vld [vmem:[%s326_s0 + $0x68] sm:$0xff]  ;;  %194 = vset.pattern.permute.xlu1 %v195_v3  ;;  %193 = vset.pattern.permute.xlu0 %v195_v3 }
   0x2   :  { %77 = vmatpush.msra.mxu0 %v37_v0  ;;  %160 = vmatpush.msra.mxu2 %v37_v0  ;;  %v39_v4 = vld [vmem:[%s326_s0 + $0x88] sm:$0xff]  ;;  %v34_v5 = vld [vmem:[%s326_s0 + $0x60] sm:$0xff]  ;;  %v33_v8 = vld [vmem:[%s326_s0 + $0x58] sm:$0xff] }
   0x3   :  { %161 = vmatpush.msra.mxu3 %v37_v0  ;;  %120 = vmatpush.msra.mxu1 %v39_v4  ;;  %v38_v6 = vld [vmem:[%s326_s0 + $0x80] sm:$0xff]  ;;  %v15_v7 = vld [vmem:[%s327_s1 + $0x8] sm:$0xff]  ;;  %v32_v9 = vld [vmem:[%s326_s0 + $0x50] sm:$0xff] }
   0x4   :  { %78 = vmatpush.msra.mxu0 %v36_v1  ;;  %162 = vmatpush.msra.mxu2 %v36_v1  ;;  %v42_v10 = vld [vmem:[%s328_s2 + $0x10] sm:$0xff]  ;;  %v31_v11 = vld [vmem:[%s326_s0 + $0x48] sm:$0xff]  ;;  %v40_v12 = vld [vmem:[%s328_s2] sm:$0xff] }
   0x5   :  { %163 = vmatpush.msra.mxu3 %v36_v1  ;;  %121 = vmatpush.msra.mxu1 %v38_v6  ;;  %v30_v13 = vld [vmem:[%s326_s0 + $0x40] sm:$0xff]  ;;  %v17_v14 = vld [vmem:[%s327_s1 + $0x18] sm:$0xff]  ;;  %v28_v16 = vld [vmem:[%s326_s0 + $0x30] sm:$0xff] }
   0x6   :  { %79 = vmatpush.msra.mxu0 %v35_v2  ;;  %164 = vmatpush.msra.mxu2 %v35_v2  ;;  %v29_v15 = vld [vmem:[%s326_s0 + $0x38] sm:$0xff]  ;;  %v27_v18 = vld [vmem:[%s326_s0 + $0x28] sm:$0xff]  ;;  %v26_v20 = vld [vmem:[%s326_s0 + $0x20] sm:$0xff] }
   0x7   :  { %165 = vmatpush.msra.mxu3 %v35_v2  ;;  %156 = vmatmul.msk.f32.vlgmr.msra.gmra.mxu1 %vm64_vm0, %v15_v7  ;;  %v43_v17 = vld [vmem:[%s328_s2 + $0x18] sm:$0xff]  ;;  %v41_v19 = vld [vmem:[%s328_s2 + $0x8] sm:$0xff]  ;;  %v24_v23 = vld [vmem:[%s326_s0 + $0x10] sm:$0xff] }
   0x8   :  { %80 = vmatpush.msra.mxu0 %v34_v5  ;;  %166 = vmatpush.msra.mxu2 %v34_v5  ;;  %v19_v21 = vld [vmem:[%s327_s1 + $0x28] sm:$0xff]  ;;  %v25_v22 = vld [vmem:[%s326_s0 + $0x18] sm:$0xff]  ;;  %v22_v25 = vld [vmem:[%s326_s0] sm:$0xff] }
   0x9   :  { %167 = vmatpush.msra.mxu3 %v34_v5  ;;  %56 = vperm.xlu1 %194, %v42_v10   ;;  %v23_v24 = vld [vmem:[%s326_s0 + $0x8] sm:$0xff]  ;;  %v14_v26 = vld [vmem:[%s327_s1] sm:$0xff]  ;;  %v16_v27 = vld [vmem:[%s327_s1 + $0x10] sm:$0xff] }
   0xa   :  { %81 = vmatpush.msra.mxu0 %v33_v8  ;;  %168 = vmatpush.msra.mxu2 %v33_v8  ;;  %v18_v28 = vld [vmem:[%s327_s1 + $0x20] sm:$0xff]  ;;  %v21_v29 = vld [vmem:[%s327_s1 + $0x38] sm:$0xff]  ;;  %v20_v30 = vld [vmem:[%s327_s1 + $0x30] sm:$0xff] }
   0xb   :  { %169 = vmatpush.msra.mxu3 %v33_v8  ;;  %46 = vperm.xlu0 %193, %v40_v12  }
   0xc   :  { %82 = vmatpush.msra.mxu0 %v32_v9  ;;  %170 = vmatpush.msra.mxu2 %v32_v9 }
   0xd   :  { %171 = vmatpush.msra.mxu3 %v32_v9 }
   0xe   :  { %83 = vmatpush.msra.mxu0 %v31_v11  ;;  %172 = vmatpush.msra.mxu2 %v31_v11 }
   0xf   :  { %173 = vmatpush.msra.mxu3 %v31_v11  ;;  %157 = vmatmul.msk.f32.gmra.mxu1 %vm64_vm0, %v17_v14 }
  0x10   :  { %84 = vmatpush.msra.mxu0 %v30_v13  ;;  %174 = vmatpush.msra.mxu2 %v30_v13 }
  0x11   :  { %175 = vmatpush.msra.mxu3 %v30_v13  ;;  %61 = vperm.xlu1 %194, %v43_v17  }
  0x12   :  { %85 = vmatpush.msra.mxu0 %v29_v15  ;;  %176 = vmatpush.msra.mxu2 %v29_v15 }
  0x13   :  { %177 = vmatpush.msra.mxu3 %v29_v15  ;;  %51 = vperm.xlu0 %193, %v41_v19  }
  0x14   :  { %86 = vmatpush.msra.mxu0 %v28_v16  ;;  %178 = vmatpush.msra.mxu2 %v28_v16 }
  0x15   :  { %179 = vmatpush.msra.mxu3 %v28_v16 }
  0x16   :  { %87 = vmatpush.msra.mxu0 %v27_v18  ;;  %180 = vmatpush.msra.mxu2 %v27_v18 }
  0x17   :  { %181 = vmatpush.msra.mxu3 %v27_v18  ;;  %158 = vmatmul.msk.f32.gmra.mxu1 %vm64_vm0, %v19_v21 }
  0x18   :  { %88 = vmatpush.msra.mxu0 %v26_v20  ;;  %182 = vmatpush.msra.mxu2 %v26_v20 }
  0x19   :  { %183 = vmatpush.msra.mxu3 %v26_v20 }
  0x1a   :  { %89 = vmatpush.msra.mxu0 %v25_v22  ;;  %184 = vmatpush.msra.mxu2 %v25_v22 }
  0x1b   :  { %185 = vmatpush.msra.mxu3 %v25_v22 }
  0x1c   :  { %90 = vmatpush.msra.mxu0 %v24_v23  ;;  %186 = vmatpush.msra.mxu2 %v24_v23 }
  0x1d   :  { %187 = vmatpush.msra.mxu3 %v24_v23 }
  0x1e   :  { %91 = vmatpush.msra.mxu0 %v23_v24  ;;  %188 = vmatpush.msra.mxu2 %v23_v24 }
  0x1f   :  { %189 = vmatpush.msra.mxu3 %v23_v24  ;;  %159 = vmatmul.msk.f32.gmra.mxu1 %vm64_vm0, %v21_v29 }
  0x20   :  { %92 = vmatpush.msra.mxu0 %v22_v25  ;;  %190 = vmatpush.msra.mxu2 %v22_v25 }
  0x21   :  { %191 = vmatpush.msra.mxu3 %v22_v25  ;;  %93 = vmatmul.f32.vlgmr.msra.gmra.mxu0 %v14_v26 }
  0x22   :  { %96 = vmatmul.f32.vlgmr.msra.gmra.mxu2 %v16_v27  ;;  %99 = vmatmul.f32.vlgmr.msra.gmra.mxu3 %v18_v28 }
  0x2a   :  { %102 = vmatmul.f32.gmra.mxu3 %v20_v30 }
  0x7b   :  { %v57_v37 = vpop.permute.xlu1 %56 }
  0x7d   :  { %v47_v32 = vpop.permute.xlu0 %46 }
  0x83   :  { %v62_v50 = vpop.permute.xlu1 %61 }
  0x84   :  { %v123_v31 = vpop.f32.mrf.mxu1 }
  0x85   :  { %v52_v39 = vpop.permute.xlu0 %51 }
  0x8c   :  { %v126_v33 = vpop.f32.mrf.mxu1 }
  0x94   :  { %v129_v40 = vpop.f32.mrf.mxu1 }
  0x9c   :  { %v132_v54 = vpop.f32.mrf.mxu1 }
  0x9e   :  { %v94_v34 = vpop.f32.mrf.mxu0 }
  0x9f   :  { %v95_v35 = vadd.f32 %v94_v34, %v47_v32 }
  0xa1   :  { %v124_v36 = vadd.f32 %v123_v31, %v95_v35 }
  0xa3   :  { %vm135_vm1 = vcmp.ge.f32.partialorder %v124_v36, 0.0  ;;  %v139_v38 = vmul.f32 0.2, %v124_v36 }
  0xa5   :  { %v143_v41 = vsel %vm135_vm1, %v124_v36, %v139_v38  ;;  %v97_v42 = vpop.f32.mrf.mxu2  ;;  %v100_v43 = vpop.f32.mrf.mxu3 }
  0xa6   :  { %148 = vst.msk [vmem:[%s329_s3] sm:$0xff] %vm147_vm2, %v143_v41  ;;  %v98_v44 = vadd.f32 %v97_v42, %v52_v39  ;;  %v101_v45 = vadd.f32 %v100_v43, %v57_v37 }
  0xa8   :  { %v127_v46 = vadd.f32 %v126_v33, %v98_v44  ;;  %v130_v47 = vadd.f32 %v129_v40, %v101_v45 }
  0xaa   :  { %vm136_vm3 = vcmp.ge.f32.partialorder %v127_v46, 0.0  ;;  %v140_v48 = vmul.f32 0.2, %v127_v46  ;;  %vm137_vm4 = vcmp.ge.f32.partialorder %v130_v47, 0.0  ;;  %v141_v49 = vmul.f32 0.2, %v130_v47 }
  0xac   :  { %v144_v51 = vsel %vm136_vm3, %v127_v46, %v140_v48  ;;  %v145_v52 = vsel %vm137_vm4, %v130_v47, %v141_v49 }
  0xad   :  { %149 = vst.msk [vmem:[%s329_s3 + $0x8] sm:$0xff] %vm147_vm2, %v144_v51  ;;  %v103_v53 = vpop.f32.mrf.mxu3 }
  0xae   :  { %150 = vst.msk [vmem:[%s329_s3 + $0x10] sm:$0xff] %vm147_vm2, %v145_v52  ;;  %v104_v55 = vadd.f32 %v103_v53, %v62_v50 }
  0xb0   :  { %v133_v56 = vadd.f32 %v132_v54, %v104_v55 }
  0xb2   :  { %vm138_vm5 = vcmp.ge.f32.partialorder %v133_v56, 0.0  ;;  %v142_v57 = vmul.f32 0.2, %v133_v56 }
  0xb4   :  { %v146_v58 = vsel %vm138_vm5, %v133_v56, %v142_v57 }
  0xb5   :  { %151 = vst.msk [vmem:[%s329_s3 + $0x18] sm:$0xff] %vm147_vm2, %v146_v58 }

// kernel: uconvlstm_forward.13
= control target key start
LH: loop header
LB: loop body
LE: loop exit
PB: predicated region body
PF: predicated region fallthrough
CT: control target
= control target key end

     0   :  { %v230_v5 = vmov 0   ;;  %vm86_vm0 = vcmask 261120   ;;  %vm198_vm2 = vcmask 195584   ;;  %s427_s0 = inlined_call_operand.vmem [shape: f32[288,24], index: 0, kind: input, shape index: {}]   ;;  %s428_s1 = inlined_call_operand.vmem [shape: f32[32,288], index: 1, kind: input, shape index: {}]   ;;  %s429_s2 = inlined_call_operand.vmem [shape: f32[32,1], index: 2, kind: input, shape index: {}]   ;;  %s430_s3 = inlined_call_operand.vmem [shape: f32[32,24], index: 3, kind: output, shape index: {}]  }
   0x1   :  { %v41_v0 = vld [vmem:[%s427_s0 + $0x78] sm:$0xff]  ;;  %v40_v2 = vld [vmem:[%s427_s0 + $0x70] sm:$0xff]  ;;  %v39_v4 = vld [vmem:[%s427_s0 + $0x68] sm:$0xff]  ;;  %228 = vset.pattern.permute.xlu0 %v230_v5  ;;  %229 = vset.pattern.permute.xlu1 %v230_v5 }
   0x2   :  { %v57_v1 = vld [vmem:[%s427_s0 + $0xf8] sm:$0xff]  ;;  %99 = vmatpush.msra.mxu0 %v41_v0  ;;  %211 = vmatpush.msra.mxu3 %v41_v0  ;;  %v56_v3 = vld [vmem:[%s427_s0 + $0xf0] sm:$0xff]  ;;  %v55_v6 = vld [vmem:[%s427_s0 + $0xe8] sm:$0xff] }
   0x3   :  { %128 = vmatpush.msra.mxu1 %v57_v1  ;;  %v38_v7 = vld [vmem:[%s427_s0 + $0x60] sm:$0xff]  ;;  %v37_v9 = vld [vmem:[%s427_s0 + $0x58] sm:$0xff]  ;;  %v36_v12 = vld [vmem:[%s427_s0 + $0x50] sm:$0xff] }
   0x4   :  { %100 = vmatpush.msra.mxu0 %v40_v2  ;;  %212 = vmatpush.msra.mxu3 %v40_v2  ;;  %v54_v8 = vld [vmem:[%s427_s0 + $0xe0] sm:$0xff]  ;;  %v53_v10 = vld [vmem:[%s427_s0 + $0xd8] sm:$0xff]  ;;  %v60_v13 = vld [vmem:[%s427_s0 + $0x110] sm:$0xff] }
   0x5   :  { %129 = vmatpush.msra.mxu1 %v56_v3  ;;  %v61_v11 = vld [vmem:[%s427_s0 + $0x118] sm:$0xff]  ;;  %v52_v14 = vld [vmem:[%s427_s0 + $0xd0] sm:$0xff]  ;;  %v59_v15 = vld [vmem:[%s427_s0 + $0x108] sm:$0xff] }
   0x6   :  { %101 = vmatpush.msra.mxu0 %v39_v4  ;;  %213 = vmatpush.msra.mxu3 %v39_v4  ;;  %v35_v16 = vld [vmem:[%s427_s0 + $0x48] sm:$0xff]  ;;  %v58_v18 = vld [vmem:[%s427_s0 + $0x100] sm:$0xff]  ;;  %v16_v21 = vld [vmem:[%s428_s1 + $0x10] sm:$0xff] }
   0x7   :  { %130 = vmatpush.msra.mxu1 %v55_v6  ;;  %169 = vmatpush.msra.mxu2 %v61_v11  ;;  %v51_v17 = vld [vmem:[%s427_s0 + $0xc8] sm:$0xff]  ;;  %v34_v19 = vld [vmem:[%s427_s0 + $0x40] sm:$0xff]  ;;  %v33_v22 = vld [vmem:[%s427_s0 + $0x38] sm:$0xff] }
   0x8   :  { %102 = vmatpush.msra.mxu0 %v38_v7  ;;  %214 = vmatpush.msra.mxu3 %v38_v7  ;;  %v50_v20 = vld [vmem:[%s427_s0 + $0xc0] sm:$0xff]  ;;  %v49_v23 = vld [vmem:[%s427_s0 + $0xb8] sm:$0xff]  ;;  %v32_v25 = vld [vmem:[%s427_s0 + $0x30] sm:$0xff] }
   0x9   :  { %131 = vmatpush.msra.mxu1 %v54_v8  ;;  %170 = vmatpush.msra.mxu2 %v60_v13  ;;  %v62_v24 = vld [vmem:[%s429_s2] sm:$0xff]  ;;  %v48_v26 = vld [vmem:[%s427_s0 + $0xb0] sm:$0xff]  ;;  %v31_v28 = vld [vmem:[%s427_s0 + $0x28] sm:$0xff] }
   0xa   :  { %103 = vmatpush.msra.mxu0 %v37_v9  ;;  %215 = vmatpush.msra.mxu3 %v37_v9  ;;  %v64_v27 = vld [vmem:[%s429_s2 + $0x10] sm:$0xff]  ;;  %v47_v29 = vld [vmem:[%s427_s0 + $0xa8] sm:$0xff]  ;;  %v30_v30 = vld [vmem:[%s427_s0 + $0x20] sm:$0xff] }
   0xb   :  { %132 = vmatpush.msra.mxu1 %v53_v10  ;;  %171 = vmatpush.msra.mxu2 %v59_v15  ;;  %v46_v31 = vld [vmem:[%s427_s0 + $0xa0] sm:$0xff]  ;;  %v19_v32 = vld [vmem:[%s428_s1 + $0x28] sm:$0xff]  ;;  %v29_v33 = vld [vmem:[%s427_s0 + $0x18] sm:$0xff] }
   0xc   :  { %104 = vmatpush.msra.mxu0 %v36_v12  ;;  %216 = vmatpush.msra.mxu3 %v36_v12  ;;  %v45_v34 = vld [vmem:[%s427_s0 + $0x98] sm:$0xff]  ;;  %v63_v35 = vld [vmem:[%s429_s2 + $0x8] sm:$0xff]  ;;  %v28_v36 = vld [vmem:[%s427_s0 + $0x10] sm:$0xff] }
   0xd   :  { %133 = vmatpush.msra.mxu1 %v52_v14  ;;  %172 = vmatpush.msra.mxu2 %v58_v18  ;;  %v44_v37 = vld [vmem:[%s427_s0 + $0x90] sm:$0xff]  ;;  %v65_v38 = vld [vmem:[%s429_s2 + $0x18] sm:$0xff]  ;;  %v27_v39 = vld [vmem:[%s427_s0 + $0x8] sm:$0xff] }
   0xe   :  { %105 = vmatpush.msra.mxu0 %v35_v16  ;;  %217 = vmatpush.msra.mxu3 %v35_v16  ;;  %v43_v40 = vld [vmem:[%s427_s0 + $0x88] sm:$0xff]  ;;  %v26_v41 = vld [vmem:[%s427_s0] sm:$0xff]  ;;  %v17_v44 = vld [vmem:[%s428_s1 + $0x18] sm:$0xff] }
   0xf   :  { %134 = vmatpush.msra.mxu1 %v51_v17  ;;  %207 = vmatmul.msk.f32.vlgmr.msra.gmra.mxu2 %vm86_vm0, %v16_v21  ;;  %v42_v42 = vld [vmem:[%s427_s0 + $0x80] sm:$0xff]  ;;  %v15_v45 = vld [vmem:[%s428_s1 + $0x8] sm:$0xff]  ;;  %v20_v47 = vld [vmem:[%s428_s1 + $0x30] sm:$0xff] }
  0x10   :  { %106 = vmatpush.msra.mxu0 %v34_v19  ;;  %218 = vmatpush.msra.mxu3 %v34_v19  ;;  %v14_v43 = vld [vmem:[%s428_s1] sm:$0xff]  ;;  %v25_v49 = vld [vmem:[%s428_s1 + $0x58] sm:$0xff]  ;;  %v23_v50 = vld [vmem:[%s428_s1 + $0x48] sm:$0xff] }
  0x11   :  { %135 = vmatpush.msra.mxu1 %v50_v20  ;;  %68 = vperm.xlu0 %228, %v62_v24   ;;  %v22_v46 = vld [vmem:[%s428_s1 + $0x40] sm:$0xff]  ;;  %v21_v51 = vld [vmem:[%s428_s1 + $0x38] sm:$0xff]  ;;  %v24_v52 = vld [vmem:[%s428_s1 + $0x50] sm:$0xff] }
  0x12   :  { %107 = vmatpush.msra.mxu0 %v33_v22  ;;  %219 = vmatpush.msra.mxu3 %v33_v22  ;;  %v18_v48 = vld [vmem:[%s428_s1 + $0x20] sm:$0xff] }
  0x13   :  { %136 = vmatpush.msra.mxu1 %v49_v23  ;;  %78 = vperm.xlu1 %229, %v64_v27  }
  0x14   :  { %108 = vmatpush.msra.mxu0 %v32_v25  ;;  %220 = vmatpush.msra.mxu3 %v32_v25 }
  0x15   :  { %137 = vmatpush.msra.mxu1 %v48_v26 }
  0x16   :  { %109 = vmatpush.msra.mxu0 %v31_v28  ;;  %221 = vmatpush.msra.mxu3 %v31_v28 }
  0x17   :  { %138 = vmatpush.msra.mxu1 %v47_v29  ;;  %208 = vmatmul.msk.f32.gmra.mxu2 %vm86_vm0, %v19_v32 }
  0x18   :  { %110 = vmatpush.msra.mxu0 %v30_v30  ;;  %222 = vmatpush.msra.mxu3 %v30_v30 }
  0x19   :  { %139 = vmatpush.msra.mxu1 %v46_v31  ;;  %73 = vperm.xlu0 %228, %v63_v35  }
  0x1a   :  { %111 = vmatpush.msra.mxu0 %v29_v33  ;;  %223 = vmatpush.msra.mxu3 %v29_v33 }
  0x1b   :  { %140 = vmatpush.msra.mxu1 %v45_v34  ;;  %83 = vperm.xlu1 %229, %v65_v38  }
  0x1c   :  { %112 = vmatpush.msra.mxu0 %v28_v36  ;;  %224 = vmatpush.msra.mxu3 %v28_v36 }
  0x1d   :  { %141 = vmatpush.msra.mxu1 %v44_v37 }
  0x1e   :  { %113 = vmatpush.msra.mxu0 %v27_v39  ;;  %225 = vmatpush.msra.mxu3 %v27_v39 }
  0x1f   :  { %142 = vmatpush.msra.mxu1 %v43_v40  ;;  %209 = vmatmul.msk.f32.gmra.mxu2 %vm86_vm0, %v22_v46 }
  0x20   :  { %114 = vmatpush.msra.mxu0 %v26_v41  ;;  %226 = vmatpush.msra.mxu3 %v26_v41 }
  0x21   :  { %143 = vmatpush.msra.mxu1 %v42_v42  ;;  %115 = vmatmul.f32.vlgmr.msra.gmra.mxu0 %v14_v43 }
  0x22   :  { %118 = vmatmul.f32.vlgmr.msra.gmra.mxu3 %v17_v44  ;;  %144 = vmatmul.f32.vlgmr.msra.gmra.mxu1 %v15_v45 }
  0x27   :  { %210 = vmatmul.msk.f32.gmra.mxu2 %vm86_vm0, %v25_v49 }
  0x2a   :  { %121 = vmatmul.f32.gmra.mxu3 %v20_v47  ;;  %147 = vmatmul.f32.gmra.mxu1 %v18_v48 }
  0x32   :  { %124 = vmatmul.f32.gmra.mxu3 %v23_v50  ;;  %150 = vmatmul.f32.gmra.mxu1 %v21_v51 }
  0x3a   :  { %153 = vmatmul.f32.gmra.mxu1 %v24_v52 }
  0x83   :  { %v69_v53 = vpop.permute.xlu0 %68 }
  0x85   :  { %v79_v5 = vpop.permute.xlu1 %78 }
  0x8b   :  { %v74_v60 = vpop.permute.xlu0 %73 }
  0x8d   :  { %v84_v15 = vpop.permute.xlu1 %83 }
  0x92   :  { %v174_v54 = vpop.f32.mrf.mxu2 }
  0x9a   :  { %v177_v61 = vpop.f32.mrf.mxu2 }
  0x9e   :  { %v116_v55 = vpop.f32.mrf.mxu0 }
  0x9f   :  { %v117_v56 = vadd.f32 %v116_v55, %v69_v53  ;;  %v145_v57 = vpop.f32.mrf.mxu1 }
  0xa1   :  { %v146_v58 = vadd.f32 %v145_v57, %v117_v56 }
  0xa2   :  { %v180_v8 = vpop.f32.mrf.mxu2 }
  0xa3   :  { %v175_v59 = vadd.f32 %v174_v54, %v146_v58 }
  0xa5   :  { %vm186_vm1 = vcmp.ge.f32.partialorder %v175_v59, 0.0  ;;  %v190_v62 = vmul.f32 0.2, %v175_v59  ;;  %v119_v63 = vpop.f32.mrf.mxu3 }
  0xa6   :  { %v120_v0 = vadd.f32 %v119_v63, %v74_v60 }
  0xa7   :  { %v194_v1 = vsel %vm186_vm1, %v175_v59, %v190_v62  ;;  %v148_v2 = vpop.f32.mrf.mxu1 }
  0xa8   :  { %199 = vst.msk [vmem:[%s430_s3] sm:$0xff] %vm198_vm2, %v194_v1  ;;  %v149_v3 = vadd.f32 %v148_v2, %v120_v0 }
  0xaa   :  { %v178_v4 = vadd.f32 %v177_v61, %v149_v3  ;;  %v183_v20 = vpop.f32.mrf.mxu2 }
  0xac   :  { %vm187_vm3 = vcmp.ge.f32.partialorder %v178_v4, 0.0  ;;  %v191_v6 = vmul.f32 0.2, %v178_v4 }
  0xad   :  { %v122_v7 = vpop.f32.mrf.mxu3 }
  0xae   :  { %v195_v9 = vsel %vm187_vm3, %v178_v4, %v191_v6  ;;  %v123_v10 = vadd.f32 %v122_v7, %v79_v5 }
  0xaf   :  { %200 = vst.msk [vmem:[%s430_s3 + $0x8] sm:$0xff] %vm198_vm2, %v195_v9  ;;  %v151_v11 = vpop.f32.mrf.mxu1 }
  0xb0   :  { %v152_v12 = vadd.f32 %v151_v11, %v123_v10 }
  0xb2   :  { %v181_v13 = vadd.f32 %v180_v8, %v152_v12 }
  0xb4   :  { %vm188_vm4 = vcmp.ge.f32.partialorder %v181_v13, 0.0  ;;  %v192_v14 = vmul.f32 0.2, %v181_v13 }
  0xb5   :  { %v125_v16 = vpop.f32.mrf.mxu3 }
  0xb6   :  { %v196_v17 = vsel %vm188_vm4, %v181_v13, %v192_v14  ;;  %v126_v18 = vadd.f32 %v125_v16, %v84_v15 }
  0xb7   :  { %201 = vst.msk [vmem:[%s430_s3 + $0x10] sm:$0xff] %vm198_vm2, %v196_v17  ;;  %v154_v19 = vpop.f32.mrf.mxu1 }
  0xb8   :  { %v155_v21 = vadd.f32 %v154_v19, %v126_v18 }
  0xba   :  { %v184_v22 = vadd.f32 %v183_v20, %v155_v21 }
  0xbc   :  { %vm189_vm5 = vcmp.ge.f32.partialorder %v184_v22, 0.0  ;;  %v193_v23 = vmul.f32 0.2, %v184_v22 }
  0xbe   :  { %v197_v24 = vsel %vm189_vm5, %v184_v22, %v193_v23 }
  0xbf   :  { %202 = vst.msk [vmem:[%s430_s3 + $0x18] sm:$0xff] %vm198_vm2, %v197_v24 }

// kernel: uconvlstm_forward.14
= control target key start
LH: loop header
LB: loop body
LE: loop exit
PB: predicated region body
PF: predicated region fallthrough
CT: control target
= control target key end

     0   :  { %v230_v5 = vmov 0   ;;  %vm86_vm0 = vcmask 261120   ;;  %vm198_vm2 = vcmask 48128   ;;  %s427_s0 = inlined_call_operand.vmem [shape: f32[288,6], index: 0, kind: input, shape index: {}]   ;;  %s428_s1 = inlined_call_operand.vmem [shape: f32[32,288], index: 1, kind: input, shape index: {}]   ;;  %s429_s2 = inlined_call_operand.vmem [shape: f32[32,1], index: 2, kind: input, shape index: {}]   ;;  %s430_s3 = inlined_call_operand.vmem [shape: f32[32,6], index: 3, kind: output, shape index: {}]  }
   0x1   :  { %v41_v0 = vld [vmem:[%s427_s0 + $0x78] sm:$0xff]  ;;  %v40_v2 = vld [vmem:[%s427_s0 + $0x70] sm:$0xff]  ;;  %v39_v4 = vld [vmem:[%s427_s0 + $0x68] sm:$0xff]  ;;  %228 = vset.pattern.permute.xlu0 %v230_v5  ;;  %229 = vset.pattern.permute.xlu1 %v230_v5 }
   0x2   :  { %v57_v1 = vld [vmem:[%s427_s0 + $0xf8] sm:$0xff]  ;;  %99 = vmatpush.msra.mxu0 %v41_v0  ;;  %211 = vmatpush.msra.mxu3 %v41_v0  ;;  %v56_v3 = vld [vmem:[%s427_s0 + $0xf0] sm:$0xff]  ;;  %v55_v6 = vld [vmem:[%s427_s0 + $0xe8] sm:$0xff] }
   0x3   :  { %128 = vmatpush.msra.mxu1 %v57_v1  ;;  %v38_v7 = vld [vmem:[%s427_s0 + $0x60] sm:$0xff]  ;;  %v37_v9 = vld [vmem:[%s427_s0 + $0x58] sm:$0xff]  ;;  %v36_v12 = vld [vmem:[%s427_s0 + $0x50] sm:$0xff] }
   0x4   :  { %100 = vmatpush.msra.mxu0 %v40_v2  ;;  %212 = vmatpush.msra.mxu3 %v40_v2  ;;  %v54_v8 = vld [vmem:[%s427_s0 + $0xe0] sm:$0xff]  ;;  %v53_v10 = vld [vmem:[%s427_s0 + $0xd8] sm:$0xff]  ;;  %v60_v13 = vld [vmem:[%s427_s0 + $0x110] sm:$0xff] }
   0x5   :  { %129 = vmatpush.msra.mxu1 %v56_v3  ;;  %v61_v11 = vld [vmem:[%s427_s0 + $0x118] sm:$0xff]  ;;  %v52_v14 = vld [vmem:[%s427_s0 + $0xd0] sm:$0xff]  ;;  %v59_v15 = vld [vmem:[%s427_s0 + $0x108] sm:$0xff] }
   0x6   :  { %101 = vmatpush.msra.mxu0 %v39_v4  ;;  %213 = vmatpush.msra.mxu3 %v39_v4  ;;  %v35_v16 = vld [vmem:[%s427_s0 + $0x48] sm:$0xff]  ;;  %v58_v18 = vld [vmem:[%s427_s0 + $0x100] sm:$0xff]  ;;  %v16_v21 = vld [vmem:[%s428_s1 + $0x10] sm:$0xff] }
   0x7   :  { %130 = vmatpush.msra.mxu1 %v55_v6  ;;  %169 = vmatpush.msra.mxu2 %v61_v11  ;;  %v51_v17 = vld [vmem:[%s427_s0 + $0xc8] sm:$0xff]  ;;  %v34_v19 = vld [vmem:[%s427_s0 + $0x40] sm:$0xff]  ;;  %v33_v22 = vld [vmem:[%s427_s0 + $0x38] sm:$0xff] }
   0x8   :  { %102 = vmatpush.msra.mxu0 %v38_v7  ;;  %214 = vmatpush.msra.mxu3 %v38_v7  ;;  %v50_v20 = vld [vmem:[%s427_s0 + $0xc0] sm:$0xff]  ;;  %v49_v23 = vld [vmem:[%s427_s0 + $0xb8] sm:$0xff]  ;;  %v32_v25 = vld [vmem:[%s427_s0 + $0x30] sm:$0xff] }
   0x9   :  { %131 = vmatpush.msra.mxu1 %v54_v8  ;;  %170 = vmatpush.msra.mxu2 %v60_v13  ;;  %v62_v24 = vld [vmem:[%s429_s2] sm:$0xff]  ;;  %v48_v26 = vld [vmem:[%s427_s0 + $0xb0] sm:$0xff]  ;;  %v31_v28 = vld [vmem:[%s427_s0 + $0x28] sm:$0xff] }
   0xa   :  { %103 = vmatpush.msra.mxu0 %v37_v9  ;;  %215 = vmatpush.msra.mxu3 %v37_v9  ;;  %v64_v27 = vld [vmem:[%s429_s2 + $0x10] sm:$0xff]  ;;  %v47_v29 = vld [vmem:[%s427_s0 + $0xa8] sm:$0xff]  ;;  %v30_v30 = vld [vmem:[%s427_s0 + $0x20] sm:$0xff] }
   0xb   :  { %132 = vmatpush.msra.mxu1 %v53_v10  ;;  %171 = vmatpush.msra.mxu2 %v59_v15  ;;  %v46_v31 = vld [vmem:[%s427_s0 + $0xa0] sm:$0xff]  ;;  %v19_v32 = vld [vmem:[%s428_s1 + $0x28] sm:$0xff]  ;;  %v29_v33 = vld [vmem:[%s427_s0 + $0x18] sm:$0xff] }
   0xc   :  { %104 = vmatpush.msra.mxu0 %v36_v12  ;;  %216 = vmatpush.msra.mxu3 %v36_v12  ;;  %v45_v34 = vld [vmem:[%s427_s0 + $0x98] sm:$0xff]  ;;  %v63_v35 = vld [vmem:[%s429_s2 + $0x8] sm:$0xff]  ;;  %v28_v36 = vld [vmem:[%s427_s0 + $0x10] sm:$0xff] }
   0xd   :  { %133 = vmatpush.msra.mxu1 %v52_v14  ;;  %172 = vmatpush.msra.mxu2 %v58_v18  ;;  %v44_v37 = vld [vmem:[%s427_s0 + $0x90] sm:$0xff]  ;;  %v65_v38 = vld [vmem:[%s429_s2 + $0x18] sm:$0xff]  ;;  %v27_v39 = vld [vmem:[%s427_s0 + $0x8] sm:$0xff] }
   0xe   :  { %105 = vmatpush.msra.mxu0 %v35_v16  ;;  %217 = vmatpush.msra.mxu3 %v35_v16  ;;  %v43_v40 = vld [vmem:[%s427_s0 + $0x88] sm:$0xff]  ;;  %v26_v41 = vld [vmem:[%s427_s0] sm:$0xff]  ;;  %v17_v44 = vld [vmem:[%s428_s1 + $0x18] sm:$0xff] }
   0xf   :  { %134 = vmatpush.msra.mxu1 %v51_v17  ;;  %207 = vmatmul.msk.f32.vlgmr.msra.gmra.mxu2 %vm86_vm0, %v16_v21  ;;  %v42_v42 = vld [vmem:[%s427_s0 + $0x80] sm:$0xff]  ;;  %v15_v45 = vld [vmem:[%s428_s1 + $0x8] sm:$0xff]  ;;  %v20_v47 = vld [vmem:[%s428_s1 + $0x30] sm:$0xff] }
  0x10   :  { %106 = vmatpush.msra.mxu0 %v34_v19  ;;  %218 = vmatpush.msra.mxu3 %v34_v19  ;;  %v14_v43 = vld [vmem:[%s428_s1] sm:$0xff]  ;;  %v25_v49 = vld [vmem:[%s428_s1 + $0x58] sm:$0xff]  ;;  %v23_v50 = vld [vmem:[%s428_s1 + $0x48] sm:$0xff] }
  0x11   :  { %135 = vmatpush.msra.mxu1 %v50_v20  ;;  %68 = vperm.xlu0 %228, %v62_v24   ;;  %v22_v46 = vld [vmem:[%s428_s1 + $0x40] sm:$0xff]  ;;  %v21_v51 = vld [vmem:[%s428_s1 + $0x38] sm:$0xff]  ;;  %v24_v52 = vld [vmem:[%s428_s1 + $0x50] sm:$0xff] }
  0x12   :  { %107 = vmatpush.msra.mxu0 %v33_v22  ;;  %219 = vmatpush.msra.mxu3 %v33_v22  ;;  %v18_v48 = vld [vmem:[%s428_s1 + $0x20] sm:$0xff] }
  0x13   :  { %136 = vmatpush.msra.mxu1 %v49_v23  ;;  %78 = vperm.xlu1 %229, %v64_v27  }
  0x14   :  { %108 = vmatpush.msra.mxu0 %v32_v25  ;;  %220 = vmatpush.msra.mxu3 %v32_v25 }
  0x15   :  { %137 = vmatpush.msra.mxu1 %v48_v26 }
  0x16   :  { %109 = vmatpush.msra.mxu0 %v31_v28  ;;  %221 = vmatpush.msra.mxu3 %v31_v28 }
  0x17   :  { %138 = vmatpush.msra.mxu1 %v47_v29  ;;  %208 = vmatmul.msk.f32.gmra.mxu2 %vm86_vm0, %v19_v32 }
  0x18   :  { %110 = vmatpush.msra.mxu0 %v30_v30  ;;  %222 = vmatpush.msra.mxu3 %v30_v30 }
  0x19   :  { %139 = vmatpush.msra.mxu1 %v46_v31  ;;  %73 = vperm.xlu0 %228, %v63_v35  }
  0x1a   :  { %111 = vmatpush.msra.mxu0 %v29_v33  ;;  %223 = vmatpush.msra.mxu3 %v29_v33 }
  0x1b   :  { %140 = vmatpush.msra.mxu1 %v45_v34  ;;  %83 = vperm.xlu1 %229, %v65_v38  }
  0x1c   :  { %112 = vmatpush.msra.mxu0 %v28_v36  ;;  %224 = vmatpush.msra.mxu3 %v28_v36 }
  0x1d   :  { %141 = vmatpush.msra.mxu1 %v44_v37 }
  0x1e   :  { %113 = vmatpush.msra.mxu0 %v27_v39  ;;  %225 = vmatpush.msra.mxu3 %v27_v39 }
  0x1f   :  { %142 = vmatpush.msra.mxu1 %v43_v40  ;;  %209 = vmatmul.msk.f32.gmra.mxu2 %vm86_vm0, %v22_v46 }
  0x20   :  { %114 = vmatpush.msra.mxu0 %v26_v41  ;;  %226 = vmatpush.msra.mxu3 %v26_v41 }
  0x21   :  { %143 = vmatpush.msra.mxu1 %v42_v42  ;;  %115 = vmatmul.f32.vlgmr.msra.gmra.mxu0 %v14_v43 }
  0x22   :  { %118 = vmatmul.f32.vlgmr.msra.gmra.mxu3 %v17_v44  ;;  %144 = vmatmul.f32.vlgmr.msra.gmra.mxu1 %v15_v45 }
  0x27   :  { %210 = vmatmul.msk.f32.gmra.mxu2 %vm86_vm0, %v25_v49 }
  0x2a   :  { %121 = vmatmul.f32.gmra.mxu3 %v20_v47  ;;  %147 = vmatmul.f32.gmra.mxu1 %v18_v48 }
  0x32   :  { %124 = vmatmul.f32.gmra.mxu3 %v23_v50  ;;  %150 = vmatmul.f32.gmra.mxu1 %v21_v51 }
  0x3a   :  { %153 = vmatmul.f32.gmra.mxu1 %v24_v52 }
  0x83   :  { %v69_v53 = vpop.permute.xlu0 %68 }
  0x85   :  { %v79_v5 = vpop.permute.xlu1 %78 }
  0x8b   :  { %v74_v60 = vpop.permute.xlu0 %73 }
  0x8d   :  { %v84_v15 = vpop.permute.xlu1 %83 }
  0x92   :  { %v174_v54 = vpop.f32.mrf.mxu2 }
  0x9a   :  { %v177_v61 = vpop.f32.mrf.mxu2 }
  0x9e   :  { %v116_v55 = vpop.f32.mrf.mxu0 }
  0x9f   :  { %v117_v56 = vadd.f32 %v116_v55, %v69_v53  ;;  %v145_v57 = vpop.f32.mrf.mxu1 }
  0xa1   :  { %v146_v58 = vadd.f32 %v145_v57, %v117_v56 }
  0xa2   :  { %v180_v8 = vpop.f32.mrf.mxu2 }
  0xa3   :  { %v175_v59 = vadd.f32 %v174_v54, %v146_v58 }
  0xa5   :  { %vm186_vm1 = vcmp.ge.f32.partialorder %v175_v59, 0.0  ;;  %v190_v62 = vmul.f32 0.2, %v175_v59  ;;  %v119_v63 = vpop.f32.mrf.mxu3 }
  0xa6   :  { %v120_v0 = vadd.f32 %v119_v63, %v74_v60 }
  0xa7   :  { %v194_v1 = vsel %vm186_vm1, %v175_v59, %v190_v62  ;;  %v148_v2 = vpop.f32.mrf.mxu1 }
  0xa8   :  { %199 = vst.msk [vmem:[%s430_s3] sm:$0xff] %vm198_vm2, %v194_v1  ;;  %v149_v3 = vadd.f32 %v148_v2, %v120_v0 }
  0xaa   :  { %v178_v4 = vadd.f32 %v177_v61, %v149_v3  ;;  %v183_v20 = vpop.f32.mrf.mxu2 }
  0xac   :  { %vm187_vm3 = vcmp.ge.f32.partialorder %v178_v4, 0.0  ;;  %v191_v6 = vmul.f32 0.2, %v178_v4 }
  0xad   :  { %v122_v7 = vpop.f32.mrf.mxu3 }
  0xae   :  { %v195_v9 = vsel %vm187_vm3, %v178_v4, %v191_v6  ;;  %v123_v10 = vadd.f32 %v122_v7, %v79_v5 }
  0xaf   :  { %200 = vst.msk [vmem:[%s430_s3 + $0x8] sm:$0xff] %vm198_vm2, %v195_v9  ;;  %v151_v11 = vpop.f32.mrf.mxu1 }
  0xb0   :  { %v152_v12 = vadd.f32 %v151_v11, %v123_v10 }
  0xb2   :  { %v181_v13 = vadd.f32 %v180_v8, %v152_v12 }
  0xb4   :  { %vm188_vm4 = vcmp.ge.f32.partialorder %v181_v13, 0.0  ;;  %v192_v14 = vmul.f32 0.2, %v181_v13 }
  0xb5   :  { %v125_v16 = vpop.f32.mrf.mxu3 }
  0xb6   :  { %v196_v17 = vsel %vm188_vm4, %v181_v13, %v192_v14  ;;  %v126_v18 = vadd.f32 %v125_v16, %v84_v15 }
  0xb7   :  { %201 = vst.msk [vmem:[%s430_s3 + $0x10] sm:$0xff] %vm198_vm2, %v196_v17  ;;  %v154_v19 = vpop.f32.mrf.mxu1 }
  0xb8   :  { %v155_v21 = vadd.f32 %v154_v19, %v126_v18 }
  0xba   :  { %v184_v22 = vadd.f32 %v183_v20, %v155_v21 }
  0xbc   :  { %vm189_vm5 = vcmp.ge.f32.partialorder %v184_v22, 0.0  ;;  %v193_v23 = vmul.f32 0.2, %v184_v22 }
  0xbe   :  { %v197_v24 = vsel %vm189_vm5, %v184_v22, %v193_v23 }
  0xbf   :  { %202 = vst.msk [vmem:[%s430_s3 + $0x18] sm:$0xff] %vm198_vm2, %v197_v24 }

// kernel: uconvlstm_forward.15
= control target key start
LH: loop header
LB: loop body
LE: loop exit
PB: predicated region body
PF: predicated region fallthrough
CT: control target
= control target key end

     0   :  { %s1047_s12 = smov 0   ;;  %s1269_s0 = inlined_call_operand.vmem [shape: f32[6,32,17], index: 0, kind: input, shape index: {}]   ;;  %s1270_s1 = inlined_call_operand.vmem [shape: f32[9,32,32], index: 1, kind: input, shape index: {}]   ;;  %s1271_s2 = inlined_call_operand.vmem [shape: f32[32,1], index: 2, kind: input, shape index: {}]   ;;  %s1272_s3 = inlined_call_operand.vmem [shape: f32[6,32,9], index: 3, kind: output, shape index: {}]  }
   0x1 LB: > { %s817_s13 = sadd.s32 4294967295, %s1016_s12   ;;  %p821_p0 = scmp.ge.s32.totalorder %s1016_s12, 1  ;;  %s1016_s12 = sphi %s1047_s12, %s13_s12  }
   0x2   : > { %p137_p1 = scmp.lt.s32.totalorder %s1016_s12, 7 }
   0x4   : > { %p138_p2 = pnand %p821_p0, %p137_p1 }
   0x5   : > { %p161_p3 = scmp.lt.s32.totalorder (!%p138_p2), %s817_s13, 5  ;;  %s1018_s18 = smov (!%p138_p2), 126  }
   0x6   : > { %141 = sbr.rel (%p138_p2) target bundleno = 355 (0x163), region = 32  ;;  %s1019_s19 = smov (!%p138_p2), 127  }
   0x7   : > { %s1020_s20 = smov (!%p138_p2), 125   ;;  %s1021_s21 = smov (!%p138_p2), 124  }
   0x8   : > { %s1022_s22 = smov (!%p138_p2), 122   ;;  %s1023_s23 = smov (!%p138_p2), 123  }
   0x9   : > { %s1024_s24 = smov (!%p138_p2), 121   ;;  %s1025_s25 = smov (!%p138_p2), 120  }
   0xb   : > { %s1274_s13 = smov (!%p161_p3, %s817_s13), 5  ;;  %v827_v17 = vld [vmem:[%s1270_s1 + $0x28] sm:$0xff]  ;;  %vm200_vm0 = vcmask 261120   ;;  %v828_v18 = vld [vmem:[%s1270_s1 + $0x30] sm:$0xff]  ;;  %v829_v22 = vld [vmem:[%s1270_s1 + $0x38] sm:$0xff]  ;;  %vm757_vm1 = vcmask 72704  }
   0xc   : > { %s896_s14 = sshll.u32 %s1274_s13, 5  ;;  %v175_v35 = vld [vmem:[%s1270_s1] sm:$0xff]  ;;  %v176_v52 = vld [vmem:[%s1270_s1 + $0x8] sm:$0xff]  ;;  %v177_v62 = vld [vmem:[%s1270_s1 + $0x10] sm:$0xff] }
   0xd   : > { %s165_s17 = scalar_lea.vmem %s1269_s0, %s896_s14  ;;  %v838_v36 = vld [vmem:[%s1270_s1 + $0x40] sm:$0xff]  ;;  %v839_v53 = vld [vmem:[%s1270_s1 + $0x48] sm:$0xff]  ;;  %v840_v63 = vld [vmem:[%s1270_s1 + $0x50] sm:$0xff]  ;;  %s1256_s9 = scalar_lea.vmem %s1272_s3, %s896_s14 }
   0xe   : > { %v1063_v0 = vld [vmem:[%s165_s17 + $0x10] sm:$0xff]  ;;  %v1065_v1 = vld [vmem:[%s165_s17 + $0x18] sm:$0xff]  ;;  %v1069_v3 = vld [vmem:[%s165_s17] sm:$0xff] }
   0xf   : > { %v937_v2 = vpack.i.bf16 %v1063_v0, %v1065_v1  ;;  %v1071_v4 = vld [vmem:[%s165_s17 + $0x8] sm:$0xff]  ;;  %v826_v40 = vld [vmem:[%s1270_s1 + $0x20] sm:$0xff] }
  0x10   : > { %v947_v5 = vpack.i.bf16 %v1069_v3, %v1071_v4  ;;  %v846_v41 = vld [vmem:[%s1270_s1 + $0x60] sm:$0xff]  ;;  %v847_v54 = vld [vmem:[%s1270_s1 + $0x68] sm:$0xff] }
  0x11   : > { %938 = vrot.lane.b32.xlu1 %v937_v2, %s1018_s18  ;;  %928 = vrot.lane.b32.xlu0 %v937_v2, %s1019_s19  ;;  %v854_v55 = vld [vmem:[%s1270_s1 + $0x80] sm:$0xff] }
  0x12   : > { %948 = vrot.lane.b32.xlu2 %v947_v5, %s1018_s18 }
  0x19   : > { %943 = vrot.lane.b32.xlu1 %v937_v2, %s1020_s20  ;;  %933 = vrot.lane.b32.xlu0 %v947_v5, %s1019_s19 }
  0x1a   : > { %953 = vrot.lane.b32.xlu2 %v947_v5, %s1020_s20 }
  0x21   : > { %963 = vrot.lane.b32.xlu1 %v947_v5, %s1021_s21  ;;  %958 = vrot.lane.b32.xlu0 %v937_v2, %s1021_s21 }
  0x22   : > { %968 = vrot.lane.b32.xlu2 %v937_v2, %s1022_s22 }
  0x29   : > { %978 = vrot.lane.b32.xlu1 %v937_v2, %s1023_s23  ;;  %973 = vrot.lane.b32.xlu0 %v937_v2, %s1024_s24 }
  0x2a   : > { %983 = vrot.lane.b32.xlu2 %v947_v5, %s1022_s22 }
  0x31   : > { %988 = vrot.lane.b32.xlu0 %v947_v5, %s1024_s24  ;;  %993 = vrot.lane.b32.xlu1 %v947_v5, %s1023_s23 }
  0x32   : > { %998 = vrot.lane.b32.xlu2 %v937_v2, %s1025_s25 }
  0x39   : > { %1003 = vrot.lane.b32.xlu0 %v947_v5, %s1025_s25  ;;  %v717_v5 = vld [vmem:[%s1271_s2] sm:$0xff] }
  0x6c   : > { %v1075_v6 = vpop.permute.xlu2 %948 }
  0x6d   : > { %v950_v30 = vunpack.i.l.bf16 %v1075_v6  ;;  %v951_v33 = vunpack.i.h.bf16 %v1075_v6  ;;  %v1026_v6 = vmov 0  }
  0x6e   : > { %1007 = vset.pattern.permute.xlu1 %v1026_v6  ;;  %1009 = vset.pattern.permute.xlu0 %v1026_v6 }
  0x6f   : > { %723 = vperm.xlu1 %1007, %v717_v5   ;;  %1008 = vset.pattern.permute.xlu2 %v1026_v6 }
  0x74   : > { %v1077_v7 = vpop.permute.xlu2 %953 }
  0x75   : > { %v955_v27 = vunpack.i.l.bf16 %v1077_v7  ;;  %v956_v31 = vunpack.i.h.bf16 %v1077_v7  ;;  %v178_v7 = vld [vmem:[%s1270_s1 + $0x18] sm:$0xff] }
  0x7c   : > { %v1079_v11 = vpop.permute.xlu2 %968 }
  0x7d   : > { %v970_v32 = vunpack.i.l.bf16 %v1079_v11  ;;  %v971_v34 = vunpack.i.h.bf16 %v1079_v11  ;;  %v862_v11 = vld [vmem:[%s1270_s1 + $0xa0] sm:$0xff] }
  0x83   : > { %v939_v8 = vpop.permute.xlu1 %938  ;;  %v929_v9 = vpop.permute.xlu0 %928 }
  0x84   : > { %v930_v10 = vunpack.i.l.bf16 %v929_v9  ;;  %v931_v12 = vunpack.i.h.bf16 %v929_v9  ;;  %v1087_v20 = vpop.permute.xlu2 %983  ;;  %v940_v21 = vunpack.i.l.bf16 %v939_v8  ;;  %v941_v26 = vunpack.i.h.bf16 %v939_v8  ;;  %v841_v8 = vld [vmem:[%s1270_s1 + $0x58] sm:$0xff] }
  0x85   : > { %v985_v39 = vunpack.i.l.bf16 %v1087_v20  ;;  %v986_v45 = vunpack.i.h.bf16 %v1087_v20  ;;  %v849_v9 = vld [vmem:[%s1270_s1 + $0x78] sm:$0xff]  ;;  %v879_v20 = vld [vmem:[%s1270_s1 + $0xe8] sm:$0xff] }
  0x86   : > { %225 = vmatpush.msra.mxu0 %v930_v10  ;;  %898 = vmatpush.msra.mxu1 %v930_v10 }
  0x87   : > { %899 = vmatpush.msra.mxu2 %v930_v10  ;;  %900 = vmatpush.msra.mxu3 %v930_v10  ;;  %v856_v10 = vld [vmem:[%s1270_s1 + $0x90] sm:$0xff] }
  0x88   : > { %226 = vmatpush.msra.mxu0 %v931_v12  ;;  %901 = vmatpush.msra.mxu1 %v931_v12 }
  0x89   : > { %902 = vmatpush.msra.mxu2 %v931_v12  ;;  %903 = vmatpush.msra.mxu3 %v931_v12  ;;  %v870_v12 = vld [vmem:[%s1270_s1 + $0xc0] sm:$0xff] }
  0x8b   : > { %v944_v13 = vpop.permute.xlu1 %943  ;;  %v934_v14 = vpop.permute.xlu0 %933 }
  0x8c   : > { %v935_v15 = vunpack.i.l.bf16 %v934_v14  ;;  %v936_v16 = vunpack.i.h.bf16 %v934_v14  ;;  %v945_v19 = vunpack.i.l.bf16 %v944_v13  ;;  %v946_v23 = vunpack.i.h.bf16 %v944_v13  ;;  %v999_v38 = vpop.permute.xlu2 %998  ;;  %v857_v13 = vld [vmem:[%s1270_s1 + $0x98] sm:$0xff]  ;;  %v878_v14 = vld [vmem:[%s1270_s1 + $0xe0] sm:$0xff] }
  0x8d   : > { %v1000_v48 = vunpack.i.l.bf16 %v999_v38  ;;  %v1001_v51 = vunpack.i.h.bf16 %v999_v38 }
  0x8e   : > { %227 = vmatpush.msra.mxu0 %v935_v15  ;;  %904 = vmatpush.msra.mxu1 %v935_v15 }
  0x8f   : > { %905 = vmatpush.msra.mxu2 %v935_v15  ;;  %906 = vmatpush.msra.mxu3 %v935_v15  ;;  %v719_v15 = vld [vmem:[%s1271_s2 + $0x10] sm:$0xff] }
  0x90   : > { %228 = vmatpush.msra.mxu0 %v936_v16  ;;  %907 = vmatpush.msra.mxu1 %v936_v16 }
  0x91   : > { %908 = vmatpush.msra.mxu2 %v936_v16  ;;  %909 = vmatpush.msra.mxu3 %v936_v16  ;;  %v720_v16 = vld [vmem:[%s1271_s2 + $0x18] sm:$0xff] }
  0x92   : > { %831 = vmatmul.msk.f32.vlgmr.msra.gmra.mxu1 %vm200_vm0, %v827_v17  ;;  %832 = vmatmul.msk.f32.vlgmr.msra.gmra.mxu2 %vm200_vm0, %v828_v18  ;;  %v718_v17 = vld [vmem:[%s1271_s2 + $0x8] sm:$0xff] }
  0x93   : > { %324 = vmatpush.msrb.mxu2 %v940_v21  ;;  %386 = vmatpush.msrb.mxu3 %v945_v19  ;;  %v964_v24 = vpop.permute.xlu1 %963  ;;  %v959_v25 = vpop.permute.xlu0 %958  ;;  %v863_v18 = vld [vmem:[%s1270_s1 + $0xa8] sm:$0xff]  ;;  %v886_v21 = vld [vmem:[%s1270_s1 + $0x100] sm:$0xff] }
  0x94   : > { %266 = vmatpush.msrb.mxu1 %v1065_v1  ;;  %833 = vmatmul.msk.f32.vlgmr.msra.gmra.mxu3 %vm200_vm0, %v829_v22  ;;  %v960_v28 = vunpack.i.l.bf16 %v959_v25  ;;  %v961_v29 = vunpack.i.h.bf16 %v959_v25  ;;  %v965_v37 = vunpack.i.l.bf16 %v964_v24  ;;  %v966_v42 = vunpack.i.h.bf16 %v964_v24  ;;  %v855_v1 = vld [vmem:[%s1270_s1 + $0x88] sm:$0xff]  ;;  %v864_v22 = vld [vmem:[%s1270_s1 + $0xb0] sm:$0xff] }
  0x95   : > { %325 = vmatpush.msrb.mxu2 %v941_v26  ;;  %387 = vmatpush.msrb.mxu3 %v946_v23  ;;  %v871_v19 = vld [vmem:[%s1270_s1 + $0xc8] sm:$0xff]  ;;  %v872_v23 = vld [vmem:[%s1270_s1 + $0xd0] sm:$0xff]  ;;  %v865_v26 = vld [vmem:[%s1270_s1 + $0xb8] sm:$0xff] }
  0x96   : > { %267 = vmatpush.msrb.mxu1 %v1063_v0  ;;  %448 = vmatpush.msrb.mxu0 %v960_v28  ;;  %v848_v0 = vld [vmem:[%s1270_s1 + $0x70] sm:$0xff]  ;;  %v887_v25 = vld [vmem:[%s1270_s1 + $0x108] sm:$0xff]  ;;  %v881_v28 = vld [vmem:[%s1270_s1 + $0xf8] sm:$0xff] }
  0x97   : > { %326 = vmatpush.msrb.mxu2 %v950_v30  ;;  %388 = vmatpush.msrb.mxu3 %v955_v27  ;;  %v880_v24 = vld [vmem:[%s1270_s1 + $0xf0] sm:$0xff]  ;;  %v873_v27 = vld [vmem:[%s1270_s1 + $0xd8] sm:$0xff] }
  0x98   : > { %268 = vmatpush.msrb.mxu1 %v1071_v4  ;;  %449 = vmatpush.msrb.mxu0 %v961_v29  ;;  %v888_v29 = vld [vmem:[%s1270_s1 + $0x110] sm:$0xff]  ;;  %v889_v30 = vld [vmem:[%s1270_s1 + $0x118] sm:$0xff] }
  0x99   : > { %327 = vmatpush.msrb.mxu2 %v951_v33  ;;  %389 = vmatpush.msrb.mxu3 %v956_v31 }
  0x9a   : > { %269 = vmatpush.msrb.mxu1 %v1069_v3  ;;  %842 = vmatmul.msk.f32.vlgmr.msrb.gmra.mxu2 %vm200_vm0, %v838_v36 }
  0x9b   : > { %572 = vmatpush.msra.mxu2 %v970_v32  ;;  %834 = vmatmul.msk.f32.vlgmr.msrb.gmra.mxu1 %vm200_vm0, %v175_v35  ;;  %v979_v43 = vpop.permute.xlu1 %978  ;;  %v974_v44 = vpop.permute.xlu0 %973 }
  0x9c   : > { %450 = vmatpush.msrb.mxu0 %v965_v37  ;;  %v980_v46 = vunpack.i.l.bf16 %v979_v43  ;;  %v975_v47 = vunpack.i.l.bf16 %v974_v44  ;;  %v981_v49 = vunpack.i.h.bf16 %v979_v43  ;;  %v976_v50 = vunpack.i.h.bf16 %v974_v44  ;;  %850 = vmatmul.msk.f32.vlgmr.msrb.gmra.mxu3 %vm200_vm0, %v846_v41 }
  0x9d   : > { %573 = vmatpush.msra.mxu2 %v971_v34  ;;  %830 = vmatmul.msk.f32.vlgmr.msra.gmra.mxu0 %vm200_vm0, %v826_v40 }
  0x9e   : > { %451 = vmatpush.msrb.mxu0 %v966_v42  ;;  %510 = vmatpush.msra.mxu1 %v980_v46 }
  0x9f   : > { %574 = vmatpush.msra.mxu2 %v985_v39  ;;  %634 = vmatpush.msra.mxu3 %v975_v47 }
  0xa0   : > { %696 = vmatpush.msra.mxu0 %v1000_v48  ;;  %511 = vmatpush.msra.mxu1 %v981_v49 }
  0xa1   : > { %575 = vmatpush.msra.mxu2 %v986_v45  ;;  %635 = vmatpush.msra.mxu3 %v976_v50 }
  0xa2   : > { %697 = vmatpush.msra.mxu0 %v1001_v51  ;;  %843 = vmatmul.msk.f32.gmra.mxu2 %vm200_vm0, %v839_v53 }
  0xa3   : > { %835 = vmatmul.msk.f32.gmra.mxu1 %vm200_vm0, %v176_v52  ;;  %v989_v56 = vpop.permute.xlu0 %988  ;;  %v994_v57 = vpop.permute.xlu1 %993  ;;  %733 = vperm.xlu0 %1009, %v719_v15  }
  0xa4   : > { %v991_v58 = vunpack.i.h.bf16 %v989_v56  ;;  %v990_v59 = vunpack.i.l.bf16 %v989_v56  ;;  %v996_v60 = vunpack.i.h.bf16 %v994_v57  ;;  %v995_v61 = vunpack.i.l.bf16 %v994_v57  ;;  %851 = vmatmul.msk.f32.gmra.mxu3 %vm200_vm0, %v847_v54  ;;  %738 = vperm.xlu1 %1007, %v720_v16  }
  0xa5   : > { %858 = vmatmul.msk.f32.vlgmr.msrb.gmra.mxu0 %vm200_vm0, %v854_v55  ;;  %728 = vperm.xlu2 %1008, %v718_v17  }
  0xa6   : > { %636 = vmatpush.msra.mxu3 %v990_v59  ;;  %512 = vmatpush.msra.mxu1 %v995_v61 }
  0xa8   : > { %637 = vmatpush.msra.mxu3 %v991_v58  ;;  %513 = vmatpush.msra.mxu1 %v996_v60 }
  0xaa   : > { %844 = vmatmul.msk.f32.gmra.mxu2 %vm200_vm0, %v840_v63 }
  0xab   : > { %836 = vmatmul.msk.f32.gmra.mxu1 %vm200_vm0, %v177_v62  ;;  %v1004_v2 = vpop.permute.xlu0 %1003 }
  0xac   : > { %v1006_v3 = vunpack.i.h.bf16 %v1004_v2  ;;  %v1005_v4 = vunpack.i.l.bf16 %v1004_v2  ;;  %852 = vmatmul.msk.f32.gmra.mxu3 %vm200_vm0, %v848_v0 }
  0xad   : > { %859 = vmatmul.msk.f32.gmra.mxu0 %vm200_vm0, %v855_v1 }
  0xae   : > { %698 = vmatpush.msra.mxu0 %v1005_v4 }
  0xb0   : > { %699 = vmatpush.msra.mxu0 %v1006_v3 }
  0xb2   : > { %845 = vmatmul.msk.f32.gmra.mxu2 %vm200_vm0, %v841_v8 }
  0xb3   : > { %837 = vmatmul.msk.f32.gmra.mxu1 %vm200_vm0, %v178_v7 }
  0xb4   : > { %853 = vmatmul.msk.f32.gmra.mxu3 %vm200_vm0, %v849_v9 }
  0xb5   : > { %860 = vmatmul.msk.f32.gmra.mxu0 %vm200_vm0, %v856_v10 }
  0xba   : > { %874 = vmatmul.msk.f32.vlgmr.msra.gmra.mxu2 %vm200_vm0, %v870_v12 }
  0xbb   : > { %866 = vmatmul.msk.f32.vlgmr.msra.gmra.mxu1 %vm200_vm0, %v862_v11 }
  0xbc   : > { %882 = vmatmul.msk.f32.vlgmr.msra.gmra.mxu3 %vm200_vm0, %v878_v14 }
  0xbd   : > { %861 = vmatmul.msk.f32.gmra.mxu0 %vm200_vm0, %v857_v13 }
  0xc2   : > { %875 = vmatmul.msk.f32.gmra.mxu2 %vm200_vm0, %v871_v19 }
  0xc3   : > { %867 = vmatmul.msk.f32.gmra.mxu1 %vm200_vm0, %v863_v18 }
  0xc4   : > { %883 = vmatmul.msk.f32.gmra.mxu3 %vm200_vm0, %v879_v20 }
  0xc5   : > { %890 = vmatmul.msk.f32.vlgmr.msra.gmra.mxu0 %vm200_vm0, %v886_v21 }
  0xca   : > { %876 = vmatmul.msk.f32.gmra.mxu2 %vm200_vm0, %v872_v23 }
  0xcb   : > { %868 = vmatmul.msk.f32.gmra.mxu1 %vm200_vm0, %v864_v22 }
  0xcc   : > { %884 = vmatmul.msk.f32.gmra.mxu3 %vm200_vm0, %v880_v24 }
  0xcd   : > { %891 = vmatmul.msk.f32.gmra.mxu0 %vm200_vm0, %v887_v25 }
  0xd2   : > { %877 = vmatmul.msk.f32.gmra.mxu2 %vm200_vm0, %v873_v27 }
  0xd3   : > { %869 = vmatmul.msk.f32.gmra.mxu1 %vm200_vm0, %v865_v26 }
  0xd4   : > { %885 = vmatmul.msk.f32.gmra.mxu3 %vm200_vm0, %v881_v28 }
  0xd5   : > { %892 = vmatmul.msk.f32.gmra.mxu0 %vm200_vm0, %v888_v29 }
  0xdd   : > { %893 = vmatmul.msk.f32.gmra.mxu0 %vm200_vm0, %v889_v30 }
  0xe1   : > { %v724_v3 = vpop.permute.xlu1 %723 }
  0xff   : > { %v729_v19 = vpop.permute.xlu2 %728 }
 0x10f   : > { %v233_v31 = vpop.f32.mrf.mxu1 }
 0x115   : > { %v236_v32 = vpop.f32.mrf.mxu2 }
 0x117   : > { %v239_v33 = vpop.f32.mrf.mxu3 }
 0x118   : > { %v271_v34 = vpop.f32.mrf.mxu1 }
 0x11a   : > { %v230_v35 = vpop.f32.mrf.mxu0 }
 0x11b   : > { %v272_v47 = vadd.f32 %v271_v34, %v230_v35 }
 0x11d   : > { %v329_v36 = vpop.f32.mrf.mxu2 }
 0x11e   : > { %v341_v49 = vadd.f32 %v329_v36, %v272_v47  ;;  %v739_v47 = vpop.permute.xlu1 %738 }
 0x11f   : > { %v391_v38 = vpop.f32.mrf.mxu3 }
 0x120   : > { %v274_v37 = vpop.f32.mrf.mxu1  ;;  %v403_v51 = vadd.f32 %v391_v38, %v341_v49 }
 0x121   : > { %v275_v54 = vadd.f32 %v274_v37, %v233_v31 }
 0x122   : > { %v453_v39 = vpop.f32.mrf.mxu0 }
 0x123   : > { %v465_v56 = vadd.f32 %v453_v39, %v403_v51 }
 0x125   : > { %v332_v40 = vpop.f32.mrf.mxu2 }
 0x126   : > { %v342_v57 = vadd.f32 %v332_v40, %v275_v54 }
 0x127   : > { %v394_v42 = vpop.f32.mrf.mxu3 }
 0x128   : > { %v277_v41 = vpop.f32.mrf.mxu1  ;;  %v404_v60 = vadd.f32 %v394_v42, %v342_v57 }
 0x129   : > { %v278_v0 = vadd.f32 %v277_v41, %v236_v32  ;;  %v734_v32 = vpop.permute.xlu0 %733 }
 0x12a   : > { %v456_v43 = vpop.f32.mrf.mxu0 }
 0x12b   : > { %v466_v4 = vadd.f32 %v456_v43, %v404_v60 }
 0x12d   : > { %v335_v44 = vpop.f32.mrf.mxu2 }
 0x12e   : > { %v343_v5 = vadd.f32 %v335_v44, %v278_v0 }
 0x12f   : > { %v397_v46 = vpop.f32.mrf.mxu3 }
 0x130   : > { %v280_v45 = vpop.f32.mrf.mxu1  ;;  %v405_v10 = vadd.f32 %v397_v46, %v343_v5 }
 0x131   : > { %v281_v15 = vadd.f32 %v280_v45, %v239_v33 }
 0x132   : > { %v459_v48 = vpop.f32.mrf.mxu0 }
 0x133   : > { %v467_v20 = vadd.f32 %v459_v48, %v405_v10 }
 0x135   : > { %v338_v50 = vpop.f32.mrf.mxu2 }
 0x136   : > { %v344_v21 = vadd.f32 %v338_v50, %v281_v15 }
 0x137   : > { %v400_v52 = vpop.f32.mrf.mxu3 }
 0x138   : > { %v515_v53 = vpop.f32.mrf.mxu1  ;;  %v406_v26 = vadd.f32 %v400_v52, %v344_v21 }
 0x139   : > { %v527_v58 = vadd.f32 %v515_v53, %v465_v56 }
 0x13a   : > { %v462_v55 = vpop.f32.mrf.mxu0 }
 0x13b   : > { %v468_v35 = vadd.f32 %v462_v55, %v406_v26 }
 0x13d   : > { %v577_v59 = vpop.f32.mrf.mxu2 }
 0x13e   : > { %v589_v61 = vadd.f32 %v577_v59, %v527_v58 }
 0x13f   : > { %v639_v63 = vpop.f32.mrf.mxu3 }
 0x140   : > { %v518_v62 = vpop.f32.mrf.mxu1  ;;  %v651_v1 = vadd.f32 %v639_v63, %v589_v61 }
 0x141   : > { %v528_v7 = vadd.f32 %v518_v62, %v466_v4 }
 0x142   : > { %v701_v2 = vpop.f32.mrf.mxu0 }
 0x143   : > { %v713_v6 = vadd.f32 %v701_v2, %v651_v1 }
 0x145   : > { %v741_v8 = vadd.f32 %v724_v3, %v713_v6  ;;  %v580_v9 = vpop.f32.mrf.mxu2 }
 0x146   : > { %v590_v12 = vadd.f32 %v580_v9, %v528_v7 }
 0x147   : > { %vm745_vm2 = vcmp.ge.f32.partialorder %v741_v8, 0.0  ;;  %v749_v11 = vmul.f32 0.2, %v741_v8  ;;  %v642_v14 = vpop.f32.mrf.mxu3 }
 0x148   : > { %v521_v13 = vpop.f32.mrf.mxu1  ;;  %v652_v17 = vadd.f32 %v642_v14, %v590_v12 }
 0x149   : > { %v753_v16 = vsel %vm745_vm2, %v741_v8, %v749_v11  ;;  %v529_v23 = vadd.f32 %v521_v13, %v467_v20 }
 0x14a   : > { %758 = vst.msk [vmem:[%s1256_s9] sm:$0xff] %vm757_vm1, %v753_v16  ;;  %v704_v18 = vpop.f32.mrf.mxu0 }
 0x14b   : > { %v714_v22 = vadd.f32 %v704_v18, %v652_v17 }
 0x14d   : > { %v742_v24 = vadd.f32 %v729_v19, %v714_v22  ;;  %v583_v25 = vpop.f32.mrf.mxu2 }
 0x14e   : > { %v591_v28 = vadd.f32 %v583_v25, %v529_v23 }
 0x14f   : > { %vm746_vm3 = vcmp.ge.f32.partialorder %v742_v24, 0.0  ;;  %v750_v27 = vmul.f32 0.2, %v742_v24  ;;  %v645_v29 = vpop.f32.mrf.mxu3 }
 0x150   : > { %v653_v31 = vadd.f32 %v645_v29, %v591_v28  ;;  %v524_v33 = vpop.f32.mrf.mxu1 }
 0x151   : > { %v754_v30 = vsel %vm746_vm3, %v742_v24, %v750_v27  ;;  %v530_v37 = vadd.f32 %v524_v33, %v468_v35 }
 0x152   : > { %759 = vst.msk [vmem:[%s1256_s9 + $0x8] sm:$0xff] %vm757_vm1, %v754_v30  ;;  %v707_v34 = vpop.f32.mrf.mxu0 }
 0x153   : > { %v715_v36 = vadd.f32 %v707_v34, %v653_v31 }
 0x155   : > { %v743_v38 = vadd.f32 %v734_v32, %v715_v36  ;;  %v586_v39 = vpop.f32.mrf.mxu2 }
 0x156   : > { %v592_v41 = vadd.f32 %v586_v39, %v530_v37 }
 0x157   : > { %vm747_vm4 = vcmp.ge.f32.partialorder %v743_v38, 0.0  ;;  %v751_v40 = vmul.f32 0.2, %v743_v38  ;;  %v648_v42 = vpop.f32.mrf.mxu3 }
 0x158   : > { %v654_v44 = vadd.f32 %v648_v42, %v592_v41 }
 0x159   : > { %v755_v43 = vsel %vm747_vm4, %v743_v38, %v751_v40 }
 0x15a   : > { %760 = vst.msk [vmem:[%s1256_s9 + $0x10] sm:$0xff] %vm757_vm1, %v755_v43  ;;  %v710_v45 = vpop.f32.mrf.mxu0 }
 0x15b   : > { %v716_v46 = vadd.f32 %v710_v45, %v654_v44 }
 0x15d   : > { %v744_v48 = vadd.f32 %v739_v47, %v716_v46 }
 0x15f   : > { %vm748_vm5 = vcmp.ge.f32.partialorder %v744_v48, 0.0  ;;  %v752_v49 = vmul.f32 0.2, %v744_v48 }
 0x161   : > { %v756_v50 = vsel %vm748_vm5, %v744_v48, %v752_v49 }
 0x162   : > { %761 = vst.msk [vmem:[%s1256_s9 + $0x18] sm:$0xff] %vm757_vm1, %v756_v50 }
 0x163 PF: > { %s13_s12 = sadd.s32 1, %s1016_s12  }
 0x164   : > { %p10_p4 = scmp.ge.s32.totalorder %s13_s12, 8  }
 0x166   :  { %12 = sbr.rel (!%p10_p4) target bundleno = 1 (0x1), region = 70 }

// kernel: uconvlstm_forward.16
= control target key start
LH: loop header
LB: loop body
LE: loop exit
PB: predicated region body
PF: predicated region fallthrough
CT: control target
= control target key end

     0   :  { %s1235_s12 = smov 0   ;;  %s1466_s0 = inlined_call_operand.vmem [shape: f32[6,64,26], index: 0, kind: input, shape index: {}]   ;;  %s1467_s1 = inlined_call_operand.vmem [shape: f32[9,32,64], index: 1, kind: input, shape index: {}]   ;;  %s1468_s2 = inlined_call_operand.vmem [shape: f32[32,1], index: 2, kind: input, shape index: {}]   ;;  %s1469_s3 = inlined_call_operand.vmem [shape: f32[6,32,16], index: 3, kind: output, shape index: {}]  }
   0x1 LB: > { %s921_s13 = sadd.s32 4294967295, %s1204_s12   ;;  %p925_p0 = scmp.ge.s32.totalorder %s1204_s12, 1  ;;  %s1204_s12 = sphi %s1235_s12, %s13_s12  }
   0x2   : > { %p137_p1 = scmp.lt.s32.totalorder %s1204_s12, 7 }
   0x4   : > { %p138_p2 = pnand %p925_p0, %p137_p1 }
   0x5   : > { %p161_p3 = scmp.lt.s32.totalorder (!%p138_p2), %s921_s13, 5  ;;  %s1206_s18 = smov (!%p138_p2), 127  }
   0x6   : > { %141 = sbr.rel (%p138_p2) target bundleno = 374 (0x176), region = 32  ;;  %s1207_s19 = smov (!%p138_p2), 126  }
   0x7   : > { %s1208_s20 = smov (!%p138_p2), 124   ;;  %s1209_s21 = smov (!%p138_p2), 123  }
   0x8   : > { %s1210_s22 = smov (!%p138_p2), 120   ;;  %s1211_s23 = smov (!%p138_p2), 119  }
   0x9   : > { %s1212_s24 = smov (!%p138_p2), 122   ;;  %s1213_s25 = smov (!%p138_p2), 118  }
   0xb   : > { %s1471_s13 = smov (!%p161_p3, %s921_s13), 5  ;;  %v932_v39 = vld [vmem:[%s1467_s1 + $0x30] sm:$0xff]  ;;  %vm220_vm0 = vcmask 523264   ;;  %v930_v41 = vld [vmem:[%s1467_s1 + $0x20] sm:$0xff]  ;;  %v933_v49 = vld [vmem:[%s1467_s1 + $0x38] sm:$0xff]  ;;  %vm861_vm1 = vcmask 130048  }
   0xc   : > { %s1000_s14 = sshll.u32 %s1471_s13, 6  ;;  %v942_v51 = vld [vmem:[%s1467_s1 + $0x40] sm:$0xff]  ;;  %v931_v54 = vld [vmem:[%s1467_s1 + $0x28] sm:$0xff]  ;;  %s1001_s4 = sshll.u32 %s1471_s13, 5 }
   0xd   : > { %s165_s17 = scalar_lea.vmem %s1466_s0, %s1000_s14  ;;  %v950_v56 = vld [vmem:[%s1467_s1 + $0x60] sm:$0xff]  ;;  %v943_v62 = vld [vmem:[%s1467_s1 + $0x48] sm:$0xff]  ;;  %s1453_s7 = scalar_lea.vmem %s1469_s3, %s1001_s4 }
   0xe   : > { %v1249_v0 = vld [vmem:[%s165_s17 + $0x30] sm:$0xff]  ;;  %v1251_v1 = vld [vmem:[%s165_s17 + $0x38] sm:$0xff]  ;;  %v1261_v6 = vld [vmem:[%s165_s17] sm:$0xff] }
   0xf   : > { %v1253_v2 = vld [vmem:[%s165_s17 + $0x10] sm:$0xff]  ;;  %v1035_v3 = vpack.i.bf16 %v1249_v0, %v1251_v1  ;;  %v1257_v4 = vld [vmem:[%s165_s17 + $0x18] sm:$0xff]  ;;  %v1263_v7 = vld [vmem:[%s165_s17 + $0x8] sm:$0xff] }
  0x10   : > { %v1045_v5 = vpack.i.bf16 %v1253_v2, %v1257_v4  ;;  %v1055_v8 = vpack.i.bf16 %v1261_v6, %v1263_v7  ;;  %v1267_v9 = vld [vmem:[%s165_s17 + $0x20] sm:$0xff]  ;;  %v1269_v10 = vld [vmem:[%s165_s17 + $0x28] sm:$0xff] }
  0x11   : > { %1036 = vrot.lane.b32.xlu0 %v1035_v3, %s1206_s18  ;;  %v1040_v11 = vpack.i.bf16 %v1267_v9, %v1269_v10  ;;  %v179_v60 = vld [vmem:[%s1467_s1] sm:$0xff] }
  0x12   : > { %1046 = vrot.lane.b32.xlu1 %v1045_v5, %s1206_s18  ;;  %1056 = vrot.lane.b32.xlu2 %v1055_v8, %s1206_s18 }
  0x19   : > { %1041 = vrot.lane.b32.xlu0 %v1040_v11, %s1206_s18 }
  0x1a   : > { %1051 = vrot.lane.b32.xlu1 %v1035_v3, %s1207_s19  ;;  %1061 = vrot.lane.b32.xlu2 %v1040_v11, %s1207_s19 }
  0x21   : > { %1066 = vrot.lane.b32.xlu0 %v1035_v3, %s1208_s20 }
  0x22   : > { %1071 = vrot.lane.b32.xlu1 %v1045_v5, %s1207_s19  ;;  %1076 = vrot.lane.b32.xlu2 %v1040_v11, %s1208_s20 }
  0x29   : > { %1081 = vrot.lane.b32.xlu0 %v1055_v8, %s1207_s19 }
  0x2a   : > { %1086 = vrot.lane.b32.xlu1 %v1045_v5, %s1208_s20  ;;  %1091 = vrot.lane.b32.xlu2 %v1055_v8, %s1208_s20 }
  0x31   : > { %1096 = vrot.lane.b32.xlu0 %v1035_v3, %s1209_s21 }
  0x32   : > { %1101 = vrot.lane.b32.xlu1 %v1040_v11, %s1209_s21  ;;  %1106 = vrot.lane.b32.xlu2 %v1045_v5, %s1209_s21 }
  0x39   : > { %1111 = vrot.lane.b32.xlu0 %v1035_v3, %s1210_s22 }
  0x3a   : > { %1116 = vrot.lane.b32.xlu1 %v1055_v8, %s1209_s21  ;;  %1121 = vrot.lane.b32.xlu2 %v1040_v11, %s1210_s22 }
  0x41   : > { %1126 = vrot.lane.b32.xlu0 %v1035_v3, %s1211_s23 }
  0x42   : > { %1131 = vrot.lane.b32.xlu1 %v1035_v3, %s1212_s24  ;;  %1136 = vrot.lane.b32.xlu2 %v1045_v5, %s1210_s22 }
  0x49   : > { %1141 = vrot.lane.b32.xlu0 %v1040_v11, %s1211_s23 }
  0x4a   : > { %1146 = vrot.lane.b32.xlu1 %v1040_v11, %s1212_s24  ;;  %1151 = vrot.lane.b32.xlu2 %v1055_v8, %s1210_s22 }
  0x51   : > { %1156 = vrot.lane.b32.xlu0 %v1045_v5, %s1211_s23 }
  0x52   : > { %1161 = vrot.lane.b32.xlu1 %v1045_v5, %s1212_s24  ;;  %1166 = vrot.lane.b32.xlu2 %v1055_v8, %s1211_s23 }
  0x59   : > { %1171 = vrot.lane.b32.xlu0 %v1055_v8, %s1212_s24 }
  0x5a   : > { %1176 = vrot.lane.b32.xlu1 %v1035_v3, %s1213_s25  ;;  %1181 = vrot.lane.b32.xlu2 %v1040_v11, %s1213_s25  ;;  %v944_v11 = vld [vmem:[%s1467_s1 + $0x50] sm:$0xff] }
  0x61   : > { %1186 = vrot.lane.b32.xlu0 %v1045_v5, %s1213_s25 }
  0x62   : > { %1191 = vrot.lane.b32.xlu1 %v1055_v8, %s1213_s25 }
  0x6c   : > { %v1057_v12 = vpop.permute.xlu2 %1056 }
  0x6d   : > { %v1058_v32 = vunpack.i.l.bf16 %v1057_v12  ;;  %v1059_v36 = vunpack.i.h.bf16 %v1057_v12 }
  0x74   : > { %v1062_v13 = vpop.permute.xlu2 %1061 }
  0x75   : > { %v1063_v26 = vunpack.i.l.bf16 %v1062_v13  ;;  %v1064_v28 = vunpack.i.h.bf16 %v1062_v13 }
  0x7c   : > { %v1077_v14 = vpop.permute.xlu2 %1076 }
  0x7d   : > { %v1078_v40 = vunpack.i.l.bf16 %v1077_v14  ;;  %v1079_v42 = vunpack.i.h.bf16 %v1077_v14  ;;  %v958_v14 = vld [vmem:[%s1467_s1 + $0x80] sm:$0xff] }
  0x83   : > { %v1037_v15 = vpop.permute.xlu0 %1036 }
  0x84   : > { %v1047_v16 = vpop.permute.xlu1 %1046  ;;  %v1038_v17 = vunpack.i.l.bf16 %v1037_v15  ;;  %v1039_v18 = vunpack.i.h.bf16 %v1037_v15  ;;  %v1273_v22 = vpop.permute.xlu2 %1091 }
  0x85   : > { %v1048_v27 = vunpack.i.l.bf16 %v1047_v16  ;;  %v1049_v29 = vunpack.i.h.bf16 %v1047_v16  ;;  %v1093_v50 = vunpack.i.l.bf16 %v1273_v22  ;;  %v1094_v53 = vunpack.i.h.bf16 %v1273_v22  ;;  %v952_v16 = vld [vmem:[%s1467_s1 + $0x70] sm:$0xff] }
  0x86   : > { %241 = vmatpush.msra.mxu0 %v1038_v17  ;;  %1002 = vmatpush.msra.mxu1 %v1038_v17 }
  0x88   : > { %242 = vmatpush.msra.mxu0 %v1039_v18  ;;  %1003 = vmatpush.msra.mxu1 %v1039_v18 }
  0x8b   : > { %v1042_v19 = vpop.permute.xlu0 %1041 }
  0x8c   : > { %v1052_v20 = vpop.permute.xlu1 %1051  ;;  %v1043_v21 = vunpack.i.l.bf16 %v1042_v19  ;;  %v1044_v25 = vunpack.i.h.bf16 %v1042_v19  ;;  %v1275_v37 = vpop.permute.xlu2 %1106 }
  0x8d   : > { %v1053_v23 = vunpack.i.l.bf16 %v1052_v20  ;;  %v1054_v24 = vunpack.i.h.bf16 %v1052_v20 }
  0x8e   : > { %243 = vmatpush.msra.mxu0 %v1043_v21  ;;  %1004 = vmatpush.msra.mxu1 %v1043_v21 }
  0x8f   : > { %352 = vmatpush.msra.mxu2 %v1053_v23 }
  0x90   : > { %244 = vmatpush.msra.mxu0 %v1044_v25  ;;  %1005 = vmatpush.msra.mxu1 %v1044_v25 }
  0x91   : > { %353 = vmatpush.msra.mxu2 %v1054_v24  ;;  %v181_v24 = vld [vmem:[%s1467_s1 + $0x10] sm:$0xff] }
  0x92   : > { %245 = vmatpush.msra.mxu0 %v1048_v27  ;;  %1006 = vmatpush.msra.mxu1 %v1048_v27  ;;  %v945_v27 = vld [vmem:[%s1467_s1 + $0x58] sm:$0xff] }
  0x93   : > { %354 = vmatpush.msra.mxu2 %v1063_v26  ;;  %v1067_v30 = vpop.permute.xlu0 %1066 }
  0x94   : > { %v1072_v31 = vpop.permute.xlu1 %1071  ;;  %246 = vmatpush.msra.mxu0 %v1049_v29  ;;  %1007 = vmatpush.msra.mxu1 %v1049_v29  ;;  %v1068_v33 = vunpack.i.l.bf16 %v1067_v30  ;;  %v1069_v38 = vunpack.i.h.bf16 %v1067_v30  ;;  %v1295_v52 = vpop.permute.xlu2 %1121  ;;  %v959_v29 = vld [vmem:[%s1467_s1 + $0x88] sm:$0xff] }
  0x95   : > { %355 = vmatpush.msra.mxu2 %v1064_v28  ;;  %v1073_v34 = vunpack.i.l.bf16 %v1072_v31  ;;  %v1074_v35 = vunpack.i.h.bf16 %v1072_v31  ;;  %v1124_v12 = vunpack.i.h.bf16 %v1295_v52  ;;  %v953_v31 = vld [vmem:[%s1467_s1 + $0x78] sm:$0xff] }
  0x96   : > { %247 = vmatpush.msra.mxu0 %v1058_v32  ;;  %1008 = vmatpush.msra.mxu1 %v1058_v32 }
  0x97   : > { %356 = vmatpush.msra.mxu2 %v1073_v34  ;;  %426 = vmatpush.msra.mxu3 %v1068_v33 }
  0x98   : > { %248 = vmatpush.msra.mxu0 %v1059_v36  ;;  %1009 = vmatpush.msra.mxu1 %v1059_v36  ;;  %v182_v36 = vld [vmem:[%s1467_s1 + $0x18] sm:$0xff] }
  0x99   : > { %357 = vmatpush.msra.mxu2 %v1074_v35  ;;  %427 = vmatpush.msra.mxu3 %v1069_v38  ;;  %v974_v38 = vld [vmem:[%s1467_s1 + $0xc0] sm:$0xff] }
  0x9a   : > { %936 = vmatmul.msk.f32.vlgmr.msra.gmra.mxu1 %vm220_vm0, %v932_v39  ;;  %934 = vmatmul.msk.f32.vlgmr.msra.gmra.mxu0 %vm220_vm0, %v930_v41  ;;  %v960_v39 = vld [vmem:[%s1467_s1 + $0x90] sm:$0xff] }
  0x9b   : > { %282 = vmatpush.msrb.mxu1 %v1251_v1  ;;  %428 = vmatpush.msra.mxu3 %v1078_v40  ;;  %v1082_v43 = vpop.permute.xlu0 %1081 }
  0x9c   : > { %v1087_v44 = vpop.permute.xlu1 %1086  ;;  %v1083_v45 = vunpack.i.l.bf16 %v1082_v43  ;;  %v1084_v48 = vunpack.i.h.bf16 %v1082_v43 }
  0x9d   : > { %283 = vmatpush.msrb.mxu1 %v1249_v0  ;;  %429 = vmatpush.msra.mxu3 %v1079_v42  ;;  %v1088_v46 = vunpack.i.l.bf16 %v1087_v44  ;;  %v1089_v47 = vunpack.i.h.bf16 %v1087_v44  ;;  %v1137_v0 = vpop.permute.xlu2 %1136 }
  0x9e   : > { %358 = vmatpush.msra.mxu2 %v1083_v45  ;;  %v1138_v17 = vunpack.i.l.bf16 %v1137_v0  ;;  %v1139_v23 = vunpack.i.h.bf16 %v1137_v0  ;;  %v976_v0 = vld [vmem:[%s1467_s1 + $0xd0] sm:$0xff] }
  0x9f   : > { %284 = vmatpush.msrb.mxu1 %v1269_v10  ;;  %430 = vmatpush.msra.mxu3 %v1088_v46 }
  0xa0   : > { %359 = vmatpush.msra.mxu2 %v1084_v48 }
  0xa1   : > { %285 = vmatpush.msrb.mxu1 %v1267_v9  ;;  %431 = vmatpush.msra.mxu3 %v1089_v47  ;;  %v1123_v9 = vunpack.i.l.bf16 %v1295_v52 }
  0xa2   : > { %937 = vmatmul.msk.f32.gmra.mxu1 %vm220_vm0, %v933_v49  ;;  %946 = vmatmul.msk.f32.vlgmr.msra.gmra.mxu2 %vm220_vm0, %v942_v51  ;;  %v975_v49 = vld [vmem:[%s1467_s1 + $0xc8] sm:$0xff]  ;;  %v982_v51 = vld [vmem:[%s1467_s1 + $0xe0] sm:$0xff] }
  0xa3   : > { %286 = vmatpush.msrb.mxu1 %v1257_v4  ;;  %v1097_v55 = vpop.permute.xlu0 %1096  ;;  %432 = vmatpush.msra.mxu3 %v1093_v50  ;;  %v1108_v4 = vunpack.i.l.bf16 %v1275_v37  ;;  %v961_v50 = vld [vmem:[%s1467_s1 + $0x98] sm:$0xff] }
  0xa4   : > { %v1102_v57 = vpop.permute.xlu1 %1101  ;;  %v1098_v58 = vunpack.i.l.bf16 %v1097_v55  ;;  %935 = vmatmul.msk.f32.gmra.mxu0 %vm220_vm0, %v931_v54  ;;  %v1099_v59 = vunpack.i.h.bf16 %v1097_v55 }
  0xa5   : > { %287 = vmatpush.msrb.mxu1 %v1253_v2  ;;  %433 = vmatpush.msra.mxu3 %v1094_v53  ;;  %v1103_v61 = vunpack.i.l.bf16 %v1102_v57  ;;  %v1104_v63 = vunpack.i.h.bf16 %v1102_v57  ;;  %v951_v2 = vld [vmem:[%s1467_s1 + $0x68] sm:$0xff]  ;;  %v1152_v20 = vpop.permute.xlu2 %1151 }
  0xa6   : > { %500 = vmatpush.msrb.mxu0 %v1098_v58  ;;  %954 = vmatmul.msk.f32.vlgmr.msra.gmra.mxu3 %vm220_vm0, %v950_v56  ;;  %v1153_v25 = vunpack.i.l.bf16 %v1152_v20  ;;  %v1154_v28 = vunpack.i.h.bf16 %v1152_v20  ;;  %v992_v20 = vld [vmem:[%s1467_s1 + $0x110] sm:$0xff] }
  0xa7   : > { %288 = vmatpush.msrb.mxu1 %v1263_v7  ;;  %v180_v7 = vld [vmem:[%s1467_s1 + $0x8] sm:$0xff] }
  0xa8   : > { %501 = vmatpush.msrb.mxu0 %v1099_v59 }
  0xa9   : > { %289 = vmatpush.msrb.mxu1 %v1261_v6  ;;  %v1109_v6 = vunpack.i.h.bf16 %v1275_v37 }
  0xaa   : > { %938 = vmatmul.msk.f32.vlgmr.msrb.gmra.mxu1 %vm220_vm0, %v179_v60  ;;  %502 = vmatpush.msrb.mxu0 %v1103_v61  ;;  %v966_v60 = vld [vmem:[%s1467_s1 + $0xa0] sm:$0xff]  ;;  %v822_v61 = vld [vmem:[%s1468_s2 + $0x8] sm:$0xff] }
  0xab   : > { %v1112_v1 = vpop.permute.xlu0 %1111  ;;  %947 = vmatmul.msk.f32.gmra.mxu2 %vm220_vm0, %v943_v62  ;;  %v1214_v62 = vmov 0  }
  0xac   : > { %v1117_v3 = vpop.permute.xlu1 %1116  ;;  %503 = vmatpush.msrb.mxu0 %v1104_v63  ;;  %v1113_v5 = vunpack.i.l.bf16 %v1112_v1  ;;  %v1114_v8 = vunpack.i.h.bf16 %v1112_v1  ;;  %1196 = vset.pattern.permute.xlu0 %v1214_v62 }
  0xad   : > { %v1118_v10 = vunpack.i.l.bf16 %v1117_v3  ;;  %v1119_v13 = vunpack.i.h.bf16 %v1117_v3  ;;  %v1167_v40 = vpop.permute.xlu2 %1166  ;;  %832 = vperm.xlu0 %1196, %v822_v61   ;;  %v823_v3 = vld [vmem:[%s1468_s2 + $0x10] sm:$0xff]  ;;  %1197 = vset.pattern.permute.xlu1 %v1214_v62 }
  0xae   : > { %504 = vmatpush.msrb.mxu0 %v1108_v4  ;;  %955 = vmatmul.msk.f32.gmra.mxu3 %vm220_vm0, %v951_v2  ;;  %v1168_v47 = vunpack.i.l.bf16 %v1167_v40  ;;  %v1169_v48 = vunpack.i.h.bf16 %v1167_v40  ;;  %v983_v2 = vld [vmem:[%s1467_s1 + $0xe8] sm:$0xff] }
  0xaf   : > { %648 = vmatpush.msrb.mxu2 %v1113_v5  ;;  %837 = vperm.xlu1 %1197, %v823_v3  }
  0xb0   : > { %505 = vmatpush.msrb.mxu0 %v1109_v6  ;;  %1195 = vset.pattern.permute.xlu2 %v1214_v62 }
  0xb1   : > { %649 = vmatpush.msrb.mxu2 %v1114_v8  ;;  %v967_v8 = vld [vmem:[%s1467_s1 + $0xa8] sm:$0xff] }
  0xb2   : > { %939 = vmatmul.msk.f32.gmra.mxu1 %vm220_vm0, %v180_v7  ;;  %506 = vmatpush.msrb.mxu0 %v1118_v10 }
  0xb3   : > { %v1127_v15 = vpop.permute.xlu0 %1126  ;;  %650 = vmatpush.msrb.mxu2 %v1123_v9  ;;  %v821_v9 = vld [vmem:[%s1468_s2] sm:$0xff] }
  0xb4   : > { %v1132_v18 = vpop.permute.xlu1 %1131  ;;  %507 = vmatpush.msrb.mxu0 %v1119_v13  ;;  %948 = vmatmul.msk.f32.gmra.mxu2 %vm220_vm0, %v944_v11  ;;  %v1128_v19 = vunpack.i.l.bf16 %v1127_v15  ;;  %v1129_v26 = vunpack.i.h.bf16 %v1127_v15  ;;  %v977_v11 = vld [vmem:[%s1467_s1 + $0xd8] sm:$0xff]  ;;  %v984_v13 = vld [vmem:[%s1467_s1 + $0xf0] sm:$0xff] }
  0xb5   : > { %v1134_v21 = vunpack.i.h.bf16 %v1132_v18  ;;  %v1133_v22 = vunpack.i.l.bf16 %v1132_v18  ;;  %962 = vmatmul.msk.f32.vlgmr.msrb.gmra.mxu0 %vm220_vm0, %v958_v14  ;;  %651 = vmatpush.msrb.mxu2 %v1124_v12  ;;  %v1182_v55 = vpop.permute.xlu2 %1181  ;;  %v990_v12 = vld [vmem:[%s1467_s1 + $0x100] sm:$0xff]  ;;  %v968_v14 = vld [vmem:[%s1467_s1 + $0xb0] sm:$0xff]  ;;  %v824_v15 = vld [vmem:[%s1468_s2 + $0x18] sm:$0xff] }
  0xb6   : > { %956 = vmatmul.msk.f32.gmra.mxu3 %vm220_vm0, %v952_v16  ;;  %v1183_v59 = vunpack.i.l.bf16 %v1182_v55  ;;  %v1184_v63 = vunpack.i.h.bf16 %v1182_v55  ;;  %827 = vperm.xlu2 %1195, %v821_v9   ;;  %v993_v16 = vld [vmem:[%s1467_s1 + $0x118] sm:$0xff] }
  0xb7   : > { %574 = vmatpush.msra.mxu1 %v1133_v22  ;;  %652 = vmatpush.msrb.mxu2 %v1138_v17  ;;  %v991_v17 = vld [vmem:[%s1467_s1 + $0x108] sm:$0xff]  ;;  %v985_v18 = vld [vmem:[%s1467_s1 + $0xf8] sm:$0xff] }
  0xb8   : > { %722 = vmatpush.msrb.mxu3 %v1128_v19  ;;  %v969_v19 = vld [vmem:[%s1467_s1 + $0xb8] sm:$0xff] }
  0xb9   : > { %575 = vmatpush.msra.mxu1 %v1134_v21  ;;  %653 = vmatpush.msrb.mxu2 %v1139_v23 }
  0xba   : > { %940 = vmatmul.msk.f32.gmra.mxu1 %vm220_vm0, %v181_v24  ;;  %723 = vmatpush.msrb.mxu3 %v1129_v26 }
  0xbb   : > { %v1142_v30 = vpop.permute.xlu0 %1141  ;;  %654 = vmatpush.msrb.mxu2 %v1153_v25 }
  0xbc   : > { %v1147_v32 = vpop.permute.xlu1 %1146  ;;  %949 = vmatmul.msk.f32.gmra.mxu2 %vm220_vm0, %v945_v27  ;;  %v1143_v33 = vunpack.i.l.bf16 %v1142_v30  ;;  %v1144_v37 = vunpack.i.h.bf16 %v1142_v30 }
  0xbd   : > { %v1149_v34 = vunpack.i.h.bf16 %v1147_v32  ;;  %v1148_v35 = vunpack.i.l.bf16 %v1147_v32  ;;  %963 = vmatmul.msk.f32.gmra.mxu0 %vm220_vm0, %v959_v29  ;;  %655 = vmatpush.msrb.mxu2 %v1154_v28 }
  0xbe   : > { %957 = vmatmul.msk.f32.gmra.mxu3 %vm220_vm0, %v953_v31  ;;  %842 = vperm.xlu2 %1195, %v824_v15  }
  0xbf   : > { %576 = vmatpush.msra.mxu1 %v1148_v35  ;;  %724 = vmatpush.msrb.mxu3 %v1143_v33 }
  0xc1   : > { %577 = vmatpush.msra.mxu1 %v1149_v34  ;;  %725 = vmatpush.msrb.mxu3 %v1144_v37 }
  0xc2   : > { %941 = vmatmul.msk.f32.gmra.mxu1 %vm220_vm0, %v182_v36 }
  0xc3   : > { %v1157_v41 = vpop.permute.xlu0 %1156 }
  0xc4   : > { %v1162_v42 = vpop.permute.xlu1 %1161  ;;  %v1158_v43 = vunpack.i.l.bf16 %v1157_v41  ;;  %978 = vmatmul.msk.f32.vlgmr.msrb.gmra.mxu2 %vm220_vm0, %v974_v38  ;;  %v1159_v46 = vunpack.i.h.bf16 %v1157_v41 }
  0xc5   : > { %v1164_v44 = vunpack.i.h.bf16 %v1162_v42  ;;  %v1163_v45 = vunpack.i.l.bf16 %v1162_v42  ;;  %964 = vmatmul.msk.f32.gmra.mxu0 %vm220_vm0, %v960_v39 }
  0xc6   : > { %726 = vmatpush.msrb.mxu3 %v1158_v43 }
  0xc7   : > { %578 = vmatpush.msra.mxu1 %v1163_v45 }
  0xc8   : > { %727 = vmatpush.msrb.mxu3 %v1159_v46 }
  0xc9   : > { %579 = vmatpush.msra.mxu1 %v1164_v44 }
  0xca   : > { %728 = vmatpush.msrb.mxu3 %v1168_v47 }
  0xcb   : > { %v1172_v52 = vpop.permute.xlu0 %1171 }
  0xcc   : > { %v1177_v53 = vpop.permute.xlu1 %1176  ;;  %v1173_v54 = vunpack.i.l.bf16 %v1172_v52  ;;  %729 = vmatpush.msrb.mxu3 %v1169_v48  ;;  %979 = vmatmul.msk.f32.gmra.mxu2 %vm220_vm0, %v975_v49  ;;  %v1174_v58 = vunpack.i.h.bf16 %v1172_v52 }
  0xcd   : > { %v1179_v56 = vunpack.i.h.bf16 %v1177_v53  ;;  %v1178_v57 = vunpack.i.l.bf16 %v1177_v53  ;;  %965 = vmatmul.msk.f32.gmra.mxu0 %vm220_vm0, %v961_v50  ;;  %986 = vmatmul.msk.f32.vlgmr.msrb.gmra.mxu3 %vm220_vm0, %v982_v51 }
  0xce   : > { %580 = vmatpush.msra.mxu1 %v1173_v54 }
  0xcf   : > { %796 = vmatpush.msra.mxu0 %v1178_v57  ;;  %1010 = vmatpush.msra.mxu2 %v1178_v57 }
  0xd0   : > { %581 = vmatpush.msra.mxu1 %v1174_v58 }
  0xd1   : > { %797 = vmatpush.msra.mxu0 %v1179_v56  ;;  %1011 = vmatpush.msra.mxu2 %v1179_v56 }
  0xd2   : > { %970 = vmatmul.msk.f32.vlgmr.msra.gmra.mxu1 %vm220_vm0, %v966_v60 }
  0xd3   : > { %798 = vmatpush.msra.mxu0 %v1183_v59  ;;  %v1187_v1 = vpop.permute.xlu0 %1186  ;;  %1012 = vmatpush.msra.mxu2 %v1183_v59 }
  0xd4   : > { %v1188_v4 = vunpack.i.l.bf16 %v1187_v1  ;;  %v1192_v5 = vpop.permute.xlu1 %1191  ;;  %980 = vmatmul.msk.f32.gmra.mxu2 %vm220_vm0, %v976_v0  ;;  %v1189_v6 = vunpack.i.h.bf16 %v1187_v1 }
  0xd5   : > { %799 = vmatpush.msra.mxu0 %v1184_v63  ;;  %1013 = vmatpush.msra.mxu2 %v1184_v63  ;;  %v1193_v7 = vunpack.i.l.bf16 %v1192_v5  ;;  %v1194_v10 = vunpack.i.h.bf16 %v1192_v5 }
  0xd6   : > { %987 = vmatmul.msk.f32.gmra.mxu3 %vm220_vm0, %v983_v2 }
  0xd7   : > { %800 = vmatpush.msra.mxu0 %v1188_v4  ;;  %1014 = vmatpush.msra.mxu2 %v1188_v4 }
  0xd9   : > { %801 = vmatpush.msra.mxu0 %v1189_v6  ;;  %1015 = vmatpush.msra.mxu2 %v1189_v6 }
  0xda   : > { %971 = vmatmul.msk.f32.gmra.mxu1 %vm220_vm0, %v967_v8 }
  0xdb   : > { %802 = vmatpush.msra.mxu0 %v1193_v7  ;;  %1016 = vmatpush.msra.mxu2 %v1193_v7 }
  0xdc   : > { %981 = vmatmul.msk.f32.gmra.mxu2 %vm220_vm0, %v977_v11 }
  0xdd   : > { %803 = vmatpush.msra.mxu0 %v1194_v10  ;;  %1017 = vmatpush.msra.mxu2 %v1194_v10 }
  0xde   : > { %994 = vmatmul.msk.f32.vlgmr.msra.gmra.mxu0 %vm220_vm0, %v990_v12  ;;  %988 = vmatmul.msk.f32.gmra.mxu3 %vm220_vm0, %v984_v13 }
  0xe2   : > { %972 = vmatmul.msk.f32.gmra.mxu1 %vm220_vm0, %v968_v14 }
  0xe4   : > { %997 = vmatmul.msk.f32.vlgmr.msra.gmra.mxu2 %vm220_vm0, %v993_v16 }
  0xe6   : > { %995 = vmatmul.msk.f32.gmra.mxu0 %vm220_vm0, %v991_v17  ;;  %989 = vmatmul.msk.f32.gmra.mxu3 %vm220_vm0, %v985_v18 }
  0xea   : > { %973 = vmatmul.msk.f32.gmra.mxu1 %vm220_vm0, %v969_v19 }
  0xee   : > { %996 = vmatmul.msk.f32.gmra.mxu0 %vm220_vm0, %v992_v20 }
 0x110   : > { %v828_v63 = vpop.permute.xlu2 %827 }
 0x117   : > { %v256_v21 = vpop.f32.mrf.mxu1  ;;  %v250_v23 = vpop.f32.mrf.mxu0 }
 0x11f   : > { %v259_v22 = vpop.f32.mrf.mxu1  ;;  %v833_v15 = vpop.permute.xlu0 %832 }
 0x121   : > { %v253_v27 = vpop.f32.mrf.mxu0 }
 0x125   : > { %v361_v24 = vpop.f32.mrf.mxu2 }
 0x127   : > { %v291_v25 = vpop.f32.mrf.mxu1 }
 0x128   : > { %v292_v37 = vadd.f32 %v291_v25, %v250_v23 }
 0x129   : > { %v435_v26 = vpop.f32.mrf.mxu3 }
 0x12a   : > { %v373_v42 = vadd.f32 %v361_v24, %v292_v37 }
 0x12c   : > { %v447_v43 = vadd.f32 %v435_v26, %v373_v42 }
 0x12e   : > { %v364_v28 = vpop.f32.mrf.mxu2 }
 0x12f   : > { %v294_v29 = vpop.f32.mrf.mxu1 }
 0x130   : > { %v295_v44 = vadd.f32 %v294_v29, %v253_v27 }
 0x131   : > { %v438_v30 = vpop.f32.mrf.mxu3 }
 0x132   : > { %v509_v31 = vpop.f32.mrf.mxu0  ;;  %v374_v49 = vadd.f32 %v364_v28, %v295_v44  ;;  %v838_v28 = vpop.permute.xlu1 %837 }
 0x133   : > { %v521_v47 = vadd.f32 %v509_v31, %v447_v43 }
 0x134   : > { %v448_v52 = vadd.f32 %v438_v30, %v374_v49 }
 0x137   : > { %v367_v32 = vpop.f32.mrf.mxu2  ;;  %v297_v33 = vpop.f32.mrf.mxu1 }
 0x138   : > { %v298_v53 = vadd.f32 %v297_v33, %v256_v21 }
 0x139   : > { %v441_v34 = vpop.f32.mrf.mxu3 }
 0x13a   : > { %v512_v35 = vpop.f32.mrf.mxu0  ;;  %v375_v59 = vadd.f32 %v367_v32, %v298_v53 }
 0x13b   : > { %v522_v57 = vadd.f32 %v512_v35, %v448_v52  ;;  %v843_v35 = vpop.permute.xlu2 %842 }
 0x13c   : > { %v449_v2 = vadd.f32 %v441_v34, %v375_v59 }
 0x13f   : > { %v370_v36 = vpop.f32.mrf.mxu2  ;;  %v300_v38 = vpop.f32.mrf.mxu1 }
 0x140   : > { %v301_v0 = vadd.f32 %v300_v38, %v259_v22 }
 0x141   : > { %v444_v40 = vpop.f32.mrf.mxu3 }
 0x142   : > { %v515_v41 = vpop.f32.mrf.mxu0  ;;  %v376_v6 = vadd.f32 %v370_v36, %v301_v0 }
 0x143   : > { %v523_v7 = vadd.f32 %v515_v41, %v449_v2 }
 0x144   : > { %v450_v16 = vadd.f32 %v444_v40, %v376_v6 }
 0x147   : > { %v657_v39 = vpop.f32.mrf.mxu2 }
 0x14a   : > { %v518_v51 = vpop.f32.mrf.mxu0 }
 0x14b   : > { %v524_v18 = vadd.f32 %v518_v51, %v450_v16 }
 0x14f   : > { %v583_v45 = vpop.f32.mrf.mxu1  ;;  %v660_v46 = vpop.f32.mrf.mxu2 }
 0x150   : > { %v731_v48 = vpop.f32.mrf.mxu3  ;;  %v595_v50 = vadd.f32 %v583_v45, %v521_v47 }
 0x152   : > { %v669_v54 = vadd.f32 %v657_v39, %v595_v50 }
 0x154   : > { %v743_v60 = vadd.f32 %v731_v48, %v669_v54 }
 0x157   : > { %v586_v55 = vpop.f32.mrf.mxu1  ;;  %v663_v56 = vpop.f32.mrf.mxu2 }
 0x158   : > { %v596_v61 = vadd.f32 %v586_v55, %v522_v57 }
 0x159   : > { %v734_v58 = vpop.f32.mrf.mxu3 }
 0x15a   : > { %v670_v3 = vadd.f32 %v660_v46, %v596_v61 }
 0x15b   : > { %v805_v62 = vpop.f32.mrf.mxu0 }
 0x15c   : > { %v817_v1 = vadd.f32 %v805_v62, %v743_v60  ;;  %v744_v11 = vadd.f32 %v734_v58, %v670_v3 }
 0x15e   : > { %v845_v4 = vadd.f32 %v828_v63, %v817_v1 }
 0x15f   : > { %v589_v5 = vpop.f32.mrf.mxu1  ;;  %v666_v10 = vpop.f32.mrf.mxu2 }
 0x160   : > { %vm849_vm2 = vcmp.ge.f32.partialorder %v845_v4, 0.0  ;;  %v853_v8 = vmul.f32 0.2, %v845_v4  ;;  %v597_v13 = vadd.f32 %v589_v5, %v523_v7 }
 0x161   : > { %v737_v9 = vpop.f32.mrf.mxu3 }
 0x162   : > { %v857_v12 = vsel %vm849_vm2, %v845_v4, %v853_v8  ;;  %v671_v19 = vadd.f32 %v663_v56, %v597_v13 }
 0x163   : > { %862 = vst.msk [vmem:[%s1453_s7] sm:$0xff] %vm861_vm1, %v857_v12  ;;  %v808_v14 = vpop.f32.mrf.mxu0 }
 0x164   : > { %v818_v17 = vadd.f32 %v808_v14, %v744_v11  ;;  %v745_v25 = vadd.f32 %v737_v9, %v671_v19 }
 0x166   : > { %v846_v20 = vadd.f32 %v833_v15, %v818_v17 }
 0x167   : > { %v592_v21 = vpop.f32.mrf.mxu1  ;;  %v814_v30 = vpop.f32.mrf.mxu2 }
 0x168   : > { %vm850_vm3 = vcmp.ge.f32.partialorder %v846_v20, 0.0  ;;  %v854_v22 = vmul.f32 0.2, %v846_v20  ;;  %v598_v23 = vadd.f32 %v592_v21, %v524_v18 }
 0x169   : > { %v740_v24 = vpop.f32.mrf.mxu3 }
 0x16a   : > { %v858_v26 = vsel %vm850_vm3, %v846_v20, %v854_v22  ;;  %v672_v27 = vadd.f32 %v666_v10, %v598_v23 }
 0x16b   : > { %863 = vst.msk [vmem:[%s1453_s7 + $0x8] sm:$0xff] %vm861_vm1, %v858_v26  ;;  %v811_v29 = vpop.f32.mrf.mxu0 }
 0x16c   : > { %v746_v31 = vadd.f32 %v740_v24, %v672_v27  ;;  %v819_v32 = vadd.f32 %v811_v29, %v745_v25 }
 0x16e   : > { %v847_v33 = vadd.f32 %v838_v28, %v819_v32  ;;  %v820_v34 = vadd.f32 %v814_v30, %v746_v31 }
 0x170   : > { %vm851_vm4 = vcmp.ge.f32.partialorder %v847_v33, 0.0  ;;  %v855_v36 = vmul.f32 0.2, %v847_v33  ;;  %v848_v37 = vadd.f32 %v843_v35, %v820_v34 }
 0x172   : > { %v859_v38 = vsel %vm851_vm4, %v847_v33, %v855_v36  ;;  %vm852_vm5 = vcmp.ge.f32.partialorder %v848_v37, 0.0  ;;  %v856_v39 = vmul.f32 0.2, %v848_v37 }
 0x173   : > { %864 = vst.msk [vmem:[%s1453_s7 + $0x10] sm:$0xff] %vm861_vm1, %v859_v38 }
 0x174   : > { %v860_v40 = vsel %vm852_vm5, %v848_v37, %v856_v39 }
 0x175   : > { %865 = vst.msk [vmem:[%s1453_s7 + $0x18] sm:$0xff] %vm861_vm1, %v860_v40 }
 0x176 PF: > { %s13_s12 = sadd.s32 1, %s1204_s12  }
 0x177   : > { %p10_p4 = scmp.ge.s32.totalorder %s13_s12, 8  }
 0x179   :  { %12 = sbr.rel (!%p10_p4) target bundleno = 1 (0x1), region = 70 }

// kernel: uconvlstm_forward.17
= control target key start
LH: loop header
LB: loop body
LE: loop exit
PB: predicated region body
PF: predicated region fallthrough
CT: control target
= control target key end

     0   :  { %s1235_s12 = smov 0   ;;  %s1466_s0 = inlined_call_operand.vmem [shape: f32[6,64,50], index: 0, kind: input, shape index: {}]   ;;  %s1467_s1 = inlined_call_operand.vmem [shape: f32[9,32,64], index: 1, kind: input, shape index: {}]   ;;  %s1468_s2 = inlined_call_operand.vmem [shape: f32[32,1], index: 2, kind: input, shape index: {}]   ;;  %s1469_s3 = inlined_call_operand.vmem [shape: f32[6,32,36], index: 3, kind: output, shape index: {}]  }
   0x1 LB: > { %s921_s13 = sadd.s32 4294967295, %s1204_s12   ;;  %p925_p0 = scmp.ge.s32.totalorder %s1204_s12, 1  ;;  %s1204_s12 = sphi %s1235_s12, %s13_s12  }
   0x2   : > { %p137_p1 = scmp.lt.s32.totalorder %s1204_s12, 7 }
   0x4   : > { %p138_p2 = pnand %p925_p0, %p137_p1 }
   0x5   : > { %p161_p3 = scmp.lt.s32.totalorder (!%p138_p2), %s921_s13, 5  ;;  %s1206_s18 = smov (!%p138_p2), 127  }
   0x6   : > { %141 = sbr.rel (%p138_p2) target bundleno = 374 (0x176), region = 32  ;;  %s1207_s19 = smov (!%p138_p2), 126  }
   0x7   : > { %s1208_s20 = smov (!%p138_p2), 122   ;;  %s1209_s21 = smov (!%p138_p2), 121  }
   0x8   : > { %s1210_s22 = smov (!%p138_p2), 116   ;;  %s1211_s23 = smov (!%p138_p2), 115  }
   0x9   : > { %s1212_s24 = smov (!%p138_p2), 120   ;;  %s1213_s25 = smov (!%p138_p2), 114  }
   0xb   : > { %s1471_s13 = smov (!%p161_p3, %s921_s13), 5  ;;  %v932_v39 = vld [vmem:[%s1467_s1 + $0x30] sm:$0xff]  ;;  %vm220_vm0 = vcmask 523264   ;;  %v930_v41 = vld [vmem:[%s1467_s1 + $0x20] sm:$0xff]  ;;  %v933_v49 = vld [vmem:[%s1467_s1 + $0x38] sm:$0xff]  ;;  %vm861_vm1 = vcmask 293888  }
   0xc   : > { %s1000_s14 = sshll.u32 %s1471_s13, 6  ;;  %v942_v51 = vld [vmem:[%s1467_s1 + $0x40] sm:$0xff]  ;;  %v931_v54 = vld [vmem:[%s1467_s1 + $0x28] sm:$0xff]  ;;  %s1001_s4 = sshll.u32 %s1471_s13, 5 }
   0xd   : > { %s165_s17 = scalar_lea.vmem %s1466_s0, %s1000_s14  ;;  %v950_v56 = vld [vmem:[%s1467_s1 + $0x60] sm:$0xff]  ;;  %v943_v62 = vld [vmem:[%s1467_s1 + $0x48] sm:$0xff]  ;;  %s1453_s7 = scalar_lea.vmem %s1469_s3, %s1001_s4 }
   0xe   : > { %v1249_v0 = vld [vmem:[%s165_s17 + $0x30] sm:$0xff]  ;;  %v1251_v1 = vld [vmem:[%s165_s17 + $0x38] sm:$0xff]  ;;  %v1261_v6 = vld [vmem:[%s165_s17] sm:$0xff] }
   0xf   : > { %v1253_v2 = vld [vmem:[%s165_s17 + $0x10] sm:$0xff]  ;;  %v1035_v3 = vpack.i.bf16 %v1249_v0, %v1251_v1  ;;  %v1257_v4 = vld [vmem:[%s165_s17 + $0x18] sm:$0xff]  ;;  %v1263_v7 = vld [vmem:[%s165_s17 + $0x8] sm:$0xff] }
  0x10   : > { %v1045_v5 = vpack.i.bf16 %v1253_v2, %v1257_v4  ;;  %v1055_v8 = vpack.i.bf16 %v1261_v6, %v1263_v7  ;;  %v1267_v9 = vld [vmem:[%s165_s17 + $0x20] sm:$0xff]  ;;  %v1269_v10 = vld [vmem:[%s165_s17 + $0x28] sm:$0xff] }
  0x11   : > { %1036 = vrot.lane.b32.xlu0 %v1035_v3, %s1206_s18  ;;  %v1040_v11 = vpack.i.bf16 %v1267_v9, %v1269_v10  ;;  %v179_v60 = vld [vmem:[%s1467_s1] sm:$0xff] }
  0x12   : > { %1046 = vrot.lane.b32.xlu1 %v1045_v5, %s1206_s18  ;;  %1056 = vrot.lane.b32.xlu2 %v1055_v8, %s1206_s18 }
  0x19   : > { %1041 = vrot.lane.b32.xlu0 %v1040_v11, %s1206_s18 }
  0x1a   : > { %1051 = vrot.lane.b32.xlu1 %v1035_v3, %s1207_s19  ;;  %1061 = vrot.lane.b32.xlu2 %v1040_v11, %s1207_s19 }
  0x21   : > { %1066 = vrot.lane.b32.xlu0 %v1035_v3, %s1208_s20 }
  0x22   : > { %1071 = vrot.lane.b32.xlu1 %v1045_v5, %s1207_s19  ;;  %1076 = vrot.lane.b32.xlu2 %v1040_v11, %s1208_s20 }
  0x29   : > { %1081 = vrot.lane.b32.xlu0 %v1055_v8, %s1207_s19 }
  0x2a   : > { %1086 = vrot.lane.b32.xlu1 %v1045_v5, %s1208_s20  ;;  %1091 = vrot.lane.b32.xlu2 %v1055_v8, %s1208_s20 }
  0x31   : > { %1096 = vrot.lane.b32.xlu0 %v1035_v3, %s1209_s21 }
  0x32   : > { %1101 = vrot.lane.b32.xlu1 %v1040_v11, %s1209_s21  ;;  %1106 = vrot.lane.b32.xlu2 %v1045_v5, %s1209_s21 }
  0x39   : > { %1111 = vrot.lane.b32.xlu0 %v1035_v3, %s1210_s22 }
  0x3a   : > { %1116 = vrot.lane.b32.xlu1 %v1055_v8, %s1209_s21  ;;  %1121 = vrot.lane.b32.xlu2 %v1040_v11, %s1210_s22 }
  0x41   : > { %1126 = vrot.lane.b32.xlu0 %v1035_v3, %s1211_s23 }
  0x42   : > { %1131 = vrot.lane.b32.xlu1 %v1035_v3, %s1212_s24  ;;  %1136 = vrot.lane.b32.xlu2 %v1045_v5, %s1210_s22 }
  0x49   : > { %1141 = vrot.lane.b32.xlu0 %v1040_v11, %s1211_s23 }
  0x4a   : > { %1146 = vrot.lane.b32.xlu1 %v1040_v11, %s1212_s24  ;;  %1151 = vrot.lane.b32.xlu2 %v1055_v8, %s1210_s22 }
  0x51   : > { %1156 = vrot.lane.b32.xlu0 %v1045_v5, %s1211_s23 }
  0x52   : > { %1161 = vrot.lane.b32.xlu1 %v1045_v5, %s1212_s24  ;;  %1166 = vrot.lane.b32.xlu2 %v1055_v8, %s1211_s23 }
  0x59   : > { %1171 = vrot.lane.b32.xlu0 %v1055_v8, %s1212_s24 }
  0x5a   : > { %1176 = vrot.lane.b32.xlu1 %v1035_v3, %s1213_s25  ;;  %1181 = vrot.lane.b32.xlu2 %v1040_v11, %s1213_s25  ;;  %v944_v11 = vld [vmem:[%s1467_s1 + $0x50] sm:$0xff] }
  0x61   : > { %1186 = vrot.lane.b32.xlu0 %v1045_v5, %s1213_s25 }
  0x62   : > { %1191 = vrot.lane.b32.xlu1 %v1055_v8, %s1213_s25 }
  0x6c   : > { %v1057_v12 = vpop.permute.xlu2 %1056 }
  0x6d   : > { %v1058_v32 = vunpack.i.l.bf16 %v1057_v12  ;;  %v1059_v36 = vunpack.i.h.bf16 %v1057_v12 }
  0x74   : > { %v1062_v13 = vpop.permute.xlu2 %1061 }
  0x75   : > { %v1063_v26 = vunpack.i.l.bf16 %v1062_v13  ;;  %v1064_v28 = vunpack.i.h.bf16 %v1062_v13 }
  0x7c   : > { %v1077_v14 = vpop.permute.xlu2 %1076 }
  0x7d   : > { %v1078_v40 = vunpack.i.l.bf16 %v1077_v14  ;;  %v1079_v42 = vunpack.i.h.bf16 %v1077_v14  ;;  %v958_v14 = vld [vmem:[%s1467_s1 + $0x80] sm:$0xff] }
  0x83   : > { %v1037_v15 = vpop.permute.xlu0 %1036 }
  0x84   : > { %v1047_v16 = vpop.permute.xlu1 %1046  ;;  %v1038_v17 = vunpack.i.l.bf16 %v1037_v15  ;;  %v1039_v18 = vunpack.i.h.bf16 %v1037_v15  ;;  %v1273_v22 = vpop.permute.xlu2 %1091 }
  0x85   : > { %v1048_v27 = vunpack.i.l.bf16 %v1047_v16  ;;  %v1049_v29 = vunpack.i.h.bf16 %v1047_v16  ;;  %v1093_v50 = vunpack.i.l.bf16 %v1273_v22  ;;  %v1094_v53 = vunpack.i.h.bf16 %v1273_v22  ;;  %v952_v16 = vld [vmem:[%s1467_s1 + $0x70] sm:$0xff] }
  0x86   : > { %241 = vmatpush.msra.mxu0 %v1038_v17  ;;  %1002 = vmatpush.msra.mxu1 %v1038_v17 }
  0x88   : > { %242 = vmatpush.msra.mxu0 %v1039_v18  ;;  %1003 = vmatpush.msra.mxu1 %v1039_v18 }
  0x8b   : > { %v1042_v19 = vpop.permute.xlu0 %1041 }
  0x8c   : > { %v1052_v20 = vpop.permute.xlu1 %1051  ;;  %v1043_v21 = vunpack.i.l.bf16 %v1042_v19  ;;  %v1044_v25 = vunpack.i.h.bf16 %v1042_v19  ;;  %v1275_v37 = vpop.permute.xlu2 %1106 }
  0x8d   : > { %v1053_v23 = vunpack.i.l.bf16 %v1052_v20  ;;  %v1054_v24 = vunpack.i.h.bf16 %v1052_v20 }
  0x8e   : > { %243 = vmatpush.msra.mxu0 %v1043_v21  ;;  %1004 = vmatpush.msra.mxu1 %v1043_v21 }
  0x8f   : > { %352 = vmatpush.msra.mxu2 %v1053_v23 }
  0x90   : > { %244 = vmatpush.msra.mxu0 %v1044_v25  ;;  %1005 = vmatpush.msra.mxu1 %v1044_v25 }
  0x91   : > { %353 = vmatpush.msra.mxu2 %v1054_v24  ;;  %v181_v24 = vld [vmem:[%s1467_s1 + $0x10] sm:$0xff] }
  0x92   : > { %245 = vmatpush.msra.mxu0 %v1048_v27  ;;  %1006 = vmatpush.msra.mxu1 %v1048_v27  ;;  %v945_v27 = vld [vmem:[%s1467_s1 + $0x58] sm:$0xff] }
  0x93   : > { %354 = vmatpush.msra.mxu2 %v1063_v26  ;;  %v1067_v30 = vpop.permute.xlu0 %1066 }
  0x94   : > { %v1072_v31 = vpop.permute.xlu1 %1071  ;;  %246 = vmatpush.msra.mxu0 %v1049_v29  ;;  %1007 = vmatpush.msra.mxu1 %v1049_v29  ;;  %v1068_v33 = vunpack.i.l.bf16 %v1067_v30  ;;  %v1069_v38 = vunpack.i.h.bf16 %v1067_v30  ;;  %v1295_v52 = vpop.permute.xlu2 %1121  ;;  %v959_v29 = vld [vmem:[%s1467_s1 + $0x88] sm:$0xff] }
  0x95   : > { %355 = vmatpush.msra.mxu2 %v1064_v28  ;;  %v1073_v34 = vunpack.i.l.bf16 %v1072_v31  ;;  %v1074_v35 = vunpack.i.h.bf16 %v1072_v31  ;;  %v1124_v12 = vunpack.i.h.bf16 %v1295_v52  ;;  %v953_v31 = vld [vmem:[%s1467_s1 + $0x78] sm:$0xff] }
  0x96   : > { %247 = vmatpush.msra.mxu0 %v1058_v32  ;;  %1008 = vmatpush.msra.mxu1 %v1058_v32 }
  0x97   : > { %356 = vmatpush.msra.mxu2 %v1073_v34  ;;  %426 = vmatpush.msra.mxu3 %v1068_v33 }
  0x98   : > { %248 = vmatpush.msra.mxu0 %v1059_v36  ;;  %1009 = vmatpush.msra.mxu1 %v1059_v36  ;;  %v182_v36 = vld [vmem:[%s1467_s1 + $0x18] sm:$0xff] }
  0x99   : > { %357 = vmatpush.msra.mxu2 %v1074_v35  ;;  %427 = vmatpush.msra.mxu3 %v1069_v38  ;;  %v974_v38 = vld [vmem:[%s1467_s1 + $0xc0] sm:$0xff] }
  0x9a   : > { %936 = vmatmul.msk.f32.vlgmr.msra.gmra.mxu1 %vm220_vm0, %v932_v39  ;;  %934 = vmatmul.msk.f32.vlgmr.msra.gmra.mxu0 %vm220_vm0, %v930_v41  ;;  %v960_v39 = vld [vmem:[%s1467_s1 + $0x90] sm:$0xff] }
  0x9b   : > { %282 = vmatpush.msrb.mxu1 %v1251_v1  ;;  %428 = vmatpush.msra.mxu3 %v1078_v40  ;;  %v1082_v43 = vpop.permute.xlu0 %1081 }
  0x9c   : > { %v1087_v44 = vpop.permute.xlu1 %1086  ;;  %v1083_v45 = vunpack.i.l.bf16 %v1082_v43  ;;  %v1084_v48 = vunpack.i.h.bf16 %v1082_v43 }
  0x9d   : > { %283 = vmatpush.msrb.mxu1 %v1249_v0  ;;  %429 = vmatpush.msra.mxu3 %v1079_v42  ;;  %v1088_v46 = vunpack.i.l.bf16 %v1087_v44  ;;  %v1089_v47 = vunpack.i.h.bf16 %v1087_v44  ;;  %v1137_v0 = vpop.permute.xlu2 %1136 }
  0x9e   : > { %358 = vmatpush.msra.mxu2 %v1083_v45  ;;  %v1138_v17 = vunpack.i.l.bf16 %v1137_v0  ;;  %v1139_v23 = vunpack.i.h.bf16 %v1137_v0  ;;  %v976_v0 = vld [vmem:[%s1467_s1 + $0xd0] sm:$0xff] }
  0x9f   : > { %284 = vmatpush.msrb.mxu1 %v1269_v10  ;;  %430 = vmatpush.msra.mxu3 %v1088_v46 }
  0xa0   : > { %359 = vmatpush.msra.mxu2 %v1084_v48 }
  0xa1   : > { %285 = vmatpush.msrb.mxu1 %v1267_v9  ;;  %431 = vmatpush.msra.mxu3 %v1089_v47  ;;  %v1123_v9 = vunpack.i.l.bf16 %v1295_v52 }
  0xa2   : > { %937 = vmatmul.msk.f32.gmra.mxu1 %vm220_vm0, %v933_v49  ;;  %946 = vmatmul.msk.f32.vlgmr.msra.gmra.mxu2 %vm220_vm0, %v942_v51  ;;  %v975_v49 = vld [vmem:[%s1467_s1 + $0xc8] sm:$0xff]  ;;  %v982_v51 = vld [vmem:[%s1467_s1 + $0xe0] sm:$0xff] }
  0xa3   : > { %286 = vmatpush.msrb.mxu1 %v1257_v4  ;;  %v1097_v55 = vpop.permute.xlu0 %1096  ;;  %432 = vmatpush.msra.mxu3 %v1093_v50  ;;  %v1108_v4 = vunpack.i.l.bf16 %v1275_v37  ;;  %v961_v50 = vld [vmem:[%s1467_s1 + $0x98] sm:$0xff] }
  0xa4   : > { %v1102_v57 = vpop.permute.xlu1 %1101  ;;  %v1098_v58 = vunpack.i.l.bf16 %v1097_v55  ;;  %935 = vmatmul.msk.f32.gmra.mxu0 %vm220_vm0, %v931_v54  ;;  %v1099_v59 = vunpack.i.h.bf16 %v1097_v55 }
  0xa5   : > { %287 = vmatpush.msrb.mxu1 %v1253_v2  ;;  %433 = vmatpush.msra.mxu3 %v1094_v53  ;;  %v1103_v61 = vunpack.i.l.bf16 %v1102_v57  ;;  %v1104_v63 = vunpack.i.h.bf16 %v1102_v57  ;;  %v951_v2 = vld [vmem:[%s1467_s1 + $0x68] sm:$0xff]  ;;  %v1152_v20 = vpop.permute.xlu2 %1151 }
  0xa6   : > { %500 = vmatpush.msrb.mxu0 %v1098_v58  ;;  %954 = vmatmul.msk.f32.vlgmr.msra.gmra.mxu3 %vm220_vm0, %v950_v56  ;;  %v1153_v25 = vunpack.i.l.bf16 %v1152_v20  ;;  %v1154_v28 = vunpack.i.h.bf16 %v1152_v20  ;;  %v992_v20 = vld [vmem:[%s1467_s1 + $0x110] sm:$0xff] }
  0xa7   : > { %288 = vmatpush.msrb.mxu1 %v1263_v7  ;;  %v180_v7 = vld [vmem:[%s1467_s1 + $0x8] sm:$0xff] }
  0xa8   : > { %501 = vmatpush.msrb.mxu0 %v1099_v59 }
  0xa9   : > { %289 = vmatpush.msrb.mxu1 %v1261_v6  ;;  %v1109_v6 = vunpack.i.h.bf16 %v1275_v37 }
  0xaa   : > { %938 = vmatmul.msk.f32.vlgmr.msrb.gmra.mxu1 %vm220_vm0, %v179_v60  ;;  %502 = vmatpush.msrb.mxu0 %v1103_v61  ;;  %v966_v60 = vld [vmem:[%s1467_s1 + $0xa0] sm:$0xff]  ;;  %v822_v61 = vld [vmem:[%s1468_s2 + $0x8] sm:$0xff] }
  0xab   : > { %v1112_v1 = vpop.permute.xlu0 %1111  ;;  %947 = vmatmul.msk.f32.gmra.mxu2 %vm220_vm0, %v943_v62  ;;  %v1214_v62 = vmov 0  }
  0xac   : > { %v1117_v3 = vpop.permute.xlu1 %1116  ;;  %503 = vmatpush.msrb.mxu0 %v1104_v63  ;;  %v1113_v5 = vunpack.i.l.bf16 %v1112_v1  ;;  %v1114_v8 = vunpack.i.h.bf16 %v1112_v1  ;;  %1196 = vset.pattern.permute.xlu0 %v1214_v62 }
  0xad   : > { %v1118_v10 = vunpack.i.l.bf16 %v1117_v3  ;;  %v1119_v13 = vunpack.i.h.bf16 %v1117_v3  ;;  %v1167_v40 = vpop.permute.xlu2 %1166  ;;  %832 = vperm.xlu0 %1196, %v822_v61   ;;  %v823_v3 = vld [vmem:[%s1468_s2 + $0x10] sm:$0xff]  ;;  %1197 = vset.pattern.permute.xlu1 %v1214_v62 }
  0xae   : > { %504 = vmatpush.msrb.mxu0 %v1108_v4  ;;  %955 = vmatmul.msk.f32.gmra.mxu3 %vm220_vm0, %v951_v2  ;;  %v1168_v47 = vunpack.i.l.bf16 %v1167_v40  ;;  %v1169_v48 = vunpack.i.h.bf16 %v1167_v40  ;;  %v983_v2 = vld [vmem:[%s1467_s1 + $0xe8] sm:$0xff] }
  0xaf   : > { %648 = vmatpush.msrb.mxu2 %v1113_v5  ;;  %837 = vperm.xlu1 %1197, %v823_v3  }
  0xb0   : > { %505 = vmatpush.msrb.mxu0 %v1109_v6  ;;  %1195 = vset.pattern.permute.xlu2 %v1214_v62 }
  0xb1   : > { %649 = vmatpush.msrb.mxu2 %v1114_v8  ;;  %v967_v8 = vld [vmem:[%s1467_s1 + $0xa8] sm:$0xff] }
  0xb2   : > { %939 = vmatmul.msk.f32.gmra.mxu1 %vm220_vm0, %v180_v7  ;;  %506 = vmatpush.msrb.mxu0 %v1118_v10 }
  0xb3   : > { %v1127_v15 = vpop.permute.xlu0 %1126  ;;  %650 = vmatpush.msrb.mxu2 %v1123_v9  ;;  %v821_v9 = vld [vmem:[%s1468_s2] sm:$0xff] }
  0xb4   : > { %v1132_v18 = vpop.permute.xlu1 %1131  ;;  %507 = vmatpush.msrb.mxu0 %v1119_v13  ;;  %948 = vmatmul.msk.f32.gmra.mxu2 %vm220_vm0, %v944_v11  ;;  %v1128_v19 = vunpack.i.l.bf16 %v1127_v15  ;;  %v1129_v26 = vunpack.i.h.bf16 %v1127_v15  ;;  %v977_v11 = vld [vmem:[%s1467_s1 + $0xd8] sm:$0xff]  ;;  %v984_v13 = vld [vmem:[%s1467_s1 + $0xf0] sm:$0xff] }
  0xb5   : > { %v1134_v21 = vunpack.i.h.bf16 %v1132_v18  ;;  %v1133_v22 = vunpack.i.l.bf16 %v1132_v18  ;;  %962 = vmatmul.msk.f32.vlgmr.msrb.gmra.mxu0 %vm220_vm0, %v958_v14  ;;  %651 = vmatpush.msrb.mxu2 %v1124_v12  ;;  %v1182_v55 = vpop.permute.xlu2 %1181  ;;  %v990_v12 = vld [vmem:[%s1467_s1 + $0x100] sm:$0xff]  ;;  %v968_v14 = vld [vmem:[%s1467_s1 + $0xb0] sm:$0xff]  ;;  %v824_v15 = vld [vmem:[%s1468_s2 + $0x18] sm:$0xff] }
  0xb6   : > { %956 = vmatmul.msk.f32.gmra.mxu3 %vm220_vm0, %v952_v16  ;;  %v1183_v59 = vunpack.i.l.bf16 %v1182_v55  ;;  %v1184_v63 = vunpack.i.h.bf16 %v1182_v55  ;;  %827 = vperm.xlu2 %1195, %v821_v9   ;;  %v993_v16 = vld [vmem:[%s1467_s1 + $0x118] sm:$0xff] }
  0xb7   : > { %574 = vmatpush.msra.mxu1 %v1133_v22  ;;  %652 = vmatpush.msrb.mxu2 %v1138_v17  ;;  %v991_v17 = vld [vmem:[%s1467_s1 + $0x108] sm:$0xff]  ;;  %v985_v18 = vld [vmem:[%s1467_s1 + $0xf8] sm:$0xff] }
  0xb8   : > { %722 = vmatpush.msrb.mxu3 %v1128_v19  ;;  %v969_v19 = vld [vmem:[%s1467_s1 + $0xb8] sm:$0xff] }
  0xb9   : > { %575 = vmatpush.msra.mxu1 %v1134_v21  ;;  %653 = vmatpush.msrb.mxu2 %v1139_v23 }
  0xba   : > { %940 = vmatmul.msk.f32.gmra.mxu1 %vm220_vm0, %v181_v24  ;;  %723 = vmatpush.msrb.mxu3 %v1129_v26 }
  0xbb   : > { %v1142_v30 = vpop.permute.xlu0 %1141  ;;  %654 = vmatpush.msrb.mxu2 %v1153_v25 }
  0xbc   : > { %v1147_v32 = vpop.permute.xlu1 %1146  ;;  %949 = vmatmul.msk.f32.gmra.mxu2 %vm220_vm0, %v945_v27  ;;  %v1143_v33 = vunpack.i.l.bf16 %v1142_v30  ;;  %v1144_v37 = vunpack.i.h.bf16 %v1142_v30 }
  0xbd   : > { %v1149_v34 = vunpack.i.h.bf16 %v1147_v32  ;;  %v1148_v35 = vunpack.i.l.bf16 %v1147_v32  ;;  %963 = vmatmul.msk.f32.gmra.mxu0 %vm220_vm0, %v959_v29  ;;  %655 = vmatpush.msrb.mxu2 %v1154_v28 }
  0xbe   : > { %957 = vmatmul.msk.f32.gmra.mxu3 %vm220_vm0, %v953_v31  ;;  %842 = vperm.xlu2 %1195, %v824_v15  }
  0xbf   : > { %576 = vmatpush.msra.mxu1 %v1148_v35  ;;  %724 = vmatpush.msrb.mxu3 %v1143_v33 }
  0xc1   : > { %577 = vmatpush.msra.mxu1 %v1149_v34  ;;  %725 = vmatpush.msrb.mxu3 %v1144_v37 }
  0xc2   : > { %941 = vmatmul.msk.f32.gmra.mxu1 %vm220_vm0, %v182_v36 }
  0xc3   : > { %v1157_v41 = vpop.permute.xlu0 %1156 }
  0xc4   : > { %v1162_v42 = vpop.permute.xlu1 %1161  ;;  %v1158_v43 = vunpack.i.l.bf16 %v1157_v41  ;;  %978 = vmatmul.msk.f32.vlgmr.msrb.gmra.mxu2 %vm220_vm0, %v974_v38  ;;  %v1159_v46 = vunpack.i.h.bf16 %v1157_v41 }
  0xc5   : > { %v1164_v44 = vunpack.i.h.bf16 %v1162_v42  ;;  %v1163_v45 = vunpack.i.l.bf16 %v1162_v42  ;;  %964 = vmatmul.msk.f32.gmra.mxu0 %vm220_vm0, %v960_v39 }
  0xc6   : > { %726 = vmatpush.msrb.mxu3 %v1158_v43 }
  0xc7   : > { %578 = vmatpush.msra.mxu1 %v1163_v45 }
  0xc8   : > { %727 = vmatpush.msrb.mxu3 %v1159_v46 }
  0xc9   : > { %579 = vmatpush.msra.mxu1 %v1164_v44 }
  0xca   : > { %728 = vmatpush.msrb.mxu3 %v1168_v47 }
  0xcb   : > { %v1172_v52 = vpop.permute.xlu0 %1171 }
  0xcc   : > { %v1177_v53 = vpop.permute.xlu1 %1176  ;;  %v1173_v54 = vunpack.i.l.bf16 %v1172_v52  ;;  %729 = vmatpush.msrb.mxu3 %v1169_v48  ;;  %979 = vmatmul.msk.f32.gmra.mxu2 %vm220_vm0, %v975_v49  ;;  %v1174_v58 = vunpack.i.h.bf16 %v1172_v52 }
  0xcd   : > { %v1179_v56 = vunpack.i.h.bf16 %v1177_v53  ;;  %v1178_v57 = vunpack.i.l.bf16 %v1177_v53  ;;  %965 = vmatmul.msk.f32.gmra.mxu0 %vm220_vm0, %v961_v50  ;;  %986 = vmatmul.msk.f32.vlgmr.msrb.gmra.mxu3 %vm220_vm0, %v982_v51 }
  0xce   : > { %580 = vmatpush.msra.mxu1 %v1173_v54 }
  0xcf   : > { %796 = vmatpush.msra.mxu0 %v1178_v57  ;;  %1010 = vmatpush.msra.mxu2 %v1178_v57 }
  0xd0   : > { %581 = vmatpush.msra.mxu1 %v1174_v58 }
  0xd1   : > { %797 = vmatpush.msra.mxu0 %v1179_v56  ;;  %1011 = vmatpush.msra.mxu2 %v1179_v56 }
  0xd2   : > { %970 = vmatmul.msk.f32.vlgmr.msra.gmra.mxu1 %vm220_vm0, %v966_v60 }
  0xd3   : > { %798 = vmatpush.msra.mxu0 %v1183_v59  ;;  %v1187_v1 = vpop.permute.xlu0 %1186  ;;  %1012 = vmatpush.msra.mxu2 %v1183_v59 }
  0xd4   : > { %v1188_v4 = vunpack.i.l.bf16 %v1187_v1  ;;  %v1192_v5 = vpop.permute.xlu1 %1191  ;;  %980 = vmatmul.msk.f32.gmra.mxu2 %vm220_vm0, %v976_v0  ;;  %v1189_v6 = vunpack.i.h.bf16 %v1187_v1 }
  0xd5   : > { %799 = vmatpush.msra.mxu0 %v1184_v63  ;;  %1013 = vmatpush.msra.mxu2 %v1184_v63  ;;  %v1193_v7 = vunpack.i.l.bf16 %v1192_v5  ;;  %v1194_v10 = vunpack.i.h.bf16 %v1192_v5 }
  0xd6   : > { %987 = vmatmul.msk.f32.gmra.mxu3 %vm220_vm0, %v983_v2 }
  0xd7   : > { %800 = vmatpush.msra.mxu0 %v1188_v4  ;;  %1014 = vmatpush.msra.mxu2 %v1188_v4 }
  0xd9   : > { %801 = vmatpush.msra.mxu0 %v1189_v6  ;;  %1015 = vmatpush.msra.mxu2 %v1189_v6 }
  0xda   : > { %971 = vmatmul.msk.f32.gmra.mxu1 %vm220_vm0, %v967_v8 }
  0xdb   : > { %802 = vmatpush.msra.mxu0 %v1193_v7  ;;  %1016 = vmatpush.msra.mxu2 %v1193_v7 }
  0xdc   : > { %981 = vmatmul.msk.f32.gmra.mxu2 %vm220_vm0, %v977_v11 }
  0xdd   : > { %803 = vmatpush.msra.mxu0 %v1194_v10  ;;  %1017 = vmatpush.msra.mxu2 %v1194_v10 }
  0xde   : > { %994 = vmatmul.msk.f32.vlgmr.msra.gmra.mxu0 %vm220_vm0, %v990_v12  ;;  %988 = vmatmul.msk.f32.gmra.mxu3 %vm220_vm0, %v984_v13 }
  0xe2   : > { %972 = vmatmul.msk.f32.gmra.mxu1 %vm220_vm0, %v968_v14 }
  0xe4   : > { %997 = vmatmul.msk.f32.vlgmr.msra.gmra.mxu2 %vm220_vm0, %v993_v16 }
  0xe6   : > { %995 = vmatmul.msk.f32.gmra.mxu0 %vm220_vm0, %v991_v17  ;;  %989 = vmatmul.msk.f32.gmra.mxu3 %vm220_vm0, %v985_v18 }
  0xea   : > { %973 = vmatmul.msk.f32.gmra.mxu1 %vm220_vm0, %v969_v19 }
  0xee   : > { %996 = vmatmul.msk.f32.gmra.mxu0 %vm220_vm0, %v992_v20 }
 0x110   : > { %v828_v63 = vpop.permute.xlu2 %827 }
 0x117   : > { %v256_v21 = vpop.f32.mrf.mxu1  ;;  %v250_v23 = vpop.f32.mrf.mxu0 }
 0x11f   : > { %v259_v22 = vpop.f32.mrf.mxu1  ;;  %v833_v15 = vpop.permute.xlu0 %832 }
 0x121   : > { %v253_v27 = vpop.f32.mrf.mxu0 }
 0x125   : > { %v361_v24 = vpop.f32.mrf.mxu2 }
 0x127   : > { %v291_v25 = vpop.f32.mrf.mxu1 }
 0x128   : > { %v292_v37 = vadd.f32 %v291_v25, %v250_v23 }
 0x129   : > { %v435_v26 = vpop.f32.mrf.mxu3 }
 0x12a   : > { %v373_v42 = vadd.f32 %v361_v24, %v292_v37 }
 0x12c   : > { %v447_v43 = vadd.f32 %v435_v26, %v373_v42 }
 0x12e   : > { %v364_v28 = vpop.f32.mrf.mxu2 }
 0x12f   : > { %v294_v29 = vpop.f32.mrf.mxu1 }
 0x130   : > { %v295_v44 = vadd.f32 %v294_v29, %v253_v27 }
 0x131   : > { %v438_v30 = vpop.f32.mrf.mxu3 }
 0x132   : > { %v509_v31 = vpop.f32.mrf.mxu0  ;;  %v374_v49 = vadd.f32 %v364_v28, %v295_v44  ;;  %v838_v28 = vpop.permute.xlu1 %837 }
 0x133   : > { %v521_v47 = vadd.f32 %v509_v31, %v447_v43 }
 0x134   : > { %v448_v52 = vadd.f32 %v438_v30, %v374_v49 }
 0x137   : > { %v367_v32 = vpop.f32.mrf.mxu2  ;;  %v297_v33 = vpop.f32.mrf.mxu1 }
 0x138   : > { %v298_v53 = vadd.f32 %v297_v33, %v256_v21 }
 0x139   : > { %v441_v34 = vpop.f32.mrf.mxu3 }
 0x13a   : > { %v512_v35 = vpop.f32.mrf.mxu0  ;;  %v375_v59 = vadd.f32 %v367_v32, %v298_v53 }
 0x13b   : > { %v522_v57 = vadd.f32 %v512_v35, %v448_v52  ;;  %v843_v35 = vpop.permute.xlu2 %842 }
 0x13c   : > { %v449_v2 = vadd.f32 %v441_v34, %v375_v59 }
 0x13f   : > { %v370_v36 = vpop.f32.mrf.mxu2  ;;  %v300_v38 = vpop.f32.mrf.mxu1 }
 0x140   : > { %v301_v0 = vadd.f32 %v300_v38, %v259_v22 }
 0x141   : > { %v444_v40 = vpop.f32.mrf.mxu3 }
 0x142   : > { %v515_v41 = vpop.f32.mrf.mxu0  ;;  %v376_v6 = vadd.f32 %v370_v36, %v301_v0 }
 0x143   : > { %v523_v7 = vadd.f32 %v515_v41, %v449_v2 }
 0x144   : > { %v450_v16 = vadd.f32 %v444_v40, %v376_v6 }
 0x147   : > { %v657_v39 = vpop.f32.mrf.mxu2 }
 0x14a   : > { %v518_v51 = vpop.f32.mrf.mxu0 }
 0x14b   : > { %v524_v18 = vadd.f32 %v518_v51, %v450_v16 }
 0x14f   : > { %v583_v45 = vpop.f32.mrf.mxu1  ;;  %v660_v46 = vpop.f32.mrf.mxu2 }
 0x150   : > { %v731_v48 = vpop.f32.mrf.mxu3  ;;  %v595_v50 = vadd.f32 %v583_v45, %v521_v47 }
 0x152   : > { %v669_v54 = vadd.f32 %v657_v39, %v595_v50 }
 0x154   : > { %v743_v60 = vadd.f32 %v731_v48, %v669_v54 }
 0x157   : > { %v586_v55 = vpop.f32.mrf.mxu1  ;;  %v663_v56 = vpop.f32.mrf.mxu2 }
 0x158   : > { %v596_v61 = vadd.f32 %v586_v55, %v522_v57 }
 0x159   : > { %v734_v58 = vpop.f32.mrf.mxu3 }
 0x15a   : > { %v670_v3 = vadd.f32 %v660_v46, %v596_v61 }
 0x15b   : > { %v805_v62 = vpop.f32.mrf.mxu0 }
 0x15c   : > { %v817_v1 = vadd.f32 %v805_v62, %v743_v60  ;;  %v744_v11 = vadd.f32 %v734_v58, %v670_v3 }
 0x15e   : > { %v845_v4 = vadd.f32 %v828_v63, %v817_v1 }
 0x15f   : > { %v589_v5 = vpop.f32.mrf.mxu1  ;;  %v666_v10 = vpop.f32.mrf.mxu2 }
 0x160   : > { %vm849_vm2 = vcmp.ge.f32.partialorder %v845_v4, 0.0  ;;  %v853_v8 = vmul.f32 0.2, %v845_v4  ;;  %v597_v13 = vadd.f32 %v589_v5, %v523_v7 }
 0x161   : > { %v737_v9 = vpop.f32.mrf.mxu3 }
 0x162   : > { %v857_v12 = vsel %vm849_vm2, %v845_v4, %v853_v8  ;;  %v671_v19 = vadd.f32 %v663_v56, %v597_v13 }
 0x163   : > { %862 = vst.msk [vmem:[%s1453_s7] sm:$0xff] %vm861_vm1, %v857_v12  ;;  %v808_v14 = vpop.f32.mrf.mxu0 }
 0x164   : > { %v818_v17 = vadd.f32 %v808_v14, %v744_v11  ;;  %v745_v25 = vadd.f32 %v737_v9, %v671_v19 }
 0x166   : > { %v846_v20 = vadd.f32 %v833_v15, %v818_v17 }
 0x167   : > { %v592_v21 = vpop.f32.mrf.mxu1  ;;  %v814_v30 = vpop.f32.mrf.mxu2 }
 0x168   : > { %vm850_vm3 = vcmp.ge.f32.partialorder %v846_v20, 0.0  ;;  %v854_v22 = vmul.f32 0.2, %v846_v20  ;;  %v598_v23 = vadd.f32 %v592_v21, %v524_v18 }
 0x169   : > { %v740_v24 = vpop.f32.mrf.mxu3 }
 0x16a   : > { %v858_v26 = vsel %vm850_vm3, %v846_v20, %v854_v22  ;;  %v672_v27 = vadd.f32 %v666_v10, %v598_v23 }
 0x16b   : > { %863 = vst.msk [vmem:[%s1453_s7 + $0x8] sm:$0xff] %vm861_vm1, %v858_v26  ;;  %v811_v29 = vpop.f32.mrf.mxu0 }
 0x16c   : > { %v746_v31 = vadd.f32 %v740_v24, %v672_v27  ;;  %v819_v32 = vadd.f32 %v811_v29, %v745_v25 }
 0x16e   : > { %v847_v33 = vadd.f32 %v838_v28, %v819_v32  ;;  %v820_v34 = vadd.f32 %v814_v30, %v746_v31 }
 0x170   : > { %vm851_vm4 = vcmp.ge.f32.partialorder %v847_v33, 0.0  ;;  %v855_v36 = vmul.f32 0.2, %v847_v33  ;;  %v848_v37 = vadd.f32 %v843_v35, %v820_v34 }
 0x172   : > { %v859_v38 = vsel %vm851_vm4, %v847_v33, %v855_v36  ;;  %vm852_vm5 = vcmp.ge.f32.partialorder %v848_v37, 0.0  ;;  %v856_v39 = vmul.f32 0.2, %v848_v37 }
 0x173   : > { %864 = vst.msk [vmem:[%s1453_s7 + $0x10] sm:$0xff] %vm861_vm1, %v859_v38 }
 0x174   : > { %v860_v40 = vsel %vm852_vm5, %v848_v37, %v856_v39 }
 0x175   : > { %865 = vst.msk [vmem:[%s1453_s7 + $0x18] sm:$0xff] %vm861_vm1, %v860_v40 }
 0x176 PF: > { %s13_s12 = sadd.s32 1, %s1204_s12  }
 0x177   : > { %p10_p4 = scmp.ge.s32.totalorder %s13_s12, 8  }
 0x179   :  { %12 = sbr.rel (!%p10_p4) target bundleno = 1 (0x1), region = 70 }

// kernel: uconvlstm_forward.18
= control target key start
LH: loop header
LB: loop body
LE: loop exit
PB: predicated region body
PF: predicated region fallthrough
CT: control target
= control target key end

     0   :  { %s1138_s12 = smov 0   ;;  %s1357_s0 = inlined_call_operand.vmem [shape: f32[6,48,122], index: 0, kind: input, shape index: {}]   ;;  %s1358_s1 = inlined_call_operand.vmem [shape: f32[9,32,48], index: 1, kind: input, shape index: {}]   ;;  %s1359_s2 = inlined_call_operand.vmem [shape: f32[32,1], index: 2, kind: input, shape index: {}]   ;;  %s1360_s3 = inlined_call_operand.vmem [shape: f32[6,32,100], index: 3, kind: output, shape index: {}]  }
   0x1 LB: > { %s869_s13 = sadd.s32 4294967295, %s1107_s12   ;;  %p873_p0 = scmp.ge.s32.totalorder %s1107_s12, 1  ;;  %s1107_s12 = sphi %s1138_s12, %s13_s12  }
   0x2   : > { %p137_p1 = scmp.lt.s32.totalorder %s1107_s12, 7 }
   0x4   : > { %p138_p2 = pnand %p873_p0, %p137_p1 }
   0x5   : > { %p161_p3 = scmp.lt.s32.totalorder (!%p138_p2), %s869_s13, 5  ;;  %s1109_s18 = smov (!%p138_p2), 127  }
   0x6   : > { %141 = sbr.rel (%p138_p2) target bundleno = 362 (0x16a), region = 32  ;;  %s1110_s19 = smov (!%p138_p2), 126  }
   0x7   : > { %s1111_s20 = smov (!%p138_p2), 118   ;;  %s1112_s21 = smov (!%p138_p2), 117  }
   0x8   : > { %s1113_s22 = smov (!%p138_p2), 108   ;;  %s1114_s23 = smov (!%p138_p2), 107  }
   0x9   : > { %s1115_s24 = smov (!%p138_p2), 116   ;;  %s1116_s25 = smov (!%p138_p2), 106  }
   0xb   : > { %s1362_s13 = smov (!%p161_p3, %s869_s13), 5  ;;  %v879_v28 = vld [vmem:[%s1358_s1 + $0x30] sm:$0xff]  ;;  %vm210_vm0 = vcmask 392192   ;;  %v877_v31 = vld [vmem:[%s1358_s1 + $0x20] sm:$0xff]  ;;  %v880_v41 = vld [vmem:[%s1358_s1 + $0x38] sm:$0xff]  ;;  %vm809_vm1 = vcmask 818176  }
   0xc   : > { %s960_s14 = smul.u32 48, %s1362_s13  ;;  %v889_v39 = vld [vmem:[%s1358_s1 + $0x40] sm:$0xff]  ;;  %v878_v46 = vld [vmem:[%s1358_s1 + $0x28] sm:$0xff]  ;;  %s947_s4 = sshll.u32 %s1362_s13, 5 }
   0xd   : > { %v897_v47 = vld [vmem:[%s1358_s1 + $0x60] sm:$0xff]  ;;  %v890_v51 = vld [vmem:[%s1358_s1 + $0x48] sm:$0xff]  ;;  %s1344_s7 = scalar_lea.vmem %s1360_s3, %s947_s4 }
   0xe   : > { %s165_s17 = scalar_lea.vmem %s1357_s0, %s960_s14  ;;  %v177_v55 = vld [vmem:[%s1358_s1] sm:$0xff]  ;;  %v898_v62 = vld [vmem:[%s1358_s1 + $0x68] sm:$0xff] }
   0xf   : > { %v1152_v0 = vld [vmem:[%s165_s17 + $0x20] sm:$0xff]  ;;  %v1154_v1 = vld [vmem:[%s165_s17 + $0x28] sm:$0xff]  ;;  %v1164_v6 = vld [vmem:[%s165_s17 + $0x10] sm:$0xff] }
  0x10   : > { %v1156_v2 = vld [vmem:[%s165_s17] sm:$0xff]  ;;  %v978_v3 = vpack.i.bf16 %v1152_v0, %v1154_v1  ;;  %v1160_v4 = vld [vmem:[%s165_s17 + $0x8] sm:$0xff]  ;;  %v1166_v7 = vld [vmem:[%s165_s17 + $0x18] sm:$0xff] }
  0x11   : > { %v988_v5 = vpack.i.bf16 %v1156_v2, %v1160_v4  ;;  %v998_v8 = vpack.i.bf16 %v1164_v6, %v1166_v7 }
  0x12   : > { %979 = vrot.lane.b32.xlu0 %v978_v3, %s1109_s18 }
  0x13   : > { %989 = vrot.lane.b32.xlu1 %v988_v5, %s1109_s18  ;;  %999 = vrot.lane.b32.xlu2 %v998_v8, %s1110_s19 }
  0x1a   : > { %984 = vrot.lane.b32.xlu0 %v998_v8, %s1109_s18 }
  0x1b   : > { %994 = vrot.lane.b32.xlu1 %v978_v3, %s1110_s19  ;;  %1004 = vrot.lane.b32.xlu2 %v978_v3, %s1111_s20 }
  0x22   : > { %1009 = vrot.lane.b32.xlu0 %v988_v5, %s1110_s19 }
  0x23   : > { %1014 = vrot.lane.b32.xlu1 %v998_v8, %s1111_s20  ;;  %1019 = vrot.lane.b32.xlu2 %v988_v5, %s1111_s20 }
  0x2a   : > { %1024 = vrot.lane.b32.xlu0 %v978_v3, %s1112_s21 }
  0x2b   : > { %1029 = vrot.lane.b32.xlu1 %v998_v8, %s1112_s21  ;;  %1034 = vrot.lane.b32.xlu2 %v988_v5, %s1112_s21 }
  0x32   : > { %1039 = vrot.lane.b32.xlu0 %v978_v3, %s1113_s22 }
  0x33   : > { %1044 = vrot.lane.b32.xlu1 %v998_v8, %s1113_s22  ;;  %1049 = vrot.lane.b32.xlu2 %v978_v3, %s1114_s23 }
  0x3a   : > { %1054 = vrot.lane.b32.xlu0 %v978_v3, %s1115_s24 }
  0x3b   : > { %1059 = vrot.lane.b32.xlu1 %v988_v5, %s1113_s22  ;;  %1064 = vrot.lane.b32.xlu2 %v998_v8, %s1114_s23 }
  0x42   : > { %1069 = vrot.lane.b32.xlu0 %v998_v8, %s1115_s24 }
  0x43   : > { %1074 = vrot.lane.b32.xlu1 %v988_v5, %s1114_s23  ;;  %1079 = vrot.lane.b32.xlu2 %v988_v5, %s1115_s24 }
  0x4a   : > { %1084 = vrot.lane.b32.xlu0 %v978_v3, %s1116_s25 }
  0x4b   : > { %1089 = vrot.lane.b32.xlu1 %v998_v8, %s1116_s25  ;;  %1094 = vrot.lane.b32.xlu2 %v988_v5, %s1116_s25 }
  0x6d   : > { %v1000_v9 = vpop.permute.xlu2 %999 }
  0x6e   : > { %v1001_v26 = vunpack.i.l.bf16 %v1000_v9  ;;  %v1002_v30 = vunpack.i.h.bf16 %v1000_v9  ;;  %v899_v9 = vld [vmem:[%s1358_s1 + $0x70] sm:$0xff] }
  0x75   : > { %v1005_v10 = vpop.permute.xlu2 %1004 }
  0x76   : > { %v1006_v11 = vunpack.i.l.bf16 %v1005_v10  ;;  %v1007_v12 = vunpack.i.h.bf16 %v1005_v10 }
  0x78   : > { %406 = vmatpush.msra.mxu3 %v1006_v11 }
  0x7a   : > { %407 = vmatpush.msra.mxu3 %v1007_v12  ;;  %v906_v12 = vld [vmem:[%s1358_s1 + $0x88] sm:$0xff] }
  0x7d   : > { %v1170_v13 = vpop.permute.xlu2 %1019 }
  0x7e   : > { %v1021_v38 = vunpack.i.l.bf16 %v1170_v13  ;;  %v1022_v40 = vunpack.i.h.bf16 %v1170_v13  ;;  %v892_v13 = vld [vmem:[%s1358_s1 + $0x58] sm:$0xff] }
  0x84   : > { %v980_v14 = vpop.permute.xlu0 %979 }
  0x85   : > { %v990_v15 = vpop.permute.xlu1 %989  ;;  %v981_v16 = vunpack.i.l.bf16 %v980_v14  ;;  %v982_v17 = vunpack.i.h.bf16 %v980_v14  ;;  %v1172_v18 = vpop.permute.xlu2 %1034  ;;  %v179_v14 = vld [vmem:[%s1358_s1 + $0x10] sm:$0xff] }
  0x86   : > { %v991_v25 = vunpack.i.l.bf16 %v990_v15  ;;  %v992_v27 = vunpack.i.h.bf16 %v990_v15  ;;  %v1036_v56 = vunpack.i.l.bf16 %v1172_v18  ;;  %v1037_v59 = vunpack.i.h.bf16 %v1172_v18 }
  0x87   : > { %233 = vmatpush.msra.mxu0 %v981_v16  ;;  %948 = vmatpush.msra.mxu1 %v981_v16 }
  0x89   : > { %234 = vmatpush.msra.mxu0 %v982_v17  ;;  %949 = vmatpush.msra.mxu1 %v982_v17 }
  0x8c   : > { %v985_v19 = vpop.permute.xlu0 %984 }
  0x8d   : > { %v995_v20 = vpop.permute.xlu1 %994  ;;  %v986_v21 = vunpack.i.l.bf16 %v985_v19  ;;  %v987_v24 = vunpack.i.h.bf16 %v985_v19  ;;  %v1050_v34 = vpop.permute.xlu2 %1049  ;;  %v900_v19 = vld [vmem:[%s1358_s1 + $0x78] sm:$0xff] }
  0x8e   : > { %v996_v22 = vunpack.i.l.bf16 %v995_v20  ;;  %v997_v23 = vunpack.i.h.bf16 %v995_v20  ;;  %v1051_v48 = vunpack.i.l.bf16 %v1050_v34  ;;  %v1052_v52 = vunpack.i.h.bf16 %v1050_v34  ;;  %v929_v34 = vld [vmem:[%s1358_s1 + $0xe0] sm:$0xff] }
  0x8f   : > { %235 = vmatpush.msra.mxu0 %v986_v21  ;;  %950 = vmatpush.msra.mxu1 %v986_v21 }
  0x90   : > { %338 = vmatpush.msra.mxu2 %v996_v22  ;;  %v769_v22 = vld [vmem:[%s1359_s2] sm:$0xff] }
  0x91   : > { %236 = vmatpush.msra.mxu0 %v987_v24  ;;  %951 = vmatpush.msra.mxu1 %v987_v24 }
  0x92   : > { %339 = vmatpush.msra.mxu2 %v997_v23  ;;  %v907_v23 = vld [vmem:[%s1358_s1 + $0x90] sm:$0xff] }
  0x93   : > { %237 = vmatpush.msra.mxu0 %v991_v25  ;;  %952 = vmatpush.msra.mxu1 %v991_v25  ;;  %v1117_v25 = vmov 0  }
  0x94   : > { %340 = vmatpush.msra.mxu2 %v1001_v26  ;;  %v1010_v29 = vpop.permute.xlu0 %1009  ;;  %1098 = vset.pattern.permute.xlu0 %v1117_v25 }
  0x95   : > { %238 = vmatpush.msra.mxu0 %v992_v27  ;;  %953 = vmatpush.msra.mxu1 %v992_v27  ;;  %v1015_v32 = vpop.permute.xlu1 %1014  ;;  %v1011_v33 = vunpack.i.l.bf16 %v1010_v29  ;;  %v1012_v35 = vunpack.i.h.bf16 %v1010_v29  ;;  %v1065_v50 = vpop.permute.xlu2 %1064  ;;  %v921_v27 = vld [vmem:[%s1358_s1 + $0xc0] sm:$0xff] }
  0x96   : > { %341 = vmatpush.msra.mxu2 %v1002_v30  ;;  %883 = vmatmul.msk.f32.vlgmr.msra.gmra.mxu1 %vm210_vm0, %v879_v28  ;;  %v1016_v36 = vunpack.i.l.bf16 %v1015_v32  ;;  %v1017_v37 = vunpack.i.h.bf16 %v1015_v32  ;;  %v1066_v54 = vunpack.i.l.bf16 %v1065_v50  ;;  %v1067_v63 = vunpack.i.h.bf16 %v1065_v50  ;;  %v180_v28 = vld [vmem:[%s1358_s1 + $0x18] sm:$0xff]  ;;  %v931_v50 = vld [vmem:[%s1358_s1 + $0xf0] sm:$0xff] }
  0x97   : > { %274 = vmatpush.msrb.mxu1 %v1154_v1  ;;  %881 = vmatmul.msk.f32.vlgmr.msra.gmra.mxu0 %vm210_vm0, %v877_v31  ;;  %v891_v1 = vld [vmem:[%s1358_s1 + $0x50] sm:$0xff] }
  0x98   : > { %342 = vmatpush.msra.mxu2 %v1011_v33  ;;  %408 = vmatpush.msra.mxu3 %v1016_v36  ;;  %v908_v36 = vld [vmem:[%s1358_s1 + $0x98] sm:$0xff] }
  0x99   : > { %275 = vmatpush.msrb.mxu1 %v1152_v0  ;;  %v905_v0 = vld [vmem:[%s1358_s1 + $0x80] sm:$0xff]  ;;  %775 = vperm.xlu0 %1098, %v769_v22  }
  0x9a   : > { %343 = vmatpush.msra.mxu2 %v1012_v35  ;;  %409 = vmatpush.msra.mxu3 %v1017_v37  ;;  %v770_v37 = vld [vmem:[%s1359_s2 + $0x8] sm:$0xff] }
  0x9b   : > { %893 = vmatmul.msk.f32.vlgmr.msra.gmra.mxu2 %vm210_vm0, %v889_v39  ;;  %276 = vmatpush.msrb.mxu1 %v1166_v7  ;;  %v922_v39 = vld [vmem:[%s1358_s1 + $0xc8] sm:$0xff] }
  0x9c   : > { %v1025_v42 = vpop.permute.xlu0 %1024  ;;  %410 = vmatpush.msra.mxu3 %v1021_v38  ;;  %1099 = vset.pattern.permute.xlu1 %v1117_v25 }
  0x9d   : > { %v1026_v43 = vunpack.i.l.bf16 %v1025_v42  ;;  %v1030_v44 = vpop.permute.xlu1 %1029  ;;  %277 = vmatpush.msrb.mxu1 %v1164_v6  ;;  %v1027_v45 = vunpack.i.h.bf16 %v1025_v42  ;;  %v1080_v20 = vpop.permute.xlu2 %1079  ;;  %1100 = vset.pattern.permute.xlu2 %v1117_v25 }
  0x9e   : > { %884 = vmatmul.msk.f32.gmra.mxu1 %vm210_vm0, %v880_v41  ;;  %411 = vmatpush.msra.mxu3 %v1022_v40  ;;  %v1031_v49 = vunpack.i.l.bf16 %v1030_v44  ;;  %v1032_v53 = vunpack.i.h.bf16 %v1030_v44  ;;  %v1081_v26 = vunpack.i.l.bf16 %v1080_v20  ;;  %v1082_v30 = vunpack.i.h.bf16 %v1080_v20  ;;  %v771_v41 = vld [vmem:[%s1359_s2 + $0x10] sm:$0xff] }
  0x9f   : > { %474 = vmatpush.msrb.mxu0 %v1026_v43  ;;  %278 = vmatpush.msrb.mxu1 %v1160_v4  ;;  %v178_v4 = vld [vmem:[%s1358_s1 + $0x8] sm:$0xff]  ;;  %v913_v43 = vld [vmem:[%s1358_s1 + $0xa0] sm:$0xff] }
  0xa0   : > { %882 = vmatmul.msk.f32.gmra.mxu0 %vm210_vm0, %v878_v46  ;;  %901 = vmatmul.msk.f32.vlgmr.msra.gmra.mxu3 %vm210_vm0, %v897_v47  ;;  %v937_v46 = vld [vmem:[%s1358_s1 + $0x100] sm:$0xff]  ;;  %v923_v47 = vld [vmem:[%s1358_s1 + $0xd0] sm:$0xff] }
  0xa1   : > { %475 = vmatpush.msrb.mxu0 %v1027_v45  ;;  %279 = vmatpush.msrb.mxu1 %v1156_v2  ;;  %v930_v45 = vld [vmem:[%s1358_s1 + $0xe8] sm:$0xff] }
  0xa2   : > { %678 = vmatpush.msrb.mxu3 %v1051_v48  ;;  %780 = vperm.xlu1 %1099, %v770_v37   ;;  %v772_v48 = vld [vmem:[%s1359_s2 + $0x18] sm:$0xff] }
  0xa3   : > { %476 = vmatpush.msrb.mxu0 %v1031_v49  ;;  %894 = vmatmul.msk.f32.gmra.mxu2 %vm210_vm0, %v890_v51  ;;  %v914_v49 = vld [vmem:[%s1358_s1 + $0xa8] sm:$0xff] }
  0xa4   : > { %v1040_v57 = vpop.permute.xlu0 %1039  ;;  %679 = vmatpush.msrb.mxu3 %v1052_v52  ;;  %785 = vperm.xlu2 %1100, %v771_v41   ;;  %v938_v51 = vld [vmem:[%s1358_s1 + $0x108] sm:$0xff]  ;;  %v924_v52 = vld [vmem:[%s1358_s1 + $0xd8] sm:$0xff] }
  0xa5   : > { %477 = vmatpush.msrb.mxu0 %v1032_v53  ;;  %v1041_v58 = vunpack.i.l.bf16 %v1040_v57  ;;  %v1042_v60 = vunpack.i.h.bf16 %v1040_v57  ;;  %v1045_v61 = vpop.permute.xlu1 %1044  ;;  %v1095_v38 = vpop.permute.xlu2 %1094  ;;  %v915_v53 = vld [vmem:[%s1358_s1 + $0xb0] sm:$0xff]  ;;  %v916_v57 = vld [vmem:[%s1358_s1 + $0xb8] sm:$0xff] }
  0xa6   : > { %885 = vmatmul.msk.f32.vlgmr.msrb.gmra.mxu1 %vm210_vm0, %v177_v55  ;;  %680 = vmatpush.msrb.mxu3 %v1066_v54  ;;  %v1046_v2 = vunpack.i.l.bf16 %v1045_v61  ;;  %v1047_v3 = vunpack.i.h.bf16 %v1045_v61  ;;  %v1096_v42 = vunpack.i.l.bf16 %v1095_v38  ;;  %v1097_v44 = vunpack.i.h.bf16 %v1095_v38  ;;  %v932_v54 = vld [vmem:[%s1358_s1 + $0xf8] sm:$0xff]  ;;  %v939_v55 = vld [vmem:[%s1358_s1 + $0x110] sm:$0xff] }
  0xa7   : > { %478 = vmatpush.msrb.mxu0 %v1036_v56  ;;  %610 = vmatpush.msrb.mxu2 %v1041_v58  ;;  %v940_v56 = vld [vmem:[%s1358_s1 + $0x118] sm:$0xff] }
  0xa8   : > { %902 = vmatmul.msk.f32.gmra.mxu3 %vm210_vm0, %v898_v62 }
  0xa9   : > { %479 = vmatpush.msrb.mxu0 %v1037_v59  ;;  %611 = vmatpush.msrb.mxu2 %v1042_v60 }
  0xaa   : > { %909 = vmatmul.msk.f32.vlgmr.msrb.gmra.mxu0 %vm210_vm0, %v905_v0  ;;  %681 = vmatpush.msrb.mxu3 %v1067_v63 }
  0xab   : > { %895 = vmatmul.msk.f32.gmra.mxu2 %vm210_vm0, %v891_v1  ;;  %790 = vperm.xlu1 %1099, %v772_v48  }
  0xac   : > { %v1055_v5 = vpop.permute.xlu0 %1054  ;;  %612 = vmatpush.msrb.mxu2 %v1046_v2 }
  0xad   : > { %v1057_v6 = vunpack.i.h.bf16 %v1055_v5  ;;  %v1056_v7 = vunpack.i.l.bf16 %v1055_v5  ;;  %v1060_v8 = vpop.permute.xlu1 %1059 }
  0xae   : > { %886 = vmatmul.msk.f32.gmra.mxu1 %vm210_vm0, %v178_v4  ;;  %613 = vmatpush.msrb.mxu2 %v1047_v3  ;;  %v1061_v10 = vunpack.i.l.bf16 %v1060_v8  ;;  %v1062_v11 = vunpack.i.h.bf16 %v1060_v8 }
  0xaf   : > { %542 = vmatpush.msra.mxu1 %v1056_v7 }
  0xb0   : > { %903 = vmatmul.msk.f32.gmra.mxu3 %vm210_vm0, %v899_v9  ;;  %614 = vmatpush.msrb.mxu2 %v1061_v10 }
  0xb1   : > { %543 = vmatpush.msra.mxu1 %v1057_v6 }
  0xb2   : > { %910 = vmatmul.msk.f32.gmra.mxu0 %vm210_vm0, %v906_v12  ;;  %615 = vmatpush.msrb.mxu2 %v1062_v11 }
  0xb3   : > { %896 = vmatmul.msk.f32.gmra.mxu2 %vm210_vm0, %v892_v13 }
  0xb4   : > { %v1070_v15 = vpop.permute.xlu0 %1069 }
  0xb5   : > { %v1072_v16 = vunpack.i.h.bf16 %v1070_v15  ;;  %v1071_v17 = vunpack.i.l.bf16 %v1070_v15  ;;  %v1075_v18 = vpop.permute.xlu1 %1074 }
  0xb6   : > { %887 = vmatmul.msk.f32.gmra.mxu1 %vm210_vm0, %v179_v14  ;;  %v1076_v21 = vunpack.i.l.bf16 %v1075_v18  ;;  %v1077_v24 = vunpack.i.h.bf16 %v1075_v18 }
  0xb7   : > { %544 = vmatpush.msra.mxu1 %v1071_v17 }
  0xb8   : > { %904 = vmatmul.msk.f32.gmra.mxu3 %vm210_vm0, %v900_v19 }
  0xb9   : > { %545 = vmatpush.msra.mxu1 %v1072_v16  ;;  %682 = vmatpush.msrb.mxu3 %v1076_v21 }
  0xba   : > { %911 = vmatmul.msk.f32.gmra.mxu0 %vm210_vm0, %v907_v23 }
  0xbb   : > { %925 = vmatmul.msk.f32.vlgmr.msrb.gmra.mxu2 %vm210_vm0, %v921_v27  ;;  %683 = vmatpush.msrb.mxu3 %v1077_v24 }
  0xbc   : > { %v1085_v29 = vpop.permute.xlu0 %1084  ;;  %546 = vmatpush.msra.mxu1 %v1081_v26 }
  0xbd   : > { %v1087_v31 = vunpack.i.h.bf16 %v1085_v29  ;;  %v1086_v32 = vunpack.i.l.bf16 %v1085_v29  ;;  %v1090_v33 = vpop.permute.xlu1 %1089 }
  0xbe   : > { %888 = vmatmul.msk.f32.gmra.mxu1 %vm210_vm0, %v180_v28  ;;  %v1091_v35 = vunpack.i.l.bf16 %v1090_v33  ;;  %v1092_v40 = vunpack.i.h.bf16 %v1090_v33 }
  0xbf   : > { %746 = vmatpush.msra.mxu0 %v1086_v32  ;;  %954 = vmatpush.msra.mxu2 %v1086_v32 }
  0xc0   : > { %933 = vmatmul.msk.f32.vlgmr.msrb.gmra.mxu3 %vm210_vm0, %v929_v34  ;;  %547 = vmatpush.msra.mxu1 %v1082_v30 }
  0xc1   : > { %747 = vmatpush.msra.mxu0 %v1087_v31  ;;  %955 = vmatpush.msra.mxu2 %v1087_v31 }
  0xc2   : > { %912 = vmatmul.msk.f32.gmra.mxu0 %vm210_vm0, %v908_v36 }
  0xc3   : > { %748 = vmatpush.msra.mxu0 %v1091_v35  ;;  %926 = vmatmul.msk.f32.gmra.mxu2 %vm210_vm0, %v922_v39 }
  0xc4   : > { %956 = vmatpush.msra.mxu2 %v1091_v35 }
  0xc5   : > { %749 = vmatpush.msra.mxu0 %v1092_v40 }
  0xc6   : > { %917 = vmatmul.msk.f32.vlgmr.msra.gmra.mxu1 %vm210_vm0, %v913_v43  ;;  %957 = vmatpush.msra.mxu2 %v1092_v40 }
  0xc7   : > { %750 = vmatpush.msra.mxu0 %v1096_v42 }
  0xc8   : > { %934 = vmatmul.msk.f32.gmra.mxu3 %vm210_vm0, %v930_v45  ;;  %958 = vmatpush.msra.mxu2 %v1096_v42 }
  0xc9   : > { %751 = vmatpush.msra.mxu0 %v1097_v44 }
  0xca   : > { %941 = vmatmul.msk.f32.vlgmr.msra.gmra.mxu0 %vm210_vm0, %v937_v46  ;;  %959 = vmatpush.msra.mxu2 %v1097_v44 }
  0xcb   : > { %927 = vmatmul.msk.f32.gmra.mxu2 %vm210_vm0, %v923_v47 }
  0xce   : > { %918 = vmatmul.msk.f32.gmra.mxu1 %vm210_vm0, %v914_v49 }
  0xd0   : > { %935 = vmatmul.msk.f32.gmra.mxu3 %vm210_vm0, %v931_v50 }
  0xd2   : > { %942 = vmatmul.msk.f32.gmra.mxu0 %vm210_vm0, %v938_v51 }
  0xd3   : > { %928 = vmatmul.msk.f32.gmra.mxu2 %vm210_vm0, %v924_v52 }
  0xd6   : > { %919 = vmatmul.msk.f32.gmra.mxu1 %vm210_vm0, %v915_v53 }
  0xd8   : > { %936 = vmatmul.msk.f32.gmra.mxu3 %vm210_vm0, %v932_v54 }
  0xda   : > { %943 = vmatmul.msk.f32.gmra.mxu0 %vm210_vm0, %v939_v55 }
  0xdb   : > { %944 = vmatmul.msk.f32.vlgmr.msra.gmra.mxu2 %vm210_vm0, %v940_v56 }
  0xde   : > { %920 = vmatmul.msk.f32.gmra.mxu1 %vm210_vm0, %v916_v57 }
 0x10b   : > { %v776_v31 = vpop.permute.xlu0 %775 }
 0x113   : > { %v246_v58 = vpop.f32.mrf.mxu1 }
 0x114   : > { %v240_v59 = vpop.f32.mrf.mxu0  ;;  %v781_v46 = vpop.permute.xlu1 %780 }
 0x11b   : > { %v249_v60 = vpop.f32.mrf.mxu1 }
 0x11d   : > { %v243_v61 = vpop.f32.mrf.mxu0 }
 0x11e   : > { %v345_v62 = vpop.f32.mrf.mxu2 }
 0x123   : > { %v281_v63 = vpop.f32.mrf.mxu1  ;;  %v413_v0 = vpop.f32.mrf.mxu3 }
 0x124   : > { %v282_v9 = vadd.f32 %v281_v63, %v240_v59 }
 0x126   : > { %v348_v1 = vpop.f32.mrf.mxu2  ;;  %v357_v12 = vadd.f32 %v345_v62, %v282_v9 }
 0x127   : > { %v481_v2 = vpop.f32.mrf.mxu0 }
 0x128   : > { %v425_v15 = vadd.f32 %v413_v0, %v357_v12 }
 0x12a   : > { %v493_v19 = vadd.f32 %v481_v2, %v425_v15 }
 0x12b   : > { %v284_v3 = vpop.f32.mrf.mxu1  ;;  %v416_v4 = vpop.f32.mrf.mxu3 }
 0x12c   : > { %v285_v16 = vadd.f32 %v284_v3, %v243_v61  ;;  %v786_v61 = vpop.permute.xlu2 %785 }
 0x12e   : > { %v351_v5 = vpop.f32.mrf.mxu2  ;;  %v358_v20 = vadd.f32 %v348_v1, %v285_v16 }
 0x12f   : > { %v484_v6 = vpop.f32.mrf.mxu0 }
 0x130   : > { %v426_v25 = vadd.f32 %v416_v4, %v358_v20 }
 0x132   : > { %v494_v32 = vadd.f32 %v484_v6, %v426_v25 }
 0x133   : > { %v287_v7 = vpop.f32.mrf.mxu1  ;;  %v419_v8 = vpop.f32.mrf.mxu3 }
 0x134   : > { %v288_v24 = vadd.f32 %v287_v7, %v246_v58 }
 0x136   : > { %v354_v10 = vpop.f32.mrf.mxu2  ;;  %v359_v30 = vadd.f32 %v351_v5, %v288_v24 }
 0x137   : > { %v487_v11 = vpop.f32.mrf.mxu0 }
 0x138   : > { %v427_v38 = vadd.f32 %v419_v8, %v359_v30 }
 0x13a   : > { %v495_v47 = vadd.f32 %v487_v11, %v427_v38 }
 0x13b   : > { %v290_v13 = vpop.f32.mrf.mxu1  ;;  %v422_v14 = vpop.f32.mrf.mxu3 }
 0x13c   : > { %v291_v39 = vadd.f32 %v290_v13, %v249_v60 }
 0x13e   : > { %v617_v17 = vpop.f32.mrf.mxu2  ;;  %v360_v48 = vadd.f32 %v354_v10, %v291_v39  ;;  %v791_v10 = vpop.permute.xlu1 %790 }
 0x13f   : > { %v490_v18 = vpop.f32.mrf.mxu0 }
 0x140   : > { %v428_v54 = vadd.f32 %v422_v14, %v360_v48 }
 0x142   : > { %v496_v62 = vadd.f32 %v490_v18, %v428_v54 }
 0x143   : > { %v549_v21 = vpop.f32.mrf.mxu1  ;;  %v685_v22 = vpop.f32.mrf.mxu3 }
 0x144   : > { %v561_v23 = vadd.f32 %v549_v21, %v493_v19 }
 0x146   : > { %v629_v26 = vadd.f32 %v617_v17, %v561_v23  ;;  %v620_v27 = vpop.f32.mrf.mxu2 }
 0x147   : > { %v753_v28 = vpop.f32.mrf.mxu0 }
 0x148   : > { %v697_v29 = vadd.f32 %v685_v22, %v629_v26 }
 0x14a   : > { %v765_v33 = vadd.f32 %v753_v28, %v697_v29 }
 0x14b   : > { %v552_v34 = vpop.f32.mrf.mxu1  ;;  %v688_v35 = vpop.f32.mrf.mxu3 }
 0x14c   : > { %v793_v36 = vadd.f32 %v776_v31, %v765_v33  ;;  %v562_v37 = vadd.f32 %v552_v34, %v494_v32 }
 0x14e   : > { %vm797_vm2 = vcmp.ge.f32.partialorder %v793_v36, 0.0  ;;  %v801_v40 = vmul.f32 0.2, %v793_v36  ;;  %v630_v41 = vadd.f32 %v620_v27, %v562_v37  ;;  %v623_v42 = vpop.f32.mrf.mxu2 }
 0x14f   : > { %v756_v43 = vpop.f32.mrf.mxu0 }
 0x150   : > { %v805_v44 = vsel %vm797_vm2, %v793_v36, %v801_v40  ;;  %v698_v45 = vadd.f32 %v688_v35, %v630_v41 }
 0x151   : > { %810 = vst.msk [vmem:[%s1344_s7] sm:$0xff] %vm809_vm1, %v805_v44 }
 0x152   : > { %v766_v49 = vadd.f32 %v756_v43, %v698_v45 }
 0x153   : > { %v555_v50 = vpop.f32.mrf.mxu1  ;;  %v691_v51 = vpop.f32.mrf.mxu3 }
 0x154   : > { %v794_v52 = vadd.f32 %v781_v46, %v766_v49  ;;  %v563_v53 = vadd.f32 %v555_v50, %v495_v47 }
 0x156   : > { %vm798_vm3 = vcmp.ge.f32.partialorder %v794_v52, 0.0  ;;  %v802_v55 = vmul.f32 0.2, %v794_v52  ;;  %v631_v56 = vadd.f32 %v623_v42, %v563_v53  ;;  %v626_v57 = vpop.f32.mrf.mxu2 }
 0x157   : > { %v759_v58 = vpop.f32.mrf.mxu0 }
 0x158   : > { %v806_v59 = vsel %vm798_vm3, %v794_v52, %v802_v55  ;;  %v699_v60 = vadd.f32 %v691_v51, %v631_v56 }
 0x159   : > { %811 = vst.msk [vmem:[%s1344_s7 + $0x8] sm:$0xff] %vm809_vm1, %v806_v59 }
 0x15a   : > { %v767_v63 = vadd.f32 %v759_v58, %v699_v60 }
 0x15b   : > { %v558_v0 = vpop.f32.mrf.mxu1  ;;  %v694_v3 = vpop.f32.mrf.mxu3 }
 0x15c   : > { %v795_v1 = vadd.f32 %v786_v61, %v767_v63  ;;  %v564_v2 = vadd.f32 %v558_v0, %v496_v62 }
 0x15e   : > { %vm799_vm4 = vcmp.ge.f32.partialorder %v795_v1, 0.0  ;;  %v803_v4 = vmul.f32 0.2, %v795_v1  ;;  %v632_v5 = vadd.f32 %v626_v57, %v564_v2  ;;  %v762_v6 = vpop.f32.mrf.mxu2 }
 0x160   : > { %v807_v7 = vsel %vm799_vm4, %v795_v1, %v803_v4  ;;  %v700_v8 = vadd.f32 %v694_v3, %v632_v5 }
 0x161   : > { %812 = vst.msk [vmem:[%s1344_s7 + $0x10] sm:$0xff] %vm809_vm1, %v807_v7 }
 0x162   : > { %v768_v9 = vadd.f32 %v762_v6, %v700_v8 }
 0x164   : > { %v796_v11 = vadd.f32 %v791_v10, %v768_v9 }
 0x166   : > { %vm800_vm5 = vcmp.ge.f32.partialorder %v796_v11, 0.0  ;;  %v804_v12 = vmul.f32 0.2, %v796_v11 }
 0x168   : > { %v808_v13 = vsel %vm800_vm5, %v796_v11, %v804_v12 }
 0x169   : > { %813 = vst.msk [vmem:[%s1344_s7 + $0x18] sm:$0xff] %vm809_vm1, %v808_v13 }
 0x16a PF: > { %s13_s12 = sadd.s32 1, %s1107_s12  }
 0x16b   : > { %p10_p4 = scmp.ge.s32.totalorder %s13_s12, 8  }
 0x16d   :  { %12 = sbr.rel (!%p10_p4) target bundleno = 1 (0x1), region = 70 }

// kernel: uconvlstm_forward.19
= control target key start
LH: loop header
LB: loop body
LE: loop exit
PB: predicated region body
PF: predicated region fallthrough
CT: control target
= control target key end

     0   :  { %s2330_s12 = smov 0   ;;  %s3154_s0 = inlined_call_operand.vmem [shape: f32[6,34,362], index: 0, kind: input, shape index: {}]   ;;  %s3155_s1 = inlined_call_operand.vmem [shape: f32[9,32,34], index: 1, kind: input, shape index: {}]   ;;  %s3156_s2 = inlined_call_operand.vmem [shape: f32[32,1], index: 2, kind: input, shape index: {}]   ;;  %s3157_s3 = inlined_call_operand.vmem [shape: f32[6,32,324], index: 3, kind: output, shape index: {}]  }
   0x1 LB: > { %s1840_s13 = sadd.s32 4294967295, %s2299_s12   ;;  %p1844_p0 = scmp.ge.s32.totalorder %s2299_s12, 1  ;;  %s2299_s12 = sphi %s2330_s12, %s13_s12  }
   0x2   : > { %p137_p1 = scmp.lt.s32.totalorder %s2299_s12, 7 }
   0x4   : > { %p138_p2 = pnand %p1844_p0, %p137_p1 }
   0x5   : > { %p161_p3 = scmp.lt.s32.totalorder (!%p138_p2), %s1840_s13, 5  ;;  %s2301_s18 = smov (!%p138_p2), 127  }
   0x6   : > { %141 = sbr.rel (%p138_p2) target bundleno = 504 (0x1f8), region = 32  ;;  %s2302_s19 = smov (!%p138_p2), 126  }
   0x7   : > { %s2303_s20 = smov (!%p138_p2), 110   ;;  %s2304_s21 = smov (!%p138_p2), 109  }
   0x8   : > { %s2305_s22 = smov (!%p138_p2), 108   ;;  %s2306_s23 = smov (!%p138_p2), 92  }
   0x9   : > { %s2307_s5 = smov (!%p138_p2), 91   ;;  %s2308_s16 = smov (!%p138_p2), 90  }
   0xb   : > { %s3159_s13 = smov (!%p161_p3, %s1840_s13), 5  ;;  %vm276_vm0 = vcmask 1041408   ;;  %vm240_vm1 = vcmask 1039360   ;;  %v1847_v63 = vld [vmem:[%s3155_s1 + $0x20] sm:$0xff]  ;;  %vm263_vm2 = vcmask 277504   ;;  %vm510_vm3 = vcmask 1031168  }
   0xc   : > { %s2031_s14 = smul.u32 120, %s3159_s13  ;;  %vm685_vm4 = vcmask 900096   ;;  %vm860_vm5 = vcmask 891904   ;;  %vm1035_vm6 = vcmask 883712   ;;  %vm1210_vm7 = vcmask 752640  }
   0xd   : > { %vm1385_vm8 = vcmask 744448   ;;  %vm1560_vm9 = vcmask 736256   ;;  %s2032_s4 = smul.u32 96, %s3159_s13  ;;  %vm1774_vm15 = vcmask 556032  }
   0xe   : > { %s165_s17 = scalar_lea.vmem %s3154_s0, %s2031_s14 }
   0xf   : > { %v2344_v0 = vld [vmem:[%s165_s17 + $0x70] sm:$0x3]  ;;  %v2346_v1 = vld [vmem:[%s165_s17 + $0x60] sm:$0x3]  ;;  %v2350_v2 = vld [vmem:[%s165_s17 + $0x48] sm:$0xff]  ;;  %s3103_s7 = scalar_lea.vmem %s3157_s3, %s2032_s4 }
  0x10   : > { %238 = vrot.lane.b32.xlu1 %v2344_v0, %s2301_s18  ;;  %234 = vrot.lane.b32.xlu0 %v2346_v1, %s2301_s18  ;;  %v2352_v3 = vld [vmem:[%s165_s17 + $0x50] sm:$0xff]  ;;  %v2356_v5 = vld [vmem:[%s165_s17 + $0x58] sm:$0xff] }
  0x11   : > { %v2354_v4 = vld [vmem:[%s165_s17 + $0x30] sm:$0xff]  ;;  %v2362_v7 = vpack.i.bf16 %v2352_v3, %v2350_v2  ;;  %v2364_v8 = vld [vmem:[%s165_s17 + $0x68] sm:$0x3]  ;;  %v2366_v9 = vld [vmem:[%s165_s17 + $0x38] sm:$0xff]  ;;  %v2430_v25 = vpack.i.bf16 %v2356_v5, %v2352_v3 }
  0x12   : > { %v2055_v6 = vpack.i.bf16 %v2354_v4, %v2356_v5  ;;  %v2368_v10 = vld [vmem:[%s165_s17 + $0x40] sm:$0xff]  ;;  %v2372_v11 = vld [vmem:[%s165_s17 + $0x18] sm:$0xff]  ;;  %v2382_v15 = vld [vmem:[%s165_s17 + $0x28] sm:$0xff]  ;;  %v2405_v21 = vpack.i.bf16 %v2366_v9, %v2354_v4  ;;  %v2441_v27 = vpack.i.bf16 %v2354_v4, %v2350_v2 }
  0x13   : > { %v2376_v12 = vpack.i.bf16 %v2368_v10, %v2366_v9  ;;  %v2378_v13 = vld [vmem:[%s165_s17 + $0x20] sm:$0xff]  ;;  %v2391_v18 = vld [vmem:[%s165_s17 + $0x8] sm:$0xff]  ;;  %v2393_v19 = vld [vmem:[%s165_s17 + $0x10] sm:$0xff]  ;;  %v2416_v23 = vpack.i.bf16 %v2368_v10, %v2356_v5 }
  0x14   : > { %2056 = vrot.lane.b32.xlu2 %v2055_v6, %s2301_s18  ;;  %v2380_v14 = vld [vmem:[%s165_s17] sm:$0xff]  ;;  %v2386_v16 = vpack.i.bf16 %v2378_v13, %v2372_v11  ;;  %v2398_v20 = vpack.i.bf16 %v2393_v19, %v2391_v18  ;;  %v2423_v24 = vpack.i.bf16 %v2393_v19, %v2382_v15  ;;  %v2434_v26 = vpack.i.bf16 %v2382_v15, %v2378_v13 }
  0x15   : > { %v2070_v17 = vpack.i.bf16 %v2380_v14, %v2382_v15  ;;  %v2412_v22 = vpack.i.bf16 %v2391_v18, %v2380_v14  ;;  %v2448_v28 = vpack.i.bf16 %v2380_v14, %v2372_v11 }
  0x18   : > { %236 = vrot.lane.b32.xlu0 %v2364_v8, %s2301_s18  ;;  %2051 = vrot.lane.b32.xlu1 %v2362_v7, %s2301_s18 }
  0x1c   : > { %2061 = vrot.lane.b32.xlu2 %v2376_v12, %s2301_s18 }
  0x20   : > { %2066 = vrot.lane.b32.xlu0 %v2386_v16, %s2301_s18  ;;  %2071 = vrot.lane.b32.xlu1 %v2070_v17, %s2301_s18 }
  0x24   : > { %2076 = vrot.lane.b32.xlu2 %v2398_v20, %s2301_s18 }
  0x28   : > { %504 = vrot.lane.b32.xlu0 %v2346_v1, %s2302_s19  ;;  %506 = vrot.lane.b32.xlu1 %v2364_v8, %s2302_s19 }
  0x2c   : > { %2081 = vrot.lane.b32.xlu2 %v2362_v7, %s2302_s19 }
  0x30   : > { %2086 = vrot.lane.b32.xlu0 %v2405_v21, %s2302_s19  ;;  %2091 = vrot.lane.b32.xlu1 %v2386_v16, %s2302_s19 }
  0x34   : > { %2096 = vrot.lane.b32.xlu2 %v2412_v22, %s2302_s19 }
  0x38   : > { %508 = vrot.lane.b32.xlu0 %v2344_v0, %s2302_s19  ;;  %2101 = vrot.lane.b32.xlu1 %v2416_v23, %s2302_s19 }
  0x3c   : > { %2106 = vrot.lane.b32.xlu2 %v2423_v24, %s2302_s19 }
  0x40   : > { %681 = vrot.lane.b32.xlu0 %v2364_v8, %s2303_s20  ;;  %683 = vrot.lane.b32.xlu1 %v2344_v0, %s2303_s20 }
  0x44   : > { %2111 = vrot.lane.b32.xlu2 %v2430_v25, %s2303_s20 }
  0x48   : > { %2116 = vrot.lane.b32.xlu0 %v2376_v12, %s2303_s20  ;;  %2121 = vrot.lane.b32.xlu1 %v2434_v26, %s2303_s20 }
  0x4c   : > { %679 = vrot.lane.b32.xlu2 %v2346_v1, %s2303_s20 }
  0x50   : > { %2126 = vrot.lane.b32.xlu0 %v2398_v20, %s2303_s20  ;;  %2131 = vrot.lane.b32.xlu1 %v2441_v27, %s2303_s20 }
  0x54   : > { %2136 = vrot.lane.b32.xlu2 %v2448_v28, %s2303_s20 }
  0x58   : > { %854 = vrot.lane.b32.xlu0 %v2346_v1, %s2304_s21  ;;  %856 = vrot.lane.b32.xlu1 %v2364_v8, %s2304_s21 }
  0x5c   : > { %2141 = vrot.lane.b32.xlu2 %v2362_v7, %s2304_s21 }
  0x60   : > { %2146 = vrot.lane.b32.xlu0 %v2405_v21, %s2304_s21  ;;  %2151 = vrot.lane.b32.xlu1 %v2386_v16, %s2304_s21 }
  0x64   : > { %2156 = vrot.lane.b32.xlu2 %v2412_v22, %s2304_s21 }
  0x68   : > { %858 = vrot.lane.b32.xlu0 %v2344_v0, %s2304_s21  ;;  %2161 = vrot.lane.b32.xlu1 %v2416_v23, %s2304_s21 }
  0x6c   : > { %2166 = vrot.lane.b32.xlu2 %v2423_v24, %s2304_s21 }
  0x6e   : > { %v2057_v29 = vpop.permute.xlu2 %2056 }
  0x6f   : > { %v2058_v32 = vunpack.i.l.bf16 %v2057_v29  ;;  %v2059_v37 = vunpack.i.h.bf16 %v2057_v29  ;;  %v2509_v29 = vld [vmem:[%s3155_s1 + $0x30] sm:$0xff] }
  0x70   : > { %1029 = vrot.lane.b32.xlu0 %v2346_v1, %s2305_s22  ;;  %1031 = vrot.lane.b32.xlu1 %v2364_v8, %s2305_s22 }
  0x74   : > { %2171 = vrot.lane.b32.xlu2 %v2362_v7, %s2305_s22 }
  0x76   : > { %v2062_v30 = vpop.permute.xlu2 %2061 }
  0x77   : > { %v2064_v35 = vunpack.i.h.bf16 %v2062_v30  ;;  %v2063_v38 = vunpack.i.l.bf16 %v2062_v30 }
  0x78   : > { %2176 = vrot.lane.b32.xlu0 %v2405_v21, %s2305_s22  ;;  %2181 = vrot.lane.b32.xlu1 %v2386_v16, %s2305_s22 }
  0x79   : > { %v245_v48 = vsel %vm240_vm1, %v2059_v37, %v2063_v38  ;;  %v246_v49 = vsel %vm240_vm1, %v2063_v38, %v2064_v35  ;;  %v2541_v37 = vld [vmem:[%s3155_s1 + $0x38] sm:$0xff] }
  0x7c   : > { %1033 = vrot.lane.b32.xlu2 %v2344_v0, %s2305_s22 }
  0x7e   : > { %v2077_v31 = vpop.permute.xlu2 %2076 }
  0x7f   : > { %v2078_v50 = vunpack.i.l.bf16 %v2077_v31  ;;  %v2079_v53 = vunpack.i.h.bf16 %v2077_v31 }
  0x80   : > { %2186 = vrot.lane.b32.xlu0 %v2412_v22, %s2305_s22  ;;  %2191 = vrot.lane.b32.xlu1 %v2416_v23, %s2305_s22 }
  0x81   : > { %v242_v62 = vsel %vm240_vm1, %v2078_v50, %v2079_v53 }
  0x82   : > { %v239_v33 = vpop.permute.xlu1 %238  ;;  %v235_v34 = vpop.permute.xlu0 %234 }
  0x83   : > { %1861 = vmatpush.msk.msra.mxu2 %vm276_vm0, %v239_v33 }
  0x84   : > { %2196 = vrot.lane.b32.xlu2 %v2423_v24, %s2305_s22 }
  0x85   : > { %353 = vmatpush.msra.mxu2 %v2058_v32 }
  0x86   : > { %v2470_v36 = vpop.permute.xlu2 %2081 }
  0x87   : > { %354 = vmatpush.msra.mxu2 %v2064_v35  ;;  %v2084_v6 = vunpack.i.h.bf16 %v2470_v36  ;;  %v2083_v17 = vunpack.i.l.bf16 %v2470_v36  ;;  %v1848_v35 = vld [vmem:[%s3155_s1 + $0x28] sm:$0xff] }
  0x88   : > { %1204 = vrot.lane.b32.xlu0 %v2346_v1, %s2306_s23  ;;  %1206 = vrot.lane.b32.xlu1 %v2364_v8, %s2306_s23 }
  0x8a   : > { %v237_v39 = vpop.permute.xlu0 %236  ;;  %v2052_v40 = vpop.permute.xlu1 %2051 }
  0x8b   : > { %v2054_v41 = vunpack.i.h.bf16 %v2052_v40  ;;  %v2053_v42 = vunpack.i.l.bf16 %v2052_v40  ;;  %v249_v43 = vsel %vm240_vm1, %v235_v34, %v237_v39  ;;  %v250_v44 = vsel %vm240_vm1, %v237_v39, %v239_v33 }
  0x8c   : > { %1851 = vmatpush.msk.msra.mxu0 %vm276_vm0, %v249_v43  ;;  %2016 = vmatpush.msk.msra.mxu3 %vm276_vm0, %v249_v43  ;;  %v517_v33 = vsel %vm510_vm3, %v2083_v17, %v2084_v6 }
  0x8d   : > { %1856 = vmatpush.msk.msra.mxu1 %vm276_vm0, %v250_v44  ;;  %v247_v45 = vsel %vm240_vm1, %v2053_v42, %v2054_v41  ;;  %v248_v46 = vsel %vm240_vm1, %v2054_v41, %v2058_v32  ;;  %2201 = vrot.lane.b32.xlu2 %v2362_v7, %s2306_s23 }
  0x8e   : > { %295 = vmatpush.msra.mxu0 %v247_v45  ;;  %2017 = vmatpush.msra.mxu3 %v247_v45  ;;  %v2485_v47 = vpop.permute.xlu2 %2096 }
  0x8f   : > { %324 = vmatpush.msra.mxu1 %v248_v46  ;;  %v2099_v41 = vunpack.i.h.bf16 %v2485_v47  ;;  %v2098_v42 = vunpack.i.l.bf16 %v2485_v47  ;;  %v2602_v47 = vld [vmem:[%s3155_s1 + $0x8] sm:$0xff] }
  0x90   : > { %296 = vmatpush.msra.mxu0 %v245_v48  ;;  %2018 = vmatpush.msra.mxu3 %v245_v48 }
  0x91   : > { %2206 = vrot.lane.b32.xlu0 %v2405_v21, %s2306_s23  ;;  %2211 = vrot.lane.b32.xlu1 %v2386_v16, %s2306_s23 }
  0x92   : > { %v2067_v51 = vpop.permute.xlu0 %2066  ;;  %v2072_v52 = vpop.permute.xlu1 %2071  ;;  %325 = vmatpush.msra.mxu1 %v246_v49 }
  0x93   : > { %v2069_v54 = vunpack.i.h.bf16 %v2067_v51  ;;  %v2068_v55 = vunpack.i.l.bf16 %v2067_v51  ;;  %v2074_v56 = vunpack.i.h.bf16 %v2072_v52  ;;  %v2073_v57 = vunpack.i.l.bf16 %v2072_v52 }
  0x95   : > { %355 = vmatpush.msra.mxu2 %v2073_v57  ;;  %v243_v58 = vsel %vm240_vm1, %v2068_v55, %v2069_v54  ;;  %v244_v59 = vsel %vm240_vm1, %v2069_v54, %v2073_v57  ;;  %v241_v60 = vsel %vm240_vm1, %v2074_v56, %v2078_v50  ;;  %2216 = vrot.lane.b32.xlu2 %v2412_v22, %s2306_s23  ;;  %v2634_v54 = vld [vmem:[%s3155_s1 + $0x40] sm:$0xff]  ;;  %v2640_v55 = vld [vmem:[%s3155_s1 + $0x10] sm:$0xff] }
  0x96   : > { %297 = vmatpush.msra.mxu0 %v243_v58  ;;  %2019 = vmatpush.msra.mxu3 %v243_v58  ;;  %v2498_v61 = vpop.permute.xlu2 %2106 }
  0x97   : > { %326 = vmatpush.msra.mxu1 %v244_v59  ;;  %356 = vmatpush.msra.mxu2 %v2079_v53  ;;  %v2109_v45 = vunpack.i.h.bf16 %v2498_v61 }
  0x98   : > { %298 = vmatpush.msra.mxu0 %v241_v60  ;;  %2020 = vmatpush.msra.mxu3 %v241_v60 }
  0x99   : > { %1208 = vrot.lane.b32.xlu0 %v2344_v0, %s2306_s23  ;;  %2221 = vrot.lane.b32.xlu1 %v2416_v23, %s2306_s23 }
  0x9a   : > { %327 = vmatpush.msra.mxu1 %v242_v62  ;;  %1862 = vmatmul.msk.f32.vlgmr.msra.gmra.mxu2 %vm263_vm2, %v1847_v63  ;;  %v505_v30 = vpop.permute.xlu0 %504  ;;  %v507_v31 = vpop.permute.xlu1 %506  ;;  %v1882_v62 = vld [vmem:[%s3155_s1 + $0x48] sm:$0xff] }
  0x9b   : > { %1852 = vmatmul.msk.f32.vlgmr.msra.gmra.mxu0 %vm263_vm2, %v1847_v63  ;;  %1854 = vmatmul.msk.f32.vlgmr.msra.gmra.mxu3 %vm263_vm2, %v2509_v29  ;;  %v519_v32 = vsel %vm510_vm3, %v505_v30, %v507_v31 }
  0x9c   : > { %1857 = vmatmul.msk.f32.vlgmr.msra.gmra.mxu1 %vm263_vm2, %v1847_v63  ;;  %1866 = vmatpush.msk.msrb.mxu3 %vm276_vm0, %v2346_v1  ;;  %v189_v63 = vld [vmem:[%s3155_s1 + $0x18] sm:$0xff] }
  0x9d   : > { %1885 = vmatpush.msk.msrb.mxu2 %vm276_vm0, %v519_v32  ;;  %1871 = vmatpush.msk.msrb.mxu0 %vm276_vm0, %v2364_v8 }
  0x9e   : > { %400 = vmatpush.msrb.mxu3 %v2350_v2  ;;  %1876 = vmatpush.msk.msrb.mxu1 %vm276_vm0, %v2344_v0  ;;  %v2532_v34 = vpop.permute.xlu2 %2111 }
  0x9f   : > { %429 = vmatpush.msrb.mxu0 %v2352_v3  ;;  %563 = vmatpush.msrb.mxu2 %v517_v33  ;;  %v2114_v36 = vunpack.i.h.bf16 %v2532_v34 }
  0xa0   : > { %401 = vmatpush.msrb.mxu3 %v2354_v4  ;;  %2226 = vrot.lane.b32.xlu2 %v2423_v24, %s2306_s23 }
  0xa1   : > { %1381 = vrot.lane.b32.xlu0 %v2364_v8, %s2307_s5  ;;  %1383 = vrot.lane.b32.xlu1 %v2344_v0, %s2307_s5 }
  0xa2   : > { %1863 = vmatmul.msk.f32.gmra.mxu2 %vm263_vm2, %v1848_v35  ;;  %v2087_v2 = vpop.permute.xlu0 %2086  ;;  %v2092_v3 = vpop.permute.xlu1 %2091  ;;  %430 = vmatpush.msrb.mxu0 %v2366_v9 }
  0xa3   : > { %1853 = vmatmul.msk.f32.gmra.mxu0 %vm263_vm2, %v1848_v35  ;;  %1855 = vmatmul.msk.f32.gmra.mxu3 %vm263_vm2, %v2541_v37  ;;  %v2089_v4 = vunpack.i.h.bf16 %v2087_v2  ;;  %v2088_v38 = vunpack.i.l.bf16 %v2087_v2  ;;  %v2094_v39 = vunpack.i.h.bf16 %v2092_v3  ;;  %v2093_v40 = vunpack.i.l.bf16 %v2092_v3  ;;  %v1883_v2 = vld [vmem:[%s3155_s1 + $0x50] sm:$0xff] }
  0xa4   : > { %1858 = vmatmul.msk.f32.gmra.mxu1 %vm263_vm2, %v1848_v35  ;;  %402 = vmatpush.msrb.mxu3 %v2372_v11  ;;  %v2569_v11 = vld [vmem:[%s3155_s1] sm:$0xff] }
  0xa5   : > { %431 = vmatpush.msrb.mxu0 %v2378_v13  ;;  %v515_v9 = vsel %vm510_vm3, %v2088_v38, %v2089_v4  ;;  %v513_v43 = vsel %vm510_vm3, %v2093_v40, %v2094_v39  ;;  %458 = vmatpush.msrb.mxu1 %v2356_v5  ;;  %v511_v5 = vsel %vm510_vm3, %v2098_v42, %v2099_v41 }
  0xa6   : > { %564 = vmatpush.msrb.mxu2 %v515_v9  ;;  %403 = vmatpush.msrb.mxu3 %v2380_v14  ;;  %v680_v44 = vpop.permute.xlu2 %679 }
  0xa7   : > { %432 = vmatpush.msrb.mxu0 %v2391_v18  ;;  %459 = vmatpush.msrb.mxu1 %v2368_v10 }
  0xa8   : > { %565 = vmatpush.msrb.mxu2 %v513_v43  ;;  %2231 = vrot.lane.b32.xlu2 %v2430_v25, %s2307_s5  ;;  %v2108_v25 = vunpack.i.l.bf16 %v2498_v61 }
  0xa9   : > { %2236 = vrot.lane.b32.xlu0 %v2376_v12, %s2307_s5  ;;  %2241 = vrot.lane.b32.xlu1 %v2434_v26, %s2307_s5 }
  0xaa   : > { %1864 = vmatmul.msk.f32.gmra.mxu2 %vm263_vm2, %v2509_v29  ;;  %v509_v10 = vpop.permute.xlu0 %508  ;;  %v2102_v13 = vpop.permute.xlu1 %2101  ;;  %460 = vmatpush.msrb.mxu1 %v2382_v15  ;;  %v514_v50 = vsel %vm510_vm3, %v2094_v39, %v2108_v25 }
  0xab   : > { %1867 = vmatmul.msk.f32.vlgmr.msrb.gmra.mxu3 %vm263_vm2, %v2569_v11  ;;  %1872 = vmatmul.msk.f32.vlgmr.msrb.gmra.mxu0 %vm263_vm2, %v2569_v11  ;;  %v520_v12 = vsel %vm510_vm3, %v507_v31, %v509_v10  ;;  %v2103_v14 = vunpack.i.l.bf16 %v2102_v13  ;;  %v2104_v18 = vunpack.i.h.bf16 %v2102_v13 }
  0xac   : > { %1859 = vmatmul.msk.f32.gmra.mxu1 %vm263_vm2, %v2509_v29  ;;  %566 = vmatpush.msrb.mxu2 %v511_v5 }
  0xad   : > { %1895 = vmatpush.msk.msra.mxu0 %vm276_vm0, %v509_v10  ;;  %1890 = vmatpush.msk.msra.mxu3 %vm276_vm0, %v520_v12  ;;  %v518_v15 = vsel %vm510_vm3, %v2084_v6, %v2103_v14  ;;  %v516_v46 = vsel %vm510_vm3, %v2089_v4, %v2104_v18 }
  0xae   : > { %461 = vmatpush.msrb.mxu1 %v2393_v19  ;;  %v2595_v26 = vpop.permute.xlu2 %2136  ;;  %v2113_v19 = vunpack.i.l.bf16 %v2532_v34 }
  0xaf   : > { %621 = vmatpush.msra.mxu0 %v2103_v14  ;;  %592 = vmatpush.msra.mxu3 %v518_v15  ;;  %v2138_v33 = vunpack.i.l.bf16 %v2595_v26  ;;  %v2139_v35 = vunpack.i.h.bf16 %v2595_v26  ;;  %v1900_v14 = vld [vmem:[%s3155_s1 + $0x60] sm:$0xff] }
  0xb0   : > { %1379 = vrot.lane.b32.xlu2 %v2346_v1, %s2307_s5 }
  0xb1   : > { %622 = vmatpush.msra.mxu0 %v2104_v18  ;;  %2246 = vrot.lane.b32.xlu0 %v2398_v20, %s2307_s5  ;;  %v512_v20 = vsel %vm510_vm3, %v2099_v41, %v2109_v45 }
  0xb2   : > { %2251 = vrot.lane.b32.xlu1 %v2441_v27, %s2307_s5  ;;  %1865 = vmatmul.msk.f32.gmra.mxu2 %vm263_vm2, %v2541_v37  ;;  %v682_v48 = vpop.permute.xlu0 %681  ;;  %v684_v49 = vpop.permute.xlu1 %683  ;;  %v693_v27 = vsel %vm685_vm4, %v2113_v19, %v2114_v36 }
  0xb3   : > { %593 = vmatpush.msra.mxu3 %v516_v46  ;;  %1873 = vmatmul.msk.f32.gmra.mxu0 %vm263_vm2, %v2602_v47  ;;  %v694_v51 = vsel %vm685_vm4, %v680_v44, %v682_v48  ;;  %v695_v52 = vsel %vm685_vm4, %v682_v48, %v684_v49 }
  0xb4   : > { %1860 = vmatmul.msk.f32.gmra.mxu1 %vm263_vm2, %v2541_v37  ;;  %1868 = vmatmul.msk.f32.gmra.mxu3 %vm263_vm2, %v2602_v47 }
  0xb5   : > { %623 = vmatpush.msra.mxu0 %v2108_v25  ;;  %594 = vmatpush.msra.mxu3 %v514_v50  ;;  %v1901_v50 = vld [vmem:[%s3155_s1 + $0x68] sm:$0xff] }
  0xb6   : > { %1904 = vmatpush.msk.msra.mxu1 %vm276_vm0, %v694_v51  ;;  %1909 = vmatpush.msk.msra.mxu2 %vm276_vm0, %v695_v52  ;;  %v2629_v53 = vpop.permute.xlu2 %2141 }
  0xb7   : > { %624 = vmatpush.msra.mxu0 %v2109_v45  ;;  %595 = vmatpush.msra.mxu3 %v512_v20  ;;  %v2144_v3 = vunpack.i.h.bf16 %v2629_v53  ;;  %v2143_v34 = vunpack.i.l.bf16 %v2629_v53 }
  0xb8   : > { %767 = vmatpush.msra.mxu2 %v693_v27  ;;  %2256 = vrot.lane.b32.xlu2 %v2448_v28, %s2307_s5 }
  0xb9   : > { %1914 = vmatpush.msk.msrb.mxu3 %vm276_vm0, %v684_v49  ;;  %1554 = vrot.lane.b32.xlu0 %v2346_v1, %s2308_s16 }
  0xba   : > { %1556 = vrot.lane.b32.xlu1 %v2364_v8, %s2308_s16  ;;  %1886 = vmatmul.msk.f32.vlgmr.msrb.gmra.mxu2 %vm263_vm2, %v2634_v54  ;;  %v2117_v56 = vpop.permute.xlu0 %2116  ;;  %v2122_v57 = vpop.permute.xlu1 %2121 }
  0xbb   : > { %1874 = vmatmul.msk.f32.gmra.mxu0 %vm263_vm2, %v2640_v55  ;;  %v2119_v58 = vunpack.i.h.bf16 %v2117_v56  ;;  %v2118_v59 = vunpack.i.l.bf16 %v2117_v56  ;;  %v2124_v60 = vunpack.i.h.bf16 %v2122_v57  ;;  %v2123_v61 = vunpack.i.l.bf16 %v2122_v57  ;;  %796 = vmatpush.msrb.mxu3 %v2114_v36 }
  0xbc   : > { %1869 = vmatmul.msk.f32.gmra.mxu3 %vm263_vm2, %v2640_v55  ;;  %1877 = vmatmul.msk.f32.vlgmr.msrb.gmra.mxu1 %vm263_vm2, %v2569_v11 }
  0xbd   : > { %797 = vmatpush.msrb.mxu3 %v2119_v58  ;;  %v691_v1 = vsel %vm685_vm4, %v2118_v59, %v2119_v58  ;;  %v689_v8 = vsel %vm685_vm4, %v2123_v61, %v2124_v60  ;;  %v688_v4 = vsel %vm685_vm4, %v2138_v33, %v2123_v61 }
  0xbe   : > { %768 = vmatpush.msra.mxu2 %v691_v1  ;;  %v2658_v28 = vpop.permute.xlu2 %2156 }
  0xbf   : > { %798 = vmatpush.msrb.mxu3 %v2124_v60  ;;  %v2159_v42 = vunpack.i.h.bf16 %v2658_v28  ;;  %v2158_v9 = vunpack.i.l.bf16 %v2658_v28  ;;  %v1919_v60 = vld [vmem:[%s3155_s1 + $0x80] sm:$0xff] }
  0xc0   : > { %769 = vmatpush.msra.mxu2 %v689_v8  ;;  %2261 = vrot.lane.b32.xlu2 %v2362_v7, %s2308_s16 }
  0xc1   : > { %2266 = vrot.lane.b32.xlu0 %v2405_v21, %s2308_s16  ;;  %v861_v18 = vsel %vm860_vm5, %v2158_v9, %v2159_v42 }
  0xc2   : > { %2271 = vrot.lane.b32.xlu1 %v2386_v16, %s2308_s16  ;;  %1887 = vmatmul.msk.f32.gmra.mxu2 %vm263_vm2, %v1882_v62  ;;  %v2127_v6 = vpop.permute.xlu0 %2126  ;;  %v2132_v17 = vpop.permute.xlu1 %2131 }
  0xc3   : > { %1875 = vmatmul.msk.f32.gmra.mxu0 %vm263_vm2, %v189_v63  ;;  %v2129_v29 = vunpack.i.h.bf16 %v2127_v6  ;;  %v2128_v30 = vunpack.i.l.bf16 %v2127_v6  ;;  %v2134_v31 = vunpack.i.h.bf16 %v2132_v17  ;;  %v2133_v32 = vunpack.i.l.bf16 %v2132_v17 }
  0xc4   : > { %1870 = vmatmul.msk.f32.gmra.mxu3 %vm263_vm2, %v189_v63  ;;  %1878 = vmatmul.msk.f32.gmra.mxu1 %vm263_vm2, %v2602_v47 }
  0xc5   : > { %799 = vmatpush.msrb.mxu3 %v2129_v29  ;;  %v692_v7 = vsel %vm685_vm4, %v2133_v32, %v2113_v19  ;;  %v687_v16 = vsel %vm685_vm4, %v2128_v30, %v2129_v29  ;;  %v690_v21 = vsel %vm685_vm4, %v2134_v31, %v2118_v59  ;;  %v686_v40 = vsel %vm685_vm4, %v2139_v35, %v2128_v30  ;;  %v1902_v59 = vld [vmem:[%s3155_s1 + $0x70] sm:$0xff]  ;;  %v1903_v30 = vld [vmem:[%s3155_s1 + $0x78] sm:$0xff]  ;;  %v1920_v31 = vld [vmem:[%s3155_s1 + $0x88] sm:$0xff] }
  0xc6   : > { %738 = vmatpush.msra.mxu1 %v692_v7  ;;  %770 = vmatpush.msra.mxu2 %v687_v16  ;;  %v2684_v37 = vpop.permute.xlu2 %2166 }
  0xc7   : > { %v2168_v36 = vunpack.i.l.bf16 %v2684_v37  ;;  %v2169_v48 = vunpack.i.h.bf16 %v2684_v37 }
  0xc8   : > { %739 = vmatpush.msra.mxu1 %v690_v21  ;;  %2276 = vrot.lane.b32.xlu2 %v2412_v22, %s2308_s16 }
  0xc9   : > { %1558 = vrot.lane.b32.xlu0 %v2344_v0, %s2308_s16  ;;  %v867_v0 = vsel %vm860_vm5, %v2143_v34, %v2144_v3 }
  0xca   : > { %2281 = vrot.lane.b32.xlu1 %v2416_v23, %s2308_s16  ;;  %1888 = vmatmul.msk.f32.gmra.mxu2 %vm263_vm2, %v1883_v2  ;;  %v855_v38 = vpop.permute.xlu0 %854  ;;  %v857_v39 = vpop.permute.xlu1 %856  ;;  %v1884_v23 = vld [vmem:[%s3155_s1 + $0x58] sm:$0xff] }
  0xcb   : > { %1896 = vmatmul.msk.f32.vlgmr.msra.gmra.mxu0 %vm263_vm2, %v2634_v54  ;;  %v869_v41 = vsel %vm860_vm5, %v855_v38, %v857_v39  ;;  %740 = vmatpush.msra.mxu1 %v688_v4 }
  0xcc   : > { %1879 = vmatmul.msk.f32.gmra.mxu1 %vm263_vm2, %v2640_v55  ;;  %1891 = vmatmul.msk.f32.vlgmr.msra.gmra.mxu3 %vm263_vm2, %v2634_v54  ;;  %v862_v55 = vsel %vm860_vm5, %v2159_v42, %v2169_v48 }
  0xcd   : > { %741 = vmatpush.msra.mxu1 %v686_v40  ;;  %1923 = vmatpush.msk.msrb.mxu0 %vm276_vm0, %v869_v41 }
  0xce   : > { %v2709_v22 = vpop.permute.xlu2 %2171 }
  0xcf   : > { %913 = vmatpush.msrb.mxu0 %v867_v0  ;;  %v2174_v52 = vunpack.i.h.bf16 %v2709_v22  ;;  %v2173_v20 = vunpack.i.l.bf16 %v2709_v22  ;;  %v1921_v0 = vld [vmem:[%s3155_s1 + $0x90] sm:$0xff] }
  0xd0   : > { %2286 = vrot.lane.b32.xlu2 %v2423_v24, %s2308_s16 }
  0xd1   : > { %v1042_v58 = vsel %vm1035_vm6, %v2173_v20, %v2174_v52 }
  0xd2   : > { %1889 = vmatmul.msk.f32.gmra.mxu2 %vm263_vm2, %v1884_v23  ;;  %v2147_v43 = vpop.permute.xlu0 %2146  ;;  %v2152_v44 = vpop.permute.xlu1 %2151 }
  0xd3   : > { %1897 = vmatmul.msk.f32.gmra.mxu0 %vm263_vm2, %v1882_v62  ;;  %v2149_v11 = vunpack.i.h.bf16 %v2147_v43  ;;  %v2148_v5 = vunpack.i.l.bf16 %v2147_v43  ;;  %v2154_v10 = vunpack.i.h.bf16 %v2152_v44  ;;  %v2153_v13 = vunpack.i.l.bf16 %v2152_v44 }
  0xd4   : > { %1880 = vmatmul.msk.f32.gmra.mxu1 %vm263_vm2, %v189_v63  ;;  %1892 = vmatmul.msk.f32.gmra.mxu3 %vm263_vm2, %v1882_v62 }
  0xd5   : > { %v865_v24 = vsel %vm860_vm5, %v2148_v5, %v2149_v11  ;;  %v863_v12 = vsel %vm860_vm5, %v2153_v13, %v2154_v10  ;;  %v864_v51 = vsel %vm860_vm5, %v2154_v10, %v2168_v36 }
  0xd6   : > { %914 = vmatpush.msrb.mxu0 %v865_v24  ;;  %v1034_v15 = vpop.permute.xlu2 %1033 }
  0xd8   : > { %915 = vmatpush.msrb.mxu0 %v863_v12 }
  0xda   : > { %1910 = vmatmul.msk.f32.vlgmr.msra.gmra.mxu2 %vm263_vm2, %v1900_v14  ;;  %v859_v25 = vpop.permute.xlu0 %858  ;;  %v2162_v26 = vpop.permute.xlu1 %2161  ;;  %916 = vmatpush.msrb.mxu0 %v861_v18 }
  0xdb   : > { %1898 = vmatmul.msk.f32.gmra.mxu0 %vm263_vm2, %v1883_v2  ;;  %v870_v45 = vsel %vm860_vm5, %v857_v39, %v859_v25  ;;  %v2164_v46 = vunpack.i.h.bf16 %v2162_v26  ;;  %v2163_v47 = vunpack.i.l.bf16 %v2162_v26  ;;  %1933 = vmatpush.msk.msrb.mxu2 %vm276_vm0, %v859_v25 }
  0xdc   : > { %1893 = vmatmul.msk.f32.gmra.mxu3 %vm263_vm2, %v1883_v2  ;;  %1905 = vmatmul.msk.f32.vlgmr.msra.gmra.mxu1 %vm263_vm2, %v1900_v14 }
  0xdd   : > { %1928 = vmatpush.msk.msrb.mxu1 %vm276_vm0, %v870_v45  ;;  %971 = vmatpush.msrb.mxu2 %v2163_v47  ;;  %v868_v19 = vsel %vm860_vm5, %v2144_v3, %v2163_v47  ;;  %v866_v49 = vsel %vm860_vm5, %v2149_v11, %v2164_v46  ;;  %v1922_v11 = vld [vmem:[%s3155_s1 + $0x98] sm:$0xff] }
  0xde   : > { %v2745_v27 = vpop.permute.xlu2 %2196 }
  0xdf   : > { %942 = vmatpush.msrb.mxu1 %v868_v19  ;;  %972 = vmatpush.msrb.mxu2 %v2164_v46  ;;  %v2198_v32 = vunpack.i.l.bf16 %v2745_v27  ;;  %v2199_v38 = vunpack.i.h.bf16 %v2745_v27  ;;  %v1938_v46 = vld [vmem:[%s3155_s1 + $0xa0] sm:$0xff] }
  0xe1   : > { %943 = vmatpush.msrb.mxu1 %v866_v49  ;;  %973 = vmatpush.msrb.mxu2 %v2168_v36 }
  0xe2   : > { %1911 = vmatmul.msk.f32.gmra.mxu2 %vm263_vm2, %v1901_v50  ;;  %v1030_v53 = vpop.permute.xlu0 %1029  ;;  %v1032_v54 = vpop.permute.xlu1 %1031 }
  0xe3   : > { %1899 = vmatmul.msk.f32.gmra.mxu0 %vm263_vm2, %v1884_v23  ;;  %v1044_v56 = vsel %vm1035_vm6, %v1030_v53, %v1032_v54  ;;  %v1045_v57 = vsel %vm1035_vm6, %v1032_v54, %v1034_v15  ;;  %944 = vmatpush.msrb.mxu1 %v864_v51  ;;  %v1939_v53 = vld [vmem:[%s3155_s1 + $0xa8] sm:$0xff] }
  0xe4   : > { %1894 = vmatmul.msk.f32.gmra.mxu3 %vm263_vm2, %v1884_v23  ;;  %1906 = vmatmul.msk.f32.gmra.mxu1 %vm263_vm2, %v1901_v50 }
  0xe5   : > { %974 = vmatpush.msrb.mxu2 %v2169_v48  ;;  %945 = vmatpush.msrb.mxu1 %v862_v55 }
  0xe6   : > { %1942 = vmatpush.msk.msra.mxu3 %vm276_vm0, %v1044_v56  ;;  %1947 = vmatpush.msk.msra.mxu0 %vm276_vm0, %v1045_v57 }
  0xe7   : > { %1952 = vmatpush.msk.msra.mxu1 %vm276_vm0, %v1034_v15  ;;  %v2766_v6 = vpop.permute.xlu2 %2201 }
  0xe8   : > { %1088 = vmatpush.msra.mxu3 %v1042_v58  ;;  %v2204_v40 = vunpack.i.h.bf16 %v2766_v6  ;;  %v2203_v41 = vunpack.i.l.bf16 %v2766_v6 }
  0xea   : > { %1912 = vmatmul.msk.f32.gmra.mxu2 %vm263_vm2, %v1902_v59  ;;  %v2177_v61 = vpop.permute.xlu0 %2176  ;;  %v2182_v1 = vpop.permute.xlu1 %2181  ;;  %v1217_v43 = vsel %vm1210_vm7, %v2203_v41, %v2204_v40 }
  0xeb   : > { %1924 = vmatmul.msk.f32.vlgmr.msrb.gmra.mxu0 %vm263_vm2, %v1919_v60  ;;  %v2179_v8 = vunpack.i.h.bf16 %v2177_v61  ;;  %v2178_v28 = vunpack.i.l.bf16 %v2177_v61  ;;  %v2184_v62 = vunpack.i.h.bf16 %v2182_v1  ;;  %v2183_v63 = vunpack.i.l.bf16 %v2182_v1 }
  0xec   : > { %1907 = vmatmul.msk.f32.gmra.mxu1 %vm263_vm2, %v1902_v59  ;;  %1915 = vmatmul.msk.f32.vlgmr.msrb.gmra.mxu3 %vm263_vm2, %v1900_v14 }
  0xed   : > { %v1040_v17 = vsel %vm1035_vm6, %v2178_v28, %v2179_v8  ;;  %v1038_v29 = vsel %vm1035_vm6, %v2183_v63, %v2184_v62  ;;  %v1039_v39 = vsel %vm1035_vm6, %v2184_v62, %v2198_v32  ;;  %v1957_v28 = vld [vmem:[%s3155_s1 + $0xc0] sm:$0xff]  ;;  %v1940_v63 = vld [vmem:[%s3155_s1 + $0xb0] sm:$0xff] }
  0xee   : > { %1089 = vmatpush.msra.mxu3 %v1040_v17 }
  0xef   : > { %v2786_v4 = vpop.permute.xlu2 %2216 }
  0xf0   : > { %1090 = vmatpush.msra.mxu3 %v1038_v29  ;;  %v2219_v5 = vunpack.i.h.bf16 %v2786_v4  ;;  %v2218_v10 = vunpack.i.l.bf16 %v2786_v4 }
  0xf2   : > { %1913 = vmatmul.msk.f32.gmra.mxu2 %vm263_vm2, %v1903_v30  ;;  %v2187_v33 = vpop.permute.xlu0 %2186  ;;  %v2192_v7 = vpop.permute.xlu1 %2191  ;;  %v1211_v47 = vsel %vm1210_vm7, %v2218_v10, %v2219_v5 }
  0xf3   : > { %1925 = vmatmul.msk.f32.gmra.mxu0 %vm263_vm2, %v1920_v31  ;;  %v2189_v16 = vunpack.i.h.bf16 %v2187_v33  ;;  %v2188_v21 = vunpack.i.l.bf16 %v2187_v33  ;;  %v2194_v35 = vunpack.i.h.bf16 %v2192_v7  ;;  %v2193_v37 = vunpack.i.l.bf16 %v2192_v7 }
  0xf4   : > { %1908 = vmatmul.msk.f32.gmra.mxu1 %vm263_vm2, %v1903_v30  ;;  %1916 = vmatmul.msk.f32.gmra.mxu3 %vm263_vm2, %v1901_v50 }
  0xf5   : > { %1146 = vmatpush.msra.mxu1 %v2193_v37  ;;  %v1036_v2 = vsel %vm1035_vm6, %v2188_v21, %v2189_v16  ;;  %v1043_v3 = vsel %vm1035_vm6, %v2174_v52, %v2193_v37  ;;  %v1041_v34 = vsel %vm1035_vm6, %v2179_v8, %v2194_v35  ;;  %v1037_v42 = vsel %vm1035_vm6, %v2189_v16, %v2199_v38 }
  0xf6   : > { %1091 = vmatpush.msra.mxu3 %v1036_v2  ;;  %1117 = vmatpush.msra.mxu0 %v1043_v3  ;;  %v1958_v2 = vld [vmem:[%s3155_s1 + $0xc8] sm:$0xff] }
  0xf7   : > { %1147 = vmatpush.msra.mxu1 %v2194_v35 }
  0xf8   : > { %1118 = vmatpush.msra.mxu0 %v1041_v34  ;;  %v1941_v34 = vld [vmem:[%s3155_s1 + $0xb8] sm:$0xff] }
  0xf9   : > { %1148 = vmatpush.msra.mxu1 %v2198_v32 }
  0xfa   : > { %1934 = vmatmul.msk.f32.vlgmr.msrb.gmra.mxu2 %vm263_vm2, %v1919_v60  ;;  %v1205_v22 = vpop.permute.xlu0 %1204  ;;  %v1207_v23 = vpop.permute.xlu1 %1206  ;;  %1119 = vmatpush.msra.mxu0 %v1039_v39 }
  0xfb   : > { %1926 = vmatmul.msk.f32.gmra.mxu0 %vm263_vm2, %v1921_v0  ;;  %v1219_v9 = vsel %vm1210_vm7, %v1205_v22, %v1207_v23  ;;  %1149 = vmatpush.msra.mxu1 %v2199_v38  ;;  %v2803_v44 = vpop.permute.xlu2 %2226 }
  0xfc   : > { %1917 = vmatmul.msk.f32.gmra.mxu3 %vm263_vm2, %v1902_v59  ;;  %1929 = vmatmul.msk.f32.vlgmr.msrb.gmra.mxu1 %vm263_vm2, %v1919_v60  ;;  %v2228_v48 = vunpack.i.l.bf16 %v2803_v44  ;;  %v2229_v52 = vunpack.i.h.bf16 %v2803_v44 }
  0xfd   : > { %1120 = vmatpush.msra.mxu0 %v1037_v42  ;;  %1961 = vmatpush.msk.msra.mxu2 %vm276_vm0, %v1219_v9 }
  0xfe   : > { %v1212_v58 = vsel %vm1210_vm7, %v2219_v5, %v2229_v52 }
  0xff   : > { %1263 = vmatpush.msra.mxu2 %v1217_v43 }
 0x102   : > { %1935 = vmatmul.msk.f32.gmra.mxu2 %vm263_vm2, %v1920_v31 }
 0x103   : > { %1927 = vmatmul.msk.f32.gmra.mxu0 %vm263_vm2, %v1922_v11  ;;  %v2207_v13 = vpop.permute.xlu0 %2206  ;;  %v2212_v24 = vpop.permute.xlu1 %2211 }
 0x104   : > { %1918 = vmatmul.msk.f32.gmra.mxu3 %vm263_vm2, %v1903_v30  ;;  %1930 = vmatmul.msk.f32.gmra.mxu1 %vm263_vm2, %v1920_v31  ;;  %v2209_v12 = vunpack.i.h.bf16 %v2207_v13  ;;  %v2208_v14 = vunpack.i.l.bf16 %v2207_v13  ;;  %v2214_v18 = vunpack.i.h.bf16 %v2212_v24  ;;  %v2213_v15 = vunpack.i.l.bf16 %v2212_v24  ;;  %v2816_v45 = vpop.permute.xlu2 %2231 }
 0x105   : > { %v2234_v55 = vunpack.i.h.bf16 %v2816_v45  ;;  %v2233_v56 = vunpack.i.l.bf16 %v2816_v45 }
 0x106   : > { %v1215_v25 = vsel %vm1210_vm7, %v2208_v14, %v2209_v12  ;;  %v1213_v26 = vsel %vm1210_vm7, %v2213_v15, %v2214_v18  ;;  %v1214_v54 = vsel %vm1210_vm7, %v2214_v18, %v2228_v48 }
 0x107   : > { %1264 = vmatpush.msra.mxu2 %v1215_v25  ;;  %v1393_v8 = vsel %vm1385_vm8, %v2233_v56, %v2234_v55 }
 0x109   : > { %1265 = vmatpush.msra.mxu2 %v1213_v26 }
 0x10a   : > { %1936 = vmatmul.msk.f32.gmra.mxu2 %vm263_vm2, %v1921_v0 }
 0x10b   : > { %1948 = vmatmul.msk.f32.vlgmr.msra.gmra.mxu0 %vm263_vm2, %v1938_v46  ;;  %v1209_v36 = vpop.permute.xlu0 %1208  ;;  %v2222_v19 = vpop.permute.xlu1 %2221  ;;  %1266 = vmatpush.msra.mxu2 %v1211_v47 }
 0x10c   : > { %1931 = vmatmul.msk.f32.gmra.mxu1 %vm263_vm2, %v1921_v0  ;;  %1943 = vmatmul.msk.f32.vlgmr.msra.gmra.mxu3 %vm263_vm2, %v1938_v46  ;;  %v1220_v49 = vsel %vm1210_vm7, %v1207_v23, %v1209_v36  ;;  %v2224_v50 = vunpack.i.h.bf16 %v2222_v19  ;;  %v2223_v51 = vunpack.i.l.bf16 %v2222_v19  ;;  %v1380_v57 = vpop.permute.xlu2 %1379 }
 0x10d   : > { %1971 = vmatpush.msk.msrb.mxu0 %vm276_vm0, %v1209_v36  ;;  %1966 = vmatpush.msk.msrb.mxu3 %vm276_vm0, %v1220_v49  ;;  %v2922_v49 = vld [vmem:[%s3155_s1 + $0xd8] sm:$0xff] }
 0x10e   : > { %v1218_v20 = vsel %vm1210_vm7, %v2204_v40, %v2223_v51  ;;  %v1216_v27 = vsel %vm1210_vm7, %v2209_v12, %v2224_v50 }
 0x10f   : > { %1321 = vmatpush.msrb.mxu0 %v2223_v51  ;;  %1292 = vmatpush.msrb.mxu3 %v1218_v20 }
 0x111   : > { %1322 = vmatpush.msrb.mxu0 %v2224_v50  ;;  %1293 = vmatpush.msrb.mxu3 %v1216_v27 }
 0x112   : > { %1937 = vmatmul.msk.f32.gmra.mxu2 %vm263_vm2, %v1922_v11 }
 0x113   : > { %1949 = vmatmul.msk.f32.gmra.mxu0 %vm263_vm2, %v1939_v53  ;;  %v1382_v59 = vpop.permute.xlu0 %1381  ;;  %v1384_v60 = vpop.permute.xlu1 %1383  ;;  %1294 = vmatpush.msrb.mxu3 %v1214_v54 }
 0x114   : > { %1932 = vmatmul.msk.f32.gmra.mxu1 %vm263_vm2, %v1922_v11  ;;  %1944 = vmatmul.msk.f32.gmra.mxu3 %vm263_vm2, %v1939_v53  ;;  %v1395_v61 = vsel %vm1385_vm8, %v1382_v59, %v1384_v60  ;;  %v1394_v1 = vsel %vm1385_vm8, %v1380_v57, %v1382_v59  ;;  %v2257_v21 = vpop.permute.xlu2 %2256  ;;  %v2895_v11 = vld [vmem:[%s3155_s1 + $0xd0] sm:$0xff] }
 0x115   : > { %1323 = vmatpush.msrb.mxu0 %v2228_v48  ;;  %1295 = vmatpush.msrb.mxu3 %v1212_v58  ;;  %v2258_v42 = vunpack.i.l.bf16 %v2257_v21  ;;  %v2259_v10 = vunpack.i.h.bf16 %v2257_v21 }
 0x116   : > { %1980 = vmatpush.msk.msrb.mxu1 %vm276_vm0, %v1394_v1  ;;  %1985 = vmatpush.msk.msrb.mxu2 %vm276_vm0, %v1395_v61 }
 0x117   : > { %1324 = vmatpush.msrb.mxu0 %v2229_v52  ;;  %1990 = vmatpush.msk.msra.mxu3 %vm276_vm0, %v1384_v60 }
 0x118   : > { %v2855_v62 = vpop.f32.mrf.mxu0  ;;  %1467 = vmatpush.msrb.mxu2 %v1393_v8  ;;  %v2941_v8 = vld [vmem:[%s3155_s1 + $0xe0] sm:$0xff] }
 0x119   : > { %v2860_v6 = vpop.f32.mrf.mxu1  ;;  %1496 = vmatpush.msra.mxu3 %v2234_v55 }
 0x11a   : > { %1962 = vmatmul.msk.f32.vlgmr.msra.gmra.mxu2 %vm263_vm2, %v1957_v28 }
 0x11b   : > { %1950 = vmatmul.msk.f32.gmra.mxu0 %vm263_vm2, %v1940_v63  ;;  %v2237_v17 = vpop.permute.xlu0 %2236  ;;  %v2242_v29 = vpop.permute.xlu1 %2241 }
 0x11c   : > { %1945 = vmatmul.msk.f32.gmra.mxu3 %vm263_vm2, %v1940_v63  ;;  %1953 = vmatmul.msk.f32.vlgmr.msra.gmra.mxu1 %vm263_vm2, %v1938_v46  ;;  %v2239_v30 = vunpack.i.h.bf16 %v2237_v17  ;;  %v2238_v31 = vunpack.i.l.bf16 %v2237_v17  ;;  %v2244_v32 = vunpack.i.h.bf16 %v2242_v29  ;;  %v2243_v33 = vunpack.i.l.bf16 %v2242_v29  ;;  %v2900_v24 = vpop.permute.xlu2 %2261  ;;  %v1700_v29 = vld [vmem:[%s3156_s2] sm:$0xff] }
 0x11d   : > { %v2866_v7 = vpop.f32.mrf.mxu2  ;;  %v2264_v14 = vunpack.i.h.bf16 %v2900_v24  ;;  %v2263_v18 = vunpack.i.l.bf16 %v2900_v24  ;;  %v2309_v17 = vmov 0  }
 0x11e   : > { %v2868_v16 = vpop.f32.mrf.mxu3  ;;  %1497 = vmatpush.msra.mxu3 %v2239_v30  ;;  %v1391_v35 = vsel %vm1385_vm8, %v2238_v31, %v2239_v30  ;;  %v1389_v37 = vsel %vm1385_vm8, %v2243_v33, %v2244_v32  ;;  %v1388_v15 = vsel %vm1385_vm8, %v2258_v42, %v2243_v33  ;;  %2290 = vset.pattern.permute.xlu0 %v2309_v17 }
 0x11f   : > { %1468 = vmatpush.msrb.mxu2 %v1391_v35  ;;  %v1567_v36 = vsel %vm1560_vm9, %v2263_v18, %v2264_v14  ;;  %2291 = vset.pattern.permute.xlu1 %v2309_v17  ;;  %v1978_v18 = vld [vmem:[%s3155_s1 + $0xf0] sm:$0xff] }
 0x120   : > { %v2875_v3 = vpop.f32.mrf.mxu0  ;;  %1498 = vmatpush.msra.mxu3 %v2244_v32  ;;  %1706 = vperm.xlu0 %2290, %v1700_v29   ;;  %v1702_v29 = vld [vmem:[%s3156_s2 + $0x10] sm:$0xff] }
 0x121   : > { %v332_v4 = vpop.f32.mrf.mxu1  ;;  %1469 = vmatpush.msrb.mxu2 %v1389_v37  ;;  %2292 = vset.pattern.permute.xlu2 %v2309_v17  ;;  %v1998_v17 = vld [vmem:[%s3155_s1 + $0x118] sm:$0xff] }
 0x122   : > { %1963 = vmatmul.msk.f32.gmra.mxu2 %vm263_vm2, %v1958_v2  ;;  %1716 = vperm.xlu2 %2292, %v1702_v29  }
 0x123   : > { %1951 = vmatmul.msk.f32.gmra.mxu0 %vm263_vm2, %v1941_v34  ;;  %v2247_v38 = vpop.permute.xlu0 %2246 }
 0x124   : > { %1946 = vmatmul.msk.f32.gmra.mxu3 %vm263_vm2, %v1941_v34  ;;  %1954 = vmatmul.msk.f32.gmra.mxu1 %vm263_vm2, %v1939_v53  ;;  %v2249_v39 = vunpack.i.h.bf16 %v2247_v38  ;;  %v2248_v40 = vunpack.i.l.bf16 %v2247_v38  ;;  %v2252_v41 = vpop.permute.xlu1 %2251  ;;  %v2928_v20 = vpop.permute.xlu2 %2276 }
 0x125   : > { %v2254_v0 = vunpack.i.h.bf16 %v2252_v41  ;;  %v2253_v22 = vunpack.i.l.bf16 %v2252_v41  ;;  %v2884_v23 = vpop.f32.mrf.mxu2  ;;  %v2279_v59 = vunpack.i.h.bf16 %v2928_v20  ;;  %v2278_v60 = vunpack.i.l.bf16 %v2928_v20  ;;  %v1977_v41 = vld [vmem:[%s3155_s1 + $0xe8] sm:$0xff] }
 0x126   : > { %v2886_v9 = vpop.f32.mrf.mxu3  ;;  %1499 = vmatpush.msra.mxu3 %v2249_v39  ;;  %v1387_v43 = vsel %vm1385_vm8, %v2248_v40, %v2249_v39  ;;  %v1386_v45 = vsel %vm1385_vm8, %v2259_v10, %v2248_v40  ;;  %v1996_v20 = vld [vmem:[%s3155_s1 + $0x108] sm:$0xff] }
 0x127   : > { %v1392_v44 = vsel %vm1385_vm8, %v2253_v22, %v2233_v56  ;;  %1470 = vmatpush.msrb.mxu2 %v1387_v43  ;;  %v1390_v5 = vsel %vm1385_vm8, %v2254_v0, %v2238_v31  ;;  %v1561_v33 = vsel %vm1560_vm9, %v2278_v60, %v2279_v59  ;;  %v1997_v60 = vld [vmem:[%s3155_s1 + $0x110] sm:$0xff] }
 0x128   : > { %v2898_v13 = vpop.f32.mrf.mxu0  ;;  %1438 = vmatpush.msrb.mxu1 %v1392_v44 }
 0x129   : > { %v335_v12 = vpop.f32.mrf.mxu1 }
 0x12a   : > { %1964 = vmatmul.msk.f32.gmra.mxu2 %vm263_vm2, %v2895_v11  ;;  %1439 = vmatpush.msrb.mxu1 %v1390_v5 }
 0x12b   : > { %1972 = vmatmul.msk.f32.vlgmr.msrb.gmra.mxu0 %vm263_vm2, %v1957_v28  ;;  %v1555_v25 = vpop.permute.xlu0 %1554 }
 0x12c   : > { %1955 = vmatmul.msk.f32.gmra.mxu1 %vm263_vm2, %v1940_v63  ;;  %1967 = vmatmul.msk.f32.vlgmr.msrb.gmra.mxu3 %vm263_vm2, %v1957_v28  ;;  %v1557_v26 = vpop.permute.xlu1 %1556  ;;  %v2287_v21 = vpop.permute.xlu2 %2286 }
 0x12d   : > { %v1569_v46 = vsel %vm1560_vm9, %v1555_v25, %v1557_v26  ;;  %1440 = vmatpush.msrb.mxu1 %v1388_v15  ;;  %v2912_v47 = vpop.f32.mrf.mxu2  ;;  %v2289_v22 = vunpack.i.h.bf16 %v2287_v21 }
 0x12e   : > { %v405_v19 = vpop.f32.mrf.mxu3  ;;  %1999 = vmatpush.msk.msra.mxu0 %vm276_vm0, %v1569_v46 }
 0x12f   : > { %v406_v48 = vadd.f32 %v405_v19, %v2855_v62  ;;  %1441 = vmatpush.msrb.mxu1 %v1386_v45  ;;  %v435_v19 = vadd.f32 %v2898_v13, %v2860_v6 }
 0x130   : > { %v437_v50 = vpop.f32.mrf.mxu0  ;;  %1613 = vmatpush.msra.mxu0 %v1567_v36 }
 0x131   : > { %v338_v51 = vpop.f32.mrf.mxu1  ;;  %v2924_v52 = vadd.f32 %v437_v50, %v332_v4  ;;  %v2288_v4 = vunpack.i.l.bf16 %v2287_v21 }
 0x132   : > { %1965 = vmatmul.msk.f32.gmra.mxu2 %vm263_vm2, %v2922_v49 }
 0x133   : > { %1973 = vmatmul.msk.f32.gmra.mxu0 %vm263_vm2, %v1958_v2  ;;  %v2267_v27 = vpop.permute.xlu0 %2266 }
 0x134   : > { %1956 = vmatmul.msk.f32.gmra.mxu1 %vm263_vm2, %v1941_v34  ;;  %1968 = vmatmul.msk.f32.gmra.mxu3 %vm263_vm2, %v1958_v2  ;;  %v2269_v53 = vunpack.i.h.bf16 %v2267_v27  ;;  %v2268_v54 = vunpack.i.l.bf16 %v2267_v27  ;;  %v2272_v55 = vpop.permute.xlu1 %2271  ;;  %v1703_v27 = vld [vmem:[%s3156_s2 + $0x18] sm:$0xff] }
 0x135   : > { %v2274_v56 = vunpack.i.h.bf16 %v2272_v55  ;;  %v2273_v57 = vunpack.i.l.bf16 %v2272_v55  ;;  %v2933_v58 = vpop.f32.mrf.mxu2 }
 0x136   : > { %v1565_v61 = vsel %vm1560_vm9, %v2268_v54, %v2269_v53 }
 0x137   : > { %v408_v1 = vpop.f32.mrf.mxu3  ;;  %1614 = vmatpush.msra.mxu0 %v1565_v61  ;;  %v1563_v28 = vsel %vm1560_vm9, %v2273_v57, %v2274_v56  ;;  %v1564_v10 = vsel %vm1560_vm9, %v2274_v56, %v2288_v4 }
 0x138   : > { %v409_v62 = vadd.f32 %v408_v1, %v2875_v3  ;;  %v440_v63 = vpop.f32.mrf.mxu0 }
 0x139   : > { %v2948_v30 = vadd.f32 %v440_v63, %v335_v12  ;;  %v463_v31 = vpop.f32.mrf.mxu1  ;;  %1615 = vmatpush.msra.mxu0 %v1563_v28  ;;  %v1701_v12 = vld [vmem:[%s3156_s2 + $0x8] sm:$0xff] }
 0x13a   : > { %v464_v32 = vadd.f32 %v463_v31, %v2866_v7  ;;  %1986 = vmatmul.msk.f32.vlgmr.msrb.gmra.mxu2 %vm263_vm2, %v2941_v8  ;;  %1711 = vperm.xlu1 %2291, %v1701_v12  }
 0x13b   : > { %1974 = vmatmul.msk.f32.gmra.mxu0 %vm263_vm2, %v2895_v11  ;;  %v1559_v35 = vpop.permute.xlu0 %1558 }
 0x13c   : > { %1969 = vmatmul.msk.f32.gmra.mxu3 %vm263_vm2, %v2895_v11  ;;  %1981 = vmatmul.msk.f32.vlgmr.msrb.gmra.mxu1 %vm263_vm2, %v2941_v8  ;;  %v1570_v37 = vsel %vm1560_vm9, %v1557_v26, %v1559_v35  ;;  %v2282_v7 = vpop.permute.xlu1 %2281  ;;  %v2998_v26 = vld [vmem:[%s3155_s1 + $0x100] sm:$0xff] }
 0x13d   : > { %v2284_v2 = vunpack.i.h.bf16 %v2282_v7  ;;  %v2283_v3 = vunpack.i.l.bf16 %v2282_v7  ;;  %v568_v34 = vpop.f32.mrf.mxu2  ;;  %1616 = vmatpush.msra.mxu0 %v1561_v33  ;;  %2021 = vmatpush.msk.msra.mxu1 %vm276_vm0, %v1570_v37 }
 0x13e   : > { %v2962_v38 = vadd.f32 %v568_v34, %v406_v48  ;;  %2009 = vmatpush.msk.msra.mxu2 %vm276_vm0, %v1559_v35  ;;  %2026 = vmatpush.msk.msrb.mxu3 %vm276_vm0, %v1559_v35 }
 0x13f   : > { %2004 = vmatpush.msk.msrb.mxu0 %vm276_vm0, %v1570_v37  ;;  %v411_v39 = vpop.f32.mrf.mxu3  ;;  %v1568_v40 = vsel %vm1560_vm9, %v2264_v14, %v2283_v3  ;;  %v1566_v0 = vsel %vm1560_vm9, %v2269_v53, %v2284_v2 }
 0x140   : > { %v412_v42 = vadd.f32 %v411_v39, %v2868_v16  ;;  %v443_v43 = vpop.f32.mrf.mxu0  ;;  %2022 = vmatpush.msra.mxu1 %v1568_v40  ;;  %1671 = vmatpush.msra.mxu2 %v2283_v3  ;;  %v1562_v16 = vsel %vm1560_vm9, %v2279_v59, %v2289_v22 }
 0x141   : > { %1642 = vmatpush.msrb.mxu0 %v1568_v40  ;;  %v2975_v44 = vadd.f32 %v443_v43, %v338_v51  ;;  %v466_v11 = vpop.f32.mrf.mxu1  ;;  %2027 = vmatpush.msrb.mxu3 %v2283_v3 }
 0x142   : > { %v467_v5 = vadd.f32 %v466_v11, %v2884_v23  ;;  %1987 = vmatmul.msk.f32.gmra.mxu2 %vm263_vm2, %v1977_v41  ;;  %2023 = vmatpush.msra.mxu1 %v1566_v0 }
 0x143   : > { %1643 = vmatpush.msrb.mxu0 %v1566_v0  ;;  %1672 = vmatpush.msra.mxu2 %v2284_v2 }
 0x144   : > { %1975 = vmatmul.msk.f32.gmra.mxu0 %vm263_vm2, %v2922_v49  ;;  %1970 = vmatmul.msk.f32.gmra.mxu3 %vm263_vm2, %v2922_v49 }
 0x145   : > { %1982 = vmatmul.msk.f32.gmra.mxu1 %vm263_vm2, %v1977_v41  ;;  %1644 = vmatpush.msrb.mxu0 %v1564_v10  ;;  %v571_v24 = vpop.f32.mrf.mxu2 }
 0x146   : > { %2024 = vmatpush.msra.mxu1 %v1564_v10  ;;  %v2986_v23 = vadd.f32 %v571_v24, %v409_v62  ;;  %2028 = vmatpush.msrb.mxu3 %v2284_v2 }
 0x147   : > { %v414_v14 = vpop.f32.mrf.mxu3  ;;  %1645 = vmatpush.msrb.mxu0 %v1562_v16  ;;  %1673 = vmatpush.msra.mxu2 %v2288_v4 }
 0x148   : > { %2025 = vmatpush.msra.mxu1 %v1562_v16  ;;  %v415_v15 = vadd.f32 %v414_v14, %v2886_v9  ;;  %v626_v25 = vpop.f32.mrf.mxu0  ;;  %2029 = vmatpush.msrb.mxu3 %v2288_v4 }
 0x149   : > { %v469_v45 = vpop.f32.mrf.mxu1  ;;  %v3000_v46 = vadd.f32 %v626_v25, %v464_v32  ;;  %1674 = vmatpush.msra.mxu2 %v2289_v22  ;;  %1721 = vperm.xlu1 %2291, %v1703_v27  }
 0x14a   : > { %v470_v36 = vadd.f32 %v469_v45, %v2912_v47  ;;  %1988 = vmatmul.msk.f32.gmra.mxu2 %vm263_vm2, %v1978_v18  ;;  %2030 = vmatpush.msrb.mxu3 %v2289_v22  ;;  %v1979_v47 = vld [vmem:[%s3155_s1 + $0xf8] sm:$0xff] }
 0x14c   : > { %2000 = vmatmul.msk.f32.vlgmr.msra.gmra.mxu0 %vm263_vm2, %v2998_v26  ;;  %1991 = vmatmul.msk.f32.vlgmr.msra.gmra.mxu3 %vm263_vm2, %v2941_v8 }
 0x14d   : > { %1983 = vmatmul.msk.f32.gmra.mxu1 %vm263_vm2, %v1978_v18  ;;  %v574_v9 = vpop.f32.mrf.mxu2 }
 0x14e   : > { %v644_v48 = vadd.f32 %v574_v9, %v412_v42 }
 0x14f   : > { %v597_v49 = vpop.f32.mrf.mxu3 }
 0x150   : > { %v639_v50 = vadd.f32 %v597_v49, %v435_v19  ;;  %v629_v51 = vpop.f32.mrf.mxu0 }
 0x151   : > { %v472_v53 = vpop.f32.mrf.mxu1  ;;  %v643_v54 = vadd.f32 %v629_v51, %v467_v5 }
 0x152   : > { %v473_v6 = vadd.f32 %v472_v53, %v2933_v58  ;;  %1989 = vmatmul.msk.f32.gmra.mxu2 %vm263_vm2, %v1979_v47 }
 0x154   : > { %2001 = vmatmul.msk.f32.gmra.mxu0 %vm263_vm2, %v1996_v20  ;;  %1992 = vmatmul.msk.f32.gmra.mxu3 %vm263_vm2, %v1977_v41 }
 0x155   : > { %1984 = vmatmul.msk.f32.gmra.mxu1 %vm263_vm2, %v1979_v47  ;;  %v577_v13 = vpop.f32.mrf.mxu2 }
 0x156   : > { %v647_v55 = vadd.f32 %v577_v13, %v415_v15 }
 0x157   : > { %v600_v56 = vpop.f32.mrf.mxu3 }
 0x158   : > { %v642_v57 = vadd.f32 %v600_v56, %v2924_v52  ;;  %v632_v59 = vpop.f32.mrf.mxu0 }
 0x159   : > { %v646_v61 = vadd.f32 %v632_v59, %v470_v36  ;;  %v743_v58 = vpop.f32.mrf.mxu1 }
 0x15a   : > { %v813_v1 = vadd.f32 %v743_v58, %v2962_v38  ;;  %2010 = vmatmul.msk.f32.vlgmr.msra.gmra.mxu2 %vm263_vm2, %v2998_v26 }
 0x15c   : > { %2002 = vmatmul.msk.f32.gmra.mxu0 %vm263_vm2, %v1997_v60  ;;  %1993 = vmatmul.msk.f32.gmra.mxu3 %vm263_vm2, %v1978_v18 }
 0x15d   : > { %2006 = vmatmul.msk.f32.vlgmr.msra.gmra.mxu1 %vm263_vm2, %v1996_v20  ;;  %v772_v8 = vpop.f32.mrf.mxu2 }
 0x15e   : > { %v814_v52 = vadd.f32 %v772_v8, %v639_v50 }
 0x15f   : > { %v603_v28 = vpop.f32.mrf.mxu3 }
 0x160   : > { %v645_v62 = vadd.f32 %v603_v28, %v2948_v30  ;;  %v635_v63 = vpop.f32.mrf.mxu0 }
 0x161   : > { %v649_v31 = vadd.f32 %v635_v63, %v473_v6  ;;  %v746_v32 = vpop.f32.mrf.mxu1 }
 0x162   : > { %v816_v33 = vadd.f32 %v746_v32, %v2986_v23  ;;  %2011 = vmatmul.msk.f32.gmra.mxu2 %vm263_vm2, %v1996_v20 }
 0x164   : > { %2003 = vmatmul.msk.f32.gmra.mxu0 %vm263_vm2, %v1998_v17  ;;  %1994 = vmatmul.msk.f32.gmra.mxu3 %vm263_vm2, %v1979_v47 }
 0x165   : > { %2007 = vmatmul.msk.f32.gmra.mxu1 %vm263_vm2, %v1997_v60  ;;  %v775_v30 = vpop.f32.mrf.mxu2 }
 0x166   : > { %v817_v21 = vadd.f32 %v775_v30, %v642_v57 }
 0x167   : > { %v606_v35 = vpop.f32.mrf.mxu3 }
 0x168   : > { %v648_v37 = vadd.f32 %v606_v35, %v2975_v44  ;;  %v918_v7 = vpop.f32.mrf.mxu0 }
 0x169   : > { %v749_v2 = vpop.f32.mrf.mxu1  ;;  %v3048_v3 = vadd.f32 %v918_v7, %v813_v1 }
 0x16a   : > { %v819_v34 = vadd.f32 %v749_v2, %v644_v48  ;;  %2012 = vmatmul.msk.f32.gmra.mxu2 %vm263_vm2, %v1997_v60 }
 0x16c   : > { %2005 = vmatmul.msk.f32.vlgmr.msrb.gmra.mxu0 %vm263_vm2, %v2998_v26  ;;  %2013 = vmatmul.msk.f32.vlgmr.msrb.gmra.mxu3 %vm263_vm2, %v1998_v17 }
 0x16d   : > { %2008 = vmatmul.msk.f32.gmra.mxu1 %vm263_vm2, %v1998_v17  ;;  %v778_v4 = vpop.f32.mrf.mxu2 }
 0x16e   : > { %v820_v38 = vadd.f32 %v778_v4, %v645_v62 }
 0x16f   : > { %v801_v39 = vpop.f32.mrf.mxu3 }
 0x170   : > { %v815_v40 = vadd.f32 %v801_v39, %v3000_v46  ;;  %v921_v41 = vpop.f32.mrf.mxu0 }
 0x171   : > { %v752_v0 = vpop.f32.mrf.mxu1  ;;  %v3056_v22 = vadd.f32 %v921_v41, %v816_v33 }
 0x172   : > { %v822_v42 = vadd.f32 %v752_v0, %v647_v55 }
 0x175   : > { %v781_v43 = vpop.f32.mrf.mxu2 }
 0x176   : > { %v823_v44 = vadd.f32 %v781_v43, %v648_v37 }
 0x177   : > { %v804_v11 = vpop.f32.mrf.mxu3 }
 0x178   : > { %v818_v5 = vadd.f32 %v804_v11, %v643_v54  ;;  %v924_v10 = vpop.f32.mrf.mxu0 }
 0x179   : > { %v3058_v16 = vadd.f32 %v924_v10, %v819_v34  ;;  %v947_v24 = vpop.f32.mrf.mxu1 }
 0x17a   : > { %v989_v23 = vadd.f32 %v947_v24, %v814_v52 }
 0x17d   : > { %v976_v12 = vpop.f32.mrf.mxu2 }
 0x17e   : > { %v3060_v14 = vadd.f32 %v976_v12, %v815_v40 }
 0x17f   : > { %v807_v18 = vpop.f32.mrf.mxu3 }
 0x180   : > { %v821_v15 = vadd.f32 %v807_v18, %v646_v61  ;;  %v927_v25 = vpop.f32.mrf.mxu0 }
 0x181   : > { %v3062_v26 = vadd.f32 %v927_v25, %v822_v42  ;;  %v950_v45 = vpop.f32.mrf.mxu1 }
 0x182   : > { %v992_v46 = vadd.f32 %v950_v45, %v817_v21 }
 0x185   : > { %v979_v36 = vpop.f32.mrf.mxu2 }
 0x186   : > { %v3064_v9 = vadd.f32 %v979_v36, %v818_v5 }
 0x187   : > { %v810_v19 = vpop.f32.mrf.mxu3 }
 0x188   : > { %v824_v48 = vadd.f32 %v810_v19, %v649_v31  ;;  %v1122_v49 = vpop.f32.mrf.mxu0 }
 0x189   : > { %v953_v47 = vpop.f32.mrf.mxu1  ;;  %v3066_v50 = vadd.f32 %v1122_v49, %v989_v23 }
 0x18a   : > { %v995_v51 = vadd.f32 %v953_v47, %v820_v38 }
 0x18d   : > { %v982_v20 = vpop.f32.mrf.mxu2 }
 0x18e   : > { %v3068_v27 = vadd.f32 %v982_v20, %v821_v15 }
 0x18f   : > { %v1093_v53 = vpop.f32.mrf.mxu3 }
 0x190   : > { %v1125_v54 = vpop.f32.mrf.mxu0  ;;  %v1163_v40 = vadd.f32 %v1093_v53, %v3048_v3 }
 0x191   : > { %v956_v6 = vpop.f32.mrf.mxu1  ;;  %v1167_v13 = vadd.f32 %v1125_v54, %v992_v46 }
 0x192   : > { %v998_v55 = vadd.f32 %v956_v6, %v823_v44  ;;  %v3095_v11 = vpop.permute.xlu0 %1706 }
 0x195   : > { %v985_v56 = vpop.f32.mrf.mxu2 }
 0x196   : > { %v3070_v57 = vadd.f32 %v985_v56, %v824_v48 }
 0x197   : > { %v1096_v59 = vpop.f32.mrf.mxu3 }
 0x198   : > { %v1128_v60 = vpop.f32.mrf.mxu0  ;;  %v1166_v24 = vadd.f32 %v1096_v59, %v3056_v22 }
 0x199   : > { %v3072_v61 = vadd.f32 %v1128_v60, %v995_v51  ;;  %v1151_v58 = vpop.f32.mrf.mxu1 }
 0x19a   : > { %v1165_v56 = vadd.f32 %v1151_v58, %v3060_v14 }
 0x19d   : > { %v1268_v1 = vpop.f32.mrf.mxu2 }
 0x19e   : > { %v1338_v41 = vadd.f32 %v1268_v1, %v1163_v40  ;;  %v3112_v1 = vpop.permute.xlu2 %1716 }
 0x19f   : > { %v1099_v8 = vpop.f32.mrf.mxu3 }
 0x1a0   : > { %v1131_v52 = vpop.f32.mrf.mxu0  ;;  %v1169_v48 = vadd.f32 %v1099_v8, %v3058_v16 }
 0x1a1   : > { %v3074_v28 = vadd.f32 %v1131_v52, %v998_v55  ;;  %v3076_v62 = vpop.f32.mrf.mxu1 }
 0x1a5   : > { %v1271_v63 = vpop.f32.mrf.mxu2 }
 0x1a6   : > { %v1341_v12 = vadd.f32 %v1271_v63, %v1166_v24 }
 0x1a7   : > { %v1102_v17 = vpop.f32.mrf.mxu3 }
 0x1a8   : > { %v1326_v29 = vpop.f32.mrf.mxu0 }
 0x1a9   : > { %v3078_v31 = vpop.f32.mrf.mxu1  ;;  %v1340_v16 = vadd.f32 %v1326_v29, %v1165_v56  ;;  %v1168_v29 = vadd.f32 %v3076_v62, %v3064_v9 }
 0x1ac   : > { %v3106_v36 = vpop.permute.xlu1 %1711 }
 0x1ad   : > { %v1274_v32 = vpop.f32.mrf.mxu2 }
 0x1ae   : > { %v1344_v47 = vadd.f32 %v1274_v32, %v1169_v48  ;;  %v1172_v32 = vadd.f32 %v1102_v17, %v3062_v26 }
 0x1af   : > { %v3080_v33 = vpop.f32.mrf.mxu3 }
 0x1b0   : > { %v3082_v30 = vpop.f32.mrf.mxu0 }
 0x1b1   : > { %v3084_v21 = vpop.f32.mrf.mxu1 }
 0x1b5   : > { %v1277_v35 = vpop.f32.mrf.mxu2 }
 0x1b7   : > { %v1300_v37 = vpop.f32.mrf.mxu3 }
 0x1b8   : > { %v3086_v7 = vpop.f32.mrf.mxu0  ;;  %v1342_v53 = vadd.f32 %v1300_v37, %v1167_v13  ;;  %v1347_v37 = vadd.f32 %v1277_v35, %v1172_v32 }
 0x1b9   : > { %v1443_v2 = vpop.f32.mrf.mxu1 }
 0x1ba   : > { %v1513_v42 = vadd.f32 %v1443_v2, %v1338_v41 }
 0x1bb   : > { %v1722_v24 = vpop.permute.xlu1 %1721 }
 0x1bd   : > { %v3088_v34 = vpop.f32.mrf.mxu2 }
 0x1bf   : > { %v1303_v4 = vpop.f32.mrf.mxu3 }
 0x1c0   : > { %v1345_v40 = vadd.f32 %v1303_v4, %v3072_v61 }
 0x1c1   : > { %v3090_v38 = vpop.f32.mrf.mxu0 }
 0x1c2   : > { %v1446_v39 = vpop.f32.mrf.mxu1 }
 0x1c3   : > { %v1516_v15 = vadd.f32 %v1446_v39, %v1341_v12 }
 0x1c5   : > { %v1475_v0 = vpop.f32.mrf.mxu2 }
 0x1c6   : > { %v1517_v59 = vadd.f32 %v1475_v0, %v1342_v53 }
 0x1c7   : > { %v3093_v43 = vpop.f32.mrf.mxu3 }
 0x1c9   : > { %v1618_v44 = vpop.f32.mrf.mxu0 }
 0x1ca   : > { %v1449_v5 = vpop.f32.mrf.mxu1  ;;  %v1688_v10 = vadd.f32 %v1618_v44, %v1513_v42 }
 0x1cb   : > { %v1519_v54 = vadd.f32 %v1449_v5, %v1344_v47 }
 0x1cc   : > { %v1724_v23 = vadd.f32 %v3095_v11, %v1688_v10 }
 0x1cd   : > { %v1478_v18 = vpop.f32.mrf.mxu2 }
 0x1ce   : > { %vm1736_vm10 = vcmp.ge.f32.partialorder %v1724_v23, 0.0  ;;  %v1748_v3 = vmul.f32 0.2, %v1724_v23  ;;  %v1520_v44 = vadd.f32 %v1478_v18, %v1345_v40 }
 0x1cf   : > { %v1501_v45 = vpop.f32.mrf.mxu3 }
 0x1d0   : > { %v1760_v25 = vsel %vm1736_vm10, %v1724_v23, %v1748_v3  ;;  %v1515_v39 = vadd.f32 %v1501_v45, %v1340_v16  ;;  %v1343_v23 = vadd.f32 %v3082_v30, %v1168_v29 }
 0x1d1   : > { %1772 = vst [vmem:[%s3103_s7] sm:$0xff] %v1760_v25  ;;  %v1621_v46 = vpop.f32.mrf.mxu0  ;;  %v1339_v25 = vadd.f32 %v3080_v33, %v3066_v50 }
 0x1d2   : > { %v1452_v22 = vpop.f32.mrf.mxu1  ;;  %v1691_v19 = vadd.f32 %v1621_v46, %v1516_v15  ;;  %v1348_v46 = vadd.f32 %v3093_v43, %v3074_v28  ;;  %v1174_v28 = vadd.f32 %v3084_v21, %v3070_v57 }
 0x1d3   : > { %v1522_v26 = vadd.f32 %v1452_v22, %v1347_v37  ;;  %v1514_v48 = vadd.f32 %v3088_v34, %v1339_v25 }
 0x1d4   : > { %v1727_v49 = vadd.f32 %v3106_v36, %v1691_v19 }
 0x1d5   : > { %v1481_v20 = vpop.f32.mrf.mxu2 }
 0x1d6   : > { %vm1739_vm11 = vcmp.ge.f32.partialorder %v1727_v49, 0.0  ;;  %v1751_v51 = vmul.f32 0.2, %v1727_v49  ;;  %v1523_v50 = vadd.f32 %v1481_v20, %v1348_v46 }
 0x1d7   : > { %v1504_v55 = vpop.f32.mrf.mxu3 }
 0x1d8   : > { %v1763_v6 = vsel %vm1739_vm11, %v1727_v49, %v1751_v51  ;;  %v1518_v3 = vadd.f32 %v1504_v55, %v1343_v23  ;;  %v1171_v51 = vadd.f32 %v3078_v31, %v3068_v27  ;;  %v1349_v31 = vadd.f32 %v3090_v38, %v1174_v28 }
 0x1d9   : > { %1776 = vst [vmem:[%s3103_s7 + $0x18] sm:$0xff] %v1763_v6  ;;  %v1624_v60 = vpop.f32.mrf.mxu0 }
 0x1da   : > { %v1694_v52 = vadd.f32 %v1624_v60, %v1519_v54  ;;  %v1650_v63 = vpop.f32.mrf.mxu1  ;;  %v1346_v34 = vadd.f32 %v3086_v7, %v1171_v51 }
 0x1db   : > { %v1692_v8 = vadd.f32 %v1650_v63, %v1517_v59 }
 0x1dc   : > { %v1730_v2 = vadd.f32 %v3112_v1, %v1694_v52 }
 0x1dd   : > { %v1728_v13 = vadd.f32 %v3106_v36, %v1692_v8  ;;  %v1676_v58 = vpop.f32.mrf.mxu2 }
 0x1de   : > { %vm1742_vm12 = vcmp.ge.f32.partialorder %v1730_v2, 0.0  ;;  %v1754_v14 = vmul.f32 0.2, %v1730_v2  ;;  %v1690_v0 = vadd.f32 %v1676_v58, %v1515_v39 }
 0x1df   : > { %vm1740_vm13 = vcmp.ge.f32.partialorder %v1728_v13, 0.0  ;;  %v1752_v41 = vmul.f32 0.2, %v1728_v13  ;;  %v1507_v42 = vpop.f32.mrf.mxu3 }
 0x1e0   : > { %v1766_v17 = vsel %vm1742_vm12, %v1730_v2, %v1754_v14  ;;  %v1726_v35 = vadd.f32 %v3095_v11, %v1690_v0  ;;  %v1521_v20 = vadd.f32 %v1507_v42, %v1346_v34 }
 0x1e1   : > { %v1764_v5 = vsel %vm1740_vm13, %v1728_v13, %v1752_v41  ;;  %1779 = vst [vmem:[%s3103_s7 + $0x30] sm:$0xff] %v1766_v17  ;;  %v1627_v10 = vpop.f32.mrf.mxu0 }
 0x1e2   : > { %1777 = vst [vmem:[%s3103_s7 + $0x20] sm:$0xff] %v1764_v5  ;;  %v1697_v61 = vadd.f32 %v1627_v10, %v1522_v26  ;;  %v1653_v4 = vpop.f32.mrf.mxu1  ;;  %vm1738_vm14 = vcmp.ge.f32.partialorder %v1726_v35, 0.0  ;;  %v1750_v12 = vmul.f32 0.2, %v1726_v35 }
 0x1e3   : > { %v1695_v9 = vadd.f32 %v1653_v4, %v1520_v44 }
 0x1e4   : > { %v1733_v62 = vadd.f32 %v1722_v24, %v1697_v61  ;;  %v1762_v15 = vsel %vm1738_vm14, %v1726_v35, %v1750_v12 }
 0x1e5   : > { %v1731_v18 = vadd.f32 %v3112_v1, %v1695_v9  ;;  %1775 = vst.msk [vmem:[%s3103_s7 + $0x10] sm:$0xff] %vm1774_vm15, %v1762_v15  ;;  %v1679_v45 = vpop.f32.mrf.mxu2 }
 0x1e6   : > { %vm1745_vm0 = vcmp.ge.f32.partialorder %v1733_v62, 0.0  ;;  %v1757_v30 = vmul.f32 0.2, %v1733_v62  ;;  %v1693_v19 = vadd.f32 %v1679_v45, %v1518_v3 }
 0x1e7   : > { %vm1743_vm1 = vcmp.ge.f32.partialorder %v1731_v18, 0.0  ;;  %v1755_v22 = vmul.f32 0.2, %v1731_v18  ;;  %v1510_v47 = vpop.f32.mrf.mxu3 }
 0x1e8   : > { %v1769_v49 = vsel %vm1745_vm0, %v1733_v62, %v1757_v30  ;;  %v1729_v53 = vadd.f32 %v3106_v36, %v1693_v19  ;;  %v1524_v60 = vadd.f32 %v1510_v47, %v1349_v31 }
 0x1e9   : > { %v1767_v33 = vsel %vm1743_vm1, %v1731_v18, %v1755_v22  ;;  %1782 = vst [vmem:[%s3103_s7 + $0x48] sm:$0xff] %v1769_v49  ;;  %v1647_v54 = vpop.f32.mrf.mxu0 }
 0x1ea   : > { %1780 = vst [vmem:[%s3103_s7 + $0x38] sm:$0xff] %v1767_v33  ;;  %v1689_v43 = vadd.f32 %v1647_v54, %v1514_v48  ;;  %v1656_v6 = vpop.f32.mrf.mxu1  ;;  %vm1741_vm2 = vcmp.ge.f32.partialorder %v1729_v53, 0.0  ;;  %v1753_v55 = vmul.f32 0.2, %v1729_v53 }
 0x1eb   : > { %v1698_v56 = vadd.f32 %v1656_v6, %v1523_v50 }
 0x1ec   : > { %v1725_v27 = vadd.f32 %v3095_v11, %v1689_v43  ;;  %v1765_v59 = vsel %vm1741_vm2, %v1729_v53, %v1753_v55 }
 0x1ed   : > { %v1734_v36 = vadd.f32 %v1722_v24, %v1698_v56  ;;  %1778 = vst.msk [vmem:[%s3103_s7 + $0x28] sm:$0xff] %vm1774_vm15, %v1765_v59  ;;  %v1682_v21 = vpop.f32.mrf.mxu2 }
 0x1ee   : > { %vm1737_vm3 = vcmp.ge.f32.partialorder %v1725_v27, 0.0  ;;  %v1749_v57 = vmul.f32 0.2, %v1725_v27  ;;  %v1696_v52 = vadd.f32 %v1682_v21, %v1521_v20 }
 0x1ef   : > { %vm1746_vm4 = vcmp.ge.f32.partialorder %v1734_v36, 0.0  ;;  %v1758_v7 = vmul.f32 0.2, %v1734_v36  ;;  %v1685_v16 = vpop.f32.mrf.mxu3 }
 0x1f0   : > { %v1761_v63 = vsel %vm1737_vm3, %v1725_v27, %v1749_v57  ;;  %v1732_v38 = vadd.f32 %v3112_v1, %v1696_v52  ;;  %v1699_v8 = vadd.f32 %v1685_v16, %v1524_v60 }
 0x1f1   : > { %1773 = vst [vmem:[%s3103_s7 + $0x8] sm:$0xff] %v1761_v63  ;;  %v1770_v11 = vsel %vm1746_vm4, %v1734_v36, %v1758_v7 }
 0x1f2   : > { %1783 = vst [vmem:[%s3103_s7 + $0x50] sm:$0xff] %v1770_v11  ;;  %vm1744_vm5 = vcmp.ge.f32.partialorder %v1732_v38, 0.0  ;;  %v1756_v32 = vmul.f32 0.2, %v1732_v38  ;;  %v1735_v2 = vadd.f32 %v1722_v24, %v1699_v8 }
 0x1f4   : > { %v1768_v39 = vsel %vm1744_vm5, %v1732_v38, %v1756_v32  ;;  %vm1747_vm6 = vcmp.ge.f32.partialorder %v1735_v2, 0.0  ;;  %v1759_v13 = vmul.f32 0.2, %v1735_v2 }
 0x1f5   : > { %1781 = vst.msk [vmem:[%s3103_s7 + $0x40] sm:$0xff] %vm1774_vm15, %v1768_v39 }
 0x1f6   : > { %v1771_v37 = vsel %vm1747_vm6, %v1735_v2, %v1759_v13 }
 0x1f7   : > { %1784 = vst.msk [vmem:[%s3103_s7 + $0x58] sm:$0xff] %vm1774_vm15, %v1771_v37 }
 0x1f8 PF: > { %s13_s12 = sadd.s32 1, %s2299_s12  }
 0x1f9   : > { %p10_p4 = scmp.ge.s32.totalorder %s13_s12, 8  }
 0x1fb   :  { %12 = sbr.rel (!%p10_p4) target bundleno = 1 (0x1), region = 70 }

// kernel: uconvlstm_forward.20
= control target key start
LH: loop header
LB: loop body
LE: loop exit
PB: predicated region body
PF: predicated region fallthrough
CT: control target
= control target key end

     0   :  { %s1778_s12 = smov 0   ;;  %s2166_s0 = inlined_call_operand.vmem [shape: f32[6,32,362], index: 0, kind: input, shape index: {}]   ;;  %s2167_s1 = inlined_call_operand.vmem [shape: f32[9,16,32], index: 1, kind: input, shape index: {}]   ;;  %s2168_s2 = inlined_call_operand.vmem [shape: f32[16,1], index: 2, kind: input, shape index: {}]   ;;  %s2169_s3 = inlined_call_operand.vmem [shape: f32[6,16,324], index: 3, kind: output, shape index: {}]  }
   0x1 LB: > { %s1397_s13 = sadd.s32 4294967295, %s1747_s12   ;;  %p1401_p0 = scmp.ge.s32.totalorder %s1747_s12, 1  ;;  %s1747_s12 = sphi %s1778_s12, %s13_s12  }
   0x2   : > { %p137_p1 = scmp.lt.s32.totalorder %s1747_s12, 7 }
   0x4   : > { %p138_p2 = pnand %p1401_p0, %p137_p1 }
   0x5   : > { %p161_p3 = scmp.lt.s32.totalorder (!%p138_p2), %s1397_s13, 5  ;;  %s1749_s18 = smov (!%p138_p2), 127  }
   0x6   : > { %141 = sbr.rel (%p138_p2) target bundleno = 406 (0x196), region = 32  ;;  %s1750_s19 = smov (!%p138_p2), 126  }
   0x7   : > { %s1751_s20 = smov (!%p138_p2), 110   ;;  %s1752_s21 = smov (!%p138_p2), 109  }
   0x8   : > { %s1753_s22 = smov (!%p138_p2), 108   ;;  %s1754_s23 = smov (!%p138_p2), 92  }
   0x9   : > { %s1755_s24 = smov (!%p138_p2), 91   ;;  %s1756_s25 = smov (!%p138_p2), 90  }
   0xb   : > { %s2171_s13 = smov (!%p161_p3, %s1397_s13), 5  ;;  %vm224_vm0 = vcmask 1039360   ;;  %v1404_v53 = vld [vmem:[%s2167_s1 + $0x10] sm:$0xff]  ;;  %vm245_vm1 = vcmask 261120   ;;  %v1405_v59 = vld [vmem:[%s2167_s1 + $0x18] sm:$0xff]  ;;  %vm423_vm2 = vcmask 1031168  }
   0xc   : > { %s1480_s14 = smul.u32 96, %s2171_s13  ;;  %vm552_vm3 = vcmask 900096   ;;  %vm681_vm4 = vcmask 891904   ;;  %vm939_vm5 = vcmask 752640   ;;  %vm810_vm6 = vcmask 883712  }
   0xd   : > { %vm1068_vm7 = vcmask 744448   ;;  %vm1197_vm8 = vcmask 736256   ;;  %s1481_s16 = smul.u32 48, %s2171_s13  ;;  %vm1337_vm10 = vcmask 556032  }
   0xe   : > { %s165_s17 = scalar_lea.vmem %s2166_s0, %s1480_s14 }
   0xf   : > { %v1792_v0 = vld [vmem:[%s165_s17 + $0x40] sm:$0xff]  ;;  %v1794_v1 = vld [vmem:[%s165_s17 + $0x58] sm:$0xff]  ;;  %v1802_v4 = vld [vmem:[%s165_s17 + $0x8] sm:$0xff] }
  0x10   : > { %v1796_v2 = vld [vmem:[%s165_s17] sm:$0xff]  ;;  %v1800_v3 = vpack.i.bf16 %v1792_v0, %v1794_v1  ;;  %v1808_v6 = vld [vmem:[%s165_s17 + $0x30] sm:$0xff]  ;;  %v1814_v8 = vld [vmem:[%s165_s17 + $0x28] sm:$0xff] }
  0x11   : > { %v1806_v5 = vpack.i.bf16 %v1802_v4, %v1796_v2  ;;  %v1811_v7 = vld [vmem:[%s165_s17 + $0x50] sm:$0xff]  ;;  %v1816_v9 = vld [vmem:[%s165_s17 + $0x48] sm:$0xff]  ;;  %v1822_v12 = vld [vmem:[%s165_s17 + $0x18] sm:$0xff] }
  0x12   : > { %1510 = vrot.lane.b32.xlu1 %v1800_v3, %s1749_s18  ;;  %v1519_v10 = vpack.i.bf16 %v1808_v6, %v1811_v7  ;;  %v1820_v11 = vld [vmem:[%s165_s17 + $0x10] sm:$0xff]  ;;  %v1826_v13 = vpack.i.bf16 %v1816_v9, %v1814_v8  ;;  %v1828_v14 = vld [vmem:[%s165_s17 + $0x20] sm:$0xff]  ;;  %v1832_v16 = vld [vmem:[%s165_s17 + $0x38] sm:$0xff]  ;;  %v1529_v19 = vpack.i.bf16 %v1811_v7, %v1816_v9  ;;  %v1554_v21 = vpack.i.bf16 %v1794_v1, %v1811_v7 }
  0x13   : > { %1500 = vrot.lane.b32.xlu0 %v1806_v5, %s1749_s18  ;;  %v1504_v15 = vpack.i.bf16 %v1822_v12, %v1820_v11  ;;  %v1524_v17 = vpack.i.bf16 %v1828_v14, %v1832_v16  ;;  %v1839_v18 = vpack.i.bf16 %v1832_v16, %v1808_v6  ;;  %v1845_v20 = vpack.i.bf16 %v1828_v14, %v1822_v12 }
  0x14   : > { %1520 = vrot.lane.b32.xlu2 %v1519_v10, %s1749_s18  ;;  %v1564_v22 = vpack.i.bf16 %v1792_v0, %v1832_v16  ;;  %v1559_v23 = vpack.i.bf16 %v1820_v11, %v1814_v8  ;;  %v1569_v24 = vpack.i.bf16 %v1814_v8, %v1828_v14  ;;  %v1579_v25 = vpack.i.bf16 %v1808_v6, %v1816_v9 }
  0x15   : > { %v1574_v26 = vpack.i.bf16 %v1820_v11, %v1802_v4  ;;  %v1584_v27 = vpack.i.bf16 %v1796_v2, %v1822_v12  ;;  %v1599_v28 = vpack.i.bf16 %v1820_v11, %v1811_v7 }
  0x1a   : > { %1515 = vrot.lane.b32.xlu1 %v1826_v13, %s1749_s18 }
  0x1b   : > { %1505 = vrot.lane.b32.xlu0 %v1504_v15, %s1749_s18 }
  0x1c   : > { %1525 = vrot.lane.b32.xlu2 %v1524_v17, %s1749_s18 }
  0x22   : > { %1535 = vrot.lane.b32.xlu1 %v1839_v18, %s1750_s19 }
  0x23   : > { %1530 = vrot.lane.b32.xlu0 %v1529_v19, %s1750_s19 }
  0x24   : > { %1540 = vrot.lane.b32.xlu2 %v1845_v20, %s1750_s19 }
  0x2a   : > { %1550 = vrot.lane.b32.xlu1 %v1800_v3, %s1750_s19 }
  0x2b   : > { %1545 = vrot.lane.b32.xlu0 %v1806_v5, %s1750_s19 }
  0x2c   : > { %1555 = vrot.lane.b32.xlu2 %v1554_v21, %s1751_s20 }
  0x32   : > { %1565 = vrot.lane.b32.xlu1 %v1564_v22, %s1751_s20 }
  0x33   : > { %1560 = vrot.lane.b32.xlu0 %v1559_v23, %s1750_s19  ;;  %s2153_s19 = scalar_lea.vmem %s2169_s3, %s1481_s16 }
  0x34   : > { %1570 = vrot.lane.b32.xlu2 %v1569_v24, %s1751_s20 }
  0x3a   : > { %1580 = vrot.lane.b32.xlu1 %v1579_v25, %s1751_s20 }
  0x3b   : > { %1575 = vrot.lane.b32.xlu0 %v1574_v26, %s1751_s20 }
  0x3c   : > { %1585 = vrot.lane.b32.xlu2 %v1584_v27, %s1751_s20 }
  0x42   : > { %1595 = vrot.lane.b32.xlu1 %v1826_v13, %s1752_s21 }
  0x43   : > { %1590 = vrot.lane.b32.xlu0 %v1800_v3, %s1752_s21 }
  0x44   : > { %1600 = vrot.lane.b32.xlu2 %v1599_v28, %s1752_s21 }
  0x4a   : > { %1610 = vrot.lane.b32.xlu1 %v1845_v20, %s1752_s21 }
  0x4b   : > { %1605 = vrot.lane.b32.xlu0 %v1839_v18, %s1752_s21 }
  0x4c   : > { %1615 = vrot.lane.b32.xlu2 %v1806_v5, %s1752_s21 }
  0x52   : > { %1625 = vrot.lane.b32.xlu1 %v1839_v18, %s1753_s22 }
  0x53   : > { %1620 = vrot.lane.b32.xlu0 %v1529_v19, %s1753_s22 }
  0x54   : > { %1630 = vrot.lane.b32.xlu2 %v1529_v19, %s1754_s23 }
  0x5a   : > { %1640 = vrot.lane.b32.xlu1 %v1839_v18, %s1754_s23 }
  0x5b   : > { %1635 = vrot.lane.b32.xlu0 %v1845_v20, %s1753_s22 }
  0x5c   : > { %1645 = vrot.lane.b32.xlu2 %v1806_v5, %s1753_s22 }
  0x62   : > { %1655 = vrot.lane.b32.xlu1 %v1800_v3, %s1753_s22 }
  0x63   : > { %1650 = vrot.lane.b32.xlu0 %v1845_v20, %s1754_s23 }
  0x64   : > { %1660 = vrot.lane.b32.xlu2 %v1806_v5, %s1754_s23 }
  0x6a   : > { %1670 = vrot.lane.b32.xlu1 %v1800_v3, %s1754_s23 }
  0x6b   : > { %1665 = vrot.lane.b32.xlu0 %v1559_v23, %s1753_s22 }
  0x6c   : > { %1675 = vrot.lane.b32.xlu2 %v1554_v21, %s1755_s24 }
  0x6e   : > { %v1521_v29 = vpop.permute.xlu2 %1520 }
  0x6f   : > { %v1522_v32 = vunpack.i.l.bf16 %v1521_v29  ;;  %v1523_v43 = vunpack.i.h.bf16 %v1521_v29  ;;  %v184_v29 = vld [vmem:[%s2167_s1 + $0x8] sm:$0xff] }
  0x72   : > { %1685 = vrot.lane.b32.xlu1 %v1564_v22, %s1755_s24 }
  0x73   : > { %1680 = vrot.lane.b32.xlu0 %v1559_v23, %s1754_s23 }
  0x74   : > { %1690 = vrot.lane.b32.xlu2 %v1569_v24, %s1755_s24 }
  0x76   : > { %v1526_v30 = vpop.permute.xlu2 %1525 }
  0x77   : > { %v1527_v34 = vunpack.i.l.bf16 %v1526_v30  ;;  %v1528_v41 = vunpack.i.h.bf16 %v1526_v30 }
  0x79   : > { %v229_v55 = vsel %vm224_vm0, %v1523_v43, %v1527_v34 }
  0x7a   : > { %1700 = vrot.lane.b32.xlu1 %v1579_v25, %s1755_s24 }
  0x7b   : > { %1695 = vrot.lane.b32.xlu0 %v1574_v26, %s1755_s24 }
  0x7c   : > { %1705 = vrot.lane.b32.xlu2 %v1584_v27, %s1755_s24 }
  0x7e   : > { %v1880_v31 = vpop.permute.xlu2 %1540 }
  0x7f   : > { %v1543_v10 = vunpack.i.h.bf16 %v1880_v31 }
  0x82   : > { %1715 = vrot.lane.b32.xlu1 %v1826_v13, %s1756_s25  ;;  %v1542_v13 = vunpack.i.l.bf16 %v1880_v31 }
  0x83   : > { %1710 = vrot.lane.b32.xlu0 %v1800_v3, %s1756_s25 }
  0x84   : > { %v1511_v33 = vpop.permute.xlu1 %1510  ;;  %1720 = vrot.lane.b32.xlu2 %v1599_v28, %s1756_s25 }
  0x85   : > { %v1501_v35 = vpop.permute.xlu0 %1500  ;;  %v1512_v36 = vunpack.i.l.bf16 %v1511_v33  ;;  %v1513_v37 = vunpack.i.h.bf16 %v1511_v33 }
  0x86   : > { %v1885_v39 = vpop.permute.xlu2 %1555  ;;  %v1503_v52 = vunpack.i.h.bf16 %v1501_v35  ;;  %v1502_v54 = vunpack.i.l.bf16 %v1501_v35 }
  0x87   : > { %310 = vmatpush.msra.mxu2 %v1512_v36  ;;  %v232_v38 = vsel %vm224_vm0, %v1522_v32, %v1512_v36  ;;  %v230_v40 = vsel %vm224_vm0, %v1527_v34, %v1513_v37  ;;  %v1558_v19 = vunpack.i.h.bf16 %v1885_v39 }
  0x88   : > { %287 = vmatpush.msra.mxu1 %v232_v38  ;;  %v225_v61 = vsel %vm224_vm0, %v1502_v54, %v1503_v52 }
  0x89   : > { %311 = vmatpush.msra.mxu2 %v1513_v37  ;;  %v1419_v37 = vld [vmem:[%s2167_s1 + $0x28] sm:$0xff] }
  0x8a   : > { %288 = vmatpush.msra.mxu1 %v230_v40  ;;  %1730 = vrot.lane.b32.xlu1 %v1845_v20, %s1756_s25  ;;  %v1557_v20 = vunpack.i.l.bf16 %v1885_v39 }
  0x8b   : > { %1725 = vrot.lane.b32.xlu0 %v1839_v18, %s1756_s25 }
  0x8c   : > { %v1516_v42 = vpop.permute.xlu1 %1515  ;;  %1735 = vrot.lane.b32.xlu2 %v1806_v5, %s1756_s25  ;;  %v560_v24 = vsel %vm552_vm3, %v1557_v20, %v1558_v19 }
  0x8d   : > { %v1518_v44 = vunpack.i.h.bf16 %v1516_v42  ;;  %v1506_v45 = vpop.permute.xlu0 %1505  ;;  %v1517_v46 = vunpack.i.l.bf16 %v1516_v42 }
  0x8e   : > { %v1507_v47 = vunpack.i.l.bf16 %v1506_v45  ;;  %v1508_v48 = vunpack.i.h.bf16 %v1506_v45  ;;  %v1893_v51 = vpop.permute.xlu2 %1570 }
  0x8f   : > { %312 = vmatpush.msra.mxu2 %v1517_v46  ;;  %v231_v49 = vsel %vm224_vm0, %v1518_v44, %v1522_v32  ;;  %v228_v50 = vsel %vm224_vm0, %v1528_v41, %v1517_v46  ;;  %v1573_v25 = vunpack.i.h.bf16 %v1893_v51  ;;  %v1572_v26 = vunpack.i.l.bf16 %v1893_v51 }
  0x90   : > { %264 = vmatpush.msra.mxu0 %v231_v49  ;;  %1476 = vmatpush.msra.mxu3 %v231_v49  ;;  %v226_v56 = vsel %vm224_vm0, %v1503_v52, %v1507_v47  ;;  %v227_v57 = vsel %vm224_vm0, %v1508_v48, %v1528_v41  ;;  %v1426_v48 = vld [vmem:[%s2167_s1 + $0x30] sm:$0xff] }
  0x91   : > { %289 = vmatpush.msra.mxu1 %v228_v50  ;;  %313 = vmatpush.msra.mxu2 %v1507_v47 }
  0x92   : > { %265 = vmatpush.msra.mxu0 %v229_v55  ;;  %1477 = vmatpush.msra.mxu3 %v229_v55 }
  0x93   : > { %290 = vmatpush.msra.mxu1 %v226_v56  ;;  %1410 = vmatmul.msk.f32.vlgmr.msra.gmra.mxu2 %vm245_vm1, %v1404_v53 }
  0x94   : > { %v1536_v58 = vpop.permute.xlu1 %1535  ;;  %266 = vmatpush.msra.mxu0 %v227_v57  ;;  %1478 = vmatpush.msra.mxu3 %v227_v57 }
  0x95   : > { %v1531_v60 = vpop.permute.xlu0 %1530  ;;  %1408 = vmatmul.msk.f32.vlgmr.msra.gmra.mxu1 %vm245_vm1, %v1404_v53  ;;  %v1538_v3 = vunpack.i.h.bf16 %v1536_v58  ;;  %v1537_v5 = vunpack.i.l.bf16 %v1536_v58 }
  0x96   : > { %v1533_v62 = vunpack.i.h.bf16 %v1531_v60  ;;  %v1532_v63 = vunpack.i.l.bf16 %v1531_v60  ;;  %267 = vmatpush.msra.mxu0 %v225_v61  ;;  %1479 = vmatpush.msra.mxu3 %v225_v61  ;;  %v1915_v17 = vpop.permute.xlu2 %1585  ;;  %v1427_v60 = vld [vmem:[%s2167_s1 + $0x38] sm:$0xff] }
  0x97   : > { %1407 = vmatmul.msk.f32.vlgmr.msra.gmra.mxu3 %vm245_vm1, %v1405_v59  ;;  %1406 = vmatmul.msk.f32.vlgmr.msra.gmra.mxu0 %vm245_vm1, %v1404_v53  ;;  %v428_v18 = vsel %vm423_vm2, %v1537_v5, %v1538_v3  ;;  %v1587_v45 = vunpack.i.l.bf16 %v1915_v17  ;;  %v1588_v49 = vunpack.i.h.bf16 %v1915_v17 }
  0x98   : > { %362 = vmatpush.msrb.mxu0 %v1811_v7  ;;  %339 = vmatpush.msrb.mxu3 %v1816_v9  ;;  %v430_v15 = vsel %vm423_vm2, %v1532_v63, %v1533_v62  ;;  %v426_v7 = vsel %vm423_vm2, %v1542_v13, %v1543_v10 }
  0x99   : > { %462 = vmatpush.msrb.mxu2 %v430_v15  ;;  %385 = vmatpush.msrb.mxu1 %v1794_v1  ;;  %v555_v51 = vsel %vm552_vm3, %v1587_v45, %v1572_v26 }
  0x9a   : > { %363 = vmatpush.msrb.mxu0 %v1832_v16  ;;  %340 = vmatpush.msrb.mxu3 %v1808_v6  ;;  %v183_v6 = vld [vmem:[%s2167_s1] sm:$0xff] }
  0x9b   : > { %1411 = vmatmul.msk.f32.gmra.mxu2 %vm245_vm1, %v1405_v59  ;;  %386 = vmatpush.msrb.mxu1 %v1792_v0 }
  0x9c   : > { %364 = vmatpush.msrb.mxu0 %v1828_v14  ;;  %463 = vmatpush.msrb.mxu2 %v428_v18  ;;  %v1551_v9 = vpop.permute.xlu1 %1550 }
  0x9d   : > { %341 = vmatpush.msrb.mxu3 %v1822_v12  ;;  %v1553_v16 = vunpack.i.h.bf16 %v1551_v9  ;;  %v1552_v1 = vunpack.i.l.bf16 %v1551_v9  ;;  %v1546_v21 = vpop.permute.xlu0 %1545  ;;  %1409 = vmatmul.msk.f32.gmra.mxu1 %vm245_vm1, %v1405_v59 }
  0x9e   : > { %365 = vmatpush.msrb.mxu0 %v1802_v4  ;;  %v1548_v14 = vunpack.i.h.bf16 %v1546_v21  ;;  %v1547_v22 = vunpack.i.l.bf16 %v1546_v21  ;;  %464 = vmatpush.msrb.mxu2 %v426_v7  ;;  %v1418_v4 = vld [vmem:[%s2167_s1 + $0x20] sm:$0xff]  ;;  %v1949_v27 = vpop.permute.xlu2 %1600 }
  0x9f   : > { %342 = vmatpush.msrb.mxu3 %v1796_v2  ;;  %v431_v12 = vsel %vm423_vm2, %v1533_v62, %v1552_v1  ;;  %1414 = vmatmul.msk.f32.vlgmr.msrb.gmra.mxu0 %vm245_vm1, %v183_v6  ;;  %v429_v2 = vsel %vm423_vm2, %v1538_v3, %v1553_v16  ;;  %v1602_v39 = vunpack.i.l.bf16 %v1949_v27  ;;  %v1603_v5 = vunpack.i.h.bf16 %v1949_v27 }
  0xa0   : > { %1412 = vmatmul.msk.f32.vlgmr.msrb.gmra.mxu3 %vm245_vm1, %v183_v6  ;;  %508 = vmatpush.msra.mxu0 %v1552_v1  ;;  %v424_v23 = vsel %vm423_vm2, %v1547_v22, %v1548_v14 }
  0xa1   : > { %485 = vmatpush.msra.mxu3 %v431_v12  ;;  %465 = vmatpush.msrb.mxu2 %v424_v23 }
  0xa2   : > { %509 = vmatpush.msra.mxu0 %v1553_v16  ;;  %387 = vmatpush.msrb.mxu1 %v1814_v8  ;;  %v556_v8 = vsel %vm552_vm3, %v1572_v26, %v1573_v25 }
  0xa3   : > { %486 = vmatpush.msra.mxu3 %v429_v2  ;;  %1420 = vmatmul.msk.f32.vlgmr.msrb.gmra.mxu2 %vm245_vm1, %v1418_v4 }
  0xa4   : > { %v1566_v28 = vpop.permute.xlu1 %1565  ;;  %614 = vmatpush.msra.mxu2 %v560_v24  ;;  %388 = vmatpush.msrb.mxu1 %v1820_v11 }
  0xa5   : > { %v1568_v30 = vunpack.i.h.bf16 %v1566_v28  ;;  %v1567_v32 = vunpack.i.l.bf16 %v1566_v28  ;;  %v1561_v0 = vpop.permute.xlu0 %1560  ;;  %1416 = vmatmul.msk.f32.vlgmr.msrb.gmra.mxu1 %vm245_vm1, %v183_v6 }
  0xa6   : > { %v1563_v33 = vunpack.i.h.bf16 %v1561_v0  ;;  %v1562_v34 = vunpack.i.l.bf16 %v1561_v0  ;;  %v1969_v42 = vpop.permute.xlu2 %1615 }
  0xa7   : > { %v558_v35 = vsel %vm552_vm3, %v1567_v32, %v1568_v30  ;;  %1415 = vmatmul.msk.f32.gmra.mxu0 %vm245_vm1, %v184_v29  ;;  %v1617_v13 = vunpack.i.l.bf16 %v1969_v42  ;;  %v1618_v16 = vunpack.i.h.bf16 %v1969_v42 }
  0xa8   : > { %1413 = vmatmul.msk.f32.gmra.mxu3 %vm245_vm1, %v184_v29  ;;  %v427_v36 = vsel %vm423_vm2, %v1543_v10, %v1562_v34  ;;  %510 = vmatpush.msra.mxu0 %v1562_v34  ;;  %v425_v11 = vsel %vm423_vm2, %v1548_v14, %v1563_v33 }
  0xa9   : > { %615 = vmatpush.msra.mxu2 %v558_v35  ;;  %487 = vmatpush.msra.mxu3 %v427_v36  ;;  %v682_v12 = vsel %vm681_vm4, %v1617_v13, %v1618_v16 }
  0xaa   : > { %511 = vmatpush.msra.mxu0 %v1563_v33 }
  0xab   : > { %616 = vmatpush.msra.mxu2 %v556_v8  ;;  %488 = vmatpush.msra.mxu3 %v425_v11 }
  0xac   : > { %1421 = vmatmul.msk.f32.gmra.mxu2 %vm245_vm1, %v1419_v37  ;;  %v1581_v31 = vpop.permute.xlu1 %1580 }
  0xad   : > { %637 = vmatpush.msrb.mxu3 %v1558_v19  ;;  %v1583_v38 = vunpack.i.h.bf16 %v1581_v31  ;;  %v1582_v40 = vunpack.i.l.bf16 %v1581_v31  ;;  %v1576_v41 = vpop.permute.xlu0 %1575  ;;  %1417 = vmatmul.msk.f32.gmra.mxu1 %vm245_vm1, %v184_v29  ;;  %v1435_v29 = vld [vmem:[%s2167_s1 + $0x48] sm:$0xff] }
  0xae   : > { %v1578_v43 = vunpack.i.h.bf16 %v1576_v41  ;;  %v1577_v44 = vunpack.i.l.bf16 %v1576_v41  ;;  %v1991_v58 = vpop.permute.xlu2 %1630  ;;  %v1442_v41 = vld [vmem:[%s2167_s1 + $0x50] sm:$0xff] }
  0xaf   : > { %638 = vmatpush.msrb.mxu3 %v1568_v30  ;;  %v559_v46 = vsel %vm552_vm3, %v1582_v40, %v1557_v20  ;;  %1424 = vmatmul.msk.f32.vlgmr.msra.gmra.mxu0 %vm245_vm1, %v1418_v4  ;;  %v557_v50 = vsel %vm552_vm3, %v1583_v38, %v1567_v32  ;;  %v1633_v62 = vunpack.i.h.bf16 %v1991_v58  ;;  %v1632_v63 = vunpack.i.l.bf16 %v1991_v58  ;;  %v1434_v20 = vld [vmem:[%s2167_s1 + $0x40] sm:$0xff] }
  0xb0   : > { %1422 = vmatmul.msk.f32.vlgmr.msra.gmra.mxu3 %vm245_vm1, %v1418_v4  ;;  %591 = vmatpush.msra.mxu1 %v559_v46  ;;  %v554_v47 = vsel %vm552_vm3, %v1577_v44, %v1578_v43  ;;  %v553_v55 = vsel %vm552_vm3, %v1588_v49, %v1577_v44  ;;  %v683_v4 = vsel %vm681_vm4, %v1618_v16, %v1603_v5 }
  0xb1   : > { %639 = vmatpush.msrb.mxu3 %v1573_v25  ;;  %617 = vmatpush.msra.mxu2 %v554_v47  ;;  %v946_v17 = vsel %vm939_vm5, %v1632_v63, %v1633_v62 }
  0xb2   : > { %592 = vmatpush.msra.mxu1 %v557_v50 }
  0xb3   : > { %640 = vmatpush.msrb.mxu3 %v1578_v43 }
  0xb4   : > { %1430 = vmatmul.msk.f32.vlgmr.msra.gmra.mxu2 %vm245_vm1, %v1426_v48  ;;  %v1596_v52 = vpop.permute.xlu1 %1595  ;;  %593 = vmatpush.msra.mxu1 %v555_v51 }
  0xb5   : > { %v1598_v53 = vunpack.i.h.bf16 %v1596_v52  ;;  %v1591_v54 = vpop.permute.xlu0 %1590  ;;  %v1597_v3 = vunpack.i.l.bf16 %v1596_v52 }
  0xb6   : > { %v1592_v56 = vunpack.i.l.bf16 %v1591_v54  ;;  %594 = vmatpush.msra.mxu1 %v553_v55  ;;  %v1593_v59 = vunpack.i.h.bf16 %v1591_v54  ;;  %v2014_v21 = vpop.permute.xlu2 %1645 }
  0xb7   : > { %1428 = vmatmul.msk.f32.vlgmr.msra.gmra.mxu1 %vm245_vm1, %v1426_v48  ;;  %v688_v57 = vsel %vm681_vm4, %v1598_v53, %v1602_v39  ;;  %1425 = vmatmul.msk.f32.gmra.mxu0 %vm245_vm1, %v1419_v37  ;;  %v1648_v33 = vunpack.i.h.bf16 %v2014_v21  ;;  %v1647_v34 = vunpack.i.l.bf16 %v2014_v21 }
  0xb8   : > { %1423 = vmatmul.msk.f32.gmra.mxu3 %vm245_vm1, %v1419_v37  ;;  %766 = vmatpush.msrb.mxu2 %v1592_v56  ;;  %v689_v61 = vsel %vm681_vm4, %v1602_v39, %v1592_v56  ;;  %v1443_v56 = vld [vmem:[%s2167_s1 + $0x58] sm:$0xff] }
  0xb9   : > { %720 = vmatpush.msrb.mxu0 %v688_v57  ;;  %743 = vmatpush.msrb.mxu1 %v689_v61  ;;  %v811_v40 = vsel %vm810_vm6, %v1647_v34, %v1648_v33  ;;  %v2061_v57 = vld [vmem:[%s2167_s1 + $0x60] sm:$0xff] }
  0xba   : > { %767 = vmatpush.msrb.mxu2 %v1593_v59  ;;  %v1299_v34 = vld [vmem:[%s2168_s2] sm:$0xff] }
  0xbc   : > { %1431 = vmatmul.msk.f32.gmra.mxu2 %vm245_vm1, %v1427_v60  ;;  %v1611_v10 = vpop.permute.xlu1 %1610 }
  0xbd   : > { %768 = vmatpush.msrb.mxu2 %v1597_v3  ;;  %v1606_v15 = vpop.permute.xlu0 %1605  ;;  %v1613_v18 = vunpack.i.h.bf16 %v1611_v10  ;;  %v1612_v7 = vunpack.i.l.bf16 %v1611_v10 }
  0xbe   : > { %v1608_v9 = vunpack.i.h.bf16 %v1606_v15  ;;  %v1607_v6 = vunpack.i.l.bf16 %v1606_v15  ;;  %v2029_v32 = vpop.permute.xlu2 %1660 }
  0xbf   : > { %769 = vmatpush.msrb.mxu2 %v1603_v5  ;;  %1429 = vmatmul.msk.f32.gmra.mxu1 %vm245_vm1, %v1427_v60  ;;  %v684_v14 = vsel %vm681_vm4, %v1612_v7, %v1613_v18  ;;  %v685_v22 = vsel %vm681_vm4, %v1613_v18, %v1597_v3  ;;  %v1663_v43 = vunpack.i.h.bf16 %v2029_v32  ;;  %v1662_v44 = vunpack.i.l.bf16 %v2029_v32  ;;  %v2079_v18 = vld [vmem:[%s2167_s1 + $0x68] sm:$0xff]  ;;  %v1458_v32 = vld [vmem:[%s2167_s1 + $0x70] sm:$0xff] }
  0xc0   : > { %1432 = vmatmul.msk.f32.vlgmr.msrb.gmra.mxu3 %vm245_vm1, %v1426_v48  ;;  %v686_v1 = vsel %vm681_vm4, %v1607_v6, %v1608_v9  ;;  %v687_v19 = vsel %vm681_vm4, %v1608_v9, %v1593_v59 }
  0xc1   : > { %978 = vmatpush.msra.mxu2 %v946_v17  ;;  %721 = vmatpush.msrb.mxu0 %v686_v1  ;;  %v940_v54 = vsel %vm939_vm5, %v1662_v44, %v1663_v43 }
  0xc2   : > { %744 = vmatpush.msrb.mxu1 %v687_v19 }
  0xc3   : > { %722 = vmatpush.msrb.mxu0 %v684_v14 }
  0xc4   : > { %745 = vmatpush.msrb.mxu1 %v685_v22  ;;  %1440 = vmatmul.msk.f32.vlgmr.msrb.gmra.mxu2 %vm245_vm1, %v1434_v20  ;;  %v1626_v23 = vpop.permute.xlu1 %1625 }
  0xc5   : > { %v1621_v2 = vpop.permute.xlu0 %1620  ;;  %723 = vmatpush.msrb.mxu0 %v682_v12  ;;  %v1628_v24 = vunpack.i.h.bf16 %v1626_v23  ;;  %v1627_v25 = vunpack.i.l.bf16 %v1626_v23 }
  0xc6   : > { %746 = vmatpush.msrb.mxu1 %v683_v4  ;;  %v1623_v26 = vunpack.i.h.bf16 %v1621_v2  ;;  %v1622_v27 = vunpack.i.l.bf16 %v1621_v2  ;;  %1436 = vmatmul.msk.f32.vlgmr.msrb.gmra.mxu0 %vm245_vm1, %v1434_v20  ;;  %v2045_v48 = vpop.permute.xlu2 %1675 }
  0xc7   : > { %1438 = vmatmul.msk.f32.vlgmr.msrb.gmra.mxu1 %vm245_vm1, %v1434_v20  ;;  %v815_v30 = vsel %vm810_vm6, %v1627_v25, %v1628_v24  ;;  %v1678_v39 = vunpack.i.h.bf16 %v2045_v48  ;;  %v1677_v51 = vunpack.i.l.bf16 %v2045_v48 }
  0xc8   : > { %1433 = vmatmul.msk.f32.gmra.mxu3 %vm245_vm1, %v1427_v60  ;;  %v817_v28 = vsel %vm810_vm6, %v1622_v27, %v1623_v26 }
  0xc9   : > { %849 = vmatpush.msra.mxu3 %v817_v28  ;;  %v1076_v59 = vsel %vm1068_vm7, %v1677_v51, %v1678_v39 }
  0xcb   : > { %850 = vmatpush.msra.mxu3 %v815_v30 }
  0xcc   : > { %1441 = vmatmul.msk.f32.gmra.mxu2 %vm245_vm1, %v1435_v29  ;;  %v1641_v0 = vpop.permute.xlu1 %1640 }
  0xcd   : > { %v1643_v35 = vunpack.i.h.bf16 %v1641_v0  ;;  %v1642_v8 = vunpack.i.l.bf16 %v1641_v0  ;;  %v1636_v36 = vpop.permute.xlu0 %1635 }
  0xce   : > { %v1638_v37 = vunpack.i.h.bf16 %v1636_v36  ;;  %v1637_v11 = vunpack.i.l.bf16 %v1636_v36  ;;  %1437 = vmatmul.msk.f32.gmra.mxu0 %vm245_vm1, %v1435_v29  ;;  %v1691_v7 = vpop.permute.xlu2 %1690 }
  0xcf   : > { %1439 = vmatmul.msk.f32.gmra.mxu1 %vm245_vm1, %v1435_v29  ;;  %v944_v31 = vsel %vm939_vm5, %v1642_v8, %v1643_v35  ;;  %v1693_v58 = vunpack.i.h.bf16 %v1691_v7 }
  0xd0   : > { %v813_v38 = vsel %vm810_vm6, %v1637_v11, %v1638_v37  ;;  %979 = vmatpush.msra.mxu2 %v944_v31 }
  0xd1   : > { %851 = vmatpush.msra.mxu3 %v813_v38 }
  0xd3   : > { %852 = vmatpush.msra.mxu3 %v811_v40 }
  0xd4   : > { %1444 = vmatmul.msk.f32.vlgmr.msra.gmra.mxu3 %vm245_vm1, %v1442_v41  ;;  %v1656_v42 = vpop.permute.xlu1 %1655 }
  0xd5   : > { %v1658_v45 = vunpack.i.h.bf16 %v1656_v42  ;;  %v1657_v46 = vunpack.i.l.bf16 %v1656_v42  ;;  %v1651_v47 = vpop.permute.xlu0 %1650 }
  0xd6   : > { %v1653_v49 = vunpack.i.h.bf16 %v1651_v47  ;;  %v1652_v50 = vunpack.i.l.bf16 %v1651_v47  ;;  %v1706_v4 = vpop.permute.xlu2 %1705 }
  0xd7   : > { %895 = vmatpush.msra.mxu1 %v1657_v46  ;;  %v818_v52 = vsel %vm810_vm6, %v1623_v26, %v1657_v46  ;;  %v816_v55 = vsel %vm810_vm6, %v1628_v24, %v1658_v45  ;;  %v1707_v29 = vunpack.i.l.bf16 %v1706_v4 }
  0xd8   : > { %872 = vmatpush.msra.mxu0 %v818_v52  ;;  %v942_v53 = vsel %vm939_vm5, %v1652_v50, %v1653_v49 }
  0xd9   : > { %980 = vmatpush.msra.mxu2 %v942_v53  ;;  %896 = vmatpush.msra.mxu1 %v1658_v45  ;;  %v1459_v45 = vld [vmem:[%s2167_s1 + $0x78] sm:$0xff] }
  0xda   : > { %873 = vmatpush.msra.mxu0 %v816_v55 }
  0xdb   : > { %981 = vmatpush.msra.mxu2 %v940_v54 }
  0xdc   : > { %1445 = vmatmul.msk.f32.gmra.mxu3 %vm245_vm1, %v1443_v56  ;;  %1452 = vmatmul.msk.f32.vlgmr.msra.gmra.mxu2 %vm245_vm1, %v2061_v57  ;;  %v1671_v60 = vpop.permute.xlu1 %1670 }
  0xdd   : > { %v1673_v61 = vunpack.i.h.bf16 %v1671_v60  ;;  %v1672_v63 = vunpack.i.l.bf16 %v1671_v60  ;;  %v1666_v3 = vpop.permute.xlu0 %1665  ;;  %1130 = vmatpush.msrb.mxu2 %v1076_v59 }
  0xde   : > { %v1668_v5 = vunpack.i.h.bf16 %v1666_v3  ;;  %v1667_v10 = vunpack.i.l.bf16 %v1666_v3  ;;  %v1721_v36 = vpop.permute.xlu2 %1720 }
  0xdf   : > { %v947_v13 = vsel %vm939_vm5, %v1633_v62, %v1672_v63  ;;  %v945_v17 = vsel %vm939_vm5, %v1643_v35, %v1673_v61  ;;  %v1692_v62 = vunpack.i.l.bf16 %v1691_v7  ;;  %v1708_v35 = vunpack.i.h.bf16 %v1706_v4 }
  0xe0   : > { %897 = vmatpush.msra.mxu1 %v1667_v10  ;;  %v814_v15 = vsel %vm810_vm6, %v1638_v37, %v1667_v10  ;;  %1001 = vmatpush.msrb.mxu3 %v947_v13  ;;  %v812_v9 = vsel %vm810_vm6, %v1648_v33, %v1668_v5  ;;  %v1757_v33 = vmov 0   ;;  %v1722_v31 = vunpack.i.l.bf16 %v1721_v36  ;;  %v1467_v13 = vld [vmem:[%s2167_s1 + $0x88] sm:$0xff] }
  0xe1   : > { %874 = vmatpush.msra.mxu0 %v814_v15  ;;  %v1072_v22 = vsel %vm1068_vm7, %v1692_v62, %v1693_v58  ;;  %1739 = vset.pattern.permute.xlu0 %v1757_v33  ;;  %v1071_v37 = vsel %vm1068_vm7, %v1707_v29, %v1692_v62 }
  0xe2   : > { %898 = vmatpush.msra.mxu1 %v1668_v5  ;;  %1002 = vmatpush.msrb.mxu3 %v945_v17 }
  0xe3   : > { %875 = vmatpush.msra.mxu0 %v812_v9  ;;  %1448 = vmatmul.msk.f32.vlgmr.msra.gmra.mxu1 %vm245_vm1, %v1442_v41 }
  0xe4   : > { %1446 = vmatmul.msk.f32.vlgmr.msra.gmra.mxu0 %vm245_vm1, %v1442_v41  ;;  %1453 = vmatmul.msk.f32.gmra.mxu2 %vm245_vm1, %v2079_v18  ;;  %v1686_v6 = vpop.permute.xlu1 %1685 }
  0xe5   : > { %1024 = vmatpush.msrb.mxu0 %v1672_v63  ;;  %v1688_v16 = vunpack.i.h.bf16 %v1686_v6  ;;  %v1687_v1 = vunpack.i.l.bf16 %v1686_v6  ;;  %v1681_v19 = vpop.permute.xlu0 %1680  ;;  %1303 = vperm.xlu0 %1739, %v1299_v34  }
  0xe6   : > { %v1683_v20 = vunpack.i.h.bf16 %v1681_v19  ;;  %v1682_v21 = vunpack.i.l.bf16 %v1681_v19  ;;  %1740 = vset.pattern.permute.xlu1 %v1757_v33 }
  0xe7   : > { %1025 = vmatpush.msrb.mxu0 %v1673_v61  ;;  %v1074_v14 = vsel %vm1068_vm7, %v1687_v1, %v1688_v16 }
  0xe8   : > { %v943_v12 = vsel %vm939_vm5, %v1653_v49, %v1682_v21  ;;  %1131 = vmatpush.msrb.mxu2 %v1074_v14  ;;  %v941_v23 = vsel %vm939_vm5, %v1663_v43, %v1683_v20  ;;  %v1300_v43 = vld [vmem:[%s2168_s2 + $0x8] sm:$0xff]  ;;  %v1723_v49 = vunpack.i.h.bf16 %v1721_v36 }
  0xe9   : > { %1003 = vmatpush.msrb.mxu3 %v943_v12  ;;  %1026 = vmatpush.msrb.mxu0 %v1682_v21 }
  0xea   : > { %1132 = vmatpush.msrb.mxu2 %v1072_v22  ;;  %1308 = vperm.xlu1 %1740, %v1300_v43  }
  0xeb   : > { %1449 = vmatmul.msk.f32.gmra.mxu1 %vm245_vm1, %v1443_v56  ;;  %1004 = vmatpush.msrb.mxu3 %v941_v23 }
  0xec   : > { %1027 = vmatpush.msrb.mxu0 %v1683_v20  ;;  %1454 = vmatmul.msk.f32.vlgmr.msrb.gmra.mxu3 %vm245_vm1, %v2061_v57  ;;  %v1701_v2 = vpop.permute.xlu1 %1700 }
  0xed   : > { %1447 = vmatmul.msk.f32.gmra.mxu0 %vm245_vm1, %v1443_v56  ;;  %1153 = vmatpush.msra.mxu3 %v1678_v39  ;;  %v1703_v24 = vunpack.i.h.bf16 %v1701_v2  ;;  %v1702_v25 = vunpack.i.l.bf16 %v1701_v2  ;;  %v1696_v26 = vpop.permute.xlu0 %1695 }
  0xee   : > { %v1698_v27 = vunpack.i.h.bf16 %v1696_v26  ;;  %v1697_v28 = vunpack.i.l.bf16 %v1696_v26 }
  0xef   : > { %1154 = vmatpush.msra.mxu3 %v1688_v16  ;;  %v1075_v30 = vsel %vm1068_vm7, %v1702_v25, %v1677_v51  ;;  %v1073_v8 = vsel %vm1068_vm7, %v1703_v24, %v1687_v1  ;;  %v1736_v51 = vpop.permute.xlu2 %1735 }
  0xf0   : > { %1107 = vmatpush.msrb.mxu1 %v1075_v30  ;;  %v1070_v0 = vsel %vm1068_vm7, %v1697_v28, %v1698_v27  ;;  %v1069_v41 = vsel %vm1068_vm7, %v1708_v35, %v1697_v28  ;;  %v1737_v54 = vunpack.i.l.bf16 %v1736_v51  ;;  %v1738_v59 = vunpack.i.h.bf16 %v1736_v51 }
  0xf1   : > { %1155 = vmatpush.msra.mxu3 %v1693_v58  ;;  %1133 = vmatpush.msrb.mxu2 %v1070_v0 }
  0xf2   : > { %1462 = vmatmul.msk.f32.vlgmr.msrb.gmra.mxu2 %vm245_vm1, %v1458_v32  ;;  %1108 = vmatpush.msrb.mxu1 %v1073_v8  ;;  %v1198_v5 = vsel %vm1197_vm8, %v1737_v54, %v1738_v59  ;;  %v1199_v10 = vsel %vm1197_vm8, %v1738_v59, %v1723_v49 }
  0xf3   : > { %1156 = vmatpush.msra.mxu3 %v1698_v27 }
  0xf4   : > { %1455 = vmatmul.msk.f32.gmra.mxu3 %vm245_vm1, %v2079_v18  ;;  %v1716_v11 = vpop.permute.xlu1 %1715  ;;  %1109 = vmatpush.msrb.mxu1 %v1071_v37 }
  0xf5   : > { %1456 = vmatmul.msk.f32.vlgmr.msrb.gmra.mxu0 %vm245_vm1, %v2061_v57  ;;  %v1718_v38 = vunpack.i.h.bf16 %v1716_v11  ;;  %v1711_v40 = vpop.permute.xlu0 %1710  ;;  %v1717_v48 = vunpack.i.l.bf16 %v1716_v11  ;;  %v1466_v57 = vld [vmem:[%s2167_s1 + $0x80] sm:$0xff] }
  0xf6   : > { %v1712_v42 = vunpack.i.l.bf16 %v1711_v40  ;;  %1110 = vmatpush.msrb.mxu1 %v1069_v41  ;;  %v1713_v44 = vunpack.i.h.bf16 %v1711_v40 }
  0xf7   : > { %1460 = vmatmul.msk.f32.vlgmr.msrb.gmra.mxu1 %vm245_vm1, %v1458_v32  ;;  %v1204_v46 = vsel %vm1197_vm8, %v1718_v38, %v1722_v31 }
  0xf8   : > { %1282 = vmatpush.msra.mxu2 %v1712_v42  ;;  %v1205_v47 = vsel %vm1197_vm8, %v1722_v31, %v1712_v42  ;;  %1236 = vmatpush.msra.mxu0 %v1204_v46 }
  0xf9   : > { %1259 = vmatpush.msra.mxu1 %v1205_v47 }
  0xfa   : > { %1463 = vmatmul.msk.f32.gmra.mxu2 %vm245_vm1, %v1459_v45 }
  0xfb   : > { %1283 = vmatpush.msra.mxu2 %v1713_v44 }
  0xfc   : > { %1464 = vmatmul.msk.f32.vlgmr.msra.gmra.mxu3 %vm245_vm1, %v1458_v32  ;;  %v1731_v50 = vpop.permute.xlu1 %1730 }
  0xfd   : > { %1457 = vmatmul.msk.f32.gmra.mxu0 %vm245_vm1, %v2079_v18  ;;  %v1732_v39 = vunpack.i.l.bf16 %v1731_v50  ;;  %v1726_v52 = vpop.permute.xlu0 %1725  ;;  %1284 = vmatpush.msra.mxu2 %v1717_v48  ;;  %v1733_v53 = vunpack.i.h.bf16 %v1731_v50 }
  0xfe   : > { %v1728_v55 = vunpack.i.h.bf16 %v1726_v52  ;;  %v1727_v56 = vunpack.i.l.bf16 %v1726_v52 }
  0xff   : > { %1461 = vmatmul.msk.f32.gmra.mxu1 %vm245_vm1, %v1459_v45  ;;  %1285 = vmatpush.msra.mxu2 %v1723_v49  ;;  %v1200_v63 = vsel %vm1197_vm8, %v1732_v39, %v1733_v53  ;;  %v1201_v3 = vsel %vm1197_vm8, %v1733_v53, %v1717_v48 }
 0x100   : > { %v1202_v60 = vsel %vm1197_vm8, %v1727_v56, %v1728_v55  ;;  %v1203_v61 = vsel %vm1197_vm8, %v1728_v55, %v1713_v44 }
 0x101   : > { %1237 = vmatpush.msra.mxu0 %v1202_v60  ;;  %1260 = vmatpush.msra.mxu1 %v1203_v61 }
 0x102   : > { %1472 = vmatmul.msk.f32.vlgmr.msra.gmra.mxu2 %vm245_vm1, %v1466_v57 }
 0x103   : > { %1238 = vmatpush.msra.mxu0 %v1200_v63  ;;  %1261 = vmatpush.msra.mxu1 %v1201_v3 }
 0x104   : > { %1465 = vmatmul.msk.f32.gmra.mxu3 %vm245_vm1, %v1459_v45 }
 0x105   : > { %1239 = vmatpush.msra.mxu0 %v1198_v5  ;;  %1262 = vmatpush.msra.mxu1 %v1199_v10 }
 0x106   : > { %1468 = vmatmul.msk.f32.vlgmr.msra.gmra.mxu0 %vm245_vm1, %v1466_v57 }
 0x107   : > { %1470 = vmatmul.msk.f32.vlgmr.msra.gmra.mxu1 %vm245_vm1, %v1466_v57 }
 0x10a   : > { %1473 = vmatmul.msk.f32.gmra.mxu2 %vm245_vm1, %v1467_v13 }
 0x10e   : > { %1469 = vmatmul.msk.f32.gmra.mxu0 %vm245_vm1, %v1467_v13 }
 0x10f   : > { %1471 = vmatmul.msk.f32.gmra.mxu1 %vm245_vm1, %v1467_v13 }
 0x112   : > { %v292_v15 = vpop.f32.mrf.mxu1 }
 0x114   : > { %v269_v17 = vpop.f32.mrf.mxu0 }
 0x116   : > { %v315_v18 = vpop.f32.mrf.mxu2 }
 0x11a   : > { %v272_v7 = vpop.f32.mrf.mxu3  ;;  %v295_v9 = vpop.f32.mrf.mxu1 }
 0x11c   : > { %v367_v58 = vpop.f32.mrf.mxu0 }
 0x11d   : > { %v368_v6 = vadd.f32 %v367_v58, %v292_v15 }
 0x11e   : > { %v318_v62 = vpop.f32.mrf.mxu2 }
 0x122   : > { %v390_v19 = vpop.f32.mrf.mxu1 }
 0x123   : > { %v344_v16 = vpop.f32.mrf.mxu3  ;;  %v391_v20 = vadd.f32 %v390_v19, %v315_v18 }
 0x124   : > { %v345_v1 = vadd.f32 %v344_v16, %v269_v17  ;;  %v370_v14 = vpop.f32.mrf.mxu0 }
 0x125   : > { %v371_v12 = vadd.f32 %v370_v14, %v295_v9 }
 0x126   : > { %v467_v21 = vpop.f32.mrf.mxu2 }
 0x127   : > { %v519_v22 = vadd.f32 %v467_v21, %v345_v1 }
 0x12a   : > { %v393_v2 = vpop.f32.mrf.mxu1 }
 0x12b   : > { %v347_v23 = vpop.f32.mrf.mxu3  ;;  %v394_v24 = vadd.f32 %v393_v2, %v318_v62 }
 0x12c   : > { %v348_v4 = vadd.f32 %v347_v23, %v272_v7  ;;  %v513_v29 = vpop.f32.mrf.mxu0 }
 0x12d   : > { %v521_v54 = vadd.f32 %v513_v29, %v391_v20 }
 0x12f   : > { %v470_v25 = vpop.f32.mrf.mxu2 }
 0x130   : > { %v522_v26 = vadd.f32 %v470_v25, %v348_v4 }
 0x133   : > { %v490_v27 = vpop.f32.mrf.mxu3 }
 0x134   : > { %v596_v28 = vpop.f32.mrf.mxu1  ;;  %v516_v33 = vpop.f32.mrf.mxu0  ;;  %v520_v52 = vadd.f32 %v490_v27, %v368_v6 }
 0x135   : > { %v648_v55 = vadd.f32 %v596_v28, %v519_v22  ;;  %v524_v13 = vadd.f32 %v516_v33, %v394_v24 }
 0x137   : > { %v619_v30 = vpop.f32.mrf.mxu2 }
 0x138   : > { %v649_v57 = vadd.f32 %v619_v30, %v520_v52 }
 0x13b   : > { %v493_v32 = vpop.f32.mrf.mxu3 }
 0x13c   : > { %v599_v0 = vpop.f32.mrf.mxu1  ;;  %v523_v15 = vadd.f32 %v493_v32, %v371_v12 }
 0x13d   : > { %v651_v58 = vadd.f32 %v599_v0, %v522_v26 }
 0x13f   : > { %v622_v34 = vpop.f32.mrf.mxu2 }
 0x140   : > { %v652_v19 = vadd.f32 %v622_v34, %v523_v15 }
 0x143   : > { %v642_v35 = vpop.f32.mrf.mxu3  ;;  %v725_v8 = vpop.f32.mrf.mxu0 }
 0x144   : > { %v748_v36 = vpop.f32.mrf.mxu1  ;;  %v650_v56 = vadd.f32 %v642_v35, %v521_v54  ;;  %v777_v60 = vadd.f32 %v725_v8, %v648_v55 }
 0x145   : > { %v778_v63 = vadd.f32 %v748_v36, %v649_v57 }
 0x147   : > { %v771_v37 = vpop.f32.mrf.mxu2 }
 0x148   : > { %v779_v5 = vadd.f32 %v771_v37, %v650_v56 }
 0x14b   : > { %v645_v11 = vpop.f32.mrf.mxu3  ;;  %v728_v31 = vpop.f32.mrf.mxu0 }
 0x14c   : > { %v751_v38 = vpop.f32.mrf.mxu1  ;;  %v653_v62 = vadd.f32 %v645_v11, %v524_v13  ;;  %v780_v20 = vadd.f32 %v728_v31, %v651_v58 }
 0x14d   : > { %v781_v12 = vadd.f32 %v751_v38, %v652_v19 }
 0x14f   : > { %v774_v40 = vpop.f32.mrf.mxu2 }
 0x150   : > { %v782_v24 = vadd.f32 %v774_v40, %v653_v62 }
 0x157   : > { %v854_v41 = vpop.f32.mrf.mxu3  ;;  %v1304_v22 = vpop.permute.xlu0 %1303 }
 0x158   : > { %v906_v10 = vadd.f32 %v854_v41, %v777_v60 }
 0x15f   : > { %v983_v44 = vpop.f32.mrf.mxu2  ;;  %v857_v45 = vpop.f32.mrf.mxu3 }
 0x160   : > { %v900_v43 = vpop.f32.mrf.mxu1  ;;  %v1035_v7 = vadd.f32 %v983_v44, %v906_v10  ;;  %v909_v25 = vadd.f32 %v857_v45, %v780_v20  ;;  %v1309_v44 = vpop.permute.xlu1 %1308 }
 0x161   : > { %v877_v42 = vpop.f32.mrf.mxu0  ;;  %v908_v9 = vadd.f32 %v900_v43, %v779_v5 }
 0x162   : > { %v907_v17 = vadd.f32 %v877_v42, %v778_v63 }
 0x167   : > { %v986_v48 = vpop.f32.mrf.mxu2 }
 0x168   : > { %v903_v47 = vpop.f32.mrf.mxu1  ;;  %v1038_v30 = vadd.f32 %v986_v48, %v909_v25 }
 0x169   : > { %v911_v32 = vadd.f32 %v903_v47, %v782_v24 }
 0x16a   : > { %v880_v46 = vpop.f32.mrf.mxu0 }
 0x16b   : > { %v910_v0 = vadd.f32 %v880_v46, %v781_v12 }
 0x16f   : > { %v1006_v49 = vpop.f32.mrf.mxu3 }
 0x170   : > { %v1036_v6 = vadd.f32 %v1006_v49, %v907_v17 }
 0x172   : > { %v1029_v50 = vpop.f32.mrf.mxu0 }
 0x173   : > { %v1037_v16 = vadd.f32 %v1029_v50, %v908_v9 }
 0x174   : > { %v1112_v39 = vpop.f32.mrf.mxu1 }
 0x175   : > { %v1135_v51 = vpop.f32.mrf.mxu2  ;;  %v1164_v1 = vadd.f32 %v1112_v39, %v1035_v7 }
 0x176   : > { %v1165_v21 = vadd.f32 %v1135_v51, %v1036_v6 }
 0x177   : > { %v1009_v53 = vpop.f32.mrf.mxu3 }
 0x178   : > { %v1039_v8 = vadd.f32 %v1009_v53, %v910_v0 }
 0x17a   : > { %v1032_v59 = vpop.f32.mrf.mxu0 }
 0x17b   : > { %v1040_v36 = vadd.f32 %v1032_v59, %v911_v32 }
 0x17c   : > { %v1115_v61 = vpop.f32.mrf.mxu1 }
 0x17d   : > { %v1138_v3 = vpop.f32.mrf.mxu2  ;;  %v1167_v31 = vadd.f32 %v1115_v61, %v1038_v30 }
 0x17e   : > { %v1168_v41 = vadd.f32 %v1138_v3, %v1039_v8 }
 0x17f   : > { %v1158_v18 = vpop.f32.mrf.mxu3 }
 0x180   : > { %v1166_v23 = vadd.f32 %v1158_v18, %v1037_v16 }
 0x183   : > { %v1241_v14 = vpop.f32.mrf.mxu0 }
 0x184   : > { %v1293_v4 = vadd.f32 %v1241_v14, %v1164_v1  ;;  %v1264_v2 = vpop.f32.mrf.mxu1 }
 0x185   : > { %v1294_v27 = vadd.f32 %v1264_v2, %v1165_v21  ;;  %v1287_v28 = vpop.f32.mrf.mxu2 }
 0x186   : > { %v1311_v29 = vadd.f32 %v1304_v22, %v1293_v4  ;;  %v1295_v26 = vadd.f32 %v1287_v28, %v1166_v23 }
 0x187   : > { %v1312_v33 = vadd.f32 %v1304_v22, %v1294_v27  ;;  %v1161_v11 = vpop.f32.mrf.mxu3 }
 0x188   : > { %vm1317_vm9 = vcmp.ge.f32.partialorder %v1311_v29, 0.0  ;;  %v1323_v34 = vmul.f32 0.2, %v1311_v29  ;;  %v1313_v35 = vadd.f32 %v1304_v22, %v1295_v26  ;;  %v1169_v46 = vadd.f32 %v1161_v11, %v1040_v36 }
 0x189   : > { %vm1318_vm11 = vcmp.ge.f32.partialorder %v1312_v33, 0.0  ;;  %v1324_v37 = vmul.f32 0.2, %v1312_v33 }
 0x18a   : > { %v1329_v38 = vsel %vm1317_vm9, %v1311_v29, %v1323_v34  ;;  %vm1319_vm12 = vcmp.ge.f32.partialorder %v1313_v35, 0.0  ;;  %v1325_v40 = vmul.f32 0.2, %v1313_v35 }
 0x18b   : > { %1335 = vst [vmem:[%s2153_s19] sm:$0xff] %v1329_v38  ;;  %v1330_v42 = vsel %vm1318_vm11, %v1312_v33, %v1324_v37  ;;  %v1244_v43 = vpop.f32.mrf.mxu0 }
 0x18c   : > { %1336 = vst [vmem:[%s2153_s19 + $0x8] sm:$0xff] %v1330_v42  ;;  %v1331_v45 = vsel %vm1319_vm12, %v1313_v35, %v1325_v40  ;;  %v1296_v47 = vadd.f32 %v1244_v43, %v1167_v31  ;;  %v1267_v48 = vpop.f32.mrf.mxu1 }
 0x18d   : > { %1338 = vst.msk [vmem:[%s2153_s19 + $0x10] sm:$0xff] %vm1337_vm10, %v1331_v45  ;;  %v1297_v49 = vadd.f32 %v1267_v48, %v1168_v41  ;;  %v1290_v50 = vpop.f32.mrf.mxu2 }
 0x18e   : > { %v1314_v39 = vadd.f32 %v1309_v44, %v1296_v47  ;;  %v1298_v51 = vadd.f32 %v1290_v50, %v1169_v46 }
 0x18f   : > { %v1315_v52 = vadd.f32 %v1309_v44, %v1297_v49 }
 0x190   : > { %vm1320_vm13 = vcmp.ge.f32.partialorder %v1314_v39, 0.0  ;;  %v1326_v53 = vmul.f32 0.2, %v1314_v39  ;;  %v1316_v54 = vadd.f32 %v1309_v44, %v1298_v51 }
 0x191   : > { %vm1321_vm14 = vcmp.ge.f32.partialorder %v1315_v52, 0.0  ;;  %v1327_v55 = vmul.f32 0.2, %v1315_v52 }
 0x192   : > { %v1332_v56 = vsel %vm1320_vm13, %v1314_v39, %v1326_v53  ;;  %vm1322_vm15 = vcmp.ge.f32.partialorder %v1316_v54, 0.0  ;;  %v1328_v57 = vmul.f32 0.2, %v1316_v54 }
 0x193   : > { %1339 = vst [vmem:[%s2153_s19 + $0x18] sm:$0xff] %v1332_v56  ;;  %v1333_v59 = vsel %vm1321_vm14, %v1315_v52, %v1327_v55 }
 0x194   : > { %1340 = vst [vmem:[%s2153_s19 + $0x20] sm:$0xff] %v1333_v59  ;;  %v1334_v60 = vsel %vm1322_vm15, %v1316_v54, %v1328_v57 }
 0x195   : > { %1341 = vst.msk [vmem:[%s2153_s19 + $0x28] sm:$0xff] %vm1337_vm10, %v1334_v60 }
 0x196 PF: > { %s13_s12 = sadd.s32 1, %s1747_s12  }
 0x197   : > { %p10_p4 = scmp.ge.s32.totalorder %s13_s12, 8  }
 0x199   :  { %12 = sbr.rel (!%p10_p4) target bundleno = 1 (0x1), region = 70 }

// kernel: uconvlstm_forward.21
= control target key start
LH: loop header
LB: loop body
LE: loop exit
PB: predicated region body
PF: predicated region fallthrough
CT: control target
= control target key end

     0   :  { %s1467_s12 = smov 0   ;;  %s1677_s0 = inlined_call_operand.vmem [shape: f32[6,16,362], index: 0, kind: input, shape index: {}]   ;;  %s1678_s1 = inlined_call_operand.vmem [shape: f32[9,16,16], index: 1, kind: input, shape index: {}]   ;;  %s1679_s2 = inlined_call_operand.vmem [shape: f32[16,1], index: 2, kind: input, shape index: {}]   ;;  %s1680_s3 = inlined_call_operand.vmem [shape: f32[6,16,324], index: 3, kind: output, shape index: {}]  }
   0x1 LB: > { %s1209_s13 = sadd.s32 4294967295, %s1436_s12   ;;  %p1213_p0 = scmp.ge.s32.totalorder %s1436_s12, 1  ;;  %s1436_s12 = sphi %s1467_s12, %s13_s12  }
   0x2   : > { %p137_p1 = scmp.lt.s32.totalorder %s1436_s12, 7 }
   0x4   : > { %p138_p2 = pnand %p1213_p0, %p137_p1 }
   0x5   : > { %p161_p3 = scmp.lt.s32.totalorder (!%p138_p2), %s1209_s13, 5  ;;  %s1438_s18 = smov (!%p138_p2), 127  }
   0x6   : > { %141 = sbr.rel (%p138_p2) target bundleno = 387 (0x183), region = 32  ;;  %s1439_s19 = smov (!%p138_p2), 126  }
   0x7   : > { %s1440_s20 = smov (!%p138_p2), 110   ;;  %s1441_s21 = smov (!%p138_p2), 109  }
   0x8   : > { %s1442_s22 = smov (!%p138_p2), 108   ;;  %s1443_s23 = smov (!%p138_p2), 92  }
   0x9   : > { %s1444_s24 = smov (!%p138_p2), 91   ;;  %s1445_s25 = smov (!%p138_p2), 90  }
   0xb   : > { %s1682_s13 = smov (!%p161_p3, %s1209_s13), 5  ;;  %v1216_v17 = vld [vmem:[%s1678_s1 + $0x10] sm:$0xff]  ;;  %vm211_vm0 = vcmask 130048   ;;  %vm377_vm1 = vcmask 1031168   ;;  %vm200_vm2 = vcmask 1039360   ;;  %v1217_v35 = vld [vmem:[%s1678_s1 + $0x18] sm:$0xff] }
   0xc   : > { %s1290_s14 = smul.u32 48, %s1682_s13  ;;  %vm484_vm3 = vcmask 900096   ;;  %v177_v49 = vld [vmem:[%s1678_s1] sm:$0xff]  ;;  %vm591_vm4 = vcmask 891904   ;;  %vm698_vm5 = vcmask 883712   ;;  %vm805_vm6 = vcmask 752640  }
   0xd   : > { %v1230_v52 = vld [vmem:[%s1678_s1 + $0x20] sm:$0xff]  ;;  %vm912_vm7 = vcmask 744448   ;;  %vm1019_vm8 = vcmask 736256   ;;  %vm1149_vm13 = vcmask 556032  }
   0xe   : > { %s165_s17 = scalar_lea.vmem %s1677_s0, %s1290_s14 }
   0xf   : > { %v1483_v0 = vld [vmem:[%s165_s17 + $0x10] sm:$0xff]  ;;  %v1485_v1 = vld [vmem:[%s165_s17 + $0x28] sm:$0xff]  ;;  %v1487_v2 = vld [vmem:[%s165_s17] sm:$0xff] }
  0x10   : > { %v1308_v3 = vpack.i.bf16 %v1483_v0, %v1485_v1  ;;  %v1491_v4 = vld [vmem:[%s165_s17 + $0x8] sm:$0xff]  ;;  %v1495_v6 = vld [vmem:[%s165_s17 + $0x18] sm:$0xff]  ;;  %v1497_v7 = vld [vmem:[%s165_s17 + $0x20] sm:$0xff] }
  0x11   : > { %v1318_v5 = vpack.i.bf16 %v1491_v4, %v1487_v2  ;;  %v1313_v8 = vpack.i.bf16 %v1497_v7, %v1495_v6  ;;  %v1338_v9 = vpack.i.bf16 %v1485_v1, %v1497_v7  ;;  %v1343_v10 = vpack.i.bf16 %v1483_v0, %v1491_v4 }
  0x12   : > { %1309 = vrot.lane.b32.xlu0 %v1308_v3, %s1438_s18  ;;  %v1348_v11 = vpack.i.bf16 %v1487_v2, %v1495_v6 }
  0x13   : > { %1319 = vrot.lane.b32.xlu1 %v1318_v5, %s1438_s18  ;;  %1329 = vrot.lane.b32.xlu2 %v1318_v5, %s1439_s19 }
  0x1a   : > { %1314 = vrot.lane.b32.xlu0 %v1313_v8, %s1438_s18 }
  0x1b   : > { %1324 = vrot.lane.b32.xlu1 %v1313_v8, %s1439_s19  ;;  %1334 = vrot.lane.b32.xlu2 %v1308_v3, %s1439_s19 }
  0x22   : > { %1339 = vrot.lane.b32.xlu0 %v1338_v9, %s1440_s20 }
  0x23   : > { %1344 = vrot.lane.b32.xlu1 %v1343_v10, %s1440_s20  ;;  %1349 = vrot.lane.b32.xlu2 %v1348_v11, %s1440_s20  ;;  %s1664_s20 = scalar_lea.vmem %s1680_s3, %s1290_s14 }
  0x2a   : > { %1354 = vrot.lane.b32.xlu0 %v1308_v3, %s1441_s21 }
  0x2b   : > { %1359 = vrot.lane.b32.xlu1 %v1313_v8, %s1441_s21  ;;  %1364 = vrot.lane.b32.xlu2 %v1318_v5, %s1441_s21 }
  0x32   : > { %1369 = vrot.lane.b32.xlu0 %v1313_v8, %s1442_s22 }
  0x33   : > { %1374 = vrot.lane.b32.xlu1 %v1318_v5, %s1442_s22  ;;  %1379 = vrot.lane.b32.xlu2 %v1313_v8, %s1443_s23 }
  0x3a   : > { %1384 = vrot.lane.b32.xlu0 %v1318_v5, %s1443_s23 }
  0x3b   : > { %1389 = vrot.lane.b32.xlu1 %v1308_v3, %s1442_s22  ;;  %1394 = vrot.lane.b32.xlu2 %v1308_v3, %s1443_s23 }
  0x42   : > { %1399 = vrot.lane.b32.xlu0 %v1338_v9, %s1444_s24 }
  0x43   : > { %1404 = vrot.lane.b32.xlu1 %v1343_v10, %s1444_s24  ;;  %1409 = vrot.lane.b32.xlu2 %v1348_v11, %s1444_s24 }
  0x4a   : > { %1414 = vrot.lane.b32.xlu0 %v1308_v3, %s1445_s25 }
  0x4b   : > { %1419 = vrot.lane.b32.xlu1 %v1313_v8, %s1445_s25  ;;  %1424 = vrot.lane.b32.xlu2 %v1318_v5, %s1445_s25 }
  0x6d   : > { %v1330_v12 = vpop.permute.xlu2 %1329 }
  0x6e   : > { %v1332_v25 = vunpack.i.h.bf16 %v1330_v12  ;;  %v1331_v28 = vunpack.i.l.bf16 %v1330_v12 }
  0x70   : > { %v378_v38 = vsel %vm377_vm1, %v1331_v28, %v1332_v25 }
  0x75   : > { %v1510_v18 = vpop.permute.xlu2 %1334 }
  0x76   : > { %v1336_v34 = vunpack.i.l.bf16 %v1510_v18  ;;  %v1337_v37 = vunpack.i.h.bf16 %v1510_v18 }
  0x78   : > { %v379_v45 = vsel %vm377_vm1, %v1332_v25, %v1337_v37 }
  0x7d   : > { %v1350_v33 = vpop.permute.xlu2 %1349 }
  0x7e   : > { %v1351_v39 = vunpack.i.l.bf16 %v1350_v33  ;;  %v1352_v46 = vunpack.i.h.bf16 %v1350_v33 }
  0x84   : > { %v1310_v13 = vpop.permute.xlu0 %1309 }
  0x85   : > { %v1320_v14 = vpop.permute.xlu1 %1319  ;;  %v1311_v15 = vunpack.i.l.bf16 %v1310_v13  ;;  %v1312_v16 = vunpack.i.h.bf16 %v1310_v13  ;;  %v1365_v56 = vpop.permute.xlu2 %1364 }
  0x86   : > { %v1321_v19 = vunpack.i.l.bf16 %v1320_v14  ;;  %v1322_v21 = vunpack.i.h.bf16 %v1320_v14  ;;  %v1367_v62 = vunpack.i.h.bf16 %v1365_v56  ;;  %v1366_v63 = vunpack.i.l.bf16 %v1365_v56 }
  0x87   : > { %278 = vmatpush.msra.mxu2 %v1311_v15 }
  0x88   : > { %v201_v31 = vsel %vm200_vm2, %v1321_v19, %v1322_v21  ;;  %v202_v36 = vsel %vm200_vm2, %v1322_v21, %v1312_v16 }
  0x89   : > { %279 = vmatpush.msra.mxu2 %v1312_v16 }
  0x8a   : > { %1222 = vmatmul.msk.f32.vlgmr.msra.gmra.mxu2 %vm211_vm0, %v1216_v17 }
  0x8c   : > { %v1315_v20 = vpop.permute.xlu0 %1314 }
  0x8d   : > { %v1317_v22 = vunpack.i.h.bf16 %v1315_v20  ;;  %v1316_v23 = vunpack.i.l.bf16 %v1315_v20  ;;  %v1325_v24 = vpop.permute.xlu1 %1324  ;;  %v1380_v8 = vpop.permute.xlu2 %1379 }
  0x8e   : > { %v1327_v26 = vunpack.i.h.bf16 %v1325_v24  ;;  %v1326_v27 = vunpack.i.l.bf16 %v1325_v24  ;;  %v1382_v11 = vunpack.i.h.bf16 %v1380_v8  ;;  %v1381_v12 = vunpack.i.l.bf16 %v1380_v8  ;;  %v1279_v8 = vld [vmem:[%s1678_s1 + $0x88] sm:$0xff] }
  0x8f   : > { %v203_v29 = vsel %vm200_vm2, %v1316_v23, %v1317_v22  ;;  %v204_v30 = vsel %vm200_vm2, %v1317_v22, %v1311_v15  ;;  %v1238_v15 = vld [vmem:[%s1678_s1 + $0x30] sm:$0xff] }
  0x90   : > { %232 = vmatpush.msra.mxu0 %v203_v29  ;;  %1288 = vmatpush.msra.mxu3 %v203_v29  ;;  %v380_v32 = vsel %vm377_vm1, %v1326_v27, %v1327_v26  ;;  %v381_v41 = vsel %vm377_vm1, %v1327_v26, %v1336_v34  ;;  %v1239_v27 = vld [vmem:[%s1678_s1 + $0x38] sm:$0xff] }
  0x91   : > { %255 = vmatpush.msra.mxu1 %v204_v30  ;;  %408 = vmatpush.msrb.mxu2 %v380_v32 }
  0x92   : > { %233 = vmatpush.msra.mxu0 %v201_v31  ;;  %1289 = vmatpush.msra.mxu3 %v201_v31 }
  0x93   : > { %256 = vmatpush.msra.mxu1 %v202_v36  ;;  %1218 = vmatmul.msk.f32.vlgmr.msra.gmra.mxu0 %vm211_vm0, %v1216_v17 }
  0x94   : > { %1219 = vmatmul.msk.f32.vlgmr.msra.gmra.mxu3 %vm211_vm0, %v1217_v35  ;;  %1220 = vmatmul.msk.f32.vlgmr.msra.gmra.mxu1 %vm211_vm0, %v1216_v17  ;;  %v1340_v40 = vpop.permute.xlu0 %1339  ;;  %v808_v17 = vsel %vm805_vm6, %v1381_v12, %v1382_v11 }
  0x95   : > { %307 = vmatpush.msrb.mxu3 %v1495_v6  ;;  %1223 = vmatmul.msk.f32.gmra.mxu2 %vm211_vm0, %v1217_v35  ;;  %v1342_v42 = vunpack.i.h.bf16 %v1340_v40  ;;  %v1341_v43 = vunpack.i.l.bf16 %v1340_v40  ;;  %v1345_v44 = vpop.permute.xlu1 %1344  ;;  %v1395_v29 = vpop.permute.xlu2 %1394 }
  0x96   : > { %353 = vmatpush.msrb.mxu1 %v1485_v1  ;;  %409 = vmatpush.msrb.mxu2 %v378_v38  ;;  %v1346_v47 = vunpack.i.l.bf16 %v1345_v44  ;;  %v1347_v50 = vunpack.i.h.bf16 %v1345_v44  ;;  %v1396_v31 = vunpack.i.l.bf16 %v1395_v29  ;;  %v1397_v36 = vunpack.i.h.bf16 %v1395_v29 }
  0x97   : > { %308 = vmatpush.msrb.mxu3 %v1487_v2  ;;  %330 = vmatpush.msrb.mxu0 %v1497_v7  ;;  %v487_v48 = vsel %vm484_vm3, %v1351_v39, %v1341_v43  ;;  %v488_v51 = vsel %vm484_vm3, %v1341_v43, %v1342_v42  ;;  %v1231_v2 = vld [vmem:[%s1678_s1 + $0x28] sm:$0xff] }
  0x98   : > { %354 = vmatpush.msrb.mxu1 %v1483_v0  ;;  %538 = vmatpush.msra.mxu2 %v488_v51  ;;  %v485_v53 = vsel %vm484_vm3, %v1352_v46, %v1346_v47  ;;  %v486_v54 = vsel %vm484_vm3, %v1346_v47, %v1347_v50  ;;  %v178_v0 = vld [vmem:[%s1678_s1 + $0x8] sm:$0xff]  ;;  %v809_v39 = vsel %vm805_vm6, %v1382_v11, %v1396_v31 }
  0x99   : > { %431 = vmatpush.msra.mxu3 %v381_v41  ;;  %331 = vmatpush.msrb.mxu0 %v1491_v4  ;;  %v592_v4 = vsel %vm591_vm4, %v1366_v63, %v1367_v62  ;;  %v1263_v63 = vld [vmem:[%s1678_s1 + $0x68] sm:$0xff] }
  0x9a   : > { %515 = vmatpush.msra.mxu1 %v487_v48  ;;  %539 = vmatpush.msra.mxu2 %v486_v54  ;;  %v1254_v54 = vld [vmem:[%s1678_s1 + $0x50] sm:$0xff] }
  0x9b   : > { %432 = vmatpush.msra.mxu3 %v379_v45  ;;  %454 = vmatpush.msra.mxu0 %v1336_v34  ;;  %v1247_v45 = vld [vmem:[%s1678_s1 + $0x48] sm:$0xff] }
  0x9c   : > { %1226 = vmatmul.msk.f32.vlgmr.msrb.gmra.mxu0 %vm211_vm0, %v177_v49  ;;  %1221 = vmatmul.msk.f32.gmra.mxu1 %vm211_vm0, %v1217_v35  ;;  %v1355_v55 = vpop.permute.xlu0 %1354  ;;  %v1246_v35 = vld [vmem:[%s1678_s1 + $0x40] sm:$0xff] }
  0x9d   : > { %1224 = vmatmul.msk.f32.vlgmr.msrb.gmra.mxu3 %vm211_vm0, %v177_v49  ;;  %1232 = vmatmul.msk.f32.vlgmr.msrb.gmra.mxu2 %vm211_vm0, %v1230_v52  ;;  %v1360_v57 = vpop.permute.xlu1 %1359  ;;  %v1356_v58 = vunpack.i.l.bf16 %v1355_v55  ;;  %v1357_v61 = vunpack.i.h.bf16 %v1355_v55  ;;  %v1410_v40 = vpop.permute.xlu2 %1409 }
  0x9e   : > { %455 = vmatpush.msra.mxu0 %v1337_v37  ;;  %561 = vmatpush.msrb.mxu3 %v1342_v42  ;;  %v1362_v59 = vunpack.i.h.bf16 %v1360_v57  ;;  %v1361_v60 = vunpack.i.l.bf16 %v1360_v57  ;;  %v1411_v44 = vunpack.i.l.bf16 %v1410_v40  ;;  %v1412_v46 = vunpack.i.h.bf16 %v1410_v40  ;;  %v1262_v57 = vld [vmem:[%s1678_s1 + $0x60] sm:$0xff] }
  0x9f   : > { %516 = vmatpush.msra.mxu1 %v485_v53  ;;  %668 = vmatpush.msrb.mxu2 %v1356_v58  ;;  %v593_v5 = vsel %vm591_vm4, %v1367_v62, %v1357_v61  ;;  %v1255_v62 = vld [vmem:[%s1678_s1 + $0x58] sm:$0xff] }
  0xa0   : > { %562 = vmatpush.msrb.mxu3 %v1347_v50  ;;  %v594_v1 = vsel %vm591_vm4, %v1361_v60, %v1362_v59  ;;  %v595_v3 = vsel %vm591_vm4, %v1362_v59, %v1356_v58 }
  0xa1   : > { %622 = vmatpush.msrb.mxu0 %v594_v1  ;;  %669 = vmatpush.msrb.mxu2 %v1357_v61 }
  0xa3   : > { %623 = vmatpush.msrb.mxu0 %v592_v4  ;;  %v1270_v4 = vld [vmem:[%s1678_s1 + $0x70] sm:$0xff] }
  0xa4   : > { %1227 = vmatmul.msk.f32.gmra.mxu0 %vm211_vm0, %v178_v0  ;;  %1228 = vmatmul.msk.f32.vlgmr.msrb.gmra.mxu1 %vm211_vm0, %v177_v49  ;;  %v1370_v6 = vpop.permute.xlu0 %1369 }
  0xa5   : > { %1225 = vmatmul.msk.f32.gmra.mxu3 %vm211_vm0, %v178_v0  ;;  %1233 = vmatmul.msk.f32.gmra.mxu2 %vm211_vm0, %v1231_v2  ;;  %v1375_v7 = vpop.permute.xlu1 %1374  ;;  %v1372_v9 = vunpack.i.h.bf16 %v1370_v6  ;;  %v1371_v10 = vunpack.i.l.bf16 %v1370_v6  ;;  %v1425_v50 = vpop.permute.xlu2 %1424  ;;  %v1271_v6 = vld [vmem:[%s1678_s1 + $0x78] sm:$0xff] }
  0xa6   : > { %645 = vmatpush.msrb.mxu1 %v595_v3  ;;  %v1377_v13 = vunpack.i.h.bf16 %v1375_v7  ;;  %v1376_v14 = vunpack.i.l.bf16 %v1375_v7  ;;  %v1427_v55 = vunpack.i.h.bf16 %v1425_v50  ;;  %v1426_v56 = vunpack.i.l.bf16 %v1425_v50  ;;  %v1278_v7 = vld [vmem:[%s1678_s1 + $0x80] sm:$0xff] }
  0xa7   : > { %v701_v16 = vsel %vm698_vm5, %v1371_v10, %v1372_v9  ;;  %v1446_v3 = vmov 0  }
  0xa8   : > { %646 = vmatpush.msrb.mxu1 %v593_v5  ;;  %v699_v18 = vsel %vm698_vm5, %v1376_v14, %v1377_v13  ;;  %v1020_v61 = vsel %vm1019_vm8, %v1426_v56, %v1427_v55  ;;  %1428 = vset.pattern.permute.xlu0 %v1446_v3  ;;  %v1112_v5 = vld [vmem:[%s1679_s2 + $0x8] sm:$0xff] }
  0xa9   : > { %1429 = vset.pattern.permute.xlu1 %v1446_v3 }
  0xaa   : > { %1120 = vperm.xlu1 %1429, %v1112_v5  }
  0xac   : > { %1236 = vmatmul.msk.f32.vlgmr.msra.gmra.mxu0 %vm211_vm0, %v1230_v52  ;;  %1229 = vmatmul.msk.f32.gmra.mxu1 %vm211_vm0, %v178_v0  ;;  %v1385_v19 = vpop.permute.xlu0 %1384 }
  0xad   : > { %1234 = vmatmul.msk.f32.vlgmr.msra.gmra.mxu3 %vm211_vm0, %v1230_v52  ;;  %1242 = vmatmul.msk.f32.vlgmr.msra.gmra.mxu2 %vm211_vm0, %v1238_v15  ;;  %v1390_v20 = vpop.permute.xlu1 %1389  ;;  %v1387_v21 = vunpack.i.h.bf16 %v1385_v19  ;;  %v1386_v22 = vunpack.i.l.bf16 %v1385_v19 }
  0xae   : > { %729 = vmatpush.msra.mxu3 %v701_v16  ;;  %v1392_v23 = vunpack.i.h.bf16 %v1390_v20  ;;  %v1391_v24 = vunpack.i.l.bf16 %v1390_v20  ;;  %836 = vmatpush.msra.mxu2 %v808_v17 }
  0xaf   : > { %v806_v25 = vsel %vm805_vm6, %v1386_v22, %v1387_v21  ;;  %v807_v42 = vsel %vm805_vm6, %v1387_v21, %v1397_v36 }
  0xb0   : > { %730 = vmatpush.msra.mxu3 %v699_v18  ;;  %v702_v26 = vsel %vm698_vm5, %v1372_v9, %v1391_v24  ;;  %837 = vmatpush.msra.mxu2 %v806_v25  ;;  %v700_v28 = vsel %vm698_vm5, %v1377_v13, %v1392_v23 }
  0xb1   : > { %752 = vmatpush.msra.mxu0 %v702_v26 }
  0xb3   : > { %753 = vmatpush.msra.mxu0 %v700_v28 }
  0xb4   : > { %1237 = vmatmul.msk.f32.gmra.mxu0 %vm211_vm0, %v1231_v2  ;;  %1240 = vmatmul.msk.f32.vlgmr.msra.gmra.mxu1 %vm211_vm0, %v1238_v15  ;;  %v1400_v30 = vpop.permute.xlu0 %1399 }
  0xb5   : > { %1235 = vmatmul.msk.f32.gmra.mxu3 %vm211_vm0, %v1231_v2  ;;  %1243 = vmatmul.msk.f32.gmra.mxu2 %vm211_vm0, %v1239_v27  ;;  %v1405_v32 = vpop.permute.xlu1 %1404  ;;  %v1402_v33 = vunpack.i.h.bf16 %v1400_v30  ;;  %v1401_v34 = vunpack.i.l.bf16 %v1400_v30  ;;  %v1111_v2 = vld [vmem:[%s1679_s2] sm:$0xff] }
  0xb6   : > { %775 = vmatpush.msra.mxu1 %v1391_v24  ;;  %v1407_v37 = vunpack.i.h.bf16 %v1405_v32  ;;  %v1406_v38 = vunpack.i.l.bf16 %v1405_v32  ;;  %1115 = vperm.xlu0 %1428, %v1111_v2  }
  0xb7   : > { %v916_v41 = vsel %vm912_vm7, %v1401_v34, %v1402_v33  ;;  %v915_v47 = vsel %vm912_vm7, %v1411_v44, %v1401_v34 }
  0xb8   : > { %776 = vmatpush.msra.mxu1 %v1392_v23  ;;  %v914_v43 = vsel %vm912_vm7, %v1406_v38, %v1407_v37  ;;  %v913_v48 = vsel %vm912_vm7, %v1412_v46, %v1406_v38 }
  0xbc   : > { %1248 = vmatmul.msk.f32.vlgmr.msrb.gmra.mxu0 %vm211_vm0, %v1246_v35  ;;  %1241 = vmatmul.msk.f32.gmra.mxu1 %vm211_vm0, %v1239_v27  ;;  %v1415_v51 = vpop.permute.xlu0 %1414 }
  0xbd   : > { %1244 = vmatmul.msk.f32.vlgmr.msrb.gmra.mxu3 %vm211_vm0, %v1238_v15  ;;  %1252 = vmatmul.msk.f32.vlgmr.msrb.gmra.mxu2 %vm211_vm0, %v1246_v35  ;;  %v1420_v49 = vpop.permute.xlu1 %1419  ;;  %v1416_v58 = vunpack.i.l.bf16 %v1415_v51  ;;  %v1417_v60 = vunpack.i.h.bf16 %v1415_v51 }
  0xbe   : > { %859 = vmatpush.msrb.mxu3 %v809_v39  ;;  %882 = vmatpush.msrb.mxu0 %v1396_v31  ;;  %v1422_v52 = vunpack.i.h.bf16 %v1420_v49  ;;  %v1421_v53 = vunpack.i.l.bf16 %v1420_v49 }
  0xbf   : > { %966 = vmatpush.msrb.mxu2 %v916_v41  ;;  %v1021_v1 = vsel %vm1019_vm8, %v1427_v55, %v1417_v60 }
  0xc0   : > { %860 = vmatpush.msrb.mxu3 %v807_v42  ;;  %883 = vmatpush.msrb.mxu0 %v1397_v36  ;;  %v1022_v59 = vsel %vm1019_vm8, %v1421_v53, %v1422_v52  ;;  %v1023_v0 = vsel %vm1019_vm8, %v1422_v52, %v1416_v58 }
  0xc1   : > { %967 = vmatpush.msrb.mxu2 %v914_v43 }
  0xc4   : > { %1249 = vmatmul.msk.f32.gmra.mxu0 %vm211_vm0, %v1247_v45  ;;  %1250 = vmatmul.msk.f32.vlgmr.msrb.gmra.mxu1 %vm211_vm0, %v1246_v35 }
  0xc5   : > { %1245 = vmatmul.msk.f32.gmra.mxu3 %vm211_vm0, %v1239_v27  ;;  %1253 = vmatmul.msk.f32.gmra.mxu2 %vm211_vm0, %v1247_v45 }
  0xc6   : > { %943 = vmatpush.msrb.mxu1 %v915_v47 }
  0xc8   : > { %944 = vmatpush.msrb.mxu1 %v913_v48 }
  0xcc   : > { %1258 = vmatmul.msk.f32.vlgmr.msra.gmra.mxu0 %vm211_vm0, %v1254_v54  ;;  %1251 = vmatmul.msk.f32.gmra.mxu1 %vm211_vm0, %v1247_v45 }
  0xcd   : > { %1256 = vmatmul.msk.f32.vlgmr.msra.gmra.mxu3 %vm211_vm0, %v1254_v54  ;;  %1264 = vmatmul.msk.f32.vlgmr.msra.gmra.mxu2 %vm211_vm0, %v1262_v57 }
  0xce   : > { %989 = vmatpush.msra.mxu3 %v1402_v33  ;;  %1096 = vmatpush.msra.mxu2 %v1416_v58 }
  0xcf   : > { %1050 = vmatpush.msra.mxu0 %v1022_v59 }
  0xd0   : > { %990 = vmatpush.msra.mxu3 %v1407_v37  ;;  %1097 = vmatpush.msra.mxu2 %v1417_v60 }
  0xd1   : > { %1051 = vmatpush.msra.mxu0 %v1020_v61 }
  0xd4   : > { %1259 = vmatmul.msk.f32.gmra.mxu0 %vm211_vm0, %v1255_v62  ;;  %1260 = vmatmul.msk.f32.vlgmr.msra.gmra.mxu1 %vm211_vm0, %v1254_v54 }
  0xd5   : > { %1257 = vmatmul.msk.f32.gmra.mxu3 %vm211_vm0, %v1255_v62  ;;  %1265 = vmatmul.msk.f32.gmra.mxu2 %vm211_vm0, %v1263_v63 }
  0xd6   : > { %1073 = vmatpush.msra.mxu1 %v1023_v0 }
  0xd8   : > { %1074 = vmatpush.msra.mxu1 %v1021_v1 }
  0xdc   : > { %1268 = vmatmul.msk.f32.vlgmr.msrb.gmra.mxu0 %vm211_vm0, %v1262_v57  ;;  %1261 = vmatmul.msk.f32.gmra.mxu1 %vm211_vm0, %v1255_v62 }
  0xdd   : > { %1266 = vmatmul.msk.f32.vlgmr.msrb.gmra.mxu3 %vm211_vm0, %v1262_v57  ;;  %1274 = vmatmul.msk.f32.vlgmr.msrb.gmra.mxu2 %vm211_vm0, %v1270_v4 }
  0xe4   : > { %1269 = vmatmul.msk.f32.gmra.mxu0 %vm211_vm0, %v1263_v63  ;;  %1272 = vmatmul.msk.f32.vlgmr.msrb.gmra.mxu1 %vm211_vm0, %v1270_v4 }
  0xe5   : > { %1267 = vmatmul.msk.f32.gmra.mxu3 %vm211_vm0, %v1263_v63  ;;  %1275 = vmatmul.msk.f32.gmra.mxu2 %vm211_vm0, %v1271_v6 }
  0xec   : > { %1280 = vmatmul.msk.f32.vlgmr.msra.gmra.mxu0 %vm211_vm0, %v1278_v7  ;;  %1273 = vmatmul.msk.f32.gmra.mxu1 %vm211_vm0, %v1271_v6 }
  0xed   : > { %1276 = vmatmul.msk.f32.vlgmr.msra.gmra.mxu3 %vm211_vm0, %v1270_v4  ;;  %1284 = vmatmul.msk.f32.vlgmr.msra.gmra.mxu2 %vm211_vm0, %v1278_v7 }
  0xf4   : > { %1281 = vmatmul.msk.f32.gmra.mxu0 %vm211_vm0, %v1279_v8  ;;  %1282 = vmatmul.msk.f32.vlgmr.msra.gmra.mxu1 %vm211_vm0, %v1278_v7 }
  0xf5   : > { %1277 = vmatmul.msk.f32.gmra.mxu3 %vm211_vm0, %v1271_v6  ;;  %1285 = vmatmul.msk.f32.gmra.mxu2 %vm211_vm0, %v1279_v8 }
  0xfc   : > { %1283 = vmatmul.msk.f32.gmra.mxu1 %vm211_vm0, %v1279_v8 }
 0x10d   : > { %v281_v9 = vpop.f32.mrf.mxu2 }
 0x110   : > { %v235_v10 = vpop.f32.mrf.mxu0 }
 0x111   : > { %v258_v11 = vpop.f32.mrf.mxu1 }
 0x117   : > { %v238_v12 = vpop.f32.mrf.mxu3 }
 0x118   : > { %v284_v13 = vpop.f32.mrf.mxu2 }
 0x119   : > { %v333_v14 = vpop.f32.mrf.mxu0  ;;  %v261_v15 = vpop.f32.mrf.mxu1 }
 0x11a   : > { %v334_v16 = vadd.f32 %v333_v14, %v258_v11 }
 0x120   : > { %v310_v17 = vpop.f32.mrf.mxu3  ;;  %v411_v19 = vpop.f32.mrf.mxu2 }
 0x121   : > { %v336_v18 = vpop.f32.mrf.mxu0  ;;  %v356_v21 = vpop.f32.mrf.mxu1  ;;  %v311_v48 = vadd.f32 %v310_v17, %v235_v10 }
 0x122   : > { %v337_v20 = vadd.f32 %v336_v18, %v261_v15  ;;  %v357_v22 = vadd.f32 %v356_v21, %v281_v9 }
 0x123   : > { %v463_v53 = vadd.f32 %v411_v19, %v311_v48 }
 0x128   : > { %v313_v23 = vpop.f32.mrf.mxu3  ;;  %v414_v24 = vpop.f32.mrf.mxu2 }
 0x129   : > { %v457_v25 = vpop.f32.mrf.mxu0  ;;  %v359_v26 = vpop.f32.mrf.mxu1  ;;  %v314_v55 = vadd.f32 %v313_v23, %v238_v12 }
 0x12a   : > { %v360_v27 = vadd.f32 %v359_v26, %v284_v13  ;;  %v465_v0 = vadd.f32 %v457_v25, %v357_v22  ;;  %v1116_v8 = vpop.permute.xlu0 %1115 }
 0x12b   : > { %v466_v63 = vadd.f32 %v414_v24, %v314_v55 }
 0x130   : > { %v434_v28 = vpop.f32.mrf.mxu3  ;;  %v541_v30 = vpop.f32.mrf.mxu2 }
 0x131   : > { %v460_v29 = vpop.f32.mrf.mxu0  ;;  %v518_v31 = vpop.f32.mrf.mxu1  ;;  %v464_v62 = vadd.f32 %v434_v28, %v334_v16 }
 0x132   : > { %v570_v54 = vadd.f32 %v518_v31, %v463_v53  ;;  %v468_v18 = vadd.f32 %v460_v29, %v360_v27  ;;  %v1121_v27 = vpop.permute.xlu1 %1120 }
 0x133   : > { %v571_v3 = vadd.f32 %v541_v30, %v464_v62 }
 0x138   : > { %v437_v32 = vpop.f32.mrf.mxu3  ;;  %v544_v33 = vpop.f32.mrf.mxu2 }
 0x139   : > { %v625_v34 = vpop.f32.mrf.mxu0  ;;  %v521_v35 = vpop.f32.mrf.mxu1  ;;  %v467_v15 = vadd.f32 %v437_v32, %v337_v20 }
 0x13a   : > { %v677_v56 = vadd.f32 %v625_v34, %v570_v54  ;;  %v573_v1 = vadd.f32 %v521_v35, %v466_v63 }
 0x13b   : > { %v574_v26 = vadd.f32 %v544_v33, %v467_v15 }
 0x140   : > { %v564_v36 = vpop.f32.mrf.mxu3  ;;  %v671_v38 = vpop.f32.mrf.mxu2 }
 0x141   : > { %v628_v37 = vpop.f32.mrf.mxu0  ;;  %v648_v39 = vpop.f32.mrf.mxu1  ;;  %v572_v4 = vadd.f32 %v564_v36, %v465_v0 }
 0x142   : > { %v680_v5 = vadd.f32 %v628_v37, %v573_v1  ;;  %v678_v9 = vadd.f32 %v648_v39, %v571_v3 }
 0x143   : > { %v679_v17 = vadd.f32 %v671_v38, %v572_v4 }
 0x148   : > { %v567_v40 = vpop.f32.mrf.mxu3  ;;  %v674_v41 = vpop.f32.mrf.mxu2 }
 0x149   : > { %v755_v42 = vpop.f32.mrf.mxu0  ;;  %v651_v43 = vpop.f32.mrf.mxu1  ;;  %v575_v23 = vadd.f32 %v567_v40, %v468_v18 }
 0x14a   : > { %v785_v16 = vadd.f32 %v755_v42, %v678_v9  ;;  %v681_v29 = vadd.f32 %v651_v43, %v574_v26 }
 0x14b   : > { %v682_v37 = vadd.f32 %v674_v41, %v575_v23 }
 0x150   : > { %v732_v44 = vpop.f32.mrf.mxu3  ;;  %v839_v46 = vpop.f32.mrf.mxu2 }
 0x151   : > { %v758_v45 = vpop.f32.mrf.mxu0  ;;  %v778_v47 = vpop.f32.mrf.mxu1  ;;  %v784_v60 = vadd.f32 %v732_v44, %v677_v56 }
 0x152   : > { %v786_v21 = vadd.f32 %v778_v47, %v679_v17  ;;  %v788_v40 = vadd.f32 %v758_v45, %v681_v29 }
 0x153   : > { %v891_v2 = vadd.f32 %v839_v46, %v784_v60 }
 0x158   : > { %v735_v49 = vpop.f32.mrf.mxu3  ;;  %v842_v50 = vpop.f32.mrf.mxu2 }
 0x159   : > { %v885_v51 = vpop.f32.mrf.mxu0  ;;  %v781_v52 = vpop.f32.mrf.mxu1  ;;  %v787_v12 = vadd.f32 %v735_v49, %v680_v5 }
 0x15a   : > { %v893_v28 = vadd.f32 %v885_v51, %v786_v21  ;;  %v789_v46 = vadd.f32 %v781_v52, %v682_v37 }
 0x15b   : > { %v894_v24 = vadd.f32 %v842_v50, %v787_v12 }
 0x160   : > { %v862_v57 = vpop.f32.mrf.mxu3  ;;  %v969_v59 = vpop.f32.mrf.mxu2 }
 0x161   : > { %v888_v58 = vpop.f32.mrf.mxu0  ;;  %v946_v61 = vpop.f32.mrf.mxu1  ;;  %v892_v22 = vadd.f32 %v862_v57, %v785_v16 }
 0x162   : > { %v998_v6 = vadd.f32 %v946_v61, %v891_v2  ;;  %v896_v50 = vadd.f32 %v888_v58, %v789_v46 }
 0x163   : > { %v999_v32 = vadd.f32 %v969_v59, %v892_v22 }
 0x168   : > { %v865_v7 = vpop.f32.mrf.mxu3  ;;  %v972_v10 = vpop.f32.mrf.mxu2 }
 0x169   : > { %v1053_v11 = vpop.f32.mrf.mxu0  ;;  %v949_v13 = vpop.f32.mrf.mxu1  ;;  %v895_v33 = vadd.f32 %v865_v7, %v788_v40 }
 0x16a   : > { %v1105_v14 = vadd.f32 %v1053_v11, %v998_v6  ;;  %v1001_v20 = vadd.f32 %v949_v13, %v894_v24 }
 0x16b   : > { %v1002_v54 = vadd.f32 %v972_v10, %v895_v33 }
 0x16c   : > { %v1123_v19 = vadd.f32 %v1116_v8, %v1105_v14 }
 0x16e   : > { %vm1129_vm9 = vcmp.ge.f32.partialorder %v1123_v19, 0.0  ;;  %v1135_v25 = vmul.f32 0.2, %v1123_v19 }
 0x170   : > { %v1141_v30 = vsel %vm1129_vm9, %v1123_v19, %v1135_v25  ;;  %v992_v31 = vpop.f32.mrf.mxu3  ;;  %v1099_v36 = vpop.f32.mrf.mxu2 }
 0x171   : > { %1147 = vst [vmem:[%s1664_s20] sm:$0xff] %v1141_v30  ;;  %v1000_v34 = vadd.f32 %v992_v31, %v893_v28  ;;  %v1056_v35 = vpop.f32.mrf.mxu0  ;;  %v1076_v39 = vpop.f32.mrf.mxu1 }
 0x172   : > { %v1108_v38 = vadd.f32 %v1056_v35, %v1001_v20  ;;  %v1106_v42 = vadd.f32 %v1076_v39, %v999_v32 }
 0x173   : > { %v1107_v44 = vadd.f32 %v1099_v36, %v1000_v34 }
 0x174   : > { %v1126_v47 = vadd.f32 %v1121_v27, %v1108_v38  ;;  %v1124_v48 = vadd.f32 %v1116_v8, %v1106_v42 }
 0x175   : > { %v1125_v49 = vadd.f32 %v1116_v8, %v1107_v44 }
 0x176   : > { %vm1132_vm10 = vcmp.ge.f32.partialorder %v1126_v47, 0.0  ;;  %v1138_v43 = vmul.f32 0.2, %v1126_v47  ;;  %vm1130_vm11 = vcmp.ge.f32.partialorder %v1124_v48, 0.0  ;;  %v1136_v51 = vmul.f32 0.2, %v1124_v48 }
 0x177   : > { %vm1131_vm12 = vcmp.ge.f32.partialorder %v1125_v49, 0.0  ;;  %v1137_v41 = vmul.f32 0.2, %v1125_v49 }
 0x178   : > { %v1144_v53 = vsel %vm1132_vm10, %v1126_v47, %v1138_v43  ;;  %v995_v45 = vpop.f32.mrf.mxu3  ;;  %v1142_v55 = vsel %vm1130_vm11, %v1124_v48, %v1136_v51  ;;  %v1102_v57 = vpop.f32.mrf.mxu2 }
 0x179   : > { %v1143_v52 = vsel %vm1131_vm12, %v1125_v49, %v1137_v41  ;;  %1151 = vst [vmem:[%s1664_s20 + $0x18] sm:$0xff] %v1144_v53  ;;  %v1003_v56 = vadd.f32 %v995_v45, %v896_v50  ;;  %v1079_v58 = vpop.f32.mrf.mxu1 }
 0x17a   : > { %1148 = vst [vmem:[%s1664_s20 + $0x8] sm:$0xff] %v1142_v55  ;;  %v1109_v59 = vadd.f32 %v1079_v58, %v1002_v54 }
 0x17b   : > { %1150 = vst.msk [vmem:[%s1664_s20 + $0x10] sm:$0xff] %vm1149_vm13, %v1143_v52  ;;  %v1110_v60 = vadd.f32 %v1102_v57, %v1003_v56 }
 0x17c   : > { %v1127_v61 = vadd.f32 %v1121_v27, %v1109_v59 }
 0x17d   : > { %v1128_v62 = vadd.f32 %v1121_v27, %v1110_v60 }
 0x17e   : > { %vm1133_vm14 = vcmp.ge.f32.partialorder %v1127_v61, 0.0  ;;  %v1139_v63 = vmul.f32 0.2, %v1127_v61 }
 0x17f   : > { %vm1134_vm15 = vcmp.ge.f32.partialorder %v1128_v62, 0.0  ;;  %v1140_v0 = vmul.f32 0.2, %v1128_v62 }
 0x180   : > { %v1145_v1 = vsel %vm1133_vm14, %v1127_v61, %v1139_v63 }
 0x181   : > { %v1146_v2 = vsel %vm1134_vm15, %v1128_v62, %v1140_v0  ;;  %1152 = vst [vmem:[%s1664_s20 + $0x20] sm:$0xff] %v1145_v1 }
 0x182   : > { %1153 = vst.msk [vmem:[%s1664_s20 + $0x28] sm:$0xff] %vm1149_vm13, %v1146_v2 }
 0x183 PF: > { %s13_s12 = sadd.s32 1, %s1436_s12  }
 0x184   : > { %p10_p4 = scmp.ge.s32.totalorder %s13_s12, 8  }
 0x186   :  { %12 = sbr.rel (!%p10_p4) target bundleno = 1 (0x1), region = 70 }

</bundles_post_ra>
